<compile_context>
chip_gen: v6e
topology: v6e:2x2x1
jax: 0.10.0
libtpu: 0.0.40
codegen_flags: <defaults>
</compile_context>

<pallas_src>
import jax
import jax.numpy as jnp
from jax.experimental import pallas as pl
from jax.experimental.pallas import tpu as pltpu


def _round_up(x, m):
    return (x + m - 1) // m * m


# ------------------------------ fused kernel ------------------------------- #
def _siren_fused_kernel(x_ref, *refs):
    """refs = (w0, b0, w1, b1, ..., wL, bL, out_ref).

    Weights are stored transposed ([in_f, out_f]).  For all but the last layer
    w0 is already folded in (w0*W^T, w0*b), so a hidden layer is sin(x@w + b);
    the last layer is a plain affine written to the lane-dense output tile.
    """
    o_ref = refs[-1]
    wb = refs[:-1]
    n_layers = len(wb) // 2

    x = x_ref[...].astype(jnp.float32)
    for li in range(n_layers):
        w = wb[2 * li][...]
        b = wb[2 * li + 1][...]                      # (1, out_f), broadcasts over rows
        y = jnp.dot(x, w, preferred_element_type=jnp.float32) + b
        x = jnp.sin(y) if li < n_layers - 1 else y
    o_ref[...] = x.astype(o_ref.dtype)


# ------------------------------- wrapper ------------------------------------ #
def siren_h_forward(xin, layers, *, tm_max=512):
    """Fused forward for the whole SIREN_h stack in a single pallas_call.

    xin: [N, in_dim] float32.  layers: list of (W_T [in_f,out_f], b [out_f],
    w0, is_last) as produced by init_siren_params.
    """
    N, in_dim = xin.shape
    out_dim = layers[-1][0].shape[1]

    # Row tile: 128-aligned, capped at tm_max, and (when possible) >=2 grid
    # steps so both TensorCores on v7x get work.
    tm = int(min(tm_max, max(128, _round_up(pl.cdiv(N, 2), 128))))
    n_pad = _round_up(N, tm)
    grid = (n_pad // tm,)

    x = xin
    if n_pad != N:
        x = jnp.pad(x, ((0, n_pad - N), (0, 0)))

    # Fold w0 into the hidden-layer params; pad the last layer's output width
    # up to a lane-dense multiple of 128 (unmasked stores), slice afterwards.
    out_pad = _round_up(out_dim, 128)

    kernel_args = [x]
    in_specs = [pl.BlockSpec((tm, in_dim), lambda i: (i, 0))]   # x tile
    for w_t, b, w0, is_last in layers:
        if is_last:
            wf = jnp.pad(w_t, ((0, 0), (0, out_pad - out_dim)))
            bf = jnp.pad(b, (0, out_pad - out_dim))
        else:
            wf = w0 * w_t
            bf = w0 * b
        bf = bf.reshape(1, -1)
        kernel_args += [wf, bf]
        in_specs += [
            pl.BlockSpec(wf.shape, lambda i: (0, 0)),   # VMEM-resident weight
            pl.BlockSpec(bf.shape, lambda i: (0, 0)),   # VMEM-resident bias
        ]

    out = pl.pallas_call(
        _siren_fused_kernel,
        out_shape=jax.ShapeDtypeStruct((n_pad, out_pad), xin.dtype),
        grid=grid,
        in_specs=in_specs,
        out_specs=pl.BlockSpec((tm, out_pad), lambda i: (i, 0)),
        compiler_params=pltpu.CompilerParams(
            dimension_semantics=("parallel",)),
    )(*kernel_args)

    return out[:N, :out_dim]


# --------------------------- parameter creation ----------------------------- #
def init_siren_params(key, in_dim, out_dim, hidden_num, hidden_dim, feature_scales):
    """Matches SirenLayer.init_weights ranges.

    Returns list of (W_T [in_f, out_f], b [out_f], w0, is_last) per layer
    (raw, un-folded — w0 folding happens once in siren_h_forward).
    """
    model_dim = [in_dim] + hidden_num * [hidden_dim] + [out_dim]
    n_layers = len(model_dim) - 1
    layers = []
    for li in range(n_layers):
        in_f, out_f = model_dim[li], model_dim[li + 1]
        is_first = li == 0
        is_last = li == n_layers - 1
        w0 = float(feature_scales) if is_first else 30.0
        bound = (1.0 / in_f) if is_first else (float(jnp.sqrt(6.0 / in_f)) / w0)
        key, kw, kb = jax.random.split(key, 3)
        W = jax.random.uniform(kw, (out_f, in_f), jnp.float32, -bound, bound)
        bias = jax.random.uniform(kb, (out_f,), jnp.float32, -3.0, 3.0)
        layers.append((W.T, bias, w0, is_last))
    return layers


# ------------------------------ pure-JAX ref -------------------------------- #
def siren_h_reference(xin, layers):
    x = xin
    for w_t, b, w0, is_last in layers:
        y = x @ w_t + b
        x = y if is_last else jnp.sin(w0 * y)
    return x


# ---------------------------------- main ------------------------------------ #
if __name__ == "__main__":
    # Small SIREN_h: in_dim=2 coords -> out_dim=3, 3 hidden layers of width 32.
    in_dim, out_dim, hidden_num, hidden_dim, feature_scales = 2, 3, 3, 32, 30.0
    N = 256  # number of input points (not required to be tile-divisible)

    key = jax.random.PRNGKey(0)
    key, kx = jax.random.split(key)
    xin = jax.random.uniform(kx, (N, in_dim), jnp.float32, -1.0, 1.0)

    layers = init_siren_params(key, in_dim, out_dim, hidden_num, hidden_dim,
                               feature_scales)

    out = jax.block_until_ready(siren_h_forward(xin, layers))
    ref = siren_h_reference(xin, layers)

    assert out.shape == (N, out_dim)
    assert jnp.allclose(out, ref, atol=1e-4, rtol=1e-4)
    print("KERNEL_OK")
</pallas_src>

<mosaic_0001>
module attributes {stable_mosaic.version = 11 : i64} {
  func.func @_siren_fused_kernel(%arg0: i32, %arg1: memref<128x2xf32, #tpu.memory_space<vmem>>, %arg2: memref<2x32xf32, #tpu.memory_space<vmem>>, %arg3: memref<1x32xf32, #tpu.memory_space<vmem>>, %arg4: memref<32x32xf32, #tpu.memory_space<vmem>>, %arg5: memref<1x32xf32, #tpu.memory_space<vmem>>, %arg6: memref<32x32xf32, #tpu.memory_space<vmem>>, %arg7: memref<1x32xf32, #tpu.memory_space<vmem>>, %arg8: memref<32x128xf32, #tpu.memory_space<vmem>>, %arg9: memref<1x128xf32, #tpu.memory_space<vmem>>, %arg10: memref<128x128xf32, #tpu.memory_space<vmem>>) attributes {dimension_semantics = [#tpu.dimension_semantics<parallel>], iteration_bounds = array<i64: 2>, scalar_prefetch = 0 : i64, scratch_operands = 0 : i64, tpu.core_type = #tpu.core_type<tc>, window_params = [{transform_indices = @transform_0, window_bounds = array<i64: 128, 2>}, {pipeline_mode = #tpu.pipeline_mode<synchronous>, transform_indices = @transform_1, window_bounds = array<i64: 2, 32>}, {pipeline_mode = #tpu.pipeline_mode<synchronous>, transform_indices = @transform_2, window_bounds = array<i64: 1, 32>}, {pipeline_mode = #tpu.pipeline_mode<synchronous>, transform_indices = @transform_3, window_bounds = array<i64: 32, 32>}, {pipeline_mode = #tpu.pipeline_mode<synchronous>, transform_indices = @transform_4, window_bounds = array<i64: 1, 32>}, {pipeline_mode = #tpu.pipeline_mode<synchronous>, transform_indices = @transform_5, window_bounds = array<i64: 32, 32>}, {pipeline_mode = #tpu.pipeline_mode<synchronous>, transform_indices = @transform_6, window_bounds = array<i64: 1, 32>}, {pipeline_mode = #tpu.pipeline_mode<synchronous>, transform_indices = @transform_7, window_bounds = array<i64: 32, 128>}, {pipeline_mode = #tpu.pipeline_mode<synchronous>, transform_indices = @transform_8, window_bounds = array<i64: 1, 128>}, {transform_indices = @transform_9, window_bounds = array<i64: 128, 128>}]} {
    %c0 = arith.constant 0 : index
    %c0_0 = arith.constant 0 : index
    %0 = vector.load %arg1[%c0, %c0_0] : memref<128x2xf32, #tpu.memory_space<vmem>>, vector<128x2xf32>
    %c0_1 = arith.constant 0 : index
    %c0_2 = arith.constant 0 : index
    %1 = vector.load %arg2[%c0_1, %c0_2] : memref<2x32xf32, #tpu.memory_space<vmem>>, vector<2x32xf32>
    %c0_3 = arith.constant 0 : index
    %c0_4 = arith.constant 0 : index
    %2 = vector.load %arg3[%c0_3, %c0_4] : memref<1x32xf32, #tpu.memory_space<vmem>>, vector<1x32xf32>
    %cst = arith.constant dense<0.000000e+00> : vector<128x32xf32>
    %3 = tpu.matmul %0, %1, %cst {dimension_numbers = #tpu.dot_dimension_numbers<[1], [0], [0], [1], [0, 0, 1, 1], [], []>} : vector<128x2xf32>, vector<2x32xf32>, vector<128x32xf32> -> vector<128x32xf32>
    %4 = vector.broadcast %2 : vector<1x32xf32> to vector<128x32xf32>
    %5 = arith.addf %3, %4 : vector<128x32xf32>
    %6 = math.sin %5 : vector<128x32xf32>
    %c0_5 = arith.constant 0 : index
    %c0_6 = arith.constant 0 : index
    %7 = vector.load %arg4[%c0_5, %c0_6] : memref<32x32xf32, #tpu.memory_space<vmem>>, vector<32x32xf32>
    %c0_7 = arith.constant 0 : index
    %c0_8 = arith.constant 0 : index
    %8 = vector.load %arg5[%c0_7, %c0_8] : memref<1x32xf32, #tpu.memory_space<vmem>>, vector<1x32xf32>
    %cst_9 = arith.constant dense<0.000000e+00> : vector<128x32xf32>
    %9 = tpu.matmul %6, %7, %cst_9 {dimension_numbers = #tpu.dot_dimension_numbers<[1], [0], [0], [1], [0, 0, 1, 1], [], []>} : vector<128x32xf32>, vector<32x32xf32>, vector<128x32xf32> -> vector<128x32xf32>
    %10 = vector.broadcast %8 : vector<1x32xf32> to vector<128x32xf32>
    %11 = arith.addf %9, %10 : vector<128x32xf32>
    %12 = math.sin %11 : vector<128x32xf32>
    %c0_10 = arith.constant 0 : index
    %c0_11 = arith.constant 0 : index
    %13 = vector.load %arg6[%c0_10, %c0_11] : memref<32x32xf32, #tpu.memory_space<vmem>>, vector<32x32xf32>
    %c0_12 = arith.constant 0 : index
    %c0_13 = arith.constant 0 : index
    %14 = vector.load %arg7[%c0_12, %c0_13] : memref<1x32xf32, #tpu.memory_space<vmem>>, vector<1x32xf32>
    %cst_14 = arith.constant dense<0.000000e+00> : vector<128x32xf32>
    %15 = tpu.matmul %12, %13, %cst_14 {dimension_numbers = #tpu.dot_dimension_numbers<[1], [0], [0], [1], [0, 0, 1, 1], [], []>} : vector<128x32xf32>, vector<32x32xf32>, vector<128x32xf32> -> vector<128x32xf32>
    %16 = vector.broadcast %14 : vector<1x32xf32> to vector<128x32xf32>
    %17 = arith.addf %15, %16 : vector<128x32xf32>
    %18 = math.sin %17 : vector<128x32xf32>
    %c0_15 = arith.constant 0 : index
    %c0_16 = arith.constant 0 : index
    %19 = vector.load %arg8[%c0_15, %c0_16] : memref<32x128xf32, #tpu.memory_space<vmem>>, vector<32x128xf32>
    %c0_17 = arith.constant 0 : index
    %c0_18 = arith.constant 0 : index
    %20 = vector.load %arg9[%c0_17, %c0_18] : memref<1x128xf32, #tpu.memory_space<vmem>>, vector<1x128xf32>
    %cst_19 = arith.constant dense<0.000000e+00> : vector<128x128xf32>
    %21 = tpu.matmul %18, %19, %cst_19 {dimension_numbers = #tpu.dot_dimension_numbers<[1], [0], [0], [1], [0, 0, 1, 1], [], []>} : vector<128x32xf32>, vector<32x128xf32>, vector<128x128xf32> -> vector<128x128xf32>
    %22 = vector.broadcast %20 : vector<1x128xf32> to vector<128x128xf32>
    %23 = arith.addf %21, %22 : vector<128x128xf32>
    %c0_20 = arith.constant 0 : index
    %c0_21 = arith.constant 0 : index
    %24 = vector.load %arg10[%c0_20, %c0_21] : memref<128x128xf32, #tpu.memory_space<vmem>>, vector<128x128xf32>
    tpu.vector_store %arg10[%c0_20, %c0_21], %23 {strides = array<i32>} : memref<128x128xf32, #tpu.memory_space<vmem>>, vector<128x128xf32>,
    return
  }
  func.func @transform_0(%arg0: i32) -> (i32, i32) {
    %c0_i32 = arith.constant 0 : i32
    %c0_i32_0 = arith.constant 0 : i32
    return %arg0, %c0_i32 : i32, i32
  }
  func.func @transform_1(%arg0: i32) -> (i32, i32) {
    %c0_i32 = arith.constant 0 : i32
    %c0_i32_0 = arith.constant 0 : i32
    %c0_i32_1 = arith.constant 0 : i32
    return %c0_i32, %c0_i32_0 : i32, i32
  }
  func.func @transform_2(%arg0: i32) -> (i32, i32) {
    %c0_i32 = arith.constant 0 : i32
    %c0_i32_0 = arith.constant 0 : i32
    %c0_i32_1 = arith.constant 0 : i32
    return %c0_i32, %c0_i32_0 : i32, i32
  }
  func.func @transform_3(%arg0: i32) -> (i32, i32) {
    %c0_i32 = arith.constant 0 : i32
    %c0_i32_0 = arith.constant 0 : i32
    %c0_i32_1 = arith.constant 0 : i32
    return %c0_i32, %c0_i32_0 : i32, i32
  }
  func.func @transform_4(%arg0: i32) -> (i32, i32) {
    %c0_i32 = arith.constant 0 : i32
    %c0_i32_0 = arith.constant 0 : i32
    %c0_i32_1 = arith.constant 0 : i32
    return %c0_i32, %c0_i32_0 : i32, i32
  }
  func.func @transform_5(%arg0: i32) -> (i32, i32) {
    %c0_i32 = arith.constant 0 : i32
    %c0_i32_0 = arith.constant 0 : i32
    %c0_i32_1 = arith.constant 0 : i32
    return %c0_i32, %c0_i32_0 : i32, i32
  }
  func.func @transform_6(%arg0: i32) -> (i32, i32) {
    %c0_i32 = arith.constant 0 : i32
    %c0_i32_0 = arith.constant 0 : i32
    %c0_i32_1 = arith.constant 0 : i32
    return %c0_i32, %c0_i32_0 : i32, i32
  }
  func.func @transform_7(%arg0: i32) -> (i32, i32) {
    %c0_i32 = arith.constant 0 : i32
    %c0_i32_0 = arith.constant 0 : i32
    %c0_i32_1 = arith.constant 0 : i32
    return %c0_i32, %c0_i32_0 : i32, i32
  }
  func.func @transform_8(%arg0: i32) -> (i32, i32) {
    %c0_i32 = arith.constant 0 : i32
    %c0_i32_0 = arith.constant 0 : i32
    %c0_i32_1 = arith.constant 0 : i32
    return %c0_i32, %c0_i32_0 : i32, i32
  }
  func.func @transform_9(%arg0: i32) -> (i32, i32) {
    %c0_i32 = arith.constant 0 : i32
    %c0_i32_0 = arith.constant 0 : i32
    return %arg0, %c0_i32 : i32, i32
  }
}

</mosaic_0001>

<bundles_post_ra>
// kernel: tpu_custom_call.1
= control target key start
LH: loop header
LB: loop body
LE: loop exit
PB: predicated region body
PF: predicated region fallthrough
CT: control target
= control target key end

     0   :  { %14 = vsyncpa [#allocation3], 0  ;;  %s12137_s0 = inlined_call_operand.vmem [shape: f32[256,2], index: 0, kind: input, shape index: {}]   ;;  %s12138_s1 = inlined_call_operand.vmem [shape: f32[2,32], index: 1, kind: input, shape index: {}]   ;;  %s12139_s2 = inlined_call_operand.vmem [shape: f32[1,32], index: 2, kind: input, shape index: {}]   ;;  %s12140_s3 = inlined_call_operand.vmem [shape: f32[32,32], index: 3, kind: input, shape index: {}]   ;;  %s12141_s4 = inlined_call_operand.vmem [shape: f32[1,32], index: 4, kind: input, shape index: {}]   ;;  %s12142_s5 = inlined_call_operand.vmem [shape: f32[32,32], index: 5, kind: input, shape index: {}]   ;;  %s12143_s6 = inlined_call_operand.vmem [shape: f32[1,32], index: 6, kind: input, shape index: {}]   ;;  %s12144_s7 = inlined_call_operand.vmem [shape: f32[32,128], index: 7, kind: input, shape index: {}]   ;;  %s12145_s8 = inlined_call_operand.vmem [shape: f32[1,128], index: 8, kind: input, shape index: {}]   ;;  %s12146_s9 = inlined_call_operand.hbm [shape: f32[256,128], index: 9, kind: output, shape index: {}]  }
   0x1   :  { %16 = vsyncpa [#allocation3 + $0x1], 0  ;;  %s7284_s30 = smov 0   ;;  %s7286_s10 = smov 0  }
   0x2   :  { %s7288_s11 = smov 0   ;;  %s7290_s12 = smov 0  }
   0x3 LB: > { %s7305_s13 = sadd.s32 4294967295, %s7223_s12   ;;  %s6253_s14 = sadd.s32 4294967294, %s7223_s12   ;;  %s7223_s12 = sphi %s7290_s12, %s12942_s12   ;;  %s7219_s11 = sphi %s7288_s11, %s12941_s11   ;;  %s7215_s10 = sphi %s7286_s10, %s12940_s10   ;;  %s7211_s30 = sphi %s7284_s30, %s12939_s30  }
   0x4   : > { %s7309_s15 = sadd.s32 1, %s7223_s12   ;;  %s223_s16 = sadd.s32 1, %s7219_s11 }
   0x5   : > { %s220_s17 = ssub.s32 %s7223_s12, %s7309_s15  ;;  %p233_p0 = scmp.ne.s32.totalorder %s7219_s11, %s7215_s10 }
   0x6   : > { %p221_p1 = scmp.eq.s32.totalorder %s220_s17, 0  ;;  %p234_p2 = scmp.eq.s32.totalorder %s7305_s13, 1 }
   0x7   : > { %p239_p3 = scmp.ne.s32.totalorder %s7215_s10, %s7211_s30  ;;  %p240_p4 = scmp.eq.s32.totalorder %s6253_s14, 1 }
   0x8   : > { %s7320_s18 = scalar_select %p221_p1, %s7219_s11, %s223_s16  }
   0x9   : > { %p7322_p5 = por %p234_p2, %p233_p0  ;;  %p7326_p6 = por %p240_p4, %p239_p3 }
   0xa   : > { %p6256_p7 = scmp.ge.s32.totalorder %s7223_s12, 1  ;;  %p291_p8 = scmp.lt.s32.totalorder %s7223_s12, 3 }
   0xc   : > { %p292_p9 = pnand %p6256_p7, %p291_p8 }
   0xe   : > { %295 = sbr.rel (%p292_p9) target bundleno = 1983 (0x7bf), region = 56 }
  0x13   : > { %v350_v0 = vld [vmem:[%s12138_s1] sm:$0x3]  ;;  %vm407_vm0 = vcmask 1041408   ;;  %s6258_s23 = sshll.u32 %s7305_s13, 4  ;;  %vm358_vm1 = vcmask 15360   ;;  %s324_s22 = sand.u32 1, %s7215_s10  }
  0x14   : > { %6604 = vmatprep.subr.msk.mxu0 %vm407_vm0, %v350_v0  ;;  %p328_p10 = scmp.lt.s32.totalorder %s6258_s23, 31  ;;  %v7376_v17 = vld [vmem:[%s12139_s2] ss:$0 sm:$0xff]  ;;  %v12158_v43 = vmov 683565275   ;;  %s12097_s17 = scalar_lea.sflag [#allocation3], %s324_s22 }
  0x15   : > { %6605 = vmatpush3.msk.msra.mxu0 %vm407_vm0, %v350_v0  ;;  %v12156_v45 = vmov 2475754826   ;;  %v12154_v49 = vmov 2131351028   ;;  %v12151_v52 = vmov 2102212464  }
  0x16   : > { %s12944_s23 = smov (!%p328_p10, %s6258_s23), 31  ;;  %v12166_v55 = vmov 920167782   ;;  %v12164_v58 = vmov 1326507024   ;;  %s7231_s21 = smov [#allocation2]  }
  0x17   : > { %s6259_s24 = sshll.u32 %s12944_s23, 3  ;;  %s6257_s23 = sshll.u32 %s324_s22, 7 }
  0x18   : > { %s7339_s27 = scalar_lea.vmem %s12137_s0, %s6259_s24  ;;  %s12068_s26 = scalar_lea.vmem [#allocation2], %s6257_s23 }
  0x19   : > { %v334_v1 = vld [vmem:[%s7339_s27] sm:$0xff]  ;;  %v335_v2 = vld [vmem:[%s7339_s27 + $0x8] sm:$0xff]  ;;  %v336_v3 = vld [vmem:[%s7339_s27 + $0x10] sm:$0xff]  ;;  %s6191_s28 = sshll.u32 %s12068_s26, 4  ;;  %s7167_s23 = sshll.u32 %s7231_s21, 4  ;;  %s12091_s28 = int_to_ptr.vmem [resolvable:$true] %s6191_s28  ;;  %s7168_s23 = int_to_ptr.vmem [resolvable:$false] %s7167_s23 }
  0x1a   : > { %6606 = vmatprep.mubr.msk.f32.mxu0 %vm358_vm1, %v334_v1  ;;  %v337_v4 = vld [vmem:[%s7339_s27 + $0x18] sm:$0xff]  ;;  %v338_v5 = vld [vmem:[%s7339_s27 + $0x20] sm:$0xff]  ;;  %v339_v6 = vld [vmem:[%s7339_s27 + $0x28] sm:$0xff]  ;;  %s7169_s24 = scalar_lea.vmem %s7168_s23, 4096  ;;  %p7170_p0 = scmp.lt.s32.totalorder %s12091_s28, %s7168_s23 }
  0x1b   : > { %6607 = vmatmul.mubr.msk.f32.vlgmr.msra.gmra.mxu0 %vm358_vm1, %v335_v2  ;;  %v340_v7 = vld [vmem:[%s7339_s27 + $0x30] sm:$0xff]  ;;  %v341_v8 = vld [vmem:[%s7339_s27 + $0x38] sm:$0xff]  ;;  %v342_v9 = vld [vmem:[%s7339_s27 + $0x40] sm:$0xff] }
  0x1c   : > { %6609 = vmatprep.mubr.msk.f32.mxu0 %vm358_vm1, %v336_v3  ;;  %v343_v10 = vld [vmem:[%s7339_s27 + $0x48] sm:$0xff]  ;;  %v344_v11 = vld [vmem:[%s7339_s27 + $0x50] sm:$0xff]  ;;  %v345_v12 = vld [vmem:[%s7339_s27 + $0x58] sm:$0xff] }
  0x1d   : > { %v346_v13 = vld [vmem:[%s7339_s27 + $0x60] sm:$0xff]  ;;  %v347_v14 = vld [vmem:[%s7339_s27 + $0x68] sm:$0xff]  ;;  %v348_v15 = vld [vmem:[%s7339_s27 + $0x70] sm:$0xff] }
  0x1e   : > { %v349_v16 = vld [vmem:[%s7339_s27 + $0x78] sm:$0xff]  ;;  %s6526_s27 = sshll.u32 %s7305_s13, 11  ;;  %s7163_s13 = scalar_lea.vmem %s12091_s28, 2048 }
  0x1f   : > { %6610 = vmatmul.mubr.msk.f32.gmra.mxu0 %vm358_vm1, %v337_v4  ;;  %s12089_s16 = scalar_lea.hbm %s12146_s9, %s6526_s27  ;;  %p7164_p11 = scmp.ne.s32.totalorder %s12091_s28, %s7163_s13 }
  0x20   : > { %6612 = vmatprep.mubr.msk.f32.mxu0 %vm358_vm1, %v338_v5  ;;  %p7171_p1 = scmp.lt.s32.totalorder %s7169_s24, %s7163_s13 }
  0x21   : > { %p7165_p12 = pnand %p7164_p11, %p7322_p5 }
  0x22   : > { %p7172_p2 = por %p7171_p1, %p7170_p0 }
  0x23   : > { %6613 = vmatmul.mubr.msk.f32.gmra.mxu0 %vm358_vm1, %v339_v6  ;;  %p7166_p13 = pneg %p7165_p12 }
  0x24   : > { %6615 = vmatprep.mubr.msk.f32.mxu0 %vm358_vm1, %v340_v7 }
  0x25   : > { %p7173_p3 = pnand %p7172_p2, %p7166_p13 }
  0x27   : > { %6616 = vmatmul.mubr.msk.f32.gmra.mxu0 %vm358_vm1, %v341_v8 }
  0x28   : > { %6618 = vmatprep.mubr.msk.f32.mxu0 %vm358_vm1, %v342_v9 }
  0x2b   : > { %6619 = vmatmul.mubr.msk.f32.gmra.mxu0 %vm358_vm1, %v343_v10 }
  0x2c   : > { %6621 = vmatprep.mubr.msk.f32.mxu0 %vm358_vm1, %v344_v11 }
  0x2f   : > { %6622 = vmatmul.mubr.msk.f32.gmra.mxu0 %vm358_vm1, %v345_v12 }
  0x30   : > { %6624 = vmatprep.mubr.msk.f32.mxu0 %vm358_vm1, %v346_v13 }
  0x33   : > { %6625 = vmatmul.mubr.msk.f32.gmra.mxu0 %vm358_vm1, %v347_v14 }
  0x34   : > { %6627 = vmatprep.mubr.msk.f32.mxu0 %vm358_vm1, %v348_v15 }
  0x37   : > { %6628 = vmatmul.mubr.msk.f32.gmra.mxu0 %vm358_vm1, %v349_v16 }
  0xdb   : > { %v6608_v18 = vpop.f32.mrf.mxu0 }
  0xdc   : > { %v7379_v19 = vadd.f32 %v6608_v18, %v7376_v17 }
  0xdd   : > { %v7381_v20 = vpop.f32.mrf.mxu0 }
  0xde   : > { %12414 = vst [vmem:[#allocation5_spill] sm:$0xff] %v7379_v19  ;;  %v660_v21 = vand.u32 2147483647, %v7379_v19  ;;  %v663_v22 = vand.u32 2139095040, %v7379_v19 }
  0xdf   : > { %v6611_v23 = vpop.f32.mrf.mxu0 }
  0xe0   : > { %v664_v24 = vshrl.u32 %v663_v22, 23  ;;  %v7386_v25 = vadd.f32 %v6611_v23, %v7376_v17  ;;  %v667_v27 = vand.u32 8388607, %v660_v21 }
  0xe1   : > { %v487_v30 = vpop.f32.mrf.mxu0 }
  0xe2   : > { %12415 = vst [vmem:[#allocation6_spill] sm:$0xff] %v7386_v25  ;;  %v6282_v26 = vadd.s32 4294967169, %v664_v24  ;;  %v868_v28 = vand.u32 2147483647, %v7386_v25  ;;  %v871_v29 = vand.u32 2139095040, %v7386_v25  ;;  %v668_v32 = vor.u32 8388608, %v667_v27 }
  0xe3   : > { %v7393_v34 = vadd.f32 %v7376_v17, %v487_v30 }
  0xe4   : > { %v670_v31 = vadd.s32 1, %v6282_v26  ;;  %v872_v33 = vshrl.u32 %v871_v29, 23  ;;  %v875_v36 = vand.u32 8388607, %v868_v28  ;;  %v7397_v39 = vshll.u32 %v668_v32, 8 }
  0xe5   : > { %12416 = vst [vmem:[#allocation7_spill] sm:$0xff] %v7393_v34  ;;  %v767_v41 = vand.u32 2139095040, %v7393_v34 }
  0xe6   : > { %vm671_vm2 = vcmp.gt.s32.totalorder %v670_v31, 0  ;;  %v6290_v40 = vadd.s32 4294967169, %v872_v33  ;;  %v876_v47 = vor.u32 8388608, %v875_v36 }
  0xe7   : > { %v672_v35 = vsel %vm671_vm2, %v670_v31, 0  ;;  %v768_v5 = vshrl.u32 %v767_v41, 23 }
  0xe8   : > { %v674_v37 = vand.u32 31, %v672_v35  ;;  %v673_v42 = vshrl.u32 %v672_v35, 5  ;;  %v878_v63 = vadd.s32 1, %v6290_v40  ;;  %v7423_v30 = vshll.u32 %v876_v47, 8 }
  0xe9   : > { %v6286_v26 = vadd.s32 4294967169, %v768_v5 }
  0xea   : > { %v675_v38 = vsub.s32 32, %v674_v37  ;;  %v677_v44 = vshll.u32 %v12158_v43, %v674_v37  ;;  %v680_v46 = vshll.u32 %v12156_v45, %v674_v37  ;;  %v683_v51 = vshll.u32 %v12154_v49, %v674_v37 }
  0xeb   : > { %v686_v54 = vshll.u32 %v12151_v52, %v674_v37  ;;  %v689_v57 = vshll.u32 %v12166_v55, %v674_v37  ;;  %vm692_vm3 = vcmp.lt.s32.totalorder %v673_v42, 1  ;;  %vm695_vm4 = vcmp.lt.s32.totalorder %v673_v42, 4 }
  0xec   : > { %v678_v48 = vshrl.u32 %v12156_v45, %v675_v38  ;;  %v681_v50 = vshrl.u32 %v12154_v49, %v675_v38  ;;  %v684_v53 = vshrl.u32 %v12151_v52, %v675_v38  ;;  %v687_v56 = vshrl.u32 %v12166_v55, %v675_v38 }
  0xed   : > { %v690_v59 = vshrl.u32 %v12164_v58, %v675_v38  ;;  %v676_v6 = vshrl.u32 %v12158_v43, %v675_v38  ;;  %vm694_vm5 = vcmp.lt.s32.totalorder %v673_v42, 3  ;;  %vm693_vm6 = vcmp.lt.s32.totalorder %v673_v42, 2 }
  0xee   : > { %v679_v60 = vor.u32 %v678_v48, %v677_v44  ;;  %v682_v61 = vor.u32 %v681_v50, %v680_v46  ;;  %v685_v62 = vor.u32 %v684_v53, %v683_v51  ;;  %v688_v0 = vor.u32 %v687_v56, %v686_v54 }
  0xef   : > { %v691_v1 = vor.u32 %v690_v59, %v689_v57  ;;  %vm879_vm7 = vcmp.gt.s32.totalorder %v878_v63, 0  ;;  %v774_v35 = vadd.s32 1, %v6286_v26 }
  0xf0   : > { %v697_v2 = vsel %vm695_vm4, %v685_v62, 2102212464  ;;  %v700_v3 = vsel %vm692_vm3, %v679_v60, %v682_v61  ;;  %v704_v4 = vsel %vm692_vm3, %v682_v61, %v685_v62  ;;  %v701_v7 = vsel %vm695_vm4, %v688_v0, 920167782 }
  0xf1   : > { %v705_v8 = vsel %vm695_vm4, %v691_v1, 1326507024  ;;  %v702_v9 = vsel %vm694_vm5, %v685_v62, %v701_v7  ;;  %v696_v11 = vsel %vm692_vm3, %v676_v6, %v679_v60  ;;  %v698_v12 = vsel %vm694_vm5, %v682_v61, %v697_v2 }
  0xf2   : > { %v706_v10 = vsel %vm694_vm5, %v688_v0, %v705_v8  ;;  %v703_v13 = vsel %vm693_vm6, %v700_v3, %v702_v9  ;;  %v699_v23 = vsel %vm693_vm6, %v696_v11, %v698_v12  ;;  %v880_v24 = vsel %vm879_vm7, %v878_v63, 0 }
  0xf3   : > { %v707_v14 = vsel %vm693_vm6, %v704_v4, %v706_v10  ;;  %v7416_v18 = vmul.u32.u64.low %v7397_v39, %v703_v13  ;;  %v7417_v22 = vmul.u32.u64.high %v7397_v39, %v703_v13, %v7416_v18  ;;  %v882_v27 = vand.u32 31, %v880_v24 }
  0xf4   : > { %v7412_v15 = vmul.u32.u64.low %v7397_v39, %v707_v14  ;;  %v7413_v16 = vmul.u32.u64.high %v7397_v39, %v707_v14, %v7412_v15  ;;  %v715_v31 = vmul.u32 %v7397_v39, %v699_v23  ;;  %v881_v32 = vshrl.u32 %v880_v24, 5 }
  0xf5   : > { %v718_v29 = vadd.s32 1, %v7417_v22  ;;  %v883_v33 = vsub.s32 32, %v882_v27  ;;  %v885_v37 = vshll.u32 %v12158_v43, %v882_v27  ;;  %v888_v38 = vshll.u32 %v12156_v45, %v882_v27 }
  0xf6   : > { %vm717_vm8 = vc.u32 %v7413_v16, %v7416_v18  ;;  %v891_v40 = vshll.u32 %v12154_v49, %v882_v27  ;;  %v894_v46 = vshll.u32 %v12151_v52, %v882_v27  ;;  %v897_v48 = vshll.u32 %v12166_v55, %v882_v27 }
  0xf7   : > { %v719_v36 = vsel %vm717_vm8, %v718_v29, %v7417_v22  ;;  %v886_v42 = vshrl.u32 %v12156_v45, %v883_v33  ;;  %v889_v44 = vshrl.u32 %v12154_v49, %v883_v33  ;;  %v892_v39 = vshrl.u32 %v12151_v52, %v883_v33 }
  0xf8   : > { %v720_v41 = vadd.s32 %v719_v36, %v715_v31  ;;  %v895_v47 = vshrl.u32 %v12166_v55, %v883_v33  ;;  %v898_v50 = vshrl.u32 %v12164_v58, %v883_v33  ;;  %v884_v53 = vshrl.u32 %v12158_v43, %v883_v33 }
  0xf9   : > { %v887_v54 = vor.u32 %v886_v42, %v885_v37  ;;  %v890_v56 = vor.u32 %v889_v44, %v888_v38  ;;  %v893_v57 = vor.u32 %v892_v39, %v891_v40  ;;  %vm900_vm9 = vcmp.lt.s32.totalorder %v881_v32, 1  ;;  %v6614_v39 = vpop.f32.mrf.mxu0 }
  0xfa   : > { %v721_v51 = vadd.s32 536870912, %v720_v41  ;;  %v896_v59 = vor.u32 %v895_v47, %v894_v46  ;;  %v899_v60 = vor.u32 %v898_v50, %v897_v48  ;;  %vm902_vm10 = vcmp.lt.s32.totalorder %v881_v32, 3 }
  0xfb   : > { %vm903_vm11 = vcmp.lt.s32.totalorder %v881_v32, 4  ;;  %v908_v62 = vsel %vm900_vm9, %v887_v54, %v890_v56  ;;  %v912_v1 = vsel %vm900_vm9, %v890_v56, %v893_v57  ;;  %vm901_vm12 = vcmp.lt.s32.totalorder %v881_v32, 2 }
  0xfc   : > { %v7438_v61 = vshrl.u32 %v721_v51, 30  ;;  %v905_v63 = vsel %vm903_vm11, %v893_v57, 2102212464  ;;  %v909_v0 = vsel %vm903_vm11, %v896_v59, 920167782  ;;  %v904_v6 = vsel %vm900_vm9, %v884_v53, %v887_v54 }
  0xfd   : > { %v913_v2 = vsel %vm903_vm11, %v899_v60, 1326507024  ;;  %v910_v4 = vsel %vm902_vm10, %v893_v57, %v909_v0  ;;  %vm775_vm13 = vcmp.gt.s32.totalorder %v774_v35, 0  ;;  %v906_v10 = vsel %vm902_vm10, %v890_v56, %v905_v63 }
  0xfe   : > { %12417 = vst [vmem:[#allocation8_spill] sm:$0xff] %v7438_v61  ;;  %v723_v3 = vshll.u32 %v7438_v61, 30  ;;  %v914_v5 = vsel %vm902_vm10, %v896_v59, %v913_v2  ;;  %v911_v7 = vsel %vm901_vm12, %v908_v62, %v910_v4  ;;  %v776_v15 = vsel %vm775_vm13, %v774_v35, 0 }
  0xff   : > { %v915_v8 = vsel %vm901_vm12, %v912_v1, %v914_v5  ;;  %v7451_v13 = vmul.u32.u64.low %v7423_v30, %v911_v7  ;;  %v7452_v14 = vmul.u32.u64.high %v7423_v30, %v911_v7, %v7451_v13  ;;  %v778_v23 = vand.u32 31, %v776_v15 }
 0x100   : > { %v7443_v9 = vsub.s32 %v720_v41, %v723_v3  ;;  %v7447_v11 = vmul.u32.u64.low %v7423_v30, %v915_v8  ;;  %v7448_v12 = vmul.u32.u64.high %v7423_v30, %v915_v8, %v7447_v11  ;;  %v907_v24 = vsel %vm901_vm12, %v904_v6, %v906_v10 }
 0x101   : > { %v779_v26 = vsub.s32 32, %v778_v23  ;;  %v926_v29 = vadd.s32 1, %v7452_v14  ;;  %v12150_v31 = vand.u32 2147483647, %v7393_v34  ;;  %v923_v32 = vmul.u32 %v7423_v30, %v907_v24 }
 0x102   : > { %v726_v22 = vsub.s32 0, %v7443_v9  ;;  %vm925_vm14 = vc.u32 %v7448_v12, %v7451_v13  ;;  %v7462_v33 = vshrl.u32 %v776_v15, 5  ;;  %v790_v40 = vshll.u32 %v12151_v52, %v778_v23 }
 0x103   : > { %v782_v35 = vshrl.u32 %v12156_v45, %v779_v26  ;;  %v785_v36 = vshrl.u32 %v12154_v49, %v779_v26  ;;  %v927_v37 = vsel %vm925_vm14, %v926_v29, %v7452_v14  ;;  %v788_v38 = vshrl.u32 %v12151_v52, %v779_v26 }
 0x104   : > { %v6283_v27 = vmin.u32 %v726_v22, %v7443_v9  ;;  %v791_v41 = vshrl.u32 %v12166_v55, %v779_v26  ;;  %v928_v42 = vadd.s32 %v927_v37, %v923_v32  ;;  %v781_v44 = vshll.u32 %v12158_v43, %v778_v23 }
 0x105   : > { %v784_v46 = vshll.u32 %v12156_v45, %v778_v23  ;;  %v787_v30 = vshll.u32 %v12154_v49, %v778_v23  ;;  %v793_v50 = vshll.u32 %v12166_v55, %v778_v23  ;;  %v794_v51 = vshrl.u32 %v12164_v58, %v779_v26 }
 0x106   : > { %v728_v47 = vclz %v6283_v27  ;;  %v792_v48 = vor.u32 %v791_v41, %v790_v40  ;;  %v929_v53 = vadd.s32 536870912, %v928_v42  ;;  %v771_v54 = vand.u32 8388607, %v12150_v31  ;;  %v497_v41 = vpop.f32.mrf.mxu0 }
 0x107   : > { %v783_v56 = vor.u32 %v782_v35, %v781_v44  ;;  %v786_v57 = vor.u32 %v785_v36, %v784_v46  ;;  %v789_v59 = vor.u32 %v788_v38, %v787_v30  ;;  %v795_v60 = vor.u32 %v794_v51, %v793_v50 }
 0x108   : > { %v7478_v62 = vadd.f32 %v6614_v39, %v7376_v17  ;;  %v7480_v63 = vshrl.u32 %v929_v53, 30  ;;  %vm799_vm15 = vcmp.lt.s32.totalorder %v7462_v33, 4  ;;  %v6284_v0 = vadd.s32 4294967294, %v728_v47 }
 0x109   : > { %vm796_vm0 = vcmp.lt.s32.totalorder %v7462_v33, 1  ;;  %v805_v1 = vsel %vm799_vm15, %v792_v48, 920167782  ;;  %v7488_v2 = vadd.f32 %v7376_v17, %v7381_v20  ;;  %v772_v3 = vor.u32 8388608, %v771_v54 }
 0x10a   : > { %12418 = vst [vmem:[#allocation9_spill] sm:$0xff] %v7478_v62  ;;  %12419 = vst [vmem:[#allocation10_spill] sm:$0xff] %v7480_v63  ;;  %vm798_vm1 = vcmp.lt.s32.totalorder %v7462_v33, 3  ;;  %v804_v4 = vsel %vm796_vm0, %v783_v56, %v786_v57  ;;  %v808_v6 = vsel %vm796_vm0, %v786_v57, %v789_v59  ;;  %v809_v7 = vsel %vm799_vm15, %v795_v60, 1326507024 }
 0x10b   : > { %v806_v5 = vsel %vm798_vm1, %v789_v59, %v805_v1  ;;  %v1079_v8 = vand.u32 2139095040, %v7478_v62  ;;  %v931_v20 = vshll.u32 %v7480_v63, 30  ;;  %vm797_vm2 = vcmp.lt.s32.totalorder %v7462_v33, 2 }
 0x10c   : > { %vm6285_vm3 = vcmp.lt.s32.totalorder %v6284_v0, 0  ;;  %v807_v10 = vsel %vm797_vm2, %v804_v4, %v806_v5  ;;  %v810_v11 = vsel %vm798_vm1, %v792_v48, %v809_v7  ;;  %v559_v14 = vand.u32 2139095040, %v7488_v2 }
 0x10d   : > { %v811_v15 = vsel %vm797_vm2, %v808_v6, %v810_v11  ;;  %v812_v22 = vshll.u32 %v772_v3, 8  ;;  %v12149_v23 = vand.u32 2147483647, %v7478_v62  ;;  %v1080_v24 = vshrl.u32 %v1079_v8, 23 }
 0x10e   : > { %v7510_v27 = vsel %vm6285_vm3, 0, %v6284_v0  ;;  %v7512_v29 = vsub.s32 %v928_v42, %v931_v20  ;;  %v801_v36 = vsel %vm799_vm15, %v789_v59, 2102212464  ;;  %v560_v44 = vshrl.u32 %v559_v14, 23 }
 0x10f   : > { %v7514_v32 = vmul.u32.u64.low %v812_v22, %v807_v10  ;;  %v7515_v35 = vmul.u32.u64.high %v812_v22, %v807_v10, %v7514_v32  ;;  %v7520_v37 = vmul.u32.u64.low %v812_v22, %v811_v15  ;;  %v7521_v38 = vmul.u32.u64.high %v812_v22, %v811_v15, %v7520_v37 }
 0x110   : > { %v6298_v40 = vadd.s32 4294967169, %v1080_v24  ;;  %v780_v46 = vshrl.u32 %v12158_v43, %v779_v26  ;;  %v736_v30 = vsub.s32 4294967266, %v7510_v27  ;;  %v1083_v42 = vand.u32 8388607, %v12149_v23 }
 0x111   : > { %v934_v47 = vsub.s32 0, %v7512_v29  ;;  %v802_v50 = vsel %vm798_vm1, %v786_v57, %v801_v36  ;;  %v7533_v51 = vadd.f32 %v7376_v17, %v497_v41  ;;  %v732_v26 = vsub.s32 32, %v7510_v27 }
 0x112   : > { %v1086_v39 = vadd.s32 1, %v6298_v40  ;;  %v800_v48 = vsel %vm796_vm0, %v780_v46, %v783_v56  ;;  %v6278_v53 = vadd.s32 4294967169, %v560_v44  ;;  %v716_v59 = vadd.s32 %v7416_v18, %v7413_v16 }
 0x113   : > { %12420 = vst [vmem:[#allocation11_spill] sm:$0xff] %v7533_v51  ;;  %v7538_v60 = vadd.s32 127, %v736_v30  ;;  %v803_v0 = vsel %vm797_vm2, %v800_v48, %v802_v50  ;;  %v6291_v56 = vmin.u32 %v934_v47, %v7512_v29  ;;  %v822_v57 = vadd.s32 1, %v7515_v35 }
 0x114   : > { %vm1087_vm4 = vcmp.gt.s32.totalorder %v1086_v39, 0  ;;  %v1084_v1 = vor.u32 8388608, %v1083_v42  ;;  %v975_v3 = vand.u32 2139095040, %v7533_v51  ;;  %vm821_vm5 = vc.u32 %v7521_v38, %v7514_v32 }
 0x115   : > { %v1088_v54 = vsel %vm1087_vm4, %v1086_v39, 0  ;;  %v734_v5 = vshrl.u32 %v716_v59, %v732_v26  ;;  %v566_v6 = vadd.s32 1, %v6278_v53  ;;  %v738_v16 = vshll.u32 %v7538_v60, 23 }
 0x116   : > { %v1090_v4 = vand.u32 31, %v1088_v54  ;;  %v819_v18 = vmul.u32 %v812_v22, %v803_v0  ;;  %v1089_v7 = vshrl.u32 %v1088_v54, 5  ;;  %v936_v33 = vclz %v6291_v56 }
 0x117   : > { %v823_v20 = vsel %vm821_vm5, %v822_v57, %v7515_v35  ;;  %v7549_v10 = vshll.u32 %v1084_v1, 8  ;;  %v976_v11 = vshrl.u32 %v975_v3, 23  ;;  %vm567_vm10 = vcmp.gt.s32.totalorder %v566_v6, 0 }
 0x118   : > { %v1091_v8 = vsub.s32 32, %v1090_v4  ;;  %v1093_v14 = vshll.u32 %v12158_v43, %v1090_v4  ;;  %v1096_v24 = vshll.u32 %v12156_v45, %v1090_v4  ;;  %v1099_v37 = vshll.u32 %v12154_v49, %v1090_v4 }
 0x119   : > { %v1102_v40 = vshll.u32 %v12151_v52, %v1090_v4  ;;  %v824_v35 = vadd.s32 %v823_v20, %v819_v18  ;;  %vm1108_vm6 = vcmp.lt.s32.totalorder %v1089_v7, 1  ;;  %v1105_v39 = vshll.u32 %v12166_v55, %v1090_v4 }
 0x11a   : > { %v1094_v15 = vshrl.u32 %v12156_v45, %v1091_v8  ;;  %v1097_v36 = vshrl.u32 %v12154_v49, %v1091_v8  ;;  %v1100_v22 = vshrl.u32 %v12151_v52, %v1091_v8  ;;  %v1103_v41 = vshrl.u32 %v12166_v55, %v1091_v8 }
 0x11b   : > { %v1106_v47 = vshrl.u32 %v12164_v58, %v1091_v8  ;;  %vm1110_vm7 = vcmp.lt.s32.totalorder %v1089_v7, 3  ;;  %vm1111_vm8 = vcmp.lt.s32.totalorder %v1089_v7, 4  ;;  %v6294_v50 = vadd.s32 4294967169, %v976_v11 }
 0x11c   : > { %v1095_v44 = vor.u32 %v1094_v15, %v1093_v14  ;;  %v1098_v46 = vor.u32 %v1097_v36, %v1096_v24  ;;  %v1101_v30 = vor.u32 %v1100_v22, %v1099_v37  ;;  %v1104_v42 = vor.u32 %v1103_v41, %v1102_v40 }
 0x11d   : > { %v1092_v26 = vshrl.u32 %v12158_v43, %v1091_v8  ;;  %v1107_v53 = vor.u32 %v1106_v47, %v1105_v39  ;;  %v825_v60 = vadd.s32 536870912, %v824_v35  ;;  %vm1109_vm9 = vcmp.lt.s32.totalorder %v1089_v7, 2  ;;  %v6617_v7 = vpop.f32.mrf.mxu0 }
 0x11e   : > { %v1116_v48 = vsel %vm1108_vm6, %v1095_v44, %v1098_v46  ;;  %v1113_v54 = vsel %vm1111_vm8, %v1101_v30, 2102212464  ;;  %v1117_v59 = vsel %vm1111_vm8, %v1104_v42, 920167782  ;;  %v1120_v56 = vsel %vm1108_vm6, %v1098_v46, %v1101_v30 }
 0x11f   : > { %v1118_v0 = vsel %vm1110_vm7, %v1101_v30, %v1117_v59  ;;  %v6292_v57 = vadd.s32 4294967294, %v936_v33  ;;  %v1112_v1 = vsel %vm1108_vm6, %v1092_v26, %v1095_v44  ;;  %v1121_v4 = vsel %vm1111_vm8, %v1107_v53, 1326507024 }
 0x120   : > { %v1119_v3 = vsel %vm1109_vm9, %v1116_v48, %v1118_v0  ;;  %v1114_v18 = vsel %vm1110_vm7, %v1098_v46, %v1113_v54  ;;  %v1122_v20 = vsel %vm1110_vm7, %v1104_v42, %v1121_v4  ;;  %v12147_v15 = vand.u32 2147483647, %v7533_v51 }
 0x121   : > { %v7570_v8 = vmul.u32.u64.low %v7549_v10, %v1119_v3  ;;  %v7571_v11 = vmul.u32.u64.high %v7549_v10, %v1119_v3, %v7570_v8  ;;  %v1123_v14 = vsel %vm1109_vm9, %v1120_v56, %v1122_v20  ;;  %v982_v33 = vadd.s32 1, %v6294_v50 }
 0x122   : > { %v733_v24 = vshll.u32 %v7443_v9, %v7510_v27  ;;  %v7578_v36 = vshrl.u32 %v825_v60, 30  ;;  %v7581_v37 = vmul.u32.u64.low %v7549_v10, %v1123_v14  ;;  %v7582_v22 = vmul.u32.u64.high %v7549_v10, %v1123_v14, %v7581_v37 }
 0x123   : > { %vm6293_vm11 = vcmp.lt.s32.totalorder %v6292_v57, 0  ;;  %v1115_v40 = vsel %vm1109_vm9, %v1112_v1, %v1114_v18  ;;  %vm983_vm12 = vcmp.gt.s32.totalorder %v982_v33, 0  ;;  %v739_v44 = vor.u32 4788187, %v738_v16 }
 0x124   : > { %12421 = vst [vmem:[#allocation12_spill] sm:$0xff] %v7578_v36  ;;  %v735_v41 = vor.u32 %v734_v5, %v733_v24  ;;  %v7585_v46 = vsel %vm567_vm10, %v566_v6, 0  ;;  %v1134_v30 = vadd.s32 1, %v7571_v11  ;;  %v979_v42 = vand.u32 8388607, %v12147_v15 }
 0x125   : > { %v984_v9 = vsel %vm983_vm12, %v982_v33, 0  ;;  %v7590_v27 = vsel %vm6293_vm11, 0, %v6292_v57  ;;  %v827_v39 = vshll.u32 %v7578_v36, 30  ;;  %v1131_v47 = vmul.u32 %v7549_v10, %v1115_v40 }
 0x126   : > { %vm1133_vm13 = vc.u32 %v7582_v22, %v7570_v8  ;;  %v986_v6 = vand.u32 31, %v984_v9  ;;  %v740_v16 = vand.u32 2147483647, %v739_v44  ;;  %v742_v48 = vcvt.s32.f32 %v735_v41 }
 0x127   : > { %v1135_v5 = vsel %vm1133_vm13, %v1134_v30, %v7571_v11  ;;  %v7598_v50 = vand.u32 31, %v7585_v46  ;;  %v944_v53 = vsub.s32 4294967266, %v7590_v27  ;;  %v980_v54 = vor.u32 8388608, %v979_v42 }
 0x128   : > { %v1136_v26 = vadd.s32 %v1135_v5, %v1131_v47  ;;  %v987_v59 = vsub.s32 32, %v986_v6  ;;  %v7602_v60 = vadd.f32 %v6617_v7, %v7376_v17  ;;  %v7604_v10 = vsub.s32 %v824_v35, %v827_v39 }
 0x129   : > { %v989_v0 = vshll.u32 %v12158_v43, %v986_v6  ;;  %v992_v56 = vshll.u32 %v12156_v45, %v986_v6  ;;  %v995_v57 = vshll.u32 %v12154_v49, %v986_v6  ;;  %v985_v20 = vshrl.u32 %v984_v9, 5 }
 0x12a   : > { %12422 = vst [vmem:[#allocation13_spill] sm:$0xff] %v7602_v60  ;;  %v1137_v1 = vadd.s32 536870912, %v1136_v26  ;;  %v990_v3 = vshrl.u32 %v12156_v45, %v987_v59  ;;  %v993_v4 = vshrl.u32 %v12154_v49, %v987_v59  ;;  %v996_v18 = vshrl.u32 %v12151_v52, %v987_v59 }
 0x12b   : > { %v998_v11 = vshll.u32 %v12151_v52, %v986_v6  ;;  %v999_v14 = vshrl.u32 %v12166_v55, %v987_v59  ;;  %v1001_v35 = vshll.u32 %v12166_v55, %v986_v6  ;;  %v1002_v40 = vshrl.u32 %v12164_v58, %v987_v59 }
 0x12c   : > { %v991_v33 = vor.u32 %v990_v3, %v989_v0  ;;  %v994_v24 = vor.u32 %v993_v4, %v992_v56  ;;  %v997_v37 = vor.u32 %v996_v18, %v995_v57  ;;  %v7616_v41 = vmul.f32 %v742_v48, %v740_v16 }
 0x12d   : > { %v924_v44 = vadd.s32 %v7451_v13, %v7448_v12  ;;  %v1000_v30 = vor.u32 %v999_v14, %v998_v11  ;;  %v1020_v42 = vshll.u32 %v980_v54, 8  ;;  %v940_v9 = vsub.s32 32, %v7590_v27 }
 0x12e   : > { %v830_v39 = vsub.s32 0, %v7604_v10  ;;  %v7622_v47 = vshrl.u32 %v1137_v1, 30  ;;  %v1003_v7 = vor.u32 %v1002_v40, %v1001_v35  ;;  %v945_v5 = vadd.s32 127, %v944_v53 }
 0x12f   : > { %vm1004_vm14 = vcmp.lt.s32.totalorder %v985_v20, 1  ;;  %vm1007_vm15 = vcmp.lt.s32.totalorder %v985_v20, 4  ;;  %v1287_v6 = vand.u32 2139095040, %v7602_v60  ;;  %vm1006_vm0 = vcmp.lt.s32.totalorder %v985_v20, 3 }
 0x130   : > { %12423 = vst [vmem:[#allocation14_spill] sm:$0xff] %v7622_v47  ;;  %v1009_v16 = vsel %vm1007_vm15, %v997_v37, 2102212464  ;;  %v1012_v48 = vsel %vm1004_vm14, %v991_v33, %v994_v24  ;;  %v1013_v0 = vsel %vm1007_vm15, %v1000_v30, 920167782  ;;  %v988_v12 = vshrl.u32 %v12158_v43, %v987_v59 }
 0x131   : > { %vm1005_vm1 = vcmp.lt.s32.totalorder %v985_v20, 2  ;;  %v1014_v13 = vsel %vm1006_vm0, %v997_v37, %v1013_v0  ;;  %v1016_v54 = vsel %vm1004_vm14, %v994_v24, %v997_v37  ;;  %v6287_v56 = vmin.u32 %v830_v39, %v7604_v10 }
 0x132   : > { %v1139_v57 = vshll.u32 %v7622_v47, 30  ;;  %v1015_v1 = vsel %vm1005_vm1, %v1012_v48, %v1014_v13  ;;  %v1017_v53 = vsel %vm1007_vm15, %v1003_v7, 1326507024  ;;  %v1008_v3 = vsel %vm1004_vm14, %v988_v12, %v991_v33 }
 0x133   : > { %v1010_v4 = vsel %vm1006_vm0, %v994_v24, %v1009_v16  ;;  %v1018_v18 = vsel %vm1006_vm0, %v1000_v30, %v1017_v53  ;;  %v1288_v11 = vshrl.u32 %v1287_v6, 23  ;;  %v942_v14 = vshrl.u32 %v924_v44, %v940_v9  ;;  %v507_v53 = vpop.f32.mrf.mxu0 }
 0x134   : > { %v1019_v35 = vsel %vm1005_vm1, %v1016_v54, %v1018_v18  ;;  %v7630_v40 = vmul.u32.u64.low %v1020_v42, %v1015_v1  ;;  %v7631_v15 = vmul.u32.u64.high %v1020_v42, %v1015_v1, %v7630_v40  ;;  %v946_v59 = vshll.u32 %v945_v5, 23 }
 0x135   : > { %v7634_v37 = vmul.u32.u64.low %v1020_v42, %v1019_v35  ;;  %v7635_v0 = vmul.u32.u64.high %v1020_v42, %v1019_v35, %v7634_v37  ;;  %v6306_v39 = vadd.s32 4294967169, %v1288_v11  ;;  %v941_v48 = vshll.u32 %v7512_v29, %v7590_v27 }
 0x136   : > { %v832_v7 = vclz %v6287_v56  ;;  %v7639_v33 = vsub.s32 %v1136_v26, %v1139_v57  ;;  %v1011_v24 = vsel %vm1005_vm1, %v1008_v3, %v1010_v4  ;;  %v12148_v44 = vand.u32 2147483647, %v7602_v60 }
 0x137   : > { %v1294_v30 = vadd.s32 1, %v6306_v39  ;;  %v744_v9 = vxor.u32 2147483648, %v7616_v41  ;;  %v7645_v6 = vsub.s32 32, %v7598_v50  ;;  %v943_v5 = vor.u32 %v942_v14, %v941_v48 }
 0x138   : > { %v1030_v16 = vadd.s32 1, %v7631_v15  ;;  %v947_v12 = vor.u32 4788187, %v946_v59  ;;  %v1027_v13 = vmul.u32 %v1020_v42, %v1011_v24  ;;  %vm1029_vm2 = vc.u32 %v7635_v0, %v7630_v40 }
 0x139   : > { %vm1295_vm3 = vcmp.gt.s32.totalorder %v1294_v30, 0  ;;  %v6288_v29 = vadd.s32 4294967294, %v832_v7  ;;  %v1142_v27 = vsub.s32 0, %v7639_v33  ;;  %vm662_vm4 = vcmp.lt.s32.totalorder %v7379_v19, 0 }
 0x13a   : > { %v1031_v26 = vsel %vm1029_vm2, %v1030_v16, %v7631_v15  ;;  %v1296_v20 = vsel %vm1295_vm3, %v1294_v30, 0  ;;  %v1291_v56 = vand.u32 8388607, %v12148_v44  ;;  %vm7657_vm5 = vcmp.le.f32.partialorder %v660_v21, 0.7853982 }
 0x13b   : > { %v1032_v54 = vadd.s32 %v1031_v26, %v1027_v13  ;;  %v12424_v42 = vmov 0  ;;  %v7662_v57 = vshrl.u32 %v7585_v46, 5  ;;  %v7666_v1 = vshll.u32 %v12151_v52, %v7598_v50 }
 0x13c   : > { %v12425_v42 = vsel %vm7657_vm5, 4294967295, %v12424_v42  ;;  %v1298_v15 = vand.u32 31, %v1296_v20  ;;  %v745_v3 = vsel %vm662_vm4, %v744_v9, %v7616_v41  ;;  %v583_v4 = vshrl.u32 %v12166_v55, %v7645_v6 }
 0x13d   : > { %12426 = vst [vmem:[#allocation15_spill] sm:$0xff] %v12425_v42  ;;  %v950_v21 = vcvt.s32.f32 %v943_v5  ;;  %v1033_v18 = vadd.s32 536870912, %v1032_v54  ;;  %v948_v11 = vand.u32 2147483647, %v947_v12  ;;  %vm6289_vm6 = vcmp.lt.s32.totalorder %v6288_v29, 0 }
 0x13e   : > { %v6299_v46 = vmin.u32 %v1142_v27, %v7639_v33  ;;  %v1299_v14 = vsub.s32 32, %v1298_v15  ;;  %v1292_v35 = vor.u32 8388608, %v1291_v56  ;;  %v1301_v59 = vshll.u32 %v12158_v43, %v1298_v15 }
 0x13f   : > { %v1304_v37 = vshll.u32 %v12156_v45, %v1298_v15  ;;  %v7677_v39 = vadd.f32 %v7376_v17, %v507_v53  ;;  %v7679_v48 = vshrl.u32 %v1033_v18, 30  ;;  %v1297_v30 = vshrl.u32 %v1296_v20, 5 }
 0x140   : > { %v1302_v41 = vshrl.u32 %v12156_v45, %v1299_v14  ;;  %v1305_v7 = vshrl.u32 %v12154_v49, %v1299_v14  ;;  %v1308_v24 = vshrl.u32 %v12151_v52, %v1299_v14  ;;  %v1307_v9 = vshll.u32 %v12154_v49, %v1298_v15 }
 0x141   : > { %12427 = vst [vmem:[#allocation16_spill] sm:$0xff] %v7679_v48  ;;  %v1310_v5 = vshll.u32 %v12151_v52, %v1298_v15  ;;  %v1311_v16 = vshrl.u32 %v12166_v55, %v1299_v14  ;;  %v7690_v12 = vsel %vm7657_vm5, %v7379_v19, %v745_v3  ;;  %v7692_v13 = vmul.f32 %v950_v21, %v948_v11 }
 0x142   : > { %v1303_v27 = vor.u32 %v1302_v41, %v1301_v59  ;;  %v1306_v26 = vor.u32 %v1305_v7, %v1304_v37  ;;  %v1309_v56 = vor.u32 %v1308_v24, %v1307_v9  ;;  %v1313_v18 = vshll.u32 %v12166_v55, %v1298_v15 }
 0x143   : > { %v1312_v53 = vor.u32 %v1311_v16, %v1310_v5  ;;  %v1314_v20 = vshrl.u32 %v12164_v58, %v1299_v14  ;;  %v7697_v44 = vsel %vm6289_vm6, 0, %v6288_v29  ;;  %v1144_v23 = vclz %v6299_v46 }
 0x144   : > { %v1035_v31 = vshll.u32 %v7679_v48, 30  ;;  %v1183_v52 = vand.u32 2139095040, %v7677_v39  ;;  %vm1316_vm7 = vcmp.lt.s32.totalorder %v1297_v30, 1  ;;  %vm1319_vm8 = vcmp.lt.s32.totalorder %v1297_v30, 4 }
 0x145   : > { %v1315_v3 = vor.u32 %v1314_v20, %v1313_v18  ;;  %v1332_v21 = vshll.u32 %v1292_v35, 8  ;;  %v1300_v11 = vshrl.u32 %v12158_v43, %v1299_v14  ;;  %vm1318_vm9 = vcmp.lt.s32.totalorder %v1297_v30, 3  ;;  %v6620_v20 = vpop.f32.mrf.mxu0 }
 0x146   : > { %v1324_v59 = vsel %vm1316_vm7, %v1303_v27, %v1306_v26  ;;  %v1325_v15 = vsel %vm1319_vm8, %v1312_v53, 920167782  ;;  %vm1317_vm10 = vcmp.lt.s32.totalorder %v1297_v30, 2  ;;  %v1321_v37 = vsel %vm1319_vm8, %v1309_v56, 2102212464 }
 0x147   : > { %v1326_v29 = vsel %vm1318_vm9, %v1309_v56, %v1325_v15  ;;  %v1328_v46 = vsel %vm1316_vm7, %v1306_v26, %v1309_v56  ;;  %v7705_v41 = vsub.s32 %v1032_v54, %v1035_v31  ;;  %v1329_v24 = vsel %vm1319_vm8, %v1315_v3, 1326507024 }
 0x148   : > { %v1327_v7 = vsel %vm1317_vm10, %v1324_v59, %v1326_v29  ;;  %v1184_v9 = vshrl.u32 %v1183_v52, 23  ;;  %v836_v35 = vsub.s32 32, %v7697_v44  ;;  %v840_v14 = vsub.s32 4294967266, %v7697_v44 }
 0x149   : > { %v1320_v5 = vsel %vm1316_vm7, %v1300_v11, %v1303_v27  ;;  %v1330_v16 = vsel %vm1318_vm9, %v1312_v53, %v1329_v24  ;;  %vm12241_vm11 = vcmp.lt.s32.totalorder %v7386_v25, 0  ;;  %v1322_v18 = vsel %vm1318_vm9, %v1306_v26, %v1321_v37 }
 0x14a   : > { %v1331_v56 = vsel %vm1317_vm10, %v1328_v46, %v1330_v16  ;;  %v7715_v31 = vmul.u32.u64.low %v1332_v21, %v1327_v7  ;;  %v7716_v54 = vmul.u32.u64.high %v1332_v21, %v1327_v7, %v7715_v31  ;;  %v6300_v52 = vadd.s32 4294967294, %v1144_v23 }
 0x14b   : > { %v7719_v3 = vmul.u32.u64.low %v1332_v21, %v1331_v56  ;;  %v7720_v59 = vmul.u32.u64.high %v1332_v21, %v1331_v56, %v7719_v3  ;;  %v12153_v15 = vand.u32 2147483647, %v7677_v39  ;;  %v7724_v27 = vor.u32 %v583_v4, %v7666_v1 }
 0x14c   : > { %v7728_v53 = vshll.u32 %v12166_v55, %v7598_v50  ;;  %v1038_v26 = vsub.s32 0, %v7705_v41  ;;  %v6302_v11 = vadd.s32 4294967169, %v1184_v9  ;;  %v7733_v37 = vshrl.u32 %v12164_v58, %v7645_v6 }
 0x14d   : > { %v820_v23 = vadd.s32 %v7514_v32, %v7521_v38  ;;  %v1323_v29 = vsel %vm1317_vm10, %v1320_v5, %v1322_v18  ;;  %v7739_v46 = vadd.f32 %v6620_v20, %v7376_v17  ;;  %6965 = vcosq.f32 %v7690_v12 }
 0x14e   : > { %v952_v1 = vxor.u32 2147483648, %v7692_v13  ;;  %v1342_v4 = vadd.s32 1, %v7716_v54  ;;  %v1190_v7 = vadd.s32 1, %v6302_v11  ;;  %v7744_v9 = vadd.s32 127, %v840_v14 }
 0x14f   : > { %12428 = vst [vmem:[#allocation17_spill] sm:$0xff] %v7739_v46  ;;  %v838_v24 = vshrl.u32 %v820_v23, %v836_v35  ;;  %vm6301_vm12 = vcmp.lt.s32.totalorder %v6300_v52, 0  ;;  %v1187_v16 = vand.u32 8388607, %v12153_v15  ;;  %v6295_v32 = vmin.u32 %v1038_v26, %v7705_v41 }
 0x150   : > { %v1339_v38 = vmul.u32 %v1332_v21, %v1323_v29  ;;  %vm1341_vm13 = vc.u32 %v7720_v59, %v7715_v31  ;;  %vm1191_vm14 = vcmp.gt.s32.totalorder %v1190_v7, 0  ;;  %v837_v17 = vshll.u32 %v7604_v10, %v7697_v44 }
 0x151   : > { %v1343_v30 = vsel %vm1341_vm13, %v1342_v4, %v7716_v54  ;;  %v1192_v5 = vsel %vm1191_vm14, %v1190_v7, 0  ;;  %v1495_v35 = vand.u32 2139095040, %v7739_v46  ;;  %6967 = vsinq.f32 %v7690_v12 }
 0x152   : > { %v1344_v18 = vadd.s32 %v1343_v30, %v1339_v38  ;;  %v1194_v56 = vand.u32 31, %v1192_v5  ;;  %v953_v21 = vsel %vm12241_vm11, %v952_v1, %v7692_v13  ;;  %v7761_v20 = vor.u32 %v838_v24, %v837_v17 }
 0x153   : > { %v842_v10 = vshll.u32 %v7744_v9, 23  ;;  %v7765_v44 = vsel %vm6301_vm12, 0, %v6300_v52  ;;  %v1040_v54 = vclz %v6295_v32  ;;  %v1188_v26 = vor.u32 8388608, %v1187_v16 }
 0x154   : > { %v1345_v3 = vadd.s32 536870912, %v1344_v18  ;;  %v1195_v12 = vsub.s32 32, %v1194_v56  ;;  %v1193_v11 = vshrl.u32 %v1192_v5, 5  ;;  %v1197_v23 = vshll.u32 %v12158_v43, %v1194_v56 }
 0x155   : > { %v1200_v29 = vshll.u32 %v12156_v45, %v1194_v56  ;;  %v1496_v4 = vshrl.u32 %v1495_v35, 23  ;;  %v1203_v24 = vshll.u32 %v12154_v49, %v1194_v56  ;;  %vm7776_vm15 = vcmp.le.f32.partialorder %v868_v28, 0.7853982 }
 0x156   : > { %v7769_v7 = vshrl.u32 %v1345_v3, 30  ;;  %v1198_v13 = vshrl.u32 %v12156_v45, %v1195_v12  ;;  %v1201_v1 = vshrl.u32 %v12154_v49, %v1195_v12  ;;  %v12430_v52 = vmov 0 }
 0x157   : > { %v12431_v52 = vsel %vm7776_vm15, 4294967295, %v12430_v52  ;;  %v12433_v9 = vmov 2102212464   ;;  %v1207_v38 = vshrl.u32 %v12166_v55, %v1195_v12  ;;  %v1209_v17 = vshll.u32 %v12166_v55, %v1194_v56 }
 0x158   : > { %12429 = vst [vmem:[#allocation18_spill] sm:$0xff] %v7769_v7  ;;  %12432 = vst [vmem:[#allocation19_spill] sm:$0xff] %v12431_v52  ;;  %v1204_v16 = vshrl.u32 %v12433_v9, %v1195_v12  ;;  %v1206_v32 = vshll.u32 %v12433_v9, %v1194_v56  ;;  %v1347_v30 = vshll.u32 %v7769_v7, 30  ;;  %v1199_v5 = vor.u32 %v1198_v13, %v1197_v23 }
 0x159   : > { %v1202_v35 = vor.u32 %v1201_v1, %v1200_v29  ;;  %v1210_v3 = vshrl.u32 %v12164_v58, %v1195_v12  ;;  %v1152_v14 = vsub.s32 4294967266, %v7765_v44  ;;  %v12168_v49 = vand.u32 2147483647, %v7739_v46 }
 0x15a   : > { %v1205_v28 = vor.u32 %v1204_v16, %v1203_v24  ;;  %v1208_v15 = vor.u32 %v1207_v38, %v1206_v32  ;;  %v6296_v45 = vadd.s32 4294967294, %v1040_v54  ;;  %v7788_v43 = vsub.s32 %v1344_v18, %v1347_v30  ;;  %v7790_v48 = vpop.eup %6965  ;;  %v517_v30 = vpop.f32.mrf.mxu0 }
 0x15b   : > { %v1211_v47 = vor.u32 %v1210_v3, %v1209_v17  ;;  %vm1212_vm0 = vcmp.lt.s32.totalorder %v1193_v11, 1  ;;  %12434 = vst [vmem:[#allocation20_spill] sm:$0xff] %v7790_v48  ;;  %vm1215_vm1 = vcmp.lt.s32.totalorder %v1193_v11, 4  ;;  %v1228_v23 = vshll.u32 %v1188_v26, 8 }
 0x15c   : > { %v1220_v56 = vsel %vm1212_vm0, %v1199_v5, %v1202_v35  ;;  %v6314_v29 = vadd.s32 4294967169, %v1496_v4  ;;  %v12435_v13 = vmov 683565275   ;;  %vm1214_vm2 = vcmp.lt.s32.totalorder %v1193_v11, 3 }
 0x15d   : > { %v1196_v1 = vshrl.u32 %v12435_v13, %v1195_v12  ;;  %v1217_v58 = vsel %vm1215_vm1, %v1205_v28, 2102212464  ;;  %v1221_v24 = vsel %vm1215_vm1, %v1208_v15, 920167782  ;;  %vm1213_vm3 = vcmp.lt.s32.totalorder %v1193_v11, 2 }
 0x15e   : > { %v1222_v16 = vsel %vm1214_vm2, %v1205_v28, %v1221_v24  ;;  %v1224_v54 = vsel %vm1212_vm0, %v1202_v35, %v1205_v28  ;;  %v1225_v18 = vsel %vm1215_vm1, %v1211_v47, 1326507024  ;;  %vm6297_vm6 = vcmp.lt.s32.totalorder %v6296_v45, 0  ;;  %v7798_v26 = vpop.eup %6967 }
 0x15f   : > { %v1350_v32 = vsub.s32 0, %v7788_v43  ;;  %v1216_v38 = vsel %vm1212_vm0, %v1196_v1, %v1199_v5  ;;  %v1223_v17 = vsel %vm1213_vm3, %v1220_v56, %v1222_v16  ;;  %12436 = vst [vmem:[#allocation21_spill] sm:$0xff] %v7798_v26  ;;  %v1218_v4 = vsel %vm1214_vm2, %v1202_v35, %v1217_v58  ;;  %v7816_v58 = vld [vmem:[%s12139_s2] ss:$0 sm:$0xff] }
 0x160   : > { %v1226_v12 = vsel %vm1214_vm2, %v1208_v15, %v1225_v18  ;;  %v7800_v3 = vmul.u32.u64.low %v1228_v23, %v1223_v17  ;;  %v7801_v55 = vmul.u32.u64.high %v1228_v23, %v1223_v17, %v7800_v3  ;;  %v7807_v47 = vsel %vm7776_vm15, %v7386_v25, %v953_v21 }
 0x161   : > { %v843_v28 = vor.u32 4788187, %v842_v10  ;;  %v1153_v24 = vadd.s32 127, %v1152_v14  ;;  %v1227_v5 = vsel %vm1213_vm3, %v1224_v54, %v1226_v12  ;;  %v1502_v16 = vadd.s32 1, %v6314_v29 }
 0x162   : > { %v7810_v1 = vmul.u32.u64.low %v1228_v23, %v1227_v5  ;;  %v7811_v56 = vmul.u32.u64.high %v1228_v23, %v1227_v5, %v7810_v1  ;;  %v7819_v15 = vadd.f32 %v7816_v58, %v517_v30  ;;  %v7822_v35 = vsel %vm6297_vm6, 0, %v6296_v45 }
 0x163   : > { %v6307_v21 = vmin.u32 %v1350_v32, %v7788_v43  ;;  %v1219_v14 = vsel %vm1213_vm3, %v1216_v38, %v1218_v4  ;;  %v1499_v10 = vand.u32 8388607, %v12168_v49  ;;  %v846_v29 = vcvt.s32.f32 %v7761_v20 }
 0x164   : > { %v1132_v54 = vadd.s32 %v7570_v8, %v7582_v22  ;;  %v1238_v18 = vadd.s32 1, %v7801_v55  ;;  %vm1503_vm7 = vcmp.gt.s32.totalorder %v1502_v16, 0  ;;  %v844_v17 = vand.u32 2147483647, %v843_v28 }
 0x165   : > { %v1148_v30 = vsub.s32 32, %v7765_v44  ;;  %v1154_v45 = vshll.u32 %v1153_v24, 23  ;;  %v1504_v12 = vsel %vm1503_vm7, %v1502_v16, 0  ;;  %v1044_v32 = vsub.s32 32, %v7822_v35 }
 0x166   : > { %v1048_v11 = vsub.s32 4294967266, %v7822_v35  ;;  %v1235_v38 = vmul.u32 %v1228_v23, %v1219_v14  ;;  %vm1237_vm8 = vc.u32 %v7811_v56, %v7800_v3  ;;  %v1352_v20 = vclz %v6307_v21 }
 0x167   : > { %v1239_v4 = vsel %vm1237_vm8, %v1238_v18, %v7801_v55  ;;  %v1500_v8 = vor.u32 8388608, %v1499_v10  ;;  %v1391_v22 = vand.u32 2139095040, %v7819_v15  ;;  %6969 = vcosq.f32 %v7807_v47 }
 0x168   : > { %v1028_v28 = vadd.s32 %v7630_v40, %v7635_v0  ;;  %v1240_v24 = vadd.s32 %v1239_v4, %v1235_v38  ;;  %v1506_v5 = vand.u32 31, %v1504_v12  ;;  %v7842_v1 = vmul.f32 %v846_v29, %v844_v17 }
 0x169   : > { %v1149_v23 = vshll.u32 %v7639_v33, %v7765_v44  ;;  %v1150_v16 = vshrl.u32 %v1132_v54, %v1148_v30  ;;  %v7846_v14 = vor.u32 4788187, %v1154_v45  ;;  %v1505_v10 = vshrl.u32 %v1504_v12, 5 }
 0x16a   : > { %v1046_v21 = vshrl.u32 %v1028_v28, %v1044_v32  ;;  %v1241_v55 = vadd.s32 536870912, %v1240_v24  ;;  %v1507_v18 = vsub.s32 32, %v1506_v5  ;;  %v7848_v49 = vadd.s32 127, %v1048_v11 }
 0x16b   : > { %v6308_v7 = vadd.s32 4294967294, %v1352_v20  ;;  %v7850_v52 = vshll.u32 %v1500_v8, 8  ;;  %v1392_v40 = vshrl.u32 %v1391_v22, 23  ;;  %v1509_v0 = vshll.u32 %v12435_v13, %v1506_v5 }
 0x16c   : > { %v12437_v29 = vmov 2475754826   ;;  %v12438_v33 = vmov 2131351028   ;;  %v1516_v30 = vshrl.u32 %v12433_v9, %v1507_v18  ;;  %v1518_v45 = vshll.u32 %v12433_v9, %v1506_v5 }
 0x16d   : > { %v1510_v17 = vshrl.u32 %v12437_v29, %v1507_v18  ;;  %v1512_v38 = vshll.u32 %v12437_v29, %v1506_v5  ;;  %v1513_v44 = vshrl.u32 %v12438_v33, %v1507_v18  ;;  %v1515_v54 = vshll.u32 %v12438_v33, %v1506_v5 }
 0x16e   : > { %v12439_v12 = vmov 920167782   ;;  %v7860_v11 = vshrl.u32 %v1241_v55, 30  ;;  %vm1524_vm9 = vcmp.lt.s32.totalorder %v1505_v10, 1  ;;  %v12441_v25 = vmov 1326507024  }
 0x16f   : > { %v1519_v32 = vshrl.u32 %v12439_v12, %v1507_v18  ;;  %v1511_v20 = vor.u32 %v1510_v17, %v1509_v0  ;;  %v1514_v4 = vor.u32 %v1513_v44, %v1512_v38  ;;  %v1517_v8 = vor.u32 %v1516_v30, %v1515_v54 }
 0x170   : > { %12440 = vst [vmem:[#allocation22_spill] sm:$0xff] %v7860_v11  ;;  %v1521_v28 = vshll.u32 %v12439_v12, %v1506_v5  ;;  %v1522_v48 = vshrl.u32 %v12441_v25, %v1507_v18  ;;  %vm12243_vm10 = vcmp.lt.s32.totalorder %v7393_v34, 0  ;;  %v1508_v26 = vshrl.u32 %v12435_v13, %v1507_v18 }
 0x171   : > { %v1520_v22 = vor.u32 %v1519_v32, %v1518_v45  ;;  %vm1526_vm12 = vcmp.lt.s32.totalorder %v1505_v10, 3  ;;  %vm1527_vm13 = vcmp.lt.s32.totalorder %v1505_v10, 4  ;;  %v1532_v63 = vsel %vm1524_vm9, %v1511_v20, %v1514_v4 }
 0x172   : > { %v1523_v42 = vor.u32 %v1522_v48, %v1521_v28  ;;  %v1529_v55 = vsel %vm1527_vm13, %v1517_v8, 2102212464  ;;  %v6310_v0 = vadd.s32 4294967169, %v1392_v40  ;;  %v1243_v17 = vshll.u32 %v7860_v11, 30 }
 0x173   : > { %v1533_v19 = vsel %vm1527_vm13, %v1520_v22, 920167782  ;;  %vm1525_vm14 = vcmp.lt.s32.totalorder %v1505_v10, 2  ;;  %v1536_v5 = vsel %vm1524_vm9, %v1514_v4, %v1517_v8  ;;  %vm6309_vm0 = vcmp.lt.s32.totalorder %v6308_v7, 0 }
 0x174   : > { %v1534_v38 = vsel %vm1526_vm12, %v1517_v8, %v1533_v19  ;;  %v1528_v44 = vsel %vm1524_vm9, %v1508_v26, %v1511_v20  ;;  %v1537_v54 = vsel %vm1527_vm13, %v1523_v42, 1326507024  ;;  %v1530_v30 = vsel %vm1526_vm12, %v1514_v4, %v1529_v55  ;;  %v7879_v32 = vpop.eup %6969 }
 0x175   : > { %v1535_v18 = vsel %vm1525_vm14, %v1532_v63, %v1534_v38  ;;  %v1538_v48 = vsel %vm1526_vm12, %v1520_v22, %v1537_v54  ;;  %12442 = vst [vmem:[#allocation23_spill] sm:$0xff] %v7879_v32  ;;  %v848_v19 = vxor.u32 2147483648, %v7842_v1  ;;  %v1151_v8 = vor.u32 %v1150_v16, %v1149_v23 }
 0x176   : > { %v7875_v45 = vmul.u32.u64.low %v7850_v52, %v1535_v18  ;;  %v7876_v40 = vmul.u32.u64.high %v7850_v52, %v1535_v18, %v7875_v45  ;;  %v1539_v28 = vsel %vm1525_vm14, %v1536_v5, %v1538_v48  ;;  %v1398_v26 = vadd.s32 1, %v6310_v0 }
 0x177   : > { %v1045_v63 = vshll.u32 %v7705_v41, %v7822_v35  ;;  %v7885_v42 = vsub.s32 %v1240_v24, %v1243_v17  ;;  %v7888_v20 = vmul.u32.u64.low %v7850_v52, %v1539_v28  ;;  %v7889_v4 = vmul.u32.u64.high %v7850_v52, %v1539_v28, %v7888_v20  ;;  %v6623_v24 = vpop.f32.mrf.mxu0 }
 0x178   : > { %v1156_v22 = vand.u32 2147483647, %v7846_v14  ;;  %v7893_v55 = vsel %vm6309_vm0, 0, %v6308_v7  ;;  %v1531_v38 = vsel %vm1525_vm14, %v1528_v44, %v1530_v30  ;;  %vm1399_vm1 = vcmp.gt.s32.totalorder %v1398_v26, 0 }
 0x179   : > { %v7896_v23 = vor.u32 %v1046_v21, %v1045_v63  ;;  %v1050_v16 = vshll.u32 %v7848_v49, 23  ;;  %v1550_v41 = vadd.s32 1, %v7876_v40  ;;  %v1400_v35 = vsel %vm1399_vm1, %v1398_v26, 0 }
 0x17a   : > { %v7903_v0 = vsel %vm12243_vm10, %v848_v19, %v7842_v1  ;;  %v1158_v14 = vcvt.s32.f32 %v1151_v8  ;;  %v12181_v7 = vand.u32 2147483647, %v7819_v15  ;;  %v1402_v17 = vand.u32 31, %v1400_v35 }
 0x17b   : > { %v1360_v10 = vsub.s32 4294967266, %v7893_v55  ;;  %v1246_v21 = vsub.s32 0, %v7885_v42  ;;  %v1547_v5 = vmul.u32 %v7850_v52, %v1531_v38  ;;  %vm1549_vm2 = vc.u32 %v7889_v4, %v7875_v45 }
 0x17c   : > { %v7911_v49 = vmul.f32 %v1158_v14, %v1156_v22  ;;  %v1551_v44 = vsel %vm1549_vm2, %v1550_v41, %v7876_v40  ;;  %v1403_v18 = vsub.s32 32, %v1402_v17  ;;  %v7915_v1 = vadd.f32 %v7816_v58, %v6623_v24 }
 0x17d   : > { %v7917_v54 = vor.u32 4788187, %v1050_v16  ;;  %v1340_v48 = vadd.s32 %v7715_v31, %v7720_v59  ;;  %v1552_v19 = vadd.s32 %v1551_v44, %v1547_v5  ;;  %v1356_v52 = vsub.s32 32, %v7893_v55 }
 0x17e   : > { %v1395_v8 = vand.u32 8388607, %v12181_v7  ;;  %v1406_v28 = vshrl.u32 %v12437_v29, %v1403_v18  ;;  %v1409_v40 = vshrl.u32 %v12438_v33, %v1403_v18  ;;  %v7927_v26 = vadd.s32 127, %v1360_v10 }
 0x17f   : > { %v6303_v63 = vmin.u32 %v1246_v21, %v7885_v42  ;;  %v1553_v20 = vadd.s32 536870912, %v1552_v19  ;;  %v1405_v22 = vshll.u32 %v12435_v13, %v1402_v17  ;;  %v1401_v38 = vshrl.u32 %v1400_v35, 5 }
 0x180   : > { %v1408_v31 = vshll.u32 %v12437_v29, %v1402_v17  ;;  %v1411_v59 = vshll.u32 %v12438_v33, %v1402_v17  ;;  %v1412_v16 = vshrl.u32 %v12433_v9, %v1403_v18  ;;  %v1414_v14 = vshll.u32 %v12433_v9, %v1402_v17 }
 0x181   : > { %v7934_v41 = vshrl.u32 %v1553_v20, 30  ;;  %v1407_v24 = vor.u32 %v1406_v28, %v1405_v22  ;;  %v1415_v10 = vshrl.u32 %v12439_v12, %v1403_v18  ;;  %v1417_v21 = vshll.u32 %v12439_v12, %v1402_v17 }
 0x182   : > { %v1410_v5 = vor.u32 %v1409_v40, %v1408_v31  ;;  %v1413_v44 = vor.u32 %v1412_v16, %v1411_v59  ;;  %v1418_v7 = vshrl.u32 %v12441_v25, %v1403_v18  ;;  %v12444_v35 = vand.u32 2147483647, %v7393_v34 }
 0x183   : > { %12443 = vst [vmem:[#allocation24_spill] sm:$0xff] %v7934_v41  ;;  %v12445_v30 = vmov 0  ;;  %v1052_v20 = vand.u32 2147483647, %v7917_v54  ;;  %v1555_v28 = vshll.u32 %v7934_v41, 30  ;;  %v1396_v22 = vor.u32 8388608, %v1395_v8 }
 0x184   : > { %vm7942_vm3 = vcmp.le.f32.partialorder %v12444_v35, 0.7853982  ;;  %v1416_v32 = vor.u32 %v1415_v10, %v1414_v14  ;;  %v1358_v11 = vshrl.u32 %v1340_v48, %v1356_v52  ;;  %v1362_v40 = vshll.u32 %v7927_v26, 23 }
 0x185   : > { %v12446_v30 = vsel %vm7942_vm3, 4294967295, %v12445_v30  ;;  %v1419_v31 = vor.u32 %v1418_v7, %v1417_v21  ;;  %v1703_v17 = vand.u32 2139095040, %v7915_v1  ;;  %v1248_v59 = vclz %v6303_v63 }
 0x186   : > { %12447 = vst [vmem:[#allocation25_spill] sm:$0xff] %v12446_v30  ;;  %v1404_v16 = vshrl.u32 %v12435_v13, %v1403_v18  ;;  %vm1420_vm6 = vcmp.lt.s32.totalorder %v1401_v38, 1  ;;  %vm1423_vm7 = vcmp.lt.s32.totalorder %v1401_v38, 4  ;;  %vm1422_vm8 = vcmp.lt.s32.totalorder %v1401_v38, 3 }
 0x187   : > { %v1425_v35 = vsel %vm1423_vm7, %v1413_v44, 2102212464  ;;  %v1428_v36 = vsel %vm1420_vm6, %v1407_v24, %v1410_v5  ;;  %v1429_v54 = vsel %vm1423_vm7, %v1416_v32, 920167782  ;;  %v7952_v61 = vsub.s32 %v1552_v19, %v1555_v28 }
 0x188   : > { %vm1421_vm9 = vcmp.lt.s32.totalorder %v1401_v38, 2  ;;  %v1430_v48 = vsel %vm1422_vm8, %v1413_v44, %v1429_v54  ;;  %v1432_v52 = vsel %vm1420_vm6, %v1410_v5, %v1413_v44  ;;  %vm12205_vm12 = vcmp.lt.s32.totalorder %v7478_v62, 0 }
 0x189   : > { %v1431_v7 = vsel %vm1421_vm9, %v1428_v36, %v1430_v48  ;;  %v1433_v8 = vsel %vm1423_vm7, %v1419_v31, 1326507024  ;;  %v1436_v18 = vshll.u32 %v1396_v22, 8  ;;  %v1704_v26 = vshrl.u32 %v1703_v17, 23 }
 0x18a   : > { %v6304_v63 = vadd.s32 4294967294, %v1248_v59  ;;  %v1424_v14 = vsel %vm1420_vm6, %v1404_v16, %v1407_v24  ;;  %v1426_v10 = vsel %vm1422_vm8, %v1410_v5, %v1425_v35  ;;  %v1434_v19 = vsel %vm1422_vm8, %v1416_v32, %v1433_v8 }
 0x18b   : > { %v1435_v21 = vsel %vm1421_vm9, %v1432_v52, %v1434_v19  ;;  %v7962_v28 = vmul.u32.u64.low %v1436_v18, %v1431_v7  ;;  %v7963_v54 = vmul.u32.u64.high %v1436_v18, %v1431_v7, %v7962_v28  ;;  %v6322_v44 = vadd.s32 4294967169, %v1704_v26 }
 0x18c   : > { %v1357_v36 = vshll.u32 %v7788_v43, %v7893_v55  ;;  %v1558_v22 = vsub.s32 0, %v7952_v61  ;;  %v7969_v31 = vmul.u32.u64.low %v1436_v18, %v1435_v21  ;;  %v7970_v17 = vmul.u32.u64.high %v1436_v18, %v1435_v21, %v7969_v31 }
 0x18d   : > { %6971 = vsinq.f32 %v7807_v47  ;;  %v7977_v32 = vsel %vm7942_vm3, %v7393_v34, %v7903_v0  ;;  %v1427_v24 = vsel %vm1421_vm9, %v1424_v14, %v1426_v10  ;;  %v1710_v5 = vadd.s32 1, %v6322_v44  ;;  %v527_v47 = vpop.f32.mrf.mxu0 }
 0x18e   : > { %v1160_v59 = vxor.u32 2147483648, %v7911_v49  ;;  %v12448_v43 = vcvt.s32.f32 %v7896_v23  ;;  %v7985_v16 = vor.u32 %v1358_v11, %v1357_v36  ;;  %v12189_v35 = vand.u32 2147483647, %v7915_v1 }
 0x18f   : > { %v7988_v48 = vor.u32 4788187, %v1362_v40  ;;  %vm6305_vm13 = vcmp.lt.s32.totalorder %v6304_v63, 0  ;;  %v1446_v0 = vadd.s32 1, %v7963_v54  ;;  %vm1711_vm14 = vcmp.gt.s32.totalorder %v1710_v5, 0 }
 0x190   : > { %v7983_v55 = vmul.f32 %v12448_v43, %v1052_v20  ;;  %v6315_v38 = vmin.u32 %v1558_v22, %v7952_v61  ;;  %v1443_v52 = vmul.u32 %v1436_v18, %v1427_v24  ;;  %vm1445_vm0 = vc.u32 %v7970_v17, %v7962_v28 }
 0x191   : > { %v1712_v23 = vsel %vm1711_vm14, %v1710_v5, 0  ;;  %6973 = vcosq.f32 %v7977_v32  ;;  %v1447_v11 = vsel %vm1445_vm0, %v1446_v0, %v7963_v54  ;;  %v7997_v7 = vadd.f32 %v7816_v58, %v527_v47 }
 0x192   : > { %v1714_v20 = vand.u32 31, %v1712_v23  ;;  %v8002_v40 = vsel %vm12205_vm12, %v1160_v59, %v7911_v49  ;;  %v1366_v18 = vcvt.s32.f32 %v7985_v16  ;;  %v1448_v26 = vadd.s32 %v1447_v11, %v1443_v52 }
 0x193   : > { %12449 = vst [vmem:[#allocation26_spill] sm:$0xff] %v7997_v7  ;;  %v1364_v14 = vand.u32 2147483647, %v7988_v48  ;;  %v8008_v10 = vsel %vm6305_vm13, 0, %v6304_v63  ;;  %v1707_v19 = vand.u32 8388607, %v12189_v35  ;;  %v1560_v54 = vclz %v6315_v38 }
 0x194   : > { %v1715_v21 = vsub.s32 32, %v1714_v20  ;;  %v1449_v44 = vadd.s32 536870912, %v1448_v26  ;;  %v1717_v36 = vshll.u32 %v12435_v13, %v1714_v20  ;;  %v1720_v49 = vshll.u32 %v12437_v29, %v1714_v20 }
 0x195   : > { %v1723_v24 = vshll.u32 %v12438_v33, %v1714_v20  ;;  %v1713_v59 = vshrl.u32 %v1712_v23, 5  ;;  %v1726_v43 = vshll.u32 %v12433_v9, %v1714_v20  ;;  %v1252_v47 = vsub.s32 32, %v8008_v10 }
 0x196   : > { %v1718_v22 = vshrl.u32 %v12437_v29, %v1715_v21  ;;  %v1721_v31 = vshrl.u32 %v12438_v33, %v1715_v21  ;;  %v1724_v5 = vshrl.u32 %v12433_v9, %v1715_v21  ;;  %v8018_v63 = vshrl.u32 %v1449_v44, 30 }
 0x197   : > { %v1727_v16 = vshrl.u32 %v12439_v12, %v1715_v21  ;;  %v1256_v52 = vsub.s32 4294967266, %v8008_v10  ;;  %v1708_v35 = vor.u32 8388608, %v1707_v19  ;;  %v12451_v41 = vand.u32 2147483647, %v7478_v62 }
 0x198   : > { %12450 = vst [vmem:[#allocation27_spill] sm:$0xff] %v8018_v63  ;;  %v1719_v48 = vor.u32 %v1718_v22, %v1717_v36  ;;  %v1722_v0 = vor.u32 %v1721_v31, %v1720_v49  ;;  %v1725_v38 = vor.u32 %v1724_v5, %v1723_v24  ;;  %v1451_v11 = vshll.u32 %v8018_v63, 30 }
 0x199   : > { %v1728_v8 = vor.u32 %v1727_v16, %v1726_v43  ;;  %vm8027_vm1 = vcmp.le.f32.partialorder %v12451_v41, 0.7853982  ;;  %v12452_v44 = vmov 0  ;;  %v6316_v23 = vadd.s32 4294967294, %v1560_v54 }
 0x19a   : > { %v12453_v44 = vsel %vm8027_vm1, 4294967295, %v12452_v44  ;;  %v1729_v30 = vshll.u32 %v12439_v12, %v1714_v20  ;;  %v1730_v34 = vshrl.u32 %v12441_v25, %v1715_v21  ;;  %v1599_v36 = vand.u32 2139095040, %v7997_v7  ;;  %v8034_v49 = vpop.eup %6971 }
 0x19b   : > { %12454 = vst [vmem:[#allocation28_spill] sm:$0xff] %v12453_v44  ;;  %12455 = vst [vmem:[#allocation29_spill] sm:$0xff] %v8034_v49  ;;  %v8036_v22 = vsub.s32 %v1448_v26, %v1451_v11  ;;  %vm1732_vm2 = vcmp.lt.s32.totalorder %v1713_v59, 1  ;;  %vm1734_vm6 = vcmp.lt.s32.totalorder %v1713_v59, 3  ;;  %vm1735_vm7 = vcmp.lt.s32.totalorder %v1713_v59, 4 }
 0x19c   : > { %vm12221_vm8 = vcmp.lt.s32.totalorder %v7533_v51, 0  ;;  %v1731_v41 = vor.u32 %v1730_v34, %v1729_v30  ;;  %v1737_v19 = vsel %vm1735_vm7, %v1725_v38, 2102212464  ;;  %v1740_v31 = vsel %vm1732_vm2, %v1719_v48, %v1722_v0 }
 0x19d   : > { %v1741_v54 = vsel %vm1735_vm7, %v1728_v8, 920167782  ;;  %v1716_v20 = vshrl.u32 %v12435_v13, %v1715_v21  ;;  %vm1733_vm9 = vcmp.lt.s32.totalorder %v1713_v59, 2  ;;  %v1748_v5 = vshll.u32 %v1708_v35, 8 }
 0x19e   : > { %v1742_v24 = vsel %vm1734_vm6, %v1725_v38, %v1741_v54  ;;  %vm6317_vm13 = vcmp.lt.s32.totalorder %v6316_v23, 0  ;;  %v1744_v43 = vsel %vm1732_vm2, %v1722_v0, %v1725_v38  ;;  %v1745_v16 = vsel %vm1735_vm7, %v1731_v41, 1326507024  ;;  %v8044_v11 = vpop.eup %6973 }
 0x19f   : > { %v1743_v26 = vsel %vm1733_vm9, %v1740_v31, %v1742_v24  ;;  %12456 = vst [vmem:[#allocation30_spill] sm:$0xff] %v8044_v11  ;;  %v1454_v34 = vsub.s32 0, %v8036_v22  ;;  %v1736_v30 = vsel %vm1732_vm2, %v1716_v20, %v1719_v48  ;;  %v1738_v63 = vsel %vm1734_vm6, %v1722_v0, %v1737_v19 }
 0x1a0   : > { %v1746_v21 = vsel %vm1734_vm6, %v1728_v8, %v1745_v16  ;;  %v12457_v49 = vand.u32 2147483647, %v7533_v51  ;;  %v12458_v35 = vmov 0  ;;  %v1600_v54 = vshrl.u32 %v1599_v36, 23 }
 0x1a1   : > { %v1747_v31 = vsel %vm1733_vm9, %v1744_v43, %v1746_v21  ;;  %v8057_v38 = vmul.u32.u64.low %v1748_v5, %v1743_v26  ;;  %v8058_v41 = vmul.u32.u64.high %v1748_v5, %v1743_v26, %v8057_v38  ;;  %v1236_v48 = vadd.s32 %v7800_v3, %v7811_v56  ;;  %v6626_v43 = vpop.f32.mrf.mxu0 }
 0x1a2   : > { %vm8052_vm14 = vcmp.le.f32.partialorder %v12457_v49, 0.7853982  ;;  %v8063_v20 = vsel %vm6317_vm13, 0, %v6316_v23  ;;  %v8065_v0 = vmul.u32.u64.low %v1748_v5, %v1747_v31  ;;  %v8066_v8 = vmul.u32.u64.high %v1748_v5, %v1747_v31, %v8065_v0 }
 0x1a3   : > { %v12459_v35 = vsel %vm8052_vm14, 4294967295, %v12458_v35  ;;  %v1367_v19 = vmul.f32 %v1366_v18, %v1364_v14  ;;  %v1257_v49 = vadd.s32 127, %v1256_v52  ;;  %v1739_v24 = vsel %vm1733_vm9, %v1736_v30, %v1738_v63 }
 0x1a4   : > { %12460 = vst [vmem:[#allocation31_spill] sm:$0xff] %v12459_v35  ;;  %v6318_v16 = vadd.s32 4294967169, %v1600_v54  ;;  %6975 = vsinq.f32 %v7977_v32  ;;  %v1164_v36 = vsel %vm8027_vm1, %v7478_v62, %v8002_v40  ;;  %vm12204_vm0 = vcmp.lt.s32.totalorder %v7602_v60, 0 }
 0x1a5   : > { %v1254_v3 = vshrl.u32 %v1236_v48, %v1252_v47  ;;  %v1568_v56 = vsub.s32 4294967266, %v8063_v20  ;;  %v6311_v23 = vmin.u32 %v1454_v34, %v8036_v22  ;;  %v1758_v18 = vadd.s32 1, %v8058_v41  ;;  %v2223_v48 = vld [vmem:[%s12140_s3 + $0x18] sm:$0xff] }
 0x1a6   : > { %v1606_v14 = vadd.s32 1, %v6318_v16  ;;  %v12461_v63 = vxor.u32 2147483648, %v7983_v55  ;;  %v1253_v59 = vshll.u32 %v7885_v42, %v8008_v10  ;;  %v1755_v40 = vmul.u32 %v1748_v5, %v1739_v24  ;;  %6630 = vmatprep.subr.mxu1 %v2223_v48 }
 0x1a7   : > { %vm1757_vm2 = vc.u32 %v8066_v8, %v8057_v38  ;;  %v1368_v47 = vxor.u32 2147483648, %v1367_v19  ;;  %v1258_v52 = vshll.u32 %v1257_v49, 23  ;;  %6977 = vcosq.f32 %v1164_v36  ;;  %6631 = vmatpush3.msra.mxu1 %v2223_v48 }
 0x1a8   : > { %v1057_v32 = vsel %vm12221_vm8, %v12461_v63, %v7983_v55  ;;  %v1759_v26 = vsel %vm1757_vm2, %v1758_v18, %v8058_v41  ;;  %vm1607_vm6 = vcmp.gt.s32.totalorder %v1606_v14, 0  ;;  %v8088_v34 = vor.u32 %v1254_v3, %v1253_v59  ;;  %v2221_v63 = vld [vmem:[%s12140_s3 + $0x8] sm:$0xff] }
 0x1a9   : > { %v1760_v30 = vadd.s32 %v1759_v26, %v1755_v40  ;;  %v12198_v21 = vand.u32 2147483647, %v7997_v7  ;;  %v1564_v55 = vsub.s32 32, %v8063_v20  ;;  %v1569_v31 = vadd.s32 127, %v1568_v56 }
 0x1aa   : > { %v1456_v42 = vclz %v6311_v23  ;;  %v1608_v10 = vsel %vm1607_vm6, %v1606_v14, 0  ;;  %6979 = vsinq.f32 %v1164_v36  ;;  %v8095_v5 = vsel %vm8052_vm14, %v7533_v51, %v1057_v32  ;;  %v2222_v36 = vld [vmem:[%s12140_s3 + $0x10] sm:$0xff] }
 0x1ab   : > { %v1761_v41 = vadd.s32 536870912, %v1760_v30  ;;  %v8098_v54 = vadd.f32 %v7816_v58, %v6626_v43  ;;  %v8105_v0 = vsel %vm12204_vm0, %v1368_v47, %v1367_v19  ;;  %v8107_v49 = vor.u32 4788187, %v1258_v52  ;;  %6632 = vmatprep.subr.mxu1 %v2222_v36  ;;  %v2220_v43 = vld [vmem:[%s12140_s3] sm:$0xff] }
 0x1ac   : > { %v1548_v24 = vadd.s32 %v7875_v45, %v7889_v4  ;;  %v1610_v16 = vand.u32 31, %v1608_v10  ;;  %v1565_v56 = vshll.u32 %v7952_v61, %v8063_v20  ;;  %v1603_v19 = vand.u32 8388607, %v12198_v21  ;;  %6633 = vmatpush3.msra.mxu1 %v2222_v36 }
 0x1ad   : > { %12462 = vst [vmem:[#allocation32_spill] sm:$0xff] %v8098_v54  ;;  %v8117_v23 = vshrl.u32 %v1761_v41, 30  ;;  %v1570_v14 = vshll.u32 %v1569_v31, 23  ;;  %v6312_v45 = vadd.s32 4294967294, %v1456_v42  ;;  %v8124_v32 = vshrl.u32 %v1608_v10, 5  ;;  %6634 = vmatprep.subr.mxu1 %v2221_v63 }
 0x1ae   : > { %v1566_v18 = vshrl.u32 %v1548_v24, %v1564_v55  ;;  %v1611_v4 = vsub.s32 32, %v1610_v16  ;;  %v1613_v59 = vshll.u32 %v12435_v13, %v1610_v16  ;;  %v1616_v61 = vshll.u32 %v12437_v29, %v1610_v16  ;;  %6635 = vmatpush3.msra.mxu1 %v2221_v63 }
 0x1af   : > { %12463 = vst [vmem:[#allocation33_spill] sm:$0xff] %v8117_v23  ;;  %v1911_v20 = vand.u32 2139095040, %v8098_v54  ;;  %v1619_v52 = vshll.u32 %v12438_v33, %v1610_v16  ;;  %v1763_v55 = vshll.u32 %v8117_v23, 30  ;;  %v1622_v31 = vshll.u32 %v12433_v9, %v1610_v16  ;;  %6636 = vmatprep.subr.mxu1 %v2220_v43 }
 0x1b0   : > { %v1614_v40 = vshrl.u32 %v12437_v29, %v1611_v4  ;;  %v1617_v47 = vshrl.u32 %v12438_v33, %v1611_v4  ;;  %v1620_v26 = vshrl.u32 %v12433_v9, %v1611_v4  ;;  %v1623_v42 = vshrl.u32 %v12439_v12, %v1611_v4  ;;  %6637 = vmatpush3.msra.mxu1 %v2220_v43 }
 0x1b1   : > { %v1625_v10 = vshll.u32 %v12439_v12, %v1610_v16  ;;  %v8140_v41 = vpop.eup %6975  ;;  %v1626_v21 = vshrl.u32 %v12441_v25, %v1611_v4  ;;  %vm591_vm7 = vcmp.lt.s32.totalorder %v7662_v57, 4  ;;  %v12465_v3 = vand.u32 2147483647, %v7602_v60 }
 0x1b2   : > { %12464 = vst [vmem:[#allocation34_spill] sm:$0xff] %v8140_v41  ;;  %v1615_v48 = vor.u32 %v1614_v40, %v1613_v59  ;;  %v1618_v24 = vor.u32 %v1617_v47, %v1616_v61  ;;  %v1621_v36 = vor.u32 %v1620_v26, %v1619_v52  ;;  %v12466_v23 = vmov 0 }
 0x1b3   : > { %vm8146_vm9 = vcmp.le.f32.partialorder %v12465_v3, 0.7853982  ;;  %v1260_v44 = vand.u32 2147483647, %v8107_v49  ;;  %v1567_v16 = vor.u32 %v1566_v18, %v1565_v56  ;;  %v1604_v63 = vor.u32 8388608, %v1603_v19 }
 0x1b4   : > { %v12467_v23 = vsel %vm8146_vm9, 4294967295, %v12466_v23  ;;  %v1624_v62 = vor.u32 %v1623_v42, %v1622_v31  ;;  %v1571_v59 = vor.u32 4788187, %v1570_v14  ;;  %vm6313_vm13 = vcmp.lt.s32.totalorder %v6312_v45, 0  ;;  %v8157_v52 = vpop.eup %6977  ;;  %v537_v31 = vpop.f32.mrf.mxu0 }
 0x1b5   : > { %12468 = vst [vmem:[#allocation35_spill] sm:$0xff] %v12467_v23  ;;  %v1627_v61 = vor.u32 %v1626_v21, %v1625_v10  ;;  %vm1628_vm2 = vcmp.lt.s32.totalorder %v8124_v32, 1  ;;  %v8152_v40 = vsub.s32 %v1760_v30, %v1763_v55  ;;  %vm1631_vm6 = vcmp.lt.s32.totalorder %v8124_v32, 4  ;;  %12469 = vst [vmem:[#allocation36_spill] sm:$0xff] %v8157_v52 }
 0x1b6   : > { %v1636_v3 = vsel %vm1628_vm2, %v1615_v48, %v1618_v24  ;;  %v1912_v47 = vshrl.u32 %v1911_v20, 23  ;;  %vm1630_vm0 = vcmp.lt.s32.totalorder %v8124_v32, 3  ;;  %v1637_v49 = vsel %vm1631_vm6, %v1624_v62, 920167782 }
 0x1b7   : > { %v1640_v56 = vsel %vm1628_vm2, %v1618_v24, %v1621_v36  ;;  %v1641_v19 = vsel %vm1631_vm6, %v1627_v61, 1326507024  ;;  %vm1629_vm12 = vcmp.lt.s32.totalorder %v8124_v32, 2  ;;  %v1633_v21 = vsel %vm1631_vm6, %v1621_v36, 2102212464  ;;  %v8165_v14 = vpop.eup %6979 }
 0x1b8   : > { %v1638_v30 = vsel %vm1630_vm0, %v1621_v36, %v1637_v49  ;;  %v1644_v18 = vshll.u32 %v1604_v63, 8  ;;  %12470 = vst [vmem:[#allocation37_spill] sm:$0xff] %v8165_v14  ;;  %v1612_v20 = vshrl.u32 %v12435_v13, %v1611_v4  ;;  %v1642_v43 = vsel %vm1630_vm0, %v1624_v62, %v1641_v19 }
 0x1b9   : > { %v1639_v26 = vsel %vm1629_vm12, %v1636_v3, %v1638_v30  ;;  %v12206_v55 = vand.u32 2147483647, %v8098_v54  ;;  %v8174_v42 = vsel %vm6313_vm13, 0, %v6312_v45  ;;  %v1766_v10 = vsub.s32 0, %v8152_v40 }
 0x1ba   : > { %v1643_v36 = vsel %vm1629_vm12, %v1640_v56, %v1642_v43  ;;  %v6330_v63 = vadd.s32 4294967169, %v1912_v47  ;;  %v1632_v4 = vsel %vm1628_vm2, %v1612_v20, %v1615_v48  ;;  %v1634_v61 = vsel %vm1630_vm0, %v1618_v24, %v1633_v21 }
 0x1bb   : > { %v8183_v3 = vmul.u32.u64.low %v1644_v18, %v1643_v36  ;;  %v8184_v62 = vmul.u32.u64.high %v1644_v18, %v1643_v36, %v8183_v3  ;;  %v8186_v49 = vmul.u32.u64.low %v1644_v18, %v1639_v26  ;;  %v8187_v19 = vmul.u32.u64.high %v1644_v18, %v1639_v26, %v8186_v49 }
 0x1bc   : > { %v1918_v45 = vadd.s32 1, %v6330_v63  ;;  %v8191_v30 = vadd.f32 %v7816_v58, %v537_v31  ;;  %v8196_v47 = vsel %vm591_vm7, %v7724_v27, 920167782  ;;  %6981 = vcosq.f32 %v8095_v5 }
 0x1bd   : > { %v8203_v48 = vsel %vm8146_vm9, %v7602_v60, %v8105_v0  ;;  %v12471_v24 = vcvt.s32.f32 %v8088_v34  ;;  %v1572_v21 = vand.u32 2147483647, %v1571_v59  ;;  %v1464_v20 = vsub.s32 4294967266, %v8174_v42 }
 0x1be   : > { %v1635_v26 = vsel %vm1629_vm12, %v1632_v4, %v1634_v61  ;;  %vm1919_vm0 = vcmp.gt.s32.totalorder %v1918_v45, 0  ;;  %v6323_v43 = vmin.u32 %v1766_v10, %v8152_v40  ;;  %vm1653_vm13 = vc.u32 %v8184_v62, %v8186_v49 }
 0x1bf   : > { %v8207_v56 = vmul.f32 %v12471_v24, %v1260_v44  ;;  %v1915_v0 = vand.u32 8388607, %v12206_v55  ;;  %v1920_v31 = vsel %vm1919_vm0, %v1918_v45, 0  ;;  %6983 = vsinq.f32 %v8095_v5 }
 0x1c0   : > { %v1574_v44 = vcvt.s32.f32 %v1567_v16  ;;  %v1654_v34 = vadd.s32 1, %v8187_v19  ;;  %v1807_v59 = vand.u32 2139095040, %v8191_v30  ;;  %6985 = vcosq.f32 %v8203_v48 }
 0x1c1   : > { %v1264_v32 = vxor.u32 2147483648, %v8207_v56  ;;  %v1651_v36 = vmul.u32 %v1644_v18, %v1635_v26  ;;  %v1922_v10 = vand.u32 31, %v1920_v31  ;;  %v8225_v61 = vadd.s32 127, %v1464_v20 }
 0x1c2   : > { %v8222_v63 = vmul.f32 %v1574_v44, %v1572_v21  ;;  %v1655_v3 = vsel %vm1653_vm13, %v1654_v34, %v8187_v19  ;;  %v1768_v5 = vclz %v6323_v43  ;;  %v1916_v45 = vor.u32 8388608, %v1915_v0 }
 0x1c3   : > { %v1656_v16 = vadd.s32 %v1655_v3, %v1651_v36  ;;  %v1923_v24 = vsub.s32 32, %v1922_v10  ;;  %v1921_v55 = vshrl.u32 %v1920_v31, 5  ;;  %v1925_v52 = vshll.u32 %v12435_v13, %v1922_v10 }
 0x1c4   : > { %v1928_v14 = vshll.u32 %v12437_v29, %v1922_v10  ;;  %v1808_v23 = vshrl.u32 %v1807_v59, 23  ;;  %v1931_v20 = vshll.u32 %v12438_v33, %v1922_v10  ;;  %vm12230_vm12 = vcmp.lt.s32.totalorder %v7677_v39, 0 }
 0x1c5   : > { %v1657_v18 = vadd.s32 536870912, %v1656_v16  ;;  %v1926_v21 = vshrl.u32 %v12437_v29, %v1923_v24  ;;  %v1929_v26 = vshrl.u32 %v12438_v33, %v1923_v24  ;;  %v1932_v19 = vshrl.u32 %v12433_v9, %v1923_v24 }
 0x1c6   : > { %v1934_v43 = vshll.u32 %v12433_v9, %v1922_v10  ;;  %v1935_v0 = vshrl.u32 %v12439_v12, %v1923_v24  ;;  %v1937_v31 = vshll.u32 %v12439_v12, %v1922_v10  ;;  %v1938_v36 = vshrl.u32 %v12441_v25, %v1923_v24 }
 0x1c7   : > { %v8238_v44 = vshrl.u32 %v1657_v18, 30  ;;  %v1927_v34 = vor.u32 %v1926_v21, %v1925_v52  ;;  %v1930_v59 = vor.u32 %v1929_v26, %v1928_v14  ;;  %v6324_v3 = vadd.s32 4294967294, %v1768_v5 }
 0x1c8   : > { %v1933_v4 = vor.u32 %v1932_v19, %v1931_v20  ;;  %v1936_v60 = vor.u32 %v1935_v0, %v1934_v43  ;;  %v1956_v11 = vshll.u32 %v1916_v45, 8  ;;  %v1939_v35 = vor.u32 %v1938_v36, %v1937_v31 }
 0x1c9   : > { %12472 = vst [vmem:[#allocation38_spill] sm:$0xff] %v8238_v44  ;;  %v1659_v41 = vshll.u32 %v8238_v44, 30  ;;  %vm1940_vm2 = vcmp.lt.s32.totalorder %v1921_v55, 1  ;;  %vm1943_vm6 = vcmp.lt.s32.totalorder %v1921_v55, 4  ;;  %v8242_v51 = vpop.eup %6981  ;;  %v1924_v54 = vshrl.u32 %v12435_v13, %v1923_v24 }
 0x1ca   : > { %v1945_v10 = vsel %vm1943_vm6, %v1933_v4, 2102212464  ;;  %v1948_v18 = vsel %vm1940_vm2, %v1927_v34, %v1930_v59  ;;  %v6326_v7 = vadd.s32 4294967169, %v1808_v23  ;;  %vm1942_vm0 = vcmp.lt.s32.totalorder %v1921_v55, 3 }
 0x1cb   : > { %v8245_v52 = vsub.s32 %v1656_v16, %v1659_v41  ;;  %v1949_v14 = vsel %vm1943_vm6, %v1936_v60, 920167782  ;;  %v1952_v5 = vsel %vm1940_vm2, %v1930_v59, %v1933_v4  ;;  %v12473_v21 = vand.u32 2147483647, %v7677_v39 }
 0x1cc   : > { %v12474_v45 = vmov 0  ;;  %vm1941_vm8 = vcmp.lt.s32.totalorder %v1921_v55, 2  ;;  %v1944_v26 = vsel %vm1940_vm2, %v1924_v54, %v1927_v34  ;;  %v1950_v20 = vsel %vm1942_vm0, %v1933_v4, %v1949_v14  ;;  %v8253_v43 = vpop.eup %6983  ;;  %v6629_v54 = vpop.f32.mrf.mxu0 }
 0x1cd   : > { %vm8249_vm13 = vcmp.le.f32.partialorder %v12473_v21, 0.7853982  ;;  %v1953_v19 = vsel %vm1943_vm6, %v1939_v35, 1326507024  ;;  %v1662_v24 = vsub.s32 0, %v8245_v52  ;;  %v1946_v23 = vsel %vm1942_vm0, %v1930_v59, %v1945_v10  ;;  %v8257_v0 = vpop.eup %6985 }
 0x1ce   : > { %v12475_v45 = vsel %vm8249_vm13, 4294967295, %v12474_v45  ;;  %v1951_v41 = vsel %vm1941_vm8, %v1948_v18, %v1950_v20  ;;  %v1954_v16 = vsel %vm1942_vm0, %v1936_v60, %v1953_v19  ;;  %12477 = vst [vmem:[#allocation40_spill] sm:$0xff] %v8257_v0  ;;  %v1466_v31 = vshll.u32 %v8225_v61, 23 }
 0x1cf   : > { %12476 = vst [vmem:[#allocation39_spill] sm:$0xff] %v12475_v45  ;;  %v1955_v36 = vsel %vm1941_vm8, %v1952_v5, %v1954_v16  ;;  %v8261_v21 = vmul.u32.u64.low %v1956_v11, %v1951_v41  ;;  %v8262_v44 = vmul.u32.u64.high %v1956_v11, %v1951_v41, %v8261_v21  ;;  %v1265_v35 = vsel %vm12230_vm12, %v1264_v32, %v8207_v56 }
 0x1d0   : > { %v8268_v4 = vmul.u32.u64.low %v1956_v11, %v1955_v36  ;;  %v8269_v34 = vmul.u32.u64.high %v1956_v11, %v1955_v36, %v8268_v4  ;;  %v12224_v60 = vand.u32 2147483647, %v8191_v30  ;;  %v1444_v59 = vadd.s32 %v7962_v28, %v7970_v17 }
 0x1d1   : > { %v6319_v61 = vmin.u32 %v1662_v24, %v8245_v52  ;;  %v1947_v10 = vsel %vm1941_vm8, %v1944_v26, %v1946_v23  ;;  %v1814_v18 = vadd.s32 1, %v6326_v7  ;;  %v1576_v14 = vxor.u32 2147483648, %v8222_v63 }
 0x1d2   : > { %v1461_v5 = vshll.u32 %v8036_v22, %v8174_v42  ;;  %vm6325_vm2 = vcmp.lt.s32.totalorder %v6324_v3, 0  ;;  %v8280_v56 = vadd.f32 %v7816_v58, %v6629_v54  ;;  %v12478_v32 = vsub.s32 32, %v8174_v42 }
 0x1d3   : > { %v8284_v19 = vor.u32 4788187, %v1466_v31  ;;  %v1966_v28 = vadd.s32 1, %v8262_v44  ;;  %vm1815_vm6 = vcmp.gt.s32.totalorder %v1814_v18, 0  ;;  %v1963_v17 = vmul.u32 %v1956_v11, %v1947_v10 }
 0x1d4   : > { %v1462_v20 = vshrl.u32 %v1444_v59, %v12478_v32  ;;  %vm1965_vm8 = vc.u32 %v8269_v34, %v8261_v21  ;;  %v1811_v7 = vand.u32 8388607, %v12224_v60  ;;  %v1816_v22 = vsel %vm1815_vm6, %v1814_v18, 0 }
 0x1d5   : > { %v8291_v55 = vsel %vm6325_vm2, 0, %v6324_v3  ;;  %v1664_v58 = vclz %v6319_v61  ;;  %v1967_v26 = vsel %vm1965_vm8, %v1966_v28, %v8262_v44  ;;  %v1818_v42 = vand.u32 31, %v1816_v22 }
 0x1d6   : > { %6987 = vsinq.f32 %v8203_v48  ;;  %v8298_v24 = vsel %vm8249_vm13, %v7677_v39, %v1265_v35  ;;  %vm12229_vm0 = vcmp.lt.s32.totalorder %v7739_v46, 0  ;;  %v1968_v11 = vadd.s32 %v1967_v26, %v1963_v17 }
 0x1d7   : > { %v8304_v23 = vsel %vm12229_vm0, %v1576_v14, %v8222_v63  ;;  %v8306_v3 = vor.u32 %v1462_v20, %v1461_v5  ;;  %v1756_v44 = vadd.s32 %v8057_v38, %v8066_v8  ;;  %v1819_v41 = vsub.s32 32, %v1818_v42 }
 0x1d8   : > { %v1776_v16 = vsub.s32 4294967266, %v8291_v55  ;;  %v1969_v31 = vadd.s32 536870912, %v1968_v11  ;;  %v1812_v36 = vor.u32 8388608, %v1811_v7  ;;  %v6320_v54 = vadd.s32 4294967294, %v1664_v58 }
 0x1d9   : > { %v1822_v35 = vshrl.u32 %v12437_v29, %v1819_v41  ;;  %v1825_v4 = vshrl.u32 %v12438_v33, %v1819_v41  ;;  %v2119_v63 = vand.u32 2139095040, %v8280_v56  ;;  %v1821_v61 = vshll.u32 %v12435_v13, %v1818_v42 }
 0x1da   : > { %v8315_v59 = vshrl.u32 %v1969_v31, 30  ;;  %v1824_v38 = vshll.u32 %v12437_v29, %v1818_v42  ;;  %v1828_v8 = vshrl.u32 %v12433_v9, %v1819_v41  ;;  %v1817_v10 = vshrl.u32 %v1816_v22, 5 }
 0x1db   : > { %v1827_v18 = vshll.u32 %v12438_v33, %v1818_v42  ;;  %v1830_v14 = vshll.u32 %v12433_v9, %v1818_v42  ;;  %v1831_v5 = vshrl.u32 %v12439_v12, %v1819_v41  ;;  %v1772_v32 = vsub.s32 32, %v8291_v55 }
 0x1dc   : > { %12479 = vst [vmem:[#allocation41_spill] sm:$0xff] %v8315_v59  ;;  %v1971_v20 = vshll.u32 %v8315_v59, 30  ;;  %v1823_v28 = vor.u32 %v1822_v35, %v1821_v61  ;;  %v1826_v17 = vor.u32 %v1825_v4, %v1824_v38  ;;  %v1833_v26 = vshll.u32 %v12439_v12, %v1818_v42 }
 0x1dd   : > { %v1829_v7 = vor.u32 %v1828_v8, %v1827_v18  ;;  %v1832_v58 = vor.u32 %v1831_v5, %v1830_v14  ;;  %v1834_v31 = vshrl.u32 %v12441_v25, %v1819_v41  ;;  %v8327_v60 = vadd.s32 127, %v1776_v16 }
 0x1de   : > { %v8329_v22 = vsub.s32 %v1968_v11, %v1971_v20  ;;  %v8331_v48 = vshll.u32 %v1812_v36, 8  ;;  %v12231_v0 = vand.u32 2147483647, %v8280_v56  ;;  %vm6321_vm2 = vcmp.lt.s32.totalorder %v6320_v54, 0 }
 0x1df   : > { %v1835_v45 = vor.u32 %v1834_v31, %v1833_v26  ;;  %vm1836_vm6 = vcmp.lt.s32.totalorder %v1817_v10, 1  ;;  %v2120_v59 = vshrl.u32 %v2119_v63, 23  ;;  %vm1838_vm8 = vcmp.lt.s32.totalorder %v1817_v10, 3 }
 0x1e0   : > { %v1974_v35 = vsub.s32 0, %v8329_v22  ;;  %vm1839_vm0 = vcmp.lt.s32.totalorder %v1817_v10, 4  ;;  %v1844_v42 = vsel %vm1836_vm6, %v1823_v28, %v1826_v17  ;;  %v1848_v16 = vsel %vm1836_vm6, %v1826_v17, %v1829_v7 }
 0x1e1   : > { %v1841_v4 = vsel %vm1839_vm0, %v1829_v7, 2102212464  ;;  %v1845_v61 = vsel %vm1839_vm0, %v1832_v58, 920167782  ;;  %v1849_v11 = vsel %vm1839_vm0, %v1835_v45, 1326507024  ;;  %v1820_v38 = vshrl.u32 %v12435_v13, %v1819_v41 }
 0x1e2   : > { %v6331_v36 = vmin.u32 %v1974_v35, %v8329_v22  ;;  %vm1837_vm12 = vcmp.lt.s32.totalorder %v1817_v10, 2  ;;  %v1846_v8 = vsel %vm1838_vm8, %v1829_v7, %v1845_v61  ;;  %v8343_v63 = vsel %vm6321_vm2, 0, %v6320_v54 }
 0x1e3   : > { %v8340_v18 = vpop.eup %6987  ;;  %v1847_v14 = vsel %vm1837_vm12, %v1844_v42, %v1846_v8  ;;  %v1850_v5 = vsel %vm1838_vm8, %v1832_v58, %v1849_v11  ;;  %v6338_v20 = vadd.s32 4294967169, %v2120_v59  ;;  %v1840_v45 = vsel %vm1836_vm6, %v1820_v38, %v1823_v28 }
 0x1e4   : > { %12480 = vst [vmem:[#allocation42_spill] sm:$0xff] %v8340_v18  ;;  %v1976_v26 = vclz %v6331_v36  ;;  %v1842_v31 = vsel %vm1838_vm8, %v1826_v17, %v1841_v4  ;;  %v1851_v41 = vsel %vm1837_vm12, %v1848_v16, %v1850_v5  ;;  %v1470_v42 = vcvt.s32.f32 %v8306_v3 }
 0x1e5   : > { %v8351_v35 = vmul.u32.u64.low %v8331_v48, %v1851_v41  ;;  %v8352_v7 = vmul.u32.u64.high %v8331_v48, %v1851_v41, %v8351_v35  ;;  %v8355_v61 = vmul.u32.u64.low %v8331_v48, %v1847_v14  ;;  %v8356_v54 = vmul.u32.u64.high %v8331_v48, %v1847_v14, %v8355_v61 }
 0x1e6   : > { %v1774_v58 = vshrl.u32 %v1756_v44, %v1772_v32  ;;  %v1672_v59 = vsub.s32 4294967266, %v8343_v63  ;;  %v2126_v11 = vadd.s32 1, %v6338_v20  ;;  %v12481_v28 = vor.u32 %v7733_v37, %v7728_v53  ;;  %v547_v44 = vpop.f32.mrf.mxu0 }
 0x1e7   : > { %6989 = vcosq.f32 %v8298_v24  ;;  %v12482_v4 = vand.u32 2147483647, %v7739_v46  ;;  %v12483_v16 = vmov 0  ;;  %v2123_v3 = vand.u32 8388607, %v12231_v0 }
 0x1e8   : > { %v8366_v17 = vsel %vm591_vm7, %v12481_v28, 1326507024  ;;  %v12486_v32 = vand.u32 2147483647, %v8284_v19  ;;  %v1773_v53 = vshll.u32 %v8152_v40, %v8291_v55  ;;  %v1843_v37 = vsel %vm1837_vm12, %v1840_v45, %v1842_v31  ;;  %v7158_v55 = vld [vmem:[%s12139_s2] ss:$0 sm:$0xff] }
 0x1e9   : > { %vm8371_vm0 = vcmp.le.f32.partialorder %v12482_v4, 0.7853982  ;;  %vm2127_vm2 = vcmp.gt.s32.totalorder %v2126_v11, 0  ;;  %v1778_v8 = vshll.u32 %v8327_v60, 23  ;;  %v6332_v14 = vadd.s32 4294967294, %v1976_v26 }
 0x1ea   : > { %v12484_v16 = vsel %vm8371_vm0, 4294967295, %v12483_v16  ;;  %v8379_v36 = vmul.f32 %v1470_v42, %v12486_v32  ;;  %v8388_v38 = vsel %vm8371_vm0, %v7739_v46, %v8304_v23  ;;  %vm1861_vm6 = vc.u32 %v8352_v7, %v8355_v61 }
 0x1eb   : > { %12485 = vst [vmem:[#allocation43_spill] sm:$0xff] %v12484_v16  ;;  %v8393_v19 = vor.u32 %v1774_v58, %v1773_v53  ;;  %v8395_v5 = vadd.s32 127, %v1672_v59  ;;  %v1862_v40 = vadd.s32 1, %v8356_v54  ;;  %v8401_v10 = vadd.f32 %v7158_v55, %v547_v44 }
 0x1ec   : > { %6991 = vsinq.f32 %v8298_v24  ;;  %v1859_v60 = vmul.u32 %v8331_v48, %v1843_v37  ;;  %v2124_v23 = vor.u32 8388608, %v2123_v3  ;;  %v2128_v20 = vsel %vm2127_vm2, %v2126_v11, 0 }
 0x1ed   : > { %6993 = vcosq.f32 %v8388_v38  ;;  %v1652_v45 = vadd.s32 %v8186_v49, %v8184_v62  ;;  %v1863_v31 = vsel %vm1861_vm6, %v1862_v40, %v8356_v54  ;;  %v8410_v41 = vor.u32 4788187, %v1778_v8 }
 0x1ee   : > { %vm6333_vm12 = vcmp.lt.s32.totalorder %v6332_v14, 0  ;;  %v1864_v35 = vadd.s32 %v1863_v31, %v1859_v60  ;;  %v2130_v42 = vand.u32 31, %v2128_v20  ;;  %v1668_v48 = vsub.s32 32, %v8343_v63 }
 0x1ef   : > { %v1674_v58 = vshll.u32 %v8395_v5, 23  ;;  %v8416_v4 = vshll.u32 %v2124_v23, 8  ;;  %v2015_v62 = vand.u32 2139095040, %v8401_v10  ;;  %v8419_v49 = vsel %vm6333_vm12, 0, %v6332_v14 }
 0x1f0   : > { %v1865_v11 = vadd.s32 536870912, %v1864_v35  ;;  %v2131_v28 = vsub.s32 32, %v2130_v42  ;;  %v2129_v54 = vshrl.u32 %v2128_v20, 5  ;;  %v2133_v3 = vshll.u32 %v12435_v13, %v2130_v42 }
 0x1f1   : > { %v2136_v44 = vshll.u32 %v12437_v29, %v2130_v42  ;;  %v2139_v8 = vshll.u32 %v12438_v33, %v2130_v42  ;;  %v2142_v40 = vshll.u32 %v12433_v9, %v2130_v42  ;;  %v2145_v55 = vshll.u32 %v12439_v12, %v2130_v42 }
 0x1f2   : > { %v8423_v32 = vshrl.u32 %v1865_v11, 30  ;;  %v2134_v53 = vshrl.u32 %v12437_v29, %v2131_v28  ;;  %v2137_v37 = vshrl.u32 %v12438_v33, %v2131_v28  ;;  %v2140_v5 = vshrl.u32 %v12433_v9, %v2131_v28 }
 0x1f3   : > { %v2143_v14 = vshrl.u32 %v12439_v12, %v2131_v28  ;;  %v2146_v31 = vshrl.u32 %v12441_v25, %v2131_v28  ;;  %vm2148_vm8 = vcmp.lt.s32.totalorder %v2129_v54, 1  ;;  %v2016_v24 = vshrl.u32 %v2015_v62, 23 }
 0x1f4   : > { %12487 = vst [vmem:[#allocation44_spill] sm:$0xff] %v8423_v32  ;;  %v1867_v60 = vshll.u32 %v8423_v32, 30  ;;  %v2135_v23 = vor.u32 %v2134_v53, %v2133_v3  ;;  %v2138_v20 = vor.u32 %v2137_v37, %v2136_v44  ;;  %v8434_v11 = vpop.eup %6989  ;;  %v2141_v0 = vor.u32 %v2140_v5, %v2139_v8 }
 0x1f5   : > { %v2144_v26 = vor.u32 %v2143_v14, %v2142_v40  ;;  %v2147_v16 = vor.u32 %v2146_v31, %v2145_v55  ;;  %vm2149_vm2 = vcmp.lt.s32.totalorder %v2129_v54, 2  ;;  %vm2151_vm6 = vcmp.lt.s32.totalorder %v2129_v54, 4 }
 0x1f6   : > { %v8436_v59 = vsub.s32 %v1864_v35, %v1867_v60  ;;  %vm2150_vm12 = vcmp.lt.s32.totalorder %v2129_v54, 3  ;;  %v2153_v46 = vsel %vm2151_vm6, %v2141_v0, 2102212464  ;;  %v2156_v42 = vsel %vm2148_vm8, %v2135_v23, %v2138_v20 }
 0x1f7   : > { %v2157_v32 = vsel %vm2151_vm6, %v2144_v26, 920167782  ;;  %v2132_v44 = vshrl.u32 %v12435_v13, %v2131_v28  ;;  %v2160_v37 = vsel %vm2148_vm8, %v2138_v20, %v2141_v0  ;;  %v2161_v62 = vsel %vm2151_vm6, %v2147_v16, 1326507024 }
 0x1f8   : > { %v1870_v3 = vsub.s32 0, %v8436_v59  ;;  %v2158_v53 = vsel %vm2150_vm12, %v2141_v0, %v2157_v32  ;;  %v6334_v5 = vadd.s32 4294967169, %v2016_v24  ;;  %v12488_v40 = vand.u32 2147483647, %v8401_v10 }
 0x1f9   : > { %v8443_v8 = vpop.eup %6991  ;;  %v2159_v35 = vsel %vm2149_vm2, %v2156_v42, %v2158_v53  ;;  %v2152_v31 = vsel %vm2148_vm8, %v2132_v44, %v2135_v23  ;;  %v2154_v28 = vsel %vm2150_vm12, %v2138_v20, %v2153_v46  ;;  %v2162_v32 = vsel %vm2150_vm12, %v2144_v26, %v2161_v62 }
 0x1fa   : > { %v2019_v14 = vand.u32 8388607, %v12488_v40  ;;  %v8448_v55 = vpop.eup %6993  ;;  %v6327_v60 = vmin.u32 %v1870_v3, %v8436_v59  ;;  %v1980_v0 = vsub.s32 32, %v8419_v49  ;;  %v2163_v18 = vsel %vm2149_vm2, %v2160_v37, %v2162_v32 }
 0x1fb   : > { %v8457_v16 = vmul.u32.u64.low %v8416_v4, %v2159_v35  ;;  %v8458_v24 = vmul.u32.u64.high %v8416_v4, %v2159_v35, %v8457_v16  ;;  %v1670_v42 = vshrl.u32 %v1652_v45, %v1668_v48  ;;  %v1964_v46 = vadd.s32 %v8261_v21, %v8269_v34 }
 0x1fc   : > { %v1872_v53 = vclz %v6327_v60  ;;  %v8462_v40 = vmul.u32.u64.low %v8416_v4, %v2163_v18  ;;  %v8463_v3 = vmul.u32.u64.high %v8416_v4, %v2163_v18, %v8462_v40  ;;  %v2155_v26 = vsel %vm2149_vm2, %v2152_v31, %v2154_v28 }
 0x1fd   : > { %v2022_v20 = vadd.s32 1, %v6334_v5  ;;  %v1669_v44 = vshll.u32 %v8245_v52, %v8343_v63  ;;  %v8471_v37 = vor.u32 4788187, %v1674_v58  ;;  %v1984_v45 = vsub.s32 4294967266, %v8419_v49 }
 0x1fe   : > { %v6328_v48 = vadd.s32 4294967294, %v1872_v53  ;;  %v1982_v35 = vshrl.u32 %v1964_v46, %v1980_v0  ;;  %v2174_v18 = vadd.s32 1, %v8458_v24  ;;  %v2020_v62 = vor.u32 8388608, %v2019_v14 }
 0x1ff   : > { %vm2023_vm8 = vcmp.gt.s32.totalorder %v2022_v20, 0  ;;  %v8475_v60 = vor.u32 %v1670_v42, %v1669_v44  ;;  %v2171_v21 = vmul.u32 %v8416_v4, %v2155_v26  ;;  %vm2173_vm2 = vc.u32 %v8463_v3, %v8457_v16 }
 0x200   : > { %v2024_v34 = vsel %vm2023_vm8, %v2022_v20, 0  ;;  %v1981_v52 = vshll.u32 %v8329_v22, %v8419_v49  ;;  %vm6329_vm6 = vcmp.lt.s32.totalorder %v6328_v48, 0  ;;  %v2175_v63 = vsel %vm2173_vm2, %v2174_v18, %v8458_v24 }
 0x201   : > { %v2026_v58 = vand.u32 31, %v2024_v34  ;;  %v8486_v5 = vadd.s32 %v8355_v61, %v8352_v7  ;;  %v2176_v14 = vadd.s32 %v2175_v63, %v2171_v21  ;;  %v12238_v4 = vand.u32 2147483647, %v7488_v2 }
 0x202   : > { %v8489_v31 = vor.u32 %v1982_v35, %v1981_v52  ;;  %v1985_v28 = vadd.s32 127, %v1984_v45  ;;  %v8491_v0 = vshll.u32 %v2020_v62, 8  ;;  %v8493_v22 = vsel %vm6329_vm6, 0, %v6328_v48 }
 0x203   : > { %v2027_v32 = vsub.s32 32, %v2026_v58  ;;  %v2177_v49 = vadd.s32 536870912, %v2176_v14  ;;  %v2029_v24 = vshll.u32 %v12435_v13, %v2026_v58  ;;  %v2032_v42 = vshll.u32 %v12437_v29, %v2026_v58 }
 0x204   : > { %v2035_v61 = vshll.u32 %v12438_v33, %v2026_v58  ;;  %v2025_v26 = vshrl.u32 %v2024_v34, 5  ;;  %v2038_v20 = vshll.u32 %v12433_v9, %v2026_v58  ;;  %v1986_v45 = vshll.u32 %v1985_v28, 23 }
 0x205   : > { %v2030_v53 = vshrl.u32 %v12437_v29, %v2027_v32  ;;  %v2033_v7 = vshrl.u32 %v12438_v33, %v2027_v32  ;;  %v2036_v40 = vshrl.u32 %v12433_v9, %v2027_v32  ;;  %v8501_v46 = vshrl.u32 %v2177_v49, 30 }
 0x206   : > { %v2039_v44 = vshrl.u32 %v12439_v12, %v2027_v32  ;;  %v8508_v52 = vand.u32 8388607, %v12238_v4  ;;  %v573_v63 = vshll.u32 %v12435_v13, %v7598_v50  ;;  %v1880_v34 = vsub.s32 4294967266, %v8493_v22 }
 0x207   : > { %v2031_v48 = vor.u32 %v2030_v53, %v2029_v24  ;;  %v2034_v35 = vor.u32 %v2033_v7, %v2032_v42  ;;  %v2037_v18 = vor.u32 %v2036_v40, %v2035_v61  ;;  %v2179_v62 = vshll.u32 %v8501_v46, 30 }
 0x208   : > { %v2040_v21 = vor.u32 %v2039_v44, %v2038_v20  ;;  %v2041_v49 = vshll.u32 %v12439_v12, %v2026_v58  ;;  %v2042_v54 = vshrl.u32 %v12441_v25, %v2027_v32  ;;  %v574_v28 = vshrl.u32 %v12437_v29, %v7645_v6 }
 0x209   : > { %v8517_v24 = vsub.s32 %v2176_v14, %v2179_v62  ;;  %vm2044_vm12 = vcmp.lt.s32.totalorder %v2025_v26, 1  ;;  %vm2046_vm8 = vcmp.lt.s32.totalorder %v2025_v26, 3  ;;  %vm2047_vm2 = vcmp.lt.s32.totalorder %v2025_v26, 4 }
 0x20a   : > { %v2043_v42 = vor.u32 %v2042_v54, %v2041_v49  ;;  %v2049_v53 = vsel %vm2047_vm2, %v2037_v18, 2102212464  ;;  %v2052_v7 = vsel %vm2044_vm12, %v2031_v48, %v2034_v35  ;;  %v2053_v61 = vsel %vm2047_vm2, %v2040_v21, 920167782 }
 0x20b   : > { %v2182_v40 = vsub.s32 0, %v8517_v24  ;;  %v2028_v20 = vshrl.u32 %v12435_v13, %v2027_v32  ;;  %vm2045_vm6 = vcmp.lt.s32.totalorder %v2025_v26, 2  ;;  %v2054_v58 = vsel %vm2046_vm8, %v2037_v18, %v2053_v61 }
 0x20c   : > { %v2055_v44 = vsel %vm2045_vm6, %v2052_v7, %v2054_v58  ;;  %v2056_v14 = vsel %vm2044_vm12, %v2034_v35, %v2037_v18  ;;  %v2057_v62 = vsel %vm2047_vm2, %v2043_v42, 1326507024  ;;  %v577_v4 = vshrl.u32 %v12438_v33, %v7645_v6 }
 0x20d   : > { %v6339_v54 = vmin.u32 %v2182_v40, %v8517_v24  ;;  %v2048_v49 = vsel %vm2044_vm12, %v2028_v20, %v2031_v48  ;;  %v2050_v23 = vsel %vm2046_vm8, %v2034_v35, %v2049_v53  ;;  %v2058_v25 = vsel %vm2046_vm8, %v2040_v21, %v2057_v62 }
 0x20e   : > { %v2059_v32 = vsel %vm2045_vm6, %v2056_v14, %v2058_v25  ;;  %v8533_v61 = vmul.u32.u64.low %v8491_v0, %v2055_v44  ;;  %v8534_v12 = vmul.u32.u64.high %v8491_v0, %v2055_v44, %v8533_v61  ;;  %v576_v18 = vshll.u32 %v12437_v29, %v7598_v50 }
 0x20f   : > { %v1881_v42 = vadd.s32 127, %v1880_v34  ;;  %v2184_v7 = vclz %v6339_v54  ;;  %v8540_v40 = vmul.u32.u64.low %v8491_v0, %v2059_v32  ;;  %v8541_v58 = vmul.u32.u64.high %v8491_v0, %v2059_v32, %v8540_v40 }
 0x210   : > { %v8543_v48 = vor.u32 4788187, %v1986_v45  ;;  %v2051_v35 = vsel %vm2045_vm6, %v2048_v49, %v2050_v23  ;;  %v579_v25 = vshll.u32 %v12438_v33, %v7598_v50  ;;  %v580_v21 = vshrl.u32 %v12433_v9, %v7645_v6 }
 0x211   : > { %v6340_v53 = vadd.s32 4294967294, %v2184_v7  ;;  %v572_v20 = vshrl.u32 %v12435_v13, %v7645_v6  ;;  %v575_v34 = vor.u32 %v574_v28, %v573_v63  ;;  %v578_v44 = vor.u32 %v577_v4, %v576_v18 }
 0x212   : > { %v1876_v14 = vsub.s32 32, %v8493_v22  ;;  %v2070_v62 = vadd.s32 1, %v8534_v12  ;;  %v564_v45 = vor.u32 8388608, %v8508_v52  ;;  %v581_v26 = vor.u32 %v580_v21, %v579_v25 }
 0x213   : > { %v1882_v23 = vshll.u32 %v1881_v42, 23  ;;  %vm6341_vm12 = vcmp.lt.s32.totalorder %v6340_v53, 0  ;;  %v2067_v50 = vmul.u32 %v8491_v0, %v2051_v35  ;;  %vm2069_vm8 = vc.u32 %v8541_v58, %v8533_v61 }
 0x214   : > { %vm12242_vm2 = vcmp.lt.s32.totalorder %v7819_v15, 0  ;;  %v1877_v6 = vshll.u32 %v8436_v59, %v8493_v22  ;;  %v8561_v4 = vsel %vm6341_vm12, 0, %v6340_v53  ;;  %v2071_v63 = vsel %vm2069_vm8, %v2070_v62, %v8534_v12 }
 0x215   : > { %vm588_vm6 = vcmp.lt.s32.totalorder %v7662_v57, 1  ;;  %v2192_v52 = vsub.s32 4294967266, %v8561_v4  ;;  %v2072_v28 = vadd.s32 %v2071_v63, %v2067_v50  ;;  %vm590_vm11 = vcmp.lt.s32.totalorder %v7662_v57, 3 }
 0x216   : > { %v596_v0 = vsel %vm588_vm6, %v575_v34, %v578_v44  ;;  %v593_v54 = vsel %vm591_vm7, %v581_v26, 2102212464  ;;  %v598_v59 = vsel %vm590_vm11, %v581_v26, %v8196_v47  ;;  %v600_v12 = vsel %vm588_vm6, %v578_v44, %v581_v26 }
 0x217   : > { %v602_v22 = vsel %vm590_vm11, %v7724_v27, %v8366_v17  ;;  %v1878_v49 = vshrl.u32 %v8486_v5, %v1876_v14  ;;  %v1883_v32 = vor.u32 4788187, %v1882_v23  ;;  %v2073_v18 = vadd.s32 536870912, %v2072_v28 }
 0x218   : > { %vm589_vm12 = vcmp.lt.s32.totalorder %v7662_v57, 2  ;;  %v12489_v42 = vand.u32 2147483647, %v7819_v15  ;;  %v2193_v47 = vadd.s32 127, %v2192_v52  ;;  %v604_v27 = vshll.u32 %v564_v45, 8 }
 0x219   : > { %v599_v40 = vsel %vm589_vm12, %v596_v0, %v598_v59  ;;  %v603_v35 = vsel %vm589_vm12, %v600_v12, %v602_v22  ;;  %v2188_v17 = vsub.s32 32, %v8561_v4  ;;  %v8593_v5 = vshrl.u32 %v2073_v18, 30 }
 0x21a   : > { %vm8584_vm7 = vcmp.le.f32.partialorder %v12489_v42, 0.7853982  ;;  %v592_v25 = vsel %vm588_vm6, %v572_v20, %v575_v34  ;;  %v594_v21 = vsel %vm590_vm11, %v578_v44, %v593_v54  ;;  %vm12244_vm8 = vcmp.lt.s32.totalorder %v7915_v1, 0  ;;  %v12494_v44 = vld [vmem:[#allocation26_spill] sm:$0xff] }
 0x21b   : > { %v8600_v53 = vmul.u32.u64.low %v604_v27, %v603_v35  ;;  %v8601_v14 = vmul.u32.u64.high %v604_v27, %v603_v35, %v8600_v53  ;;  %v8603_v62 = vmul.u32.u64.low %v604_v27, %v599_v40  ;;  %v8604_v26 = vmul.u32.u64.high %v604_v27, %v599_v40, %v8603_v62 }
 0x21c   : > { %v12492_v45 = vand.u32 2147483647, %v8410_v41  ;;  %v12493_v23 = vcvt.s32.f32 %v8393_v19  ;;  %v1678_v63 = vcvt.s32.f32 %v8475_v60  ;;  %v1988_v20 = vand.u32 2147483647, %v8543_v48 }
 0x21d   : > { %v2075_v34 = vshll.u32 %v8593_v5, 30  ;;  %vm12245_vm11 = vcmp.lt.s32.totalorder %v12494_v44, 0  ;;  %v1879_v52 = vor.u32 %v1878_v49, %v1877_v6  ;;  %v2172_v0 = vadd.s32 %v8457_v16, %v8463_v3 }
 0x21e   : > { %v1783_v50 = vmul.f32 %v12493_v23, %v12492_v45  ;;  %v2194_v54 = vshll.u32 %v2193_v47, 23  ;;  %v595_v59 = vsel %vm589_vm12, %v592_v25, %v594_v21  ;;  %v12495_v19 = vxor.u32 2147483648, %v8379_v36  ;;  %v12503_v45 = vld [vmem:[#allocation32_spill] sm:$0xff] }
 0x21f   : > { %v12496_v60 = vand.u32 2147483647, %v7915_v1  ;;  %v12497_v48 = vmov 0  ;;  %v12499_v6 = vand.u32 2147483647, %v8471_v37  ;;  %v1990_v16 = vcvt.s32.f32 %v8489_v31 }
 0x220   : > { %v1473_v41 = vsel %vm12242_vm2, %v12495_v19, %v8379_v36  ;;  %v8633_v3 = vsub.s32 %v2072_v28, %v2075_v34  ;;  %v1884_v57 = vand.u32 2147483647, %v1883_v32  ;;  %v2190_v22 = vshrl.u32 %v2172_v0, %v2188_v17 }
 0x221   : > { %vm8626_vm6 = vcmp.le.f32.partialorder %v12496_v60, 0.7853982  ;;  %v1679_v12 = vmul.f32 %v1678_v63, %v12499_v6  ;;  %vm613_vm12 = vc.u32 %v8601_v14, %v8603_v62  ;;  %v614_v36 = vadd.s32 1, %v8604_v26  ;;  %v12508_v6 = vld [vmem:[#allocation12_spill] sm:$0xff] }
 0x222   : > { %v12498_v48 = vsel %vm8626_vm6, 4294967295, %v12497_v48  ;;  %v1784_v49 = vxor.u32 2147483648, %v1783_v50  ;;  %v12500_v18 = vand.u32 2147483647, %v12494_v44  ;;  %v1991_v37 = vmul.f32 %v1990_v16, %v1988_v20 }
 0x223   : > { %v2078_v47 = vsub.s32 0, %v8633_v3  ;;  %v611_v31 = vmul.u32 %v604_v27, %v595_v59  ;;  %v1886_v28 = vcvt.s32.f32 %v1879_v52  ;;  %v2189_v32 = vshll.u32 %v8517_v24, %v8561_v4 }
 0x224   : > { %vm8640_vm2 = vcmp.le.f32.partialorder %v12500_v18, 0.7853982  ;;  %v2195_v40 = vor.u32 4788187, %v2194_v54  ;;  %v615_v35 = vsel %vm613_vm12, %v614_v36, %v8604_v26  ;;  %v1476_v17 = vsel %vm8584_vm7, %v7819_v15, %v1473_v41  ;;  %v12504_v26 = vld [vmem:[#allocation8_spill] sm:$0xff]  ;;  %v12512_v36 = vld [vmem:[#allocation5_spill] sm:$0xff] }
 0x225   : > { %v1680_v25 = vxor.u32 2147483648, %v1679_v12  ;;  %v6335_v21 = vmin.u32 %v2078_v47, %v8633_v3  ;;  %v616_v53 = vadd.s32 %v615_v35, %v611_v31  ;;  %6995 = vsinq.f32 %v8388_v38 }
 0x226   : > { %v1887_v27 = vmul.f32 %v1886_v28, %v1884_v57  ;;  %v2191_v23 = vor.u32 %v2190_v22, %v2189_v32  ;;  %v1785_v24 = vsel %vm12244_vm8, %v1784_v49, %v1783_v50  ;;  %v746_v20 = vsub.s32 4, %v12504_v26 }
 0x227   : > { %v2080_v4 = vclz %v6335_v21  ;;  %v617_v63 = vadd.s32 536870912, %v616_v53  ;;  %6997 = vcosq.f32 %v1476_v17  ;;  %v12505_v34 = vand.u32 2147483647, %v12503_v45  ;;  %v12515_v21 = vld [vmem:[#allocation7_spill] sm:$0xff] }
 0x228   : > { %v12506_v52 = vmov 0  ;;  %v1992_v0 = vxor.u32 2147483648, %v1991_v37  ;;  %v2196_v38 = vand.u32 2147483647, %v2195_v40  ;;  %6999 = vsinq.f32 %v1476_v17 }
 0x229   : > { %vm8659_vm12 = vcmp.le.f32.partialorder %v12505_v34, 0.7853982  ;;  %v1681_v54 = vsel %vm12245_vm11, %v1680_v25, %v1679_v12  ;;  %v6336_v59 = vadd.s32 4294967294, %v2080_v4  ;;  %v8665_v19 = vshrl.u32 %v617_v63, 30 }
 0x22a   : > { %v12507_v52 = vsel %vm8659_vm12, 4294967295, %v12506_v52  ;;  %v1788_v50 = vsel %vm8626_vm6, %v7915_v1, %v1785_v24  ;;  %v1888_v41 = vxor.u32 2147483648, %v1887_v27  ;;  %v2198_v60 = vcvt.s32.f32 %v2191_v23 }
 0x22b   : > { %v850_v16 = vsub.s32 4, %v12508_v6  ;;  %v12509_v57 = vand.u32 2147483647, %v8191_v30  ;;  %vm6337_vm10 = vcmp.lt.s32.totalorder %v6336_v59, 0  ;;  %v619_v12 = vshll.u32 %v8665_v19, 30 }
 0x22c   : > { %v747_v49 = vsel %vm662_vm4, %v746_v20, %v12504_v26  ;;  %v1684_v18 = vsel %vm8640_vm2, %v12494_v44, %v1681_v54  ;;  %vm12513_vm11 = vcmp.lt.s32.totalorder %v12503_v45, 0  ;;  %v2199_v31 = vmul.f32 %v2198_v60, %v2196_v38 }
 0x22d   : > { %vm8673_vm8 = vcmp.le.f32.partialorder %v12509_v57, 0.7853982  ;;  %v1993_v47 = vsel %vm12513_vm11, %v1992_v0, %v1991_v37  ;;  %v2083_v28 = vsel %vm6337_vm10, 0, %v6336_v59  ;;  %7001 = vcosq.f32 %v1788_v50 }
 0x22e   : > { %vm12248_vm6 = vcmp.lt.s32.totalorder %v8191_v30, 0  ;;  %v2088_v32 = vsub.s32 4294967266, %v2083_v28  ;;  %v8687_v40 = vsub.s32 %v616_v53, %v619_v12  ;;  %7003 = vsinq.f32 %v1788_v50  ;;  %v12522_v50 = vld [vmem:[#allocation10_spill] sm:$0xff] }
 0x22f   : > { %v1889_v35 = vsel %vm12248_vm6, %v1888_v41, %v1887_v27  ;;  %v749_v25 = vsel %vm7657_vm5, 0, %v747_v49  ;;  %vm12516_vm4 = vcmp.lt.s32.totalorder %v12515_v21, 0  ;;  %7005 = vcosq.f32 %v1684_v18 }
 0x230   : > { %v851_v23 = vsel %vm12516_vm4, %v850_v16, %v12508_v6  ;;  %v1996_v37 = vsel %vm8659_vm12, %v12503_v45, %v1993_v47  ;;  %v2089_v24 = vadd.s32 127, %v2088_v32  ;;  %v622_v53 = vsub.s32 0, %v8687_v40 }
 0x231   : > { %7007 = vsinq.f32 %v1684_v18  ;;  %v12517_v4 = vand.u32 2147483647, %v8280_v56  ;;  %v12518_v27 = vmov 0  ;;  %v2200_v63 = vxor.u32 2147483648, %v2199_v31 }
 0x232   : > { %v2084_v26 = vsub.s32 32, %v2083_v28  ;;  %v1892_v20 = vsel %vm8673_vm8, %v8191_v30, %v1889_v35  ;;  %v6279_v34 = vmin.u32 %v622_v53, %v8687_v40  ;;  %v753_v0 = vadd.s32 3, %v749_v25  ;;  %v8716_v60 = vpop.eup %6995  ;;  %v12524_v25 = vld [vmem:[#allocation20_spill] sm:$0xff] }
 0x233   : > { %vm8702_vm10 = vcmp.le.f32.partialorder %v12517_v4, 0.7853982  ;;  %v853_v54 = vsel %vm7942_vm3, 0, %v851_v23  ;;  %7009 = vcosq.f32 %v1996_v37  ;;  %vm12247_vm5 = vcmp.lt.s32.totalorder %v8280_v56, 0 }
 0x234   : > { %v12519_v27 = vsel %vm8702_vm10, 4294967295, %v12518_v27  ;;  %v2068_v59 = vadd.s32 %v8533_v61, %v8541_v58  ;;  %v954_v41 = vsub.s32 4, %v12522_v50  ;;  %7011 = vsinq.f32 %v1996_v37  ;;  %v8721_v18 = vpop.eup %6997  ;;  %v12523_v58 = vld [vmem:[#allocation21_spill] sm:$0xff]  ;;  %v12525_v37 = vld [vmem:[#allocation6_spill] sm:$0xff] }
 0x235   : > { %12520 = vst [vmem:[#allocation26_spill] sm:$0xff] %v12519_v27  ;;  %v2090_v6 = vshll.u32 %v2089_v24, 23  ;;  %v624_v16 = vclz %v6279_v34  ;;  %7013 = vcosq.f32 %v1892_v20  ;;  %v2201_v57 = vsel %vm12247_vm5, %v2200_v63, %v2199_v31  ;;  %v8724_v35 = vpop.eup %6999  ;;  %v12527_v31 = vld [vmem:[#allocation16_spill] sm:$0xff] }
 0x236   : > { %v2086_v12 = vshrl.u32 %v2068_v59, %v2084_v26  ;;  %v857_v49 = vadd.s32 3, %v853_v54  ;;  %7015 = vsinq.f32 %v1892_v20  ;;  %v754_v61 = vand.u32 3, %v753_v0 }
 0x237   : > { %v6280_v47 = vadd.s32 4294967294, %v624_v16  ;;  %v757_v32 = vxor.u32 2147483648, %v12523_v58  ;;  %v2085_v17 = vshll.u32 %v8633_v3, %v2083_v28  ;;  %v760_v23 = vxor.u32 2147483648, %v12524_v25 }
 0x238   : > { %vm12526_vm3 = vcmp.lt.s32.totalorder %v12525_v37, 0  ;;  %v1058_v53 = vsub.s32 4, %v12527_v31  ;;  %v2204_v4 = vsel %vm8702_vm10, %v8280_v56, %v2201_v57  ;;  %v2091_v63 = vor.u32 4788187, %v2090_v6 }
 0x239   : > { %v955_v24 = vsel %vm12526_vm3, %v954_v41, %v12522_v50  ;;  %v12528_v26 = vand.u32 2147483647, %v7488_v2  ;;  %v612_v3 = vadd.s32 %v8603_v62, %v8601_v14  ;;  %vm6281_vm5 = vcmp.lt.s32.totalorder %v6280_v47, 0  ;;  %v12532_v62 = vld [vmem:[#allocation11_spill] sm:$0xff] }
 0x23a   : > { %v2087_v28 = vor.u32 %v2086_v12, %v2085_v17  ;;  %v627_v34 = vsel %vm6281_vm5, 0, %v6280_v47  ;;  %v642_v0 = vsub.s32 4, %v8665_v19  ;;  %v8744_v38 = vand.u32 3, %v857_v49  ;;  %v8749_v6 = vpop.eup %7001 }
 0x23b   : > { %vm8737_vm4 = vcmp.le.f32.partialorder %v12528_v26, 0.7853982  ;;  %v628_v54 = vsub.s32 32, %v627_v34  ;;  %v632_v59 = vsub.s32 4294967266, %v627_v34  ;;  %vm752_vm3 = vweird.f32 %v12512_v36  ;;  %v8755_v57 = vpop.eup %7003 }
 0x23c   : > { %vm756_vm6 = vcmp.eq.s32.totalorder %v754_v61, 0  ;;  %v957_v41 = vsel %vm7776_vm15, 0, %v955_v24  ;;  %7017 = vcosq.f32 %v2204_v4  ;;  %vm759_vm11 = vcmp.eq.s32.totalorder %v754_v61, 2  ;;  %v8758_v26 = vpop.eup %7005 }
 0x23d   : > { %v758_v14 = vsel %vm756_vm6, %v12524_v25, %v757_v32  ;;  %vm12533_vm5 = vcmp.lt.s32.totalorder %v12532_v62, 0  ;;  %v2092_v12 = vand.u32 2147483647, %v2091_v63  ;;  %v629_v49 = vshll.u32 %v8687_v40, %v627_v34  ;;  %v12536_v40 = vld [vmem:[#allocation14_spill] sm:$0xff] }
 0x23e   : > { %v1059_v16 = vsel %vm12533_vm5, %v1058_v53, %v12527_v31  ;;  %v630_v47 = vshrl.u32 %v612_v3, %v628_v54  ;;  %v633_v17 = vadd.s32 127, %v632_v59  ;;  %v2094_v24 = vcvt.s32.f32 %v2087_v28  ;;  %v8764_v9 = vpop.eup %7007  ;;  %v12537_v28 = vld [vmem:[#allocation34_spill] sm:$0xff] }
 0x23f   : > { %vm12534_vm15 = vcmp.lt.s32.totalorder %v7488_v2, 0  ;;  %v761_v32 = vsel %vm759_vm11, %v760_v23, %v12523_v58  ;;  %v961_v25 = vadd.s32 3, %v957_v41  ;;  %v1061_v63 = vsel %vm8052_vm14, 0, %v1059_v16  ;;  %v12538_v54 = vld [vmem:[#allocation30_spill] sm:$0xff] }
 0x240   : > { %v643_v50 = vsel %vm12534_vm15, %v642_v0, %v8665_v19  ;;  %v631_v31 = vor.u32 %v630_v47, %v629_v49  ;;  %v634_v53 = vshll.u32 %v633_v17, 23  ;;  %v1162_v3 = vsub.s32 4, %v12536_v40  ;;  %v8772_v0 = vpop.eup %7009  ;;  %v12545_v17 = vld [vmem:[#allocation9_spill] sm:$0xff] }
 0x241   : > { %7019 = vsinq.f32 %v2204_v4  ;;  %vm755_vm5 = vcmp.lt.s32.totalorder %v754_v61, 2  ;;  %v861_v34 = vxor.u32 2147483648, %v12537_v28  ;;  %v864_v19 = vxor.u32 2147483648, %v12538_v54  ;;  %12539 = vst [vmem:[#allocation32_spill] sm:$0xff] %v8772_v0  ;;  %v8775_v41 = vpop.eup %7011  ;;  %v12551_v0 = vld [vmem:[#allocation18_spill] sm:$0xff] }
 0x242   : > { %v2095_v58 = vmul.f32 %v2094_v24, %v2092_v12  ;;  %v635_v23 = vor.u32 4788187, %v634_v53  ;;  %v762_v59 = vsel %vm755_vm5, %v758_v14, %v761_v32  ;;  %12540 = vst [vmem:[#allocation8_spill] sm:$0xff] %v8775_v41  ;;  %v645_v33 = vsel %vm8737_vm4, 0, %v643_v50  ;;  %v8780_v16 = vpop.eup %7013  ;;  %v12547_v32 = vld [vmem:[#allocation22_spill] sm:$0xff] }
 0x243   : > { %vm860_vm14 = vcmp.eq.s32.totalorder %v8744_v38, 0  ;;  %v962_v4 = vand.u32 3, %v961_v25  ;;  %v1065_v61 = vadd.s32 3, %v1061_v63  ;;  %12541 = vst [vmem:[#allocation12_spill] sm:$0xff] %v8780_v16  ;;  %v12542_v49 = vand.u32 2147483647, %v8401_v10  ;;  %v8792_v53 = vpop.eup %7015 }
 0x244   : > { %v636_v14 = vand.u32 2147483647, %v635_v23  ;;  %v638_v12 = vcvt.s32.f32 %v631_v31  ;;  %vm12546_vm5 = vcmp.lt.s32.totalorder %v12545_v17, 0  ;;  %v1266_v50 = vsub.s32 4, %v12547_v32  ;;  %12548 = vst [vmem:[#allocation5_spill] sm:$0xff] %v8792_v53  ;;  %v12549_v63 = vld [vmem:[#allocation29_spill] sm:$0xff] }
 0x245   : > { %vm8784_vm15 = vcmp.le.f32.partialorder %v12542_v49, 0.7853982  ;;  %v1163_v24 = vsel %vm12546_vm5, %v1162_v3, %v12536_v40  ;;  %v8796_v25 = vsel %vm752_vm3, nan, %v762_v59  ;;  %v965_v29 = vxor.u32 2147483648, %v12549_v63  ;;  %v12550_v49 = vld [vmem:[#allocation23_spill] sm:$0xff]  ;;  %v12562_v59 = vld [vmem:[#allocation37_spill] sm:$0xff] }
 0x246   : > { %v968_v13 = vxor.u32 2147483648, %v12550_v49  ;;  %v1370_v41 = vsub.s32 4, %v12551_v0  ;;  %v2096_v23 = vxor.u32 2147483648, %v2095_v58  ;;  %v639_v31 = vmul.f32 %v638_v12, %v636_v14 }
 0x247   : > { %v862_v40 = vsel %vm860_vm14, %v12538_v54, %v861_v34  ;;  %vm863_vm5 = vcmp.eq.s32.totalorder %v8744_v38, 2  ;;  %v649_v3 = vadd.s32 3, %v645_v33  ;;  %vm856_vm11 = vweird.f32 %v12515_v21 }
 0x248   : > { %v865_v36 = vsel %vm863_vm5, %v864_v19, %v12537_v28  ;;  %vm960_vm3 = vweird.f32 %v12525_v37  ;;  %vm964_vm6 = vcmp.eq.s32.totalorder %v962_v4, 0  ;;  %v1165_v27 = vsel %vm8027_vm1, 0, %v1163_v24  ;;  %v12554_v28 = vld [vmem:[#allocation13_spill] sm:$0xff] }
 0x249   : > { %v640_v16 = vxor.u32 2147483648, %v639_v31  ;;  %vm967_vm10 = vcmp.eq.s32.totalorder %v962_v4, 2  ;;  %v1066_v14 = vand.u32 3, %v1065_v61  ;;  %vm12553_vm12 = vcmp.lt.s32.totalorder %v7677_v39, 0  ;;  %v8819_v53 = vpop.eup %7017 }
 0x24a   : > { %v1267_v34 = vsel %vm12553_vm12, %v1266_v50, %v12547_v32  ;;  %v966_v54 = vsel %vm964_vm6, %v12550_v49, %v965_v29  ;;  %v969_v33 = vsel %vm967_vm10, %v968_v13, %v12549_v63  ;;  %v1069_v12 = vxor.u32 2147483648, %v8253_v43 }
 0x24b   : > { %vm12555_vm14 = vcmp.lt.s32.totalorder %v12554_v28, 0  ;;  %vm12556_vm1 = vcmp.lt.s32.totalorder %v8401_v10, 0  ;;  %vm12557_vm5 = vcmp.lt.s32.totalorder %v7488_v2, 0  ;;  %v1072_v32 = vxor.u32 2147483648, %v8242_v51 }
 0x24c   : > { %v1371_v19 = vsel %vm12555_vm14, %v1370_v41, %v12551_v0  ;;  %v2097_v24 = vsel %vm12556_vm1, %v2096_v23, %v2095_v58  ;;  %v641_v61 = vsel %vm12557_vm5, %v640_v16, %v639_v31  ;;  %v1169_v50 = vadd.s32 3, %v1165_v27  ;;  %v12561_v31 = vld [vmem:[#allocation27_spill] sm:$0xff]  ;;  %v12566_v0 = vld [vmem:[#allocation38_spill] sm:$0xff] }
 0x24d   : > { %v644_v13 = vsel %vm8737_vm4, %v7488_v2, %v641_v61  ;;  %vm12558_vm12 = vcmp.lt.s32.totalorder %v8744_v38, 2  ;;  %vm963_vm10 = vcmp.lt.s32.totalorder %v962_v4, 2  ;;  %v1269_v41 = vsel %vm8249_vm13, 0, %v1267_v34 }
 0x24e   : > { %v866_v29 = vsel %vm12558_vm12, %v862_v40, %v865_v36  ;;  %7021 = vcosq.f32 %v644_v13  ;;  %v970_v63 = vsel %vm963_vm10, %v966_v54, %v969_v33  ;;  %vm1068_vm6 = vcmp.eq.s32.totalorder %v1066_v14, 0  ;;  %v8839_v38 = vpop.eup %7019  ;;  %v12563_v54 = vld [vmem:[#allocation36_spill] sm:$0xff] }
 0x24f   : > { %v1373_v16 = vsel %vm8146_vm9, 0, %v1371_v19  ;;  %v2100_v27 = vsel %vm8784_vm15, %v8401_v10, %v2097_v24  ;;  %7023 = vsinq.f32 %v644_v13  ;;  %v1070_v20 = vsel %vm1068_vm6, %v8242_v51, %v1069_v12  ;;  %v12564_v12 = vld [vmem:[#allocation24_spill] sm:$0xff] }
 0x250   : > { %vm1071_vm4 = vcmp.eq.s32.totalorder %v1066_v14, 2  ;;  %v1170_v49 = vand.u32 3, %v1169_v50  ;;  %v1273_v23 = vadd.s32 3, %v1269_v41  ;;  %v1474_v40 = vsub.s32 4, %v12561_v31 }
 0x251   : > { %v1073_v4 = vsel %vm1071_vm4, %v1072_v32, %v8253_v43  ;;  %v8843_v36 = vand.u32 3, %v649_v3  ;;  %v1173_v34 = vxor.u32 2147483648, %v12562_v59  ;;  %v1176_v33 = vxor.u32 2147483648, %v12563_v54 }
 0x252   : > { %v1377_v19 = vadd.s32 3, %v1373_v16  ;;  %v8849_v24 = vsel %vm856_vm11, nan, %v866_v29  ;;  %v8853_v51 = vsel %vm960_vm3, nan, %v970_v63  ;;  %vm1064_vm9 = vweird.f32 %v12532_v62  ;;  %v12567_v63 = vld [vmem:[#allocation42_spill] sm:$0xff]  ;;  %v12568_v16 = vld [vmem:[#allocation40_spill] sm:$0xff] }
 0x253   : > { %vm1067_vm13 = vcmp.lt.s32.totalorder %v1066_v14, 2  ;;  %7025 = vcosq.f32 %v2100_v27  ;;  %vm1168_vm14 = vweird.f32 %v12545_v17  ;;  %v1277_v3 = vxor.u32 2147483648, %v8443_v8 }
 0x254   : > { %v1074_v43 = vsel %vm1067_vm13, %v1070_v20, %v1073_v4  ;;  %v1578_v61 = vsub.s32 4, %v12564_v12  ;;  %vm1172_vm1 = vcmp.eq.s32.totalorder %v1170_v49, 0  ;;  %vm1175_vm5 = vcmp.eq.s32.totalorder %v1170_v49, 2 }
 0x255   : > { %v1274_v21 = vand.u32 3, %v1273_v23  ;;  %vm12565_vm11 = vcmp.lt.s32.totalorder %v7819_v15, 0  ;;  %vm655_vm3 = vcmp.eq.s32.totalorder %v8843_v36, 2  ;;  %v1174_v32 = vsel %vm1172_vm1, %v12563_v54, %v1173_v34  ;;  %v12573_v54 = vld [vmem:[#allocation33_spill] sm:$0xff] }
 0x256   : > { %v1475_v37 = vsel %vm12565_vm11, %v1474_v40, %v12561_v31  ;;  %v1177_v14 = vsel %vm1175_vm5, %v1176_v33, %v12562_v59  ;;  %v1280_v50 = vxor.u32 2147483648, %v8434_v11  ;;  %v1378_v13 = vand.u32 3, %v1377_v19 }
 0x257   : > { %7027 = vsinq.f32 %v2100_v27  ;;  %vm652_vm12 = vcmp.eq.s32.totalorder %v8843_v36, 0  ;;  %v8869_v29 = vsel %vm1064_vm9, nan, %v1074_v43  ;;  %vm1171_vm10 = vcmp.lt.s32.totalorder %v1170_v49, 2  ;;  %v12569_v27 = vld [vmem:[#allocation17_spill] sm:$0xff] }
 0x258   : > { %v1682_v41 = vsub.s32 4, %v12566_v0  ;;  %v1381_v58 = vxor.u32 2147483648, %v12567_v63  ;;  %v1384_v20 = vxor.u32 2147483648, %v12568_v16  ;;  %v1477_v4 = vsel %vm8584_vm7, 0, %v1475_v37  ;;  %v12574_v37 = vld [vmem:[#allocation44_spill] sm:$0xff] }
 0x259   : > { %vm12570_vm13 = vcmp.lt.s32.totalorder %v12569_v27, 0  ;;  %vm648_vm9 = vweird.f32 %v7488_v2  ;;  %v1178_v62 = vsel %vm1171_vm10, %v1174_v32, %v1177_v14  ;;  %vm1272_vm1 = vweird.f32 %v7677_v39 }
 0x25a   : > { %v1579_v23 = vsel %vm12570_vm13, %v1578_v61, %v12564_v12  ;;  %vm1276_vm5 = vcmp.eq.s32.totalorder %v1274_v21, 0  ;;  %vm1279_vm11 = vcmp.eq.s32.totalorder %v1274_v21, 2  ;;  %vm1380_vm4 = vcmp.eq.s32.totalorder %v1378_v13, 0 }
 0x25b   : > { %v1278_v49 = vsel %vm1276_vm5, %v8434_v11, %v1277_v3  ;;  %v1281_v31 = vsel %vm1279_vm11, %v1280_v50, %v8443_v8  ;;  %vm1383_vm6 = vcmp.eq.s32.totalorder %v1378_v13, 2  ;;  %v1481_v40 = vadd.s32 3, %v1477_v4  ;;  %v7022_v19 = vpop.eup %7021 }
 0x25c   : > { %v1581_v59 = vsel %vm8371_vm0, 0, %v1579_v23  ;;  %vm12572_vm7 = vcmp.lt.s32.totalorder %v12494_v44, 0  ;;  %v1786_v33 = vsub.s32 4, %v12573_v54  ;;  %vm1275_vm10 = vcmp.lt.s32.totalorder %v1274_v21, 2  ;;  %v7024_v43 = vpop.eup %7023 }
 0x25d   : > { %v1683_v34 = vsel %vm12572_vm7, %v1682_v41, %v12566_v0  ;;  %vm1376_vm13 = vweird.f32 %v12554_v28  ;;  %v1382_v11 = vsel %vm1380_vm4, %v12568_v16, %v1381_v58  ;;  %v1385_v8 = vsel %vm1383_vm6, %v1384_v20, %v12567_v63 }
 0x25e   : > { %v656_v3 = vxor.u32 2147483648, %v7022_v19  ;;  %v8895_v12 = vsel %vm1168_vm14, nan, %v1178_v62  ;;  %v1282_v61 = vsel %vm1275_vm10, %v1278_v49, %v1281_v31  ;;  %v1890_v32 = vsub.s32 4, %v12574_v37  ;;  %v12578_v49 = vld [vmem:[#allocation41_spill] sm:$0xff] }
 0x25f   : > { %v653_v14 = vxor.u32 2147483648, %v7024_v43  ;;  %vm1379_vm0 = vcmp.lt.s32.totalorder %v1378_v13, 2  ;;  %v1585_v50 = vadd.s32 3, %v1581_v59  ;;  %v1685_v21 = vsel %vm8640_vm2, 0, %v1683_v34 }
 0x260   : > { %v657_v0 = vsel %vm655_vm3, %v656_v3, %v7024_v43  ;;  %v1386_v41 = vsel %vm1379_vm0, %v1382_v11, %v1385_v8  ;;  %v1482_v63 = vand.u32 3, %v1481_v40  ;;  %vm12575_vm6 = vcmp.lt.s32.totalorder %v7915_v1, 0  ;;  %v8911_v20 = vpop.eup %7025 }
 0x261   : > { %v1787_v17 = vsel %vm12575_vm6, %v1786_v33, %v12573_v54  ;;  %v654_v58 = vsel %vm652_vm12, %v7022_v19, %v653_v14  ;;  %v1283_v16 = vsel %vm1272_vm1, nan, %v1282_v61  ;;  %v1485_v13 = vxor.u32 2147483648, %v8724_v35 }
 0x262   : > { %v1488_v42 = vxor.u32 2147483648, %v8721_v18  ;;  %vm12576_vm2 = vcmp.lt.s32.totalorder %v8843_v36, 2  ;;  %v1689_v23 = vadd.s32 3, %v1685_v21  ;;  %vm12577_vm14 = vcmp.lt.s32.totalorder %v8191_v30, 0 }
 0x263   : > { %v658_v4 = vsel %vm12576_vm2, %v654_v58, %v657_v0  ;;  %v1891_v62 = vsel %vm12577_vm14, %v1890_v32, %v12574_v37  ;;  %v1994_v31 = vsub.s32 4, %v12578_v49  ;;  %v8923_v40 = vsel %vm1376_vm13, nan, %v1386_v41  ;;  %v12590_v41 = vld [vmem:[#allocation5_spill] sm:$0xff] }
 0x264   : > { %v659_v39 = vsel %vm648_vm9, nan, %v658_v4  ;;  %v1586_v7 = vand.u32 3, %v1585_v50  ;;  %vm12579_vm3 = vnez %v12498_v48  ;;  %vm12580_vm12 = vcmask 261120   ;;  %v8931_v2 = vpop.eup %7027 }
 0x265   : > { %v1789_v59 = vsel %vm12579_vm3, 0, %v1787_v17  ;;  %6638 = vmatprep.mubr.msk.f32.mxu1 %vm12580_vm12, %v659_v39  ;;  %vm1480_vm4 = vweird.f32 %v7819_v15  ;;  %vm1484_vm1 = vcmp.eq.s32.totalorder %v1482_v63, 0  ;;  %vm1487_vm5 = vcmp.eq.s32.totalorder %v1482_v63, 2  ;;  %vm12581_vm9 = vmmov %vm12580_vm12  ;;  %v12598_v39 = vld [vmem:[#allocation32_spill] sm:$0xff] }
 0x266   : > { %v1589_v36 = vxor.u32 2147483648, %v8716_v60  ;;  %v1592_v34 = vxor.u32 2147483648, %v8448_v55  ;;  %6639 = vmatmul.mubr.msk.f32.vlgmr.msra.gmra.mxu1 %vm12581_vm9, %v8796_v25  ;;  %v1486_v28 = vsel %vm1484_vm1, %v8721_v18, %v1485_v13  ;;  %v1489_v48 = vsel %vm1487_vm5, %v1488_v42, %v8724_v35  ;;  %vm12582_vm11 = vmmov %vm12581_vm9 }
 0x267   : > { %v1693_v54 = vxor.u32 2147483648, %v8764_v9  ;;  %v1893_v33 = vsel %vm8673_vm8, 0, %v1891_v62  ;;  %6641 = vmatprep.mubr.msk.f32.mxu1 %vm12582_vm11, %v8849_v24  ;;  %v1690_v19 = vand.u32 3, %v1689_v23  ;;  %v1793_v11 = vadd.s32 3, %v1789_v59  ;;  %vm12584_vm6 = vmmov %vm12581_vm9 }
 0x268   : > { %vm12583_vm7 = vcmp.lt.s32.totalorder %v12503_v45, 0  ;;  %v2098_v25 = vsub.s32 4, %v8593_v5  ;;  %vm1483_vm10 = vcmp.lt.s32.totalorder %v1482_v63, 2  ;;  %vm1587_vm13 = vcmp.lt.s32.totalorder %v1586_v7, 2  ;;  %vm12587_vm12 = vmmov %vm12584_vm6  ;;  %v12591_v63 = vld [vmem:[#allocation12_spill] sm:$0xff] }
 0x269   : > { %v1995_v8 = vsel %vm12583_vm7, %v1994_v31, %v12578_v49  ;;  %v1696_v18 = vxor.u32 2147483648, %v8758_v26  ;;  %v2202_v35 = vsub.s32 4, %v8501_v46  ;;  %v1490_v43 = vsel %vm1483_vm10, %v1486_v28, %v1489_v48  ;;  %vm12589_vm7 = vmmov %vm12584_vm6 }
 0x26a   : > { %vm1588_vm0 = vcmp.eq.s32.totalorder %v1586_v7, 0  ;;  %vm1591_vm8 = vcmp.eq.s32.totalorder %v1586_v7, 2  ;;  %v1897_v22 = vadd.s32 3, %v1893_v33  ;;  %6642 = vmatmul.mubr.msk.f32.gmra.mxu1 %vm12584_vm6, %v8853_v51  ;;  %vm1584_vm2 = vweird.f32 %v12569_v27 }
 0x26b   : > { %v1590_v24 = vsel %vm1588_vm0, %v8448_v55, %v1589_v36  ;;  %v1593_v3 = vsel %vm1591_vm8, %v1592_v34, %v8716_v60  ;;  %vm12585_vm14 = vnez %v12507_v52  ;;  %vm12586_vm3 = vcmp.lt.s32.totalorder %v8401_v10, 0  ;;  %6644 = vmatprep.mubr.msk.f32.mxu1 %vm12587_vm12, %v8869_v29 }
 0x26c   : > { %v1997_v61 = vsel %vm12585_vm14, 0, %v1995_v8  ;;  %v2099_v37 = vsel %vm12586_vm3, %v2098_v25, %v8593_v5  ;;  %vm1688_vm1 = vweird.f32 %v12494_v44  ;;  %vm1692_vm5 = vcmp.eq.s32.totalorder %v1690_v19, 0  ;;  %vm12595_vm14 = vmmov %vm12589_vm7 }
 0x26d   : > { %v1794_v51 = vand.u32 3, %v1793_v11  ;;  %v1797_v32 = vxor.u32 2147483648, %v8755_v57  ;;  %v1800_v55 = vxor.u32 2147483648, %v8749_v6  ;;  %v1694_v60 = vsel %vm1692_vm5, %v8758_v26, %v1693_v54  ;;  %vm12596_vm3 = vmmov %vm12589_vm7 }
 0x26e   : > { %vm1695_vm9 = vcmp.eq.s32.totalorder %v1690_v19, 2  ;;  %v2101_v52 = vsel %vm8784_vm15, 0, %v2099_v37  ;;  %vm12588_vm11 = vcmp.lt.s32.totalorder %v8280_v56, 0  ;;  %v1898_v14 = vand.u32 3, %v1897_v22  ;;  %6645 = vmatmul.mubr.msk.f32.gmra.mxu1 %vm12589_vm7, %v8895_v12  ;;  %vm12592_vm15 = vmmov %vm12584_vm6 }
 0x26f   : > { %v2203_v5 = vsel %vm12588_vm11, %v2202_v35, %v8501_v46  ;;  %v1697_v29 = vsel %vm1695_vm9, %v1696_v18, %v8764_v9  ;;  %v2001_v50 = vadd.s32 3, %v1997_v61  ;;  %v2105_v21 = vadd.s32 3, %v2101_v52  ;;  %6647 = vmatprep.mubr.msk.f32.mxu1 %vm12592_vm15, %v1283_v16  ;;  %v12593_v9 = vld [vmem:[#allocation26_spill] sm:$0xff] }
 0x270   : > { %v1491_v0 = vsel %vm1480_vm4, nan, %v1490_v43  ;;  %v1594_v26 = vsel %vm1587_vm13, %v1590_v24, %v1593_v3  ;;  %v1901_v47 = vxor.u32 2147483648, %v12590_v41  ;;  %v1904_v17 = vxor.u32 2147483648, %v12591_v63 }
 0x271   : > { %vm1691_vm10 = vcmp.lt.s32.totalorder %v1690_v19, 2  ;;  %vm1796_vm0 = vcmp.eq.s32.totalorder %v1794_v51, 0  ;;  %vm1799_vm8 = vcmp.eq.s32.totalorder %v1794_v51, 2  ;;  %vm12594_vm6 = vnez %v12593_v9 }
 0x272   : > { %v2205_v46 = vsel %vm12594_vm6, 0, %v2203_v5  ;;  %v1698_v58 = vsel %vm1691_vm10, %v1694_v60, %v1697_v29  ;;  %v1798_v12 = vsel %vm1796_vm0, %v8749_v6, %v1797_v32  ;;  %v1801_v15 = vsel %vm1799_vm8, %v1800_v55, %v8755_v57  ;;  %6648 = vmatmul.mubr.msk.f32.gmra.mxu1 %vm12595_vm14, %v8923_v40  ;;  %v12597_v57 = vld [vmem:[#allocation8_spill] sm:$0xff]  ;;  %vm12599_vm10 = vmmov %vm12596_vm3 }
 0x273   : > { %v2109_v13 = vxor.u32 2147483648, %v8931_v2  ;;  %vm1900_vm4 = vcmp.eq.s32.totalorder %v1898_v14, 0  ;;  %vm1903_vm13 = vcmp.eq.s32.totalorder %v1898_v14, 2  ;;  %v2002_v42 = vand.u32 3, %v2001_v50  ;;  %6650 = vmatprep.mubr.msk.f32.mxu1 %vm12596_vm3, %v1491_v0 }
 0x274   : > { %v2106_v4 = vand.u32 3, %v2105_v21  ;;  %v1902_v16 = vsel %vm1900_vm4, %v12591_v63, %v1901_v47  ;;  %v1905_v23 = vsel %vm1903_vm13, %v1904_v17, %v12590_v41  ;;  %v2112_v62 = vxor.u32 2147483648, %v8911_v20 }
 0x275   : > { %v2209_v49 = vadd.s32 3, %v2205_v46  ;;  %v1595_v6 = vsel %vm1584_vm2, nan, %v1594_v26  ;;  %vm1795_vm12 = vcmp.lt.s32.totalorder %v1794_v51, 2  ;;  %v2005_v31 = vxor.u32 2147483648, %v12597_v57  ;;  %vm12600_vm2 = vmmov %vm12596_vm3 }
 0x276   : > { %v2008_v7 = vxor.u32 2147483648, %v12598_v39  ;;  %v1699_v40 = vsel %vm1688_vm1, nan, %v1698_v58  ;;  %v1802_v59 = vsel %vm1795_vm12, %v1798_v12, %v1801_v15  ;;  %vm1896_vm5 = vweird.f32 %v8191_v30  ;;  %6651 = vmatmul.mubr.msk.f32.gmra.mxu1 %vm12599_vm10, %v1595_v6  ;;  %vm12601_vm4 = vmmov %vm12600_vm2 }
 0x277   : > { %vm1899_vm9 = vcmp.lt.s32.totalorder %v1898_v14, 2  ;;  %vm2004_vm11 = vcmp.eq.s32.totalorder %v2002_v42, 0  ;;  %vm2108_vm7 = vcmp.eq.s32.totalorder %v2106_v4, 0  ;;  %vm2111_vm15 = vcmp.eq.s32.totalorder %v2106_v4, 2  ;;  %6653 = vmatprep.mubr.msk.f32.mxu1 %vm12600_vm2, %v1699_v40  ;;  %vm12602_vm3 = vmmov %vm12600_vm2 }
 0x278   : > { %v1906_v36 = vsel %vm1899_vm9, %v1902_v16, %v1905_v23  ;;  %vm2007_vm0 = vcmp.eq.s32.totalorder %v2002_v42, 2  ;;  %v2110_v27 = vsel %vm2108_vm7, %v8911_v20, %v2109_v13  ;;  %v2113_v34 = vsel %vm2111_vm15, %v2112_v62, %v8931_v2  ;;  %vm12604_vm7 = vmmov %vm12600_vm2 }
 0x279   : > { %v2210_v28 = vand.u32 3, %v2209_v49  ;;  %v2006_v44 = vsel %vm2004_vm11, %v12598_v39, %v2005_v31  ;;  %v2009_v48 = vsel %vm2007_vm0, %v2008_v7, %v12597_v57  ;;  %v2213_v54 = vxor.u32 2147483648, %v8839_v38  ;;  %vm12603_vm11 = vmmov %vm12600_vm2 }
 0x27a   : > { %v2216_v33 = vxor.u32 2147483648, %v8819_v53  ;;  %vm1792_vm1 = vweird.f32 %v7915_v1  ;;  %v1907_v19 = vsel %vm1896_vm5, nan, %v1906_v36  ;;  %vm2107_vm8 = vcmp.lt.s32.totalorder %v2106_v4, 2  ;;  %vm12605_vm10 = vmmov %vm12600_vm2 }
 0x27b   : > { %v1803_v20 = vsel %vm1792_vm1, nan, %v1802_v59  ;;  %vm2003_vm6 = vcmp.lt.s32.totalorder %v2002_v42, 2  ;;  %v2114_v2 = vsel %vm2107_vm8, %v2110_v27, %v2113_v34  ;;  %vm2212_vm13 = vcmp.eq.s32.totalorder %v2210_v28, 0 }
 0x27c   : > { %6654 = vmatmul.mubr.msk.f32.gmra.mxu1 %vm12601_vm4, %v1803_v20  ;;  %v2010_v11 = vsel %vm2003_vm6, %v2006_v44, %v2009_v48  ;;  %vm2215_vm14 = vcmp.eq.s32.totalorder %v2210_v28, 2  ;;  %vm2104_vm12 = vweird.f32 %v8401_v10  ;;  %v2214_v8 = vsel %vm2212_vm13, %v8819_v53, %v2213_v54  ;;  %v9020_v10 = vld [vmem:[%s12141_s4] ss:$0 sm:$0xff] }
 0x27d   : > { %6656 = vmatprep.mubr.msk.f32.mxu1 %vm12602_vm3, %v1907_v19  ;;  %v2217_v1 = vsel %vm2215_vm14, %v2216_v33, %v8839_v38  ;;  %vm2000_vm9 = vweird.f32 %v12503_v45  ;;  %v2115_v30 = vsel %vm2104_vm12, nan, %v2114_v2  ;;  %vm2211_vm5 = vcmp.lt.s32.totalorder %v2210_v28, 2 }
 0x27e   : > { %v2011_v25 = vsel %vm2000_vm9, nan, %v2010_v11  ;;  %v2218_v18 = vsel %vm2211_vm5, %v2214_v8, %v2217_v1  ;;  %vm2208_vm15 = vweird.f32 %v8280_v56  ;;  %v12607_v12 = vmov 683565275  }
 0x27f   : > { %v2219_v35 = vsel %vm2208_vm15, nan, %v2218_v18  ;;  %v12608_v13 = vmov 2475754826   ;;  %v12609_v4 = vmov 2131351028  }
 0x280   : > { %6657 = vmatmul.mubr.msk.f32.gmra.mxu1 %vm12603_vm11, %v2011_v25  ;;  %v12610_v23 = vmov 2102212464   ;;  %v12611_v49 = vmov 920167782   ;;  %v12612_v59 = vmov 1326507024  }
 0x281   : > { %6659 = vmatprep.mubr.msk.f32.mxu1 %vm12604_vm7, %v2115_v30 }
 0x284   : > { %6660 = vmatmul.mubr.msk.f32.gmra.mxu1 %vm12605_vm10, %v2219_v35 }
 0x326   : > { %v6640_v53 = vpop.f32.mrf.mxu1 }
 0x327   : > { %v9023_v45 = vadd.f32 %v6640_v53, %v9020_v10 }
 0x328   : > { %v2346_v38 = vpop.f32.mrf.mxu1 }
 0x329   : > { %v2529_v43 = vand.u32 2147483647, %v9023_v45  ;;  %v2532_v22 = vand.u32 2139095040, %v9023_v45  ;;  %v9028_v24 = vadd.f32 %v9020_v10, %v2346_v38 }
 0x32a   : > { %v6643_v56 = vpop.f32.mrf.mxu1 }
 0x32b   : > { %v2533_v3 = vshrl.u32 %v2532_v22, 23  ;;  %v2536_v61 = vand.u32 8388607, %v2529_v43  ;;  %v2425_v37 = vand.u32 2147483647, %v9028_v24  ;;  %v2428_v51 = vand.u32 2139095040, %v9028_v24 }
 0x32c   : > { %v9035_v32 = vadd.f32 %v6643_v56, %v9020_v10 }
 0x32d   : > { %v6363_v55 = vadd.s32 4294967169, %v2533_v3  ;;  %v2429_v60 = vshrl.u32 %v2428_v51, 23  ;;  %v2432_v52 = vand.u32 8388607, %v2425_v37  ;;  %v2537_v29 = vor.u32 8388608, %v2536_v61 }
 0x32e   : > { %12606 = vst [vmem:[#allocation15_spill] sm:$0xff] %v9035_v32  ;;  %v2740_v21 = vand.u32 2139095040, %v9035_v32  ;;  %v2737_v9 = vand.u32 2147483647, %v9035_v32 }
 0x32f   : > { %v2539_v5 = vadd.s32 1, %v6363_v55  ;;  %v6359_v14 = vadd.s32 4294967169, %v2429_v60  ;;  %v2433_v50 = vor.u32 8388608, %v2432_v52  ;;  %v9040_v63 = vshll.u32 %v2537_v29, 8 }
 0x330   : > { %v2741_v46 = vshrl.u32 %v2740_v21, 23 }
 0x331   : > { %vm2540_vm0 = vcmp.gt.s32.totalorder %v2539_v5, 0  ;;  %v2435_v26 = vadd.s32 1, %v6359_v14  ;;  %v9042_v17 = vshll.u32 %v2433_v50, 8 }
 0x332   : > { %v2541_v0 = vsel %vm2540_vm0, %v2539_v5, 0  ;;  %v6371_v38 = vadd.s32 4294967169, %v2741_v46 }
 0x333   : > { %v2542_v41 = vshrl.u32 %v2541_v0, 5  ;;  %v2543_v47 = vand.u32 31, %v2541_v0  ;;  %vm2436_vm2 = vcmp.gt.s32.totalorder %v2435_v26, 0 }
 0x334   : > { %v2437_v44 = vsel %vm2436_vm2, %v2435_v26, 0 }
 0x335   : > { %v2544_v58 = vsub.s32 32, %v2543_v47  ;;  %v2546_v15 = vshll.u32 %v12607_v12, %v2543_v47  ;;  %v2549_v42 = vshll.u32 %v12608_v13, %v2543_v47  ;;  %v2552_v16 = vshll.u32 %v12609_v4, %v2543_v47 }
 0x336   : > { %v2555_v62 = vshll.u32 %v12610_v23, %v2543_v47  ;;  %v2558_v6 = vshll.u32 %v12611_v49, %v2543_v47  ;;  %vm2561_vm1 = vcmp.lt.s32.totalorder %v2542_v41, 1  ;;  %vm2562_vm8 = vcmp.lt.s32.totalorder %v2542_v41, 2 }
 0x337   : > { %v2547_v57 = vshrl.u32 %v12608_v13, %v2544_v58  ;;  %v2550_v31 = vshrl.u32 %v12609_v4, %v2544_v58  ;;  %v2553_v39 = vshrl.u32 %v12610_v23, %v2544_v58  ;;  %v2545_v7 = vshrl.u32 %v12607_v12, %v2544_v58 }
 0x338   : > { %v2556_v40 = vshrl.u32 %v12611_v49, %v2544_v58  ;;  %v2559_v36 = vshrl.u32 %v12612_v59, %v2544_v58  ;;  %vm2563_vm6 = vcmp.lt.s32.totalorder %v2542_v41, 3  ;;  %vm2564_vm4 = vcmp.lt.s32.totalorder %v2542_v41, 4 }
 0x339   : > { %v2548_v27 = vor.u32 %v2547_v57, %v2546_v15  ;;  %v2551_v34 = vor.u32 %v2550_v31, %v2549_v42  ;;  %v2554_v28 = vor.u32 %v2553_v39, %v2552_v16  ;;  %v2439_v33 = vand.u32 31, %v2437_v44 }
 0x33a   : > { %v2557_v48 = vor.u32 %v2556_v40, %v2555_v62  ;;  %v2560_v54 = vor.u32 %v2559_v36, %v2558_v6  ;;  %v2438_v3 = vshrl.u32 %v2437_v44, 5  ;;  %v2747_v44 = vadd.s32 1, %v6371_v38 }
 0x33b   : > { %v2565_v19 = vsel %vm2561_vm1, %v2545_v7, %v2548_v27  ;;  %v2566_v20 = vsel %vm2564_vm4, %v2554_v28, 2102212464  ;;  %v2569_v2 = vsel %vm2561_vm1, %v2548_v27, %v2551_v34  ;;  %v2573_v11 = vsel %vm2561_vm1, %v2551_v34, %v2554_v28 }
 0x33c   : > { %v2567_v8 = vsel %vm2563_vm6, %v2551_v34, %v2566_v20  ;;  %v2570_v1 = vsel %vm2564_vm4, %v2557_v48, 920167782  ;;  %v2574_v30 = vsel %vm2564_vm4, %v2560_v54, 1326507024  ;;  %v2440_v25 = vsub.s32 32, %v2439_v33  ;;  %v2356_v20 = vpop.f32.mrf.mxu1 }
 0x33d   : > { %v2568_v18 = vsel %vm2562_vm8, %v2565_v19, %v2567_v8  ;;  %v2571_v35 = vsel %vm2563_vm6, %v2554_v28, %v2570_v1  ;;  %v2575_v53 = vsel %vm2563_vm6, %v2557_v48, %v2574_v30  ;;  %v2442_v61 = vshll.u32 %v12607_v12, %v2439_v33 }
 0x33e   : > { %v2572_v22 = vsel %vm2562_vm8, %v2569_v2, %v2571_v35  ;;  %v2576_v56 = vsel %vm2562_vm8, %v2573_v11, %v2575_v53  ;;  %v2584_v5 = vmul.u32 %v9040_v63, %v2568_v18  ;;  %v2443_v29 = vshrl.u32 %v12608_v13, %v2440_v25 }
 0x33f   : > { %v9068_v51 = vmul.u32.u64.low %v9040_v63, %v2576_v56  ;;  %v9069_v55 = vmul.u32.u64.high %v9040_v63, %v2576_v56, %v9068_v51  ;;  %v9072_v60 = vmul.u32.u64.low %v9040_v63, %v2572_v22  ;;  %v9073_v52 = vmul.u32.u64.high %v9040_v63, %v2572_v22, %v9072_v60 }
 0x340   : > { %v2445_v14 = vshll.u32 %v12608_v13, %v2439_v33  ;;  %v2446_v50 = vshrl.u32 %v12609_v4, %v2440_v25  ;;  %v2448_v21 = vshll.u32 %v12609_v4, %v2439_v33  ;;  %v2449_v0 = vshrl.u32 %v12610_v23, %v2440_v25 }
 0x341   : > { %v2451_v26 = vshll.u32 %v12610_v23, %v2439_v33  ;;  %v2452_v41 = vshrl.u32 %v12611_v49, %v2440_v25  ;;  %v2444_v47 = vor.u32 %v2443_v29, %v2442_v61  ;;  %v2454_v58 = vshll.u32 %v12611_v49, %v2439_v33 }
 0x342   : > { %v2447_v46 = vor.u32 %v2446_v50, %v2445_v14  ;;  %v2455_v63 = vshrl.u32 %v12612_v59, %v2440_v25  ;;  %vm2586_vm13 = vc.u32 %v9069_v55, %v9072_v60  ;;  %v2587_v15 = vadd.s32 1, %v9073_v52 }
 0x343   : > { %v2441_v42 = vshrl.u32 %v12607_v12, %v2440_v25  ;;  %v2450_v16 = vor.u32 %v2449_v0, %v2448_v21  ;;  %v2453_v62 = vor.u32 %v2452_v41, %v2451_v26  ;;  %vm2457_vm14 = vcmp.lt.s32.totalorder %v2438_v3, 1 }
 0x344   : > { %v2456_v6 = vor.u32 %v2455_v63, %v2454_v58  ;;  %vm2458_vm3 = vcmp.lt.s32.totalorder %v2438_v3, 2  ;;  %v2588_v57 = vsel %vm2586_vm13, %v2587_v15, %v9073_v52  ;;  %vm2459_vm12 = vcmp.lt.s32.totalorder %v2438_v3, 3 }
 0x345   : > { %vm2460_vm9 = vcmp.lt.s32.totalorder %v2438_v3, 4  ;;  %v2465_v31 = vsel %vm2457_vm14, %v2444_v47, %v2447_v46  ;;  %v2589_v39 = vadd.s32 %v2588_v57, %v2584_v5  ;;  %v2469_v36 = vsel %vm2457_vm14, %v2447_v46, %v2450_v16 }
 0x346   : > { %v2462_v7 = vsel %vm2460_vm9, %v2450_v16, 2102212464  ;;  %v2466_v40 = vsel %vm2460_vm9, %v2453_v62, 920167782  ;;  %v2461_v27 = vsel %vm2457_vm14, %v2441_v42, %v2444_v47  ;;  %v2470_v28 = vsel %vm2460_vm9, %v2456_v6, 1326507024 }
 0x347   : > { %v2467_v34 = vsel %vm2459_vm12, %v2450_v16, %v2466_v40  ;;  %v2590_v48 = vadd.s32 536870912, %v2589_v39  ;;  %v2463_v54 = vsel %vm2459_vm12, %v2447_v46, %v2462_v7  ;;  %v2471_v19 = vsel %vm2459_vm12, %v2453_v62, %v2470_v28 }
 0x348   : > { %v2468_v33 = vsel %vm2458_vm3, %v2465_v31, %v2467_v34  ;;  %v2472_v2 = vsel %vm2458_vm3, %v2469_v36, %v2471_v19  ;;  %vm2748_vm5 = vcmp.gt.s32.totalorder %v2747_v44, 0  ;;  %v2464_v18 = vsel %vm2458_vm3, %v2461_v27, %v2463_v54 }
 0x349   : > { %v9094_v11 = vmul.u32.u64.low %v9042_v17, %v2468_v33  ;;  %v9095_v8 = vmul.u32.u64.high %v9042_v17, %v2468_v33, %v9094_v11  ;;  %v9098_v1 = vshrl.u32 %v2590_v48, 30  ;;  %v2744_v35 = vand.u32 8388607, %v2737_v9 }
 0x34a   : > { %v9101_v30 = vmul.u32.u64.low %v9042_v17, %v2472_v2  ;;  %v9102_v25 = vmul.u32.u64.high %v9042_v17, %v2472_v2, %v9101_v30  ;;  %v2749_v53 = vsel %vm2748_vm5, %v2747_v44, 0  ;;  %v9108_v38 = vadd.f32 %v9020_v10, %v2356_v20 }
 0x34b   : > { %v2592_v22 = vshll.u32 %v9098_v1, 30  ;;  %v2751_v56 = vand.u32 31, %v2749_v53  ;;  %v2483_v61 = vadd.s32 1, %v9095_v8  ;;  %v2480_v52 = vmul.u32 %v9042_v17, %v2464_v18 }
 0x34c   : > { %vm2482_vm11 = vc.u32 %v9102_v25, %v9094_v11  ;;  %v2745_v5 = vor.u32 8388608, %v2744_v35  ;;  %v2633_v14 = vand.u32 2147483647, %v9108_v38  ;;  %v9120_v0 = vshrl.u32 %v2749_v53, 5 }
 0x34d   : > { %v9112_v51 = vsub.s32 %v2589_v39, %v2592_v22  ;;  %v2484_v3 = vsel %vm2482_vm11, %v2483_v61, %v9095_v8  ;;  %v2752_v29 = vsub.s32 32, %v2751_v56  ;;  %v2636_v26 = vand.u32 2139095040, %v9108_v38 }
 0x34e   : > { %v2485_v21 = vadd.s32 %v2484_v3, %v2480_v52  ;;  %v2754_v41 = vshll.u32 %v12607_v12, %v2751_v56  ;;  %v2757_v47 = vshll.u32 %v12608_v13, %v2751_v56  ;;  %v2760_v15 = vshll.u32 %v12609_v4, %v2751_v56 }
 0x34f   : > { %v2595_v50 = vsub.s32 0, %v9112_v51  ;;  %v2755_v17 = vshrl.u32 %v12608_v13, %v2752_v29  ;;  %v2758_v46 = vshrl.u32 %v12609_v4, %v2752_v29  ;;  %v2761_v42 = vshrl.u32 %v12610_v23, %v2752_v29 }
 0x350   : > { %v2486_v63 = vadd.s32 536870912, %v2485_v21  ;;  %v2763_v6 = vshll.u32 %v12610_v23, %v2751_v56  ;;  %v2764_v57 = vshrl.u32 %v12611_v49, %v2752_v29  ;;  %v2767_v40 = vshrl.u32 %v12612_v59, %v2752_v29 }
 0x351   : > { %v6364_v58 = vmin.u32 %v2595_v50, %v9112_v51  ;;  %v2756_v16 = vor.u32 %v2755_v17, %v2754_v41  ;;  %v2759_v62 = vor.u32 %v2758_v46, %v2757_v47  ;;  %v2762_v7 = vor.u32 %v2761_v42, %v2760_v15 }
 0x352   : > { %v9132_v39 = vshrl.u32 %v2486_v63, 30  ;;  %v2765_v36 = vor.u32 %v2764_v57, %v2763_v6  ;;  %v2766_v27 = vshll.u32 %v12611_v49, %v2751_v56  ;;  %v9136_v34 = vshll.u32 %v2745_v5, 8 }
 0x353   : > { %v2597_v31 = vclz %v6364_v58  ;;  %v2637_v28 = vshrl.u32 %v2636_v26, 23  ;;  %vm2769_vm7 = vcmp.lt.s32.totalorder %v9120_v0, 1  ;;  %vm2772_vm15 = vcmp.lt.s32.totalorder %v9120_v0, 4 }
 0x354   : > { %v2488_v48 = vshll.u32 %v9132_v39, 30  ;;  %v2768_v54 = vor.u32 %v2767_v40, %v2766_v27  ;;  %vm2771_vm10 = vcmp.lt.s32.totalorder %v9120_v0, 3  ;;  %v2777_v33 = vsel %vm2769_vm7, %v2756_v16, %v2759_v62 }
 0x355   : > { %v6365_v44 = vadd.s32 4294967294, %v2597_v31  ;;  %v2778_v19 = vsel %vm2772_vm15, %v2765_v36, 920167782  ;;  %vm2770_vm2 = vcmp.lt.s32.totalorder %v9120_v0, 2  ;;  %v2753_v30 = vshrl.u32 %v12607_v12, %v2752_v29 }
 0x356   : > { %v9146_v20 = vsub.s32 %v2485_v21, %v2488_v48  ;;  %v2779_v2 = vsel %vm2771_vm10, %v2762_v7, %v2778_v19  ;;  %v6367_v35 = vadd.s32 4294967169, %v2637_v28  ;;  %v2781_v61 = vsel %vm2769_vm7, %v2759_v62, %v2762_v7 }
 0x357   : > { %vm6366_vm0 = vcmp.lt.s32.totalorder %v6365_v44, 0  ;;  %v2780_v18 = vsel %vm2770_vm2, %v2777_v33, %v2779_v2  ;;  %v2774_v52 = vsel %vm2772_vm15, %v2762_v7, 2102212464  ;;  %v2782_v3 = vsel %vm2772_vm15, %v2768_v54, 1326507024 }
 0x358   : > { %v2600_v8 = vsel %vm6366_vm0, 0, %v6365_v44  ;;  %v2491_v56 = vsub.s32 0, %v9146_v20  ;;  %v9162_v5 = vmul.u32.u64.low %v9136_v34, %v2780_v18  ;;  %v9163_v29 = vmul.u32.u64.high %v9136_v34, %v2780_v18, %v9162_v5 }
 0x359   : > { %v2601_v53 = vsub.s32 32, %v2600_v8  ;;  %v2605_v22 = vsub.s32 4294967266, %v2600_v8  ;;  %v2585_v50 = vadd.s32 %v9072_v60, %v9069_v55  ;;  %v2783_v41 = vsel %vm2771_vm10, %v2765_v36, %v2782_v3  ;;  %v6646_v55 = vpop.f32.mrf.mxu1 }
 0x35a   : > { %v6360_v26 = vmin.u32 %v2491_v56, %v9146_v20  ;;  %v2773_v17 = vsel %vm2769_vm7, %v2753_v30, %v2756_v16  ;;  %v2784_v47 = vsel %vm2770_vm2, %v2781_v61, %v2783_v41  ;;  %v2643_v46 = vadd.s32 1, %v6367_v35 }
 0x35b   : > { %v2606_v21 = vadd.s32 127, %v2605_v22  ;;  %v2603_v58 = vshrl.u32 %v2585_v50, %v2601_v53  ;;  %v2775_v42 = vsel %vm2771_vm10, %v2759_v62, %v2774_v52  ;;  %v2640_v57 = vand.u32 8388607, %v2633_v14 }
 0x35c   : > { %v2493_v15 = vclz %v6360_v26  ;;  %v9178_v60 = vmul.u32.u64.low %v9136_v34, %v2784_v47  ;;  %v9179_v6 = vmul.u32.u64.high %v9136_v34, %v2784_v47, %v9178_v60  ;;  %vm2644_vm1 = vcmp.gt.s32.totalorder %v2643_v46, 0 }
 0x35d   : > { %v2607_v63 = vshll.u32 %v2606_v21, 23  ;;  %v2602_v16 = vshll.u32 %v9112_v51, %v2600_v8  ;;  %v2645_v40 = vsel %vm2644_vm1, %v2643_v46, 0  ;;  %v2776_v36 = vsel %vm2770_vm2, %v2773_v17, %v2775_v42 }
 0x35e   : > { %v6361_v7 = vadd.s32 4294967294, %v2493_v15  ;;  %v2795_v27 = vadd.s32 1, %v9163_v29  ;;  %v2647_v62 = vand.u32 31, %v2645_v40  ;;  %v9188_v28 = vadd.f32 %v6646_v55, %v9020_v10 }
 0x35f   : > { %v2608_v31 = vor.u32 4788187, %v2607_v63  ;;  %v2604_v44 = vor.u32 %v2603_v58, %v2602_v16  ;;  %vm2794_vm6 = vc.u32 %v9179_v6, %v9162_v5  ;;  %v2641_v54 = vor.u32 8388608, %v2640_v57 }
 0x360   : > { %12613 = vst [vmem:[#allocation7_spill] sm:$0xff] %v9188_v28  ;;  %vm6362_vm8 = vcmp.lt.s32.totalorder %v6361_v7, 0  ;;  %v2648_v51 = vsub.s32 32, %v2647_v62  ;;  %v2792_v0 = vmul.u32 %v9136_v34, %v2776_v36  ;;  %v2481_v8 = vadd.s32 %v9094_v11, %v9102_v25 }
 0x361   : > { %v2496_v48 = vsel %vm6362_vm8, 0, %v6361_v7  ;;  %v2609_v33 = vand.u32 2147483647, %v2608_v31  ;;  %v2796_v30 = vsel %vm2794_vm6, %v2795_v27, %v9163_v29  ;;  %v2948_v18 = vand.u32 2139095040, %v9188_v28 }
 0x362   : > { %v2497_v19 = vsub.s32 32, %v2496_v48  ;;  %v2501_v2 = vsub.s32 4294967266, %v2496_v48  ;;  %v2611_v35 = vcvt.s32.f32 %v2604_v44  ;;  %v2797_v22 = vadd.s32 %v2796_v30, %v2792_v0 }
 0x363   : > { %v2651_v56 = vshrl.u32 %v12608_v13, %v2648_v51  ;;  %v2646_v61 = vshrl.u32 %v2645_v40, 5  ;;  %v2654_v52 = vshrl.u32 %v12609_v4, %v2648_v51  ;;  %v9199_v3 = vshll.u32 %v2641_v54, 8 }
 0x364   : > { %v2502_v53 = vadd.s32 127, %v2501_v2  ;;  %v2945_v50 = vand.u32 2147483647, %v9188_v28  ;;  %v2612_v34 = vmul.f32 %v2611_v35, %v2609_v33  ;;  %v2499_v21 = vshrl.u32 %v2481_v8, %v2497_v19  ;;  %v2366_v2 = vpop.f32.mrf.mxu1 }
 0x365   : > { %v2798_v26 = vadd.s32 536870912, %v2797_v22  ;;  %v2650_v11 = vshll.u32 %v12607_v12, %v2647_v62  ;;  %v2653_v29 = vshll.u32 %v12608_v13, %v2647_v62  ;;  %v2656_v41 = vshll.u32 %v12609_v4, %v2647_v62 }
 0x366   : > { %v2503_v25 = vshll.u32 %v2502_v53, 23  ;;  %v2657_v17 = vshrl.u32 %v12610_v23, %v2648_v51  ;;  %v2498_v47 = vshll.u32 %v9146_v20, %v2496_v48  ;;  %v2949_v63 = vshrl.u32 %v2948_v18, 23 }
 0x367   : > { %v9207_v46 = vshrl.u32 %v2798_v26, 30  ;;  %v2652_v58 = vor.u32 %v2651_v56, %v2650_v11  ;;  %vm2531_vm4 = vcmp.lt.s32.totalorder %v9023_v45, 0  ;;  %v2655_v15 = vor.u32 %v2654_v52, %v2653_v29  ;;  %v6649_v29 = vpop.f32.mrf.mxu1 }
 0x368   : > { %v2658_v42 = vor.u32 %v2657_v17, %v2656_v41  ;;  %v2659_v55 = vshll.u32 %v12610_v23, %v2647_v62  ;;  %v2660_v60 = vshrl.u32 %v12611_v49, %v2648_v51  ;;  %v2649_v16 = vshrl.u32 %v12607_v12, %v2648_v51 }
 0x369   : > { %v2800_v57 = vshll.u32 %v9207_v46, 30  ;;  %v2662_v31 = vshll.u32 %v12611_v49, %v2647_v62  ;;  %v2663_v20 = vshrl.u32 %v12612_v59, %v2648_v51  ;;  %v2613_v7 = vxor.u32 2147483648, %v2612_v34 }
 0x36a   : > { %v2500_v40 = vor.u32 %v2499_v21, %v2498_v47  ;;  %v2504_v36 = vor.u32 4788187, %v2503_v25  ;;  %v2661_v27 = vor.u32 %v2660_v60, %v2659_v55  ;;  %vm2665_vm13 = vcmp.lt.s32.totalorder %v2646_v61, 1 }
 0x36b   : > { %v9216_v44 = vsub.s32 %v2797_v22, %v2800_v57  ;;  %v2664_v48 = vor.u32 %v2663_v20, %v2662_v31  ;;  %vm2668_vm14 = vcmp.lt.s32.totalorder %v2646_v61, 4  ;;  %vm2667_vm3 = vcmp.lt.s32.totalorder %v2646_v61, 3 }
 0x36c   : > { %v2670_v54 = vsel %vm2668_vm14, %v2658_v42, 2102212464  ;;  %v2673_v33 = vsel %vm2665_vm13, %v2652_v58, %v2655_v15  ;;  %v2674_v19 = vsel %vm2668_vm14, %v2661_v27, 920167782  ;;  %vm2666_vm12 = vcmp.lt.s32.totalorder %v2646_v61, 2 }
 0x36d   : > { %v2803_v0 = vsub.s32 0, %v9216_v44  ;;  %v2675_v62 = vsel %vm2667_vm3, %v2658_v42, %v2674_v19  ;;  %v2677_v51 = vsel %vm2665_vm13, %v2655_v15, %v2658_v42  ;;  %v2505_v8 = vand.u32 2147483647, %v2504_v36 }
 0x36e   : > { %v2676_v30 = vsel %vm2666_vm12, %v2673_v33, %v2675_v62  ;;  %v2678_v18 = vsel %vm2668_vm14, %v2664_v48, 1326507024  ;;  %v6379_v35 = vadd.s32 4294967169, %v2949_v63  ;;  %v2669_v22 = vsel %vm2665_vm13, %v2649_v16, %v2652_v58 }
 0x36f   : > { %v6372_v53 = vmin.u32 %v2803_v0, %v9216_v44  ;;  %v2671_v56 = vsel %vm2667_vm3, %v2655_v15, %v2670_v54  ;;  %v2679_v52 = vsel %vm2667_vm3, %v2661_v27, %v2678_v18  ;;  %v2507_v21 = vcvt.s32.f32 %v2500_v40 }
 0x370   : > { %v2680_v26 = vsel %vm2666_vm12, %v2677_v51, %v2679_v52  ;;  %v9229_v11 = vmul.u32.u64.low %v9199_v3, %v2676_v30  ;;  %v9230_v25 = vmul.u32.u64.high %v9199_v3, %v2676_v30, %v9229_v11  ;;  %v2614_v41 = vsel %vm2531_vm4, %v2613_v7, %v2612_v34 }
 0x371   : > { %v2805_v17 = vclz %v6372_v53  ;;  %v9236_v47 = vmul.u32.u64.low %v9199_v3, %v2680_v26  ;;  %v9237_v58 = vmul.u32.u64.high %v9199_v3, %v2680_v26, %v9236_v47  ;;  %vm9241_vm9 = vcmp.le.f32.partialorder %v2529_v43, 0.7853982 }
 0x372   : > { %v9245_v15 = vmul.f32 %v2507_v21, %v2505_v8  ;;  %v2672_v42 = vsel %vm2666_vm12, %v2669_v22, %v2671_v56  ;;  %v2955_v55 = vadd.s32 1, %v6379_v35  ;;  %v2952_v34 = vand.u32 8388607, %v2945_v50 }
 0x373   : > { %v6373_v60 = vadd.s32 4294967294, %v2805_v17  ;;  %v9251_v57 = vadd.f32 %v9020_v10, %v2366_v2  ;;  %v9254_v16 = vadd.f32 %v6649_v29, %v9020_v10  ;;  %v9259_v43 = vsel %vm9241_vm9, %v9023_v45, %v2614_v41 }
 0x374   : > { %v2793_v61 = vadd.s32 %v9162_v5, %v9179_v6  ;;  %v2691_v31 = vadd.s32 1, %v9230_v25  ;;  %vm2956_vm5 = vcmp.gt.s32.totalorder %v2955_v55, 0  ;;  %v2688_v20 = vmul.u32 %v9199_v3, %v2672_v42 }
 0x375   : > { %12616 = vst [vmem:[#allocation25_spill] sm:$0xff] %v9254_v16  ;;  %vm6374_vm11 = vcmp.lt.s32.totalorder %v6373_v60, 0  ;;  %vm2690_vm7 = vc.u32 %v9237_v58, %v9229_v11  ;;  %v2957_v7 = vsel %vm2956_vm5, %v2955_v55, 0  ;;  %v2509_v40 = vxor.u32 2147483648, %v9245_v15 }
 0x376   : > { %v2808_v36 = vsel %vm6374_vm11, 0, %v6373_v60  ;;  %v2692_v27 = vsel %vm2690_vm7, %v2691_v31, %v9230_v25  ;;  %v2959_v48 = vand.u32 31, %v2957_v7  ;;  %v2953_v19 = vor.u32 8388608, %v2952_v34 }
 0x377   : > { %v2813_v54 = vsub.s32 4294967266, %v2808_v36  ;;  %v2693_v33 = vadd.s32 %v2692_v27, %v2688_v20  ;;  %v12262_v5 = vand.u32 2147483647, %v9251_v57  ;;  %v2809_v6 = vsub.s32 32, %v2808_v36 }
 0x378   : > { %v2958_v2 = vshrl.u32 %v2957_v7, 5  ;;  %v2960_v0 = vsub.s32 32, %v2959_v48  ;;  %v2844_v3 = vand.u32 2139095040, %v9251_v57  ;;  %v2962_v8 = vshll.u32 %v12607_v12, %v2959_v48 }
 0x379   : > { %v2814_v62 = vadd.s32 127, %v2813_v54  ;;  %v2694_v51 = vadd.s32 536870912, %v2693_v33  ;;  %v2965_v30 = vshll.u32 %v12608_v13, %v2959_v48  ;;  %v2968_v53 = vshll.u32 %v12609_v4, %v2959_v48 }
 0x37a   : > { %v2963_v18 = vshrl.u32 %v12608_v13, %v2960_v0  ;;  %v2966_v35 = vshrl.u32 %v12609_v4, %v2960_v0  ;;  %v2969_v22 = vshrl.u32 %v12610_v23, %v2960_v0  ;;  %v2971_v21 = vshll.u32 %v12610_v23, %v2959_v48 }
 0x37b   : > { %v2815_v56 = vshll.u32 %v2814_v62, 23  ;;  %v9277_v52 = vshrl.u32 %v2694_v51, 30  ;;  %v2972_v26 = vshrl.u32 %v12611_v49, %v2960_v0  ;;  %v2993_v17 = vshll.u32 %v2953_v19, 8 }
 0x37c   : > { %v2964_v25 = vor.u32 %v2963_v18, %v2962_v8  ;;  %v2967_v29 = vor.u32 %v2966_v35, %v2965_v30  ;;  %v2970_v41 = vor.u32 %v2969_v22, %v2968_v53  ;;  %v2810_v47 = vshll.u32 %v9216_v44, %v2808_v36 }
 0x37d   : > { %v2811_v42 = vshrl.u32 %v2793_v61, %v2809_v6  ;;  %v2696_v55 = vshll.u32 %v9277_v52, 30  ;;  %v2973_v60 = vor.u32 %v2972_v26, %v2971_v21  ;;  %vm12313_vm15 = vcmp.lt.s32.totalorder %v9028_v24, 0 }
 0x37e   : > { %v2816_v34 = vor.u32 4788187, %v2815_v56  ;;  %v2961_v31 = vshrl.u32 %v12607_v12, %v2960_v0  ;;  %v2974_v20 = vshll.u32 %v12611_v49, %v2959_v48  ;;  %v2975_v7 = vshrl.u32 %v12612_v59, %v2960_v0 }
 0x37f   : > { %v9287_v27 = vsub.s32 %v2693_v33, %v2696_v55  ;;  %vm2977_vm10 = vcmp.lt.s32.totalorder %v2958_v2, 1  ;;  %vm2979_vm0 = vcmp.lt.s32.totalorder %v2958_v2, 3  ;;  %vm2980_vm2 = vcmp.lt.s32.totalorder %v2958_v2, 4 }
 0x380   : > { %v2976_v54 = vor.u32 %v2975_v7, %v2974_v20  ;;  %v2982_v44 = vsel %vm2980_vm2, %v2970_v41, 2102212464  ;;  %v2985_v61 = vsel %vm2977_vm10, %v2964_v25, %v2967_v29  ;;  %v2986_v36 = vsel %vm2980_vm2, %v2973_v60, 920167782 }
 0x381   : > { %v2812_v19 = vor.u32 %v2811_v42, %v2810_v47  ;;  %v2699_v6 = vsub.s32 0, %v9287_v27  ;;  %vm2978_vm1 = vcmp.lt.s32.totalorder %v2958_v2, 2  ;;  %v2987_v62 = vsel %vm2979_vm0, %v2970_v41, %v2986_v36 }
 0x382   : > { %v2817_v51 = vand.u32 2147483647, %v2816_v34  ;;  %v2988_v48 = vsel %vm2978_vm1, %v2985_v61, %v2987_v62  ;;  %v2989_v33 = vsel %vm2977_vm10, %v2967_v29, %v2970_v41  ;;  %v2990_v0 = vsel %vm2980_vm2, %v2976_v54, 1326507024 }
 0x383   : > { %v6368_v8 = vmin.u32 %v2699_v6, %v9287_v27  ;;  %v2981_v30 = vsel %vm2977_vm10, %v2961_v31, %v2964_v25  ;;  %v2983_v18 = vsel %vm2979_vm0, %v2967_v29, %v2982_v44  ;;  %v2991_v35 = vsel %vm2979_vm0, %v2973_v60, %v2990_v0 }
 0x384   : > { %v2992_v53 = vsel %vm2978_vm1, %v2989_v33, %v2991_v35  ;;  %v9299_v22 = vmul.u32.u64.low %v2993_v17, %v2988_v48  ;;  %v9300_v56 = vmul.u32.u64.high %v2993_v17, %v2988_v48, %v9299_v22  ;;  %v2845_v21 = vshrl.u32 %v2844_v3, 23 }
 0x385   : > { %vm9305_vm8 = vcmp.le.f32.partialorder %v2425_v37, 0.7853982  ;;  %v2701_v41 = vclz %v6368_v8  ;;  %v9309_v47 = vmul.u32.u64.low %v2993_v17, %v2992_v53  ;;  %v9310_v25 = vmul.u32.u64.high %v2993_v17, %v2992_v53, %v9309_v47 }
 0x386   : > { %v2819_v29 = vcvt.s32.f32 %v2812_v19  ;;  %v2984_v42 = vsel %vm2978_vm1, %v2981_v30, %v2983_v18  ;;  %v6375_v55 = vadd.s32 4294967169, %v2845_v21  ;;  %v2848_v60 = vand.u32 8388607, %v12262_v5 }
 0x387   : > { %7029 = vcosq.f32 %v9259_v43  ;;  %v2510_v37 = vsel %vm12313_vm15, %v2509_v40, %v9245_v15  ;;  %v6369_v3 = vadd.s32 4294967294, %v2701_v41  ;;  %v3156_v34 = vand.u32 2139095040, %v9254_v16 }
 0x388   : > { %v9322_v31 = vmul.f32 %v2819_v29, %v2817_v51  ;;  %v3003_v2 = vadd.s32 1, %v9300_v56  ;;  %v2851_v20 = vadd.s32 1, %v6375_v55  ;;  %v12261_v7 = vand.u32 2147483647, %v9254_v16 }
 0x389   : > { %vm6370_vm6 = vcmp.lt.s32.totalorder %v6369_v3, 0  ;;  %v3000_v54 = vmul.u32 %v2993_v17, %v2984_v42  ;;  %vm3002_vm13 = vc.u32 %v9310_v25, %v9299_v22  ;;  %v2849_v44 = vor.u32 8388608, %v2848_v60 }
 0x38a   : > { %v2704_v61 = vsel %vm6370_vm6, 0, %v6369_v3  ;;  %v3004_v36 = vsel %vm3002_vm13, %v3003_v2, %v9300_v56  ;;  %vm2852_vm14 = vcmp.gt.s32.totalorder %v2851_v20, 0  ;;  %v3157_v15 = vshrl.u32 %v3156_v34, 23 }
 0x38b   : > { %v2689_v40 = vadd.s32 %v9229_v11, %v9237_v58  ;;  %v2705_v19 = vsub.s32 32, %v2704_v61  ;;  %v2709_v6 = vsub.s32 4294967266, %v2704_v61  ;;  %v3005_v62 = vadd.s32 %v3004_v36, %v3000_v54 }
 0x38c   : > { %7031 = vsinq.f32 %v9259_v43  ;;  %v9335_v17 = vsel %vm9305_vm8, %v9028_v24, %v2510_v37  ;;  %v2853_v51 = vsel %vm2852_vm14, %v2851_v20, 0  ;;  %v2706_v48 = vshll.u32 %v9287_v27, %v2704_v61 }
 0x38d   : > { %v2707_v33 = vshrl.u32 %v2689_v40, %v2705_v19  ;;  %v2710_v0 = vadd.s32 127, %v2709_v6  ;;  %v3006_v8 = vadd.s32 536870912, %v3005_v62  ;;  %v2821_v30 = vxor.u32 2147483648, %v9322_v31 }
 0x38e   : > { %v2855_v18 = vand.u32 31, %v2853_v51  ;;  %v9339_v11 = vshll.u32 %v2849_v44, 8  ;;  %v6387_v58 = vadd.s32 4294967169, %v3157_v15  ;;  %v9345_v56 = vand.u32 8388607, %v12261_v7 }
 0x38f   : > { %v2708_v35 = vor.u32 %v2707_v33, %v2706_v48  ;;  %v2711_v53 = vshll.u32 %v2710_v0, 23  ;;  %v9341_v43 = vshrl.u32 %v3006_v8, 30  ;;  %v2854_v21 = vshrl.u32 %v2853_v51, 5 }
 0x390   : > { %v2856_v41 = vsub.s32 32, %v2855_v18  ;;  %v2858_v27 = vshll.u32 %v12607_v12, %v2855_v18  ;;  %v2861_v47 = vshll.u32 %v12608_v13, %v2855_v18  ;;  %v2864_v60 = vshll.u32 %v12609_v4, %v2855_v18 }
 0x391   : > { %12619 = vst [vmem:[#allocation10_spill] sm:$0xff] %v9341_v43  ;;  %v2712_v29 = vor.u32 4788187, %v2711_v53  ;;  %v2715_v42 = vcvt.s32.f32 %v2708_v35  ;;  %v3008_v55 = vshll.u32 %v9341_v43, 30  ;;  %v2867_v2 = vshll.u32 %v12610_v23, %v2855_v18 }
 0x392   : > { %v2859_v37 = vshrl.u32 %v12608_v13, %v2856_v41  ;;  %v2862_v3 = vshrl.u32 %v12609_v4, %v2856_v41  ;;  %v2865_v34 = vshrl.u32 %v12610_v23, %v2856_v41  ;;  %v2868_v44 = vshrl.u32 %v12611_v49, %v2856_v41 }
 0x393   : > { %v2713_v20 = vand.u32 2147483647, %v2712_v29  ;;  %v9355_v54 = vsub.s32 %v3005_v62, %v3008_v55  ;;  %v2870_v61 = vshll.u32 %v12611_v49, %v2855_v18  ;;  %vm12299_vm3 = vcmp.lt.s32.totalorder %v9035_v32, 0 }
 0x394   : > { %v9359_v36 = vpop.eup %7029  ;;  %v2860_v15 = vor.u32 %v2859_v37, %v2858_v27  ;;  %v2863_v40 = vor.u32 %v2862_v3, %v2861_v47  ;;  %v2866_v19 = vor.u32 %v2865_v34, %v2864_v60  ;;  %v2871_v6 = vshrl.u32 %v12612_v59, %v2856_v41  ;;  %v2376_v27 = vpop.f32.mrf.mxu1 }
 0x395   : > { %v3011_v51 = vsub.s32 0, %v9355_v54  ;;  %v2869_v48 = vor.u32 %v2868_v44, %v2867_v2  ;;  %vm2873_vm12 = vcmp.lt.s32.totalorder %v2854_v21, 1  ;;  %v3163_v33 = vadd.s32 1, %v6387_v58 }
 0x396   : > { %vm12300_vm5 = vcmp.lt.s32.totalorder %v9108_v38, 0  ;;  %v2716_v62 = vmul.f32 %v2715_v42, %v2713_v20  ;;  %v2857_v0 = vshrl.u32 %v12607_v12, %v2856_v41  ;;  %v2872_v8 = vor.u32 %v2871_v6, %v2870_v61 }
 0x397   : > { %vm2876_vm11 = vcmp.lt.s32.totalorder %v2854_v21, 4  ;;  %v6380_v18 = vmin.u32 %v3011_v51, %v9355_v54  ;;  %vm2874_vm7 = vcmp.lt.s32.totalorder %v2854_v21, 2  ;;  %v2881_v53 = vsel %vm2873_vm12, %v2860_v15, %v2863_v40 }
 0x398   : > { %v2878_v35 = vsel %vm2876_vm11, %v2866_v19, 2102212464  ;;  %vm2875_vm10 = vcmp.lt.s32.totalorder %v2854_v21, 3  ;;  %v2882_v47 = vsel %vm2876_vm11, %v2869_v48, 920167782  ;;  %v2885_v29 = vsel %vm2873_vm12, %v2863_v40, %v2866_v19 }
 0x399   : > { %v2886_v55 = vsel %vm2876_vm11, %v2872_v8, 1326507024  ;;  %v9369_v58 = vpop.eup %7031  ;;  %v3013_v60 = vclz %v6380_v18  ;;  %v2877_v42 = vsel %vm2873_vm12, %v2857_v0, %v2860_v15  ;;  %v2879_v41 = vsel %vm2875_vm10, %v2863_v40, %v2878_v35 }
 0x39a   : > { %v2883_v37 = vsel %vm2875_vm10, %v2866_v19, %v2882_v47  ;;  %v2887_v34 = vsel %vm2875_vm10, %v2869_v48, %v2886_v55  ;;  %v3161_v2 = vor.u32 8388608, %v9345_v56  ;;  %v9375_v20 = vadd.f32 %v9020_v10, %v2376_v27 }
 0x39b   : > { %v2884_v3 = vsel %vm2874_vm7, %v2881_v53, %v2883_v37  ;;  %v2717_v44 = vxor.u32 2147483648, %v2716_v62  ;;  %v6381_v61 = vadd.s32 4294967294, %v3013_v60  ;;  %v2888_v6 = vsel %vm2874_vm7, %v2885_v29, %v2887_v34 }
 0x39c   : > { %12620 = vst [vmem:[#allocation21_spill] sm:$0xff] %v9375_v20  ;;  %vm3164_vm0 = vcmp.gt.s32.totalorder %v3163_v33, 0  ;;  %v2880_v51 = vsel %vm2874_vm7, %v2877_v42, %v2879_v41  ;;  %v9380_v8 = vmul.u32.u64.low %v9339_v11, %v2888_v6  ;;  %v9381_v15 = vmul.u32.u64.high %v9339_v11, %v2888_v6, %v9380_v8 }
 0x39d   : > { %v3165_v40 = vsel %vm3164_vm0, %v3163_v33, 0  ;;  %v9388_v56 = vsel %vm12299_vm3, %v2821_v30, %v9322_v31  ;;  %vm6382_vm2 = vcmp.lt.s32.totalorder %v6381_v61, 0  ;;  %v3001_v21 = vadd.s32 %v9299_v22, %v9310_v25 }
 0x39e   : > { %v9391_v10 = vmul.u32.u64.low %v9339_v11, %v2884_v3  ;;  %v9392_v19 = vmul.u32.u64.high %v9339_v11, %v2884_v3, %v9391_v10  ;;  %v3016_v48 = vsel %vm6382_vm2, 0, %v6381_v61  ;;  %v3167_v0 = vand.u32 31, %v3165_v40 }
 0x39f   : > { %v12260_v33 = vand.u32 2147483647, %v9375_v20  ;;  %v9400_v18 = vsel %vm12300_vm5, %v2717_v44, %v2716_v62  ;;  %v3017_v35 = vsub.s32 32, %v3016_v48  ;;  %v3021_v31 = vsub.s32 4294967266, %v3016_v48 }
 0x3a0   : > { %v2896_v30 = vmul.u32 %v9339_v11, %v2880_v51  ;;  %vm2898_vm1 = vc.u32 %v9381_v15, %v9391_v10  ;;  %v9405_v53 = vshrl.u32 %v3165_v40, 5  ;;  %v3168_v27 = vsub.s32 32, %v3167_v0 }
 0x3a1   : > { %v9407_v47 = vshll.u32 %v3161_v2, 8  ;;  %v3018_v22 = vshll.u32 %v9355_v54, %v3016_v48  ;;  %v3019_v25 = vshrl.u32 %v3001_v21, %v3017_v35  ;;  %v3022_v29 = vadd.s32 127, %v3021_v31 }
 0x3a2   : > { %v2899_v55 = vadd.s32 1, %v9392_v19  ;;  %v3170_v62 = vshll.u32 %v12607_v12, %v3167_v0  ;;  %v3171_v60 = vshrl.u32 %v12608_v13, %v3168_v27  ;;  %v3173_v11 = vshll.u32 %v12608_v13, %v3167_v0 }
 0x3a3   : > { %v3174_v42 = vshrl.u32 %v12609_v4, %v3168_v27  ;;  %v3023_v41 = vshll.u32 %v3022_v29, 23  ;;  %v3176_v3 = vshll.u32 %v12609_v4, %v3167_v0  ;;  %v3177_v34 = vshrl.u32 %v12610_v23, %v3168_v27 }
 0x3a4   : > { %v2900_v37 = vsel %vm2898_vm1, %v2899_v55, %v9392_v19  ;;  %v3020_v54 = vor.u32 %v3019_v25, %v3018_v22  ;;  %v3172_v44 = vor.u32 %v3171_v60, %v3170_v62  ;;  %vm9420_vm6 = vcmp.le.f32.partialorder %v2737_v9, 0.7853982 }
 0x3a5   : > { %v2901_v2 = vadd.s32 %v2900_v37, %v2896_v30  ;;  %v3175_v61 = vor.u32 %v3174_v42, %v3173_v11  ;;  %v12621_v6 = vmov 0  ;;  %v3024_v51 = vor.u32 4788187, %v3023_v41 }
 0x3a6   : > { %v12622_v6 = vsel %vm9420_vm6, 4294967295, %v12621_v6  ;;  %v3178_v8 = vor.u32 %v3177_v34, %v3176_v3  ;;  %v3179_v40 = vshll.u32 %v12610_v23, %v3167_v0  ;;  %v3180_v19 = vshrl.u32 %v12611_v49, %v3168_v27 }
 0x3a7   : > { %12623 = vst [vmem:[#allocation20_spill] sm:$0xff] %v12622_v6  ;;  %v2902_v21 = vadd.s32 536870912, %v2901_v2  ;;  %v3182_v48 = vshll.u32 %v12611_v49, %v3167_v0  ;;  %v3183_v35 = vshrl.u32 %v12612_v59, %v3168_v27  ;;  %vm3185_vm13 = vcmp.lt.s32.totalorder %v9405_v53, 1 }
 0x3a8   : > { %v3025_v31 = vand.u32 2147483647, %v3024_v51  ;;  %v3169_v30 = vshrl.u32 %v12607_v12, %v3168_v27  ;;  %v3181_v9 = vor.u32 %v3180_v19, %v3179_v40  ;;  %vm3188_vm14 = vcmp.lt.s32.totalorder %v9405_v53, 4 }
 0x3a9   : > { %v3027_v22 = vcvt.s32.f32 %v3020_v54  ;;  %v9431_v25 = vshrl.u32 %v2902_v21, 30  ;;  %v3184_v29 = vor.u32 %v3183_v35, %v3182_v48  ;;  %v3190_v55 = vsel %vm3188_vm14, %v3178_v8, 2102212464 }
 0x3aa   : > { %vm3186_vm12 = vcmp.lt.s32.totalorder %v9405_v53, 2  ;;  %vm3187_vm11 = vcmp.lt.s32.totalorder %v9405_v53, 3  ;;  %v3193_v0 = vsel %vm3185_vm13, %v3172_v44, %v3175_v61  ;;  %v3194_v27 = vsel %vm3188_vm14, %v3181_v9, 920167782 }
 0x3ab   : > { %12624 = vst [vmem:[#allocation6_spill] sm:$0xff] %v9431_v25  ;;  %v2904_v62 = vshll.u32 %v9431_v25, 30  ;;  %v3189_v60 = vsel %vm3185_vm13, %v3169_v30, %v3172_v44  ;;  %v3195_v11 = vsel %vm3187_vm11, %v3178_v8, %v3194_v27  ;;  %v3197_v42 = vsel %vm3185_vm13, %v3175_v61, %v3178_v8  ;;  %v12706_v44 = vld [vmem:[#allocation15_spill] sm:$0xff] }
 0x3ac   : > { %v3028_v41 = vmul.f32 %v3027_v22, %v3025_v31  ;;  %v3191_v37 = vsel %vm3187_vm11, %v3175_v61, %v3190_v55  ;;  %v3196_v3 = vsel %vm3186_vm12, %v3193_v0, %v3195_v11  ;;  %v3198_v34 = vsel %vm3188_vm14, %v3184_v29, 1326507024 }
 0x3ad   : > { %v9450_v54 = vsub.s32 %v2901_v2, %v2904_v62  ;;  %v3199_v51 = vsel %vm3187_vm11, %v3181_v9, %v3198_v34  ;;  %v9453_v40 = vmul.u32.u64.low %v9407_v47, %v3196_v3  ;;  %v9454_v19 = vmul.u32.u64.high %v9407_v47, %v3196_v3, %v9453_v40 }
 0x3ae   : > { %7033 = vcosq.f32 %v9335_v17  ;;  %vm9460_vm7 = vcmp.le.f32.partialorder %v2633_v14, 0.7853982  ;;  %v3200_v61 = vsel %vm3186_vm12, %v3197_v42, %v3199_v51  ;;  %v3052_v2 = vand.u32 2139095040, %v9375_v20  ;;  %v6652_v14 = vpop.f32.mrf.mxu1 }
 0x3af   : > { %v2825_v8 = vsel %vm9420_vm6, %v9035_v32, %v9388_v56  ;;  %v2907_v21 = vsub.s32 0, %v9450_v54  ;;  %v9473_v48 = vmul.u32.u64.low %v9407_v47, %v3200_v61  ;;  %v9474_v35 = vmul.u32.u64.high %v9407_v47, %v3200_v61, %v9473_v48 }
 0x3b0   : > { %7035 = vsinq.f32 %v9335_v17  ;;  %v2721_v31 = vsel %vm9460_vm7, %v9108_v38, %v9400_v18  ;;  %v3192_v30 = vsel %vm3186_vm12, %v3189_v60, %v3191_v37  ;;  %v3053_v9 = vshrl.u32 %v3052_v2, 23  ;;  %v9490_v17 = vld [vmem:[%s12141_s4] ss:$0 sm:$0xff] }
 0x3b1   : > { %v3029_v22 = vxor.u32 2147483648, %v3028_v41  ;;  %v6376_v56 = vmin.u32 %v2907_v21, %v9450_v54  ;;  %v3211_v29 = vadd.s32 1, %v9454_v19  ;;  %v3056_v55 = vand.u32 8388607, %v12260_v33 }
 0x3b2   : > { %7037 = vcosq.f32 %v2825_v8  ;;  %v6383_v0 = vadd.s32 4294967169, %v3053_v9  ;;  %v9493_v18 = vadd.f32 %v9490_v17, %v6652_v14  ;;  %v3208_v27 = vmul.u32 %v9407_v47, %v3192_v30 }
 0x3b3   : > { %7039 = vsinq.f32 %v2825_v8  ;;  %v2909_v53 = vclz %v6376_v56  ;;  %vm3210_vm10 = vc.u32 %v9474_v35, %v9453_v40  ;;  %vm12278_vm0 = vcmp.lt.s32.totalorder %v9188_v28, 0 }
 0x3b4   : > { %12627 = vst [vmem:[#allocation16_spill] sm:$0xff] %v9493_v18  ;;  %7041 = vcosq.f32 %v2721_v31  ;;  %v3212_v62 = vsel %vm3210_vm10, %v3211_v29, %v9454_v19  ;;  %v3059_v60 = vadd.s32 1, %v6383_v0  ;;  %v3030_v11 = vsel %vm12278_vm0, %v3029_v22, %v3028_v41 }
 0x3b5   : > { %v6377_v42 = vadd.s32 4294967294, %v2909_v53  ;;  %v3213_v37 = vadd.s32 %v3212_v62, %v3208_v27  ;;  %v3057_v3 = vor.u32 8388608, %v3056_v55  ;;  %7043 = vsinq.f32 %v2721_v31 }
 0x3b6   : > { %vm9504_vm2 = vcmp.le.f32.partialorder %v2945_v50, 0.7853982  ;;  %v12628_v47 = vmov 0  ;;  %vm3060_vm1 = vcmp.gt.s32.totalorder %v3059_v60, 0  ;;  %v3364_v34 = vand.u32 2139095040, %v9493_v18 }
 0x3b7   : > { %v12629_v47 = vsel %vm9504_vm2, 4294967295, %v12628_v47  ;;  %v2897_v51 = vadd.s32 %v9391_v10, %v9381_v15  ;;  %vm6378_vm13 = vcmp.lt.s32.totalorder %v6377_v42, 0  ;;  %v3214_v19 = vadd.s32 536870912, %v3213_v37 }
 0x3b8   : > { %12630 = vst [vmem:[#allocation19_spill] sm:$0xff] %v12629_v47  ;;  %v3061_v61 = vsel %vm3060_vm1, %v3059_v60, 0  ;;  %v9514_v41 = vsel %vm9504_vm2, %v9188_v28, %v3030_v11  ;;  %v2912_v2 = vsel %vm6378_vm13, 0, %v6377_v42  ;;  %v9519_v31 = vshll.u32 %v3057_v3, 8 }
 0x3b9   : > { %v3063_v8 = vand.u32 31, %v3061_v61  ;;  %v2913_v21 = vsub.s32 32, %v2912_v2  ;;  %v2917_v48 = vsub.s32 4294967266, %v2912_v2  ;;  %v9517_v14 = vshrl.u32 %v3214_v19, 30 }
 0x3ba   : > { %v3062_v30 = vshrl.u32 %v3061_v61, 5  ;;  %v3365_v9 = vshrl.u32 %v3364_v34, 23  ;;  %v2914_v61 = vshll.u32 %v9450_v54, %v2912_v2  ;;  %7045 = vcosq.f32 %v9514_v41 }
 0x3bb   : > { %12631 = vst [vmem:[#allocation11_spill] sm:$0xff] %v9517_v14  ;;  %v3064_v15 = vsub.s32 32, %v3063_v8  ;;  %v3066_v10 = vshll.u32 %v12607_v12, %v3063_v8  ;;  %v9522_v22 = vpop.eup %7033  ;;  %v2918_v56 = vadd.s32 127, %v2917_v48  ;;  %v3216_v29 = vshll.u32 %v9517_v14, 30 }
 0x3bc   : > { %v3069_v55 = vshll.u32 %v12608_v13, %v3063_v8  ;;  %v3072_v0 = vshll.u32 %v12609_v4, %v3063_v8  ;;  %v2915_v53 = vshrl.u32 %v2897_v51, %v2913_v21  ;;  %v3075_v34 = vshll.u32 %v12610_v23, %v3063_v8 }
 0x3bd   : > { %v3067_v27 = vshrl.u32 %v12608_v13, %v3064_v15  ;;  %v3070_v62 = vshrl.u32 %v12609_v4, %v3064_v15  ;;  %v3073_v60 = vshrl.u32 %v12610_v23, %v3064_v15  ;;  %v9530_v11 = vpop.eup %7035  ;;  %v2919_v42 = vshll.u32 %v2918_v56, 23 }
 0x3be   : > { %v9532_v3 = vsub.s32 %v3213_v37, %v3216_v29  ;;  %v3076_v19 = vshrl.u32 %v12611_v49, %v3064_v15  ;;  %v3065_v5 = vshrl.u32 %v12607_v12, %v3064_v15  ;;  %v6395_v14 = vadd.s32 4294967169, %v3365_v9 }
 0x3bf   : > { %v3068_v48 = vor.u32 %v3067_v27, %v3066_v10  ;;  %v3071_v33 = vor.u32 %v3070_v62, %v3069_v55  ;;  %v3074_v51 = vor.u32 %v3073_v60, %v3072_v0  ;;  %v9537_v21 = vpop.eup %7037  ;;  %v2916_v37 = vor.u32 %v2915_v53, %v2914_v61 }
 0x3c0   : > { %12632 = vst [vmem:[#allocation31_spill] sm:$0xff] %v9537_v21  ;;  %v3219_v7 = vsub.s32 0, %v9532_v3  ;;  %v3077_v50 = vor.u32 %v3076_v19, %v3075_v34  ;;  %v9541_v56 = vpop.eup %7039  ;;  %v2920_v29 = vor.u32 4788187, %v2919_v42  ;;  %v3078_v47 = vshll.u32 %v12611_v49, %v3063_v8 }
 0x3c1   : > { %12633 = vst [vmem:[#allocation14_spill] sm:$0xff] %v9541_v56  ;;  %v3079_v28 = vshrl.u32 %v12612_v59, %v3064_v15  ;;  %v9545_v54 = vpop.eup %7041  ;;  %vm3081_vm14 = vcmp.lt.s32.totalorder %v3062_v30, 1  ;;  %vm3083_vm12 = vcmp.lt.s32.totalorder %v3062_v30, 3  ;;  %vm3084_vm11 = vcmp.lt.s32.totalorder %v3062_v30, 4 }
 0x3c2   : > { %12634 = vst [vmem:[#allocation34_spill] sm:$0xff] %v9545_v54  ;;  %v6388_v2 = vmin.u32 %v3219_v7, %v9532_v3  ;;  %v3086_v55 = vsel %vm3084_vm11, %v3074_v51, 2102212464  ;;  %v3089_v0 = vsel %vm3081_vm14, %v3068_v48, %v3071_v33  ;;  %v3090_v27 = vsel %vm3084_vm11, %v3077_v50, 920167782  ;;  %v9548_v9 = vpop.eup %7043 }
 0x3c3   : > { %v3080_v10 = vor.u32 %v3079_v28, %v3078_v47  ;;  %vm3082_vm10 = vcmp.lt.s32.totalorder %v3062_v30, 2  ;;  %v3085_v53 = vsel %vm3081_vm14, %v3065_v5, %v3068_v48  ;;  %v3091_v8 = vsel %vm3083_vm12, %v3074_v51, %v3090_v27  ;;  %v2386_v47 = vpop.f32.mrf.mxu1 }
 0x3c4   : > { %v3221_v62 = vclz %v6388_v2  ;;  %v3087_v15 = vsel %vm3083_vm12, %v3071_v33, %v3086_v55  ;;  %v3092_v60 = vsel %vm3082_vm10, %v3089_v0, %v3091_v8  ;;  %v3093_v42 = vsel %vm3081_vm14, %v3071_v33, %v3074_v51 }
 0x3c5   : > { %v3094_v7 = vsel %vm3084_vm11, %v3080_v10, 1326507024  ;;  %v2921_v34 = vand.u32 2147483647, %v2920_v29  ;;  %v2923_v19 = vcvt.s32.f32 %v2916_v37  ;;  %v3371_v5 = vadd.s32 1, %v6395_v14 }
 0x3c6   : > { %v6389_v61 = vadd.s32 4294967294, %v3221_v62  ;;  %v3095_v28 = vsel %vm3083_vm12, %v3077_v50, %v3094_v7  ;;  %v9556_v2 = vmul.u32.u64.low %v9519_v31, %v3092_v60  ;;  %v9557_v21 = vmul.u32.u64.high %v9519_v31, %v3092_v60, %v9556_v2 }
 0x3c7   : > { %v3096_v43 = vsel %vm3082_vm10, %v3093_v42, %v3095_v28  ;;  %v3088_v48 = vsel %vm3082_vm10, %v3085_v53, %v3087_v15  ;;  %vm3372_vm13 = vcmp.gt.s32.totalorder %v3371_v5, 0  ;;  %v9567_v50 = vadd.f32 %v9490_v17, %v2386_v47 }
 0x3c8   : > { %vm6390_vm1 = vcmp.lt.s32.totalorder %v6389_v61, 0  ;;  %v9562_v33 = vmul.u32.u64.low %v9519_v31, %v3096_v43  ;;  %v9563_v51 = vmul.u32.u64.high %v9519_v31, %v3096_v43, %v9562_v33  ;;  %v2924_v29 = vmul.f32 %v2923_v19, %v2921_v34 }
 0x3c9   : > { %v3224_v37 = vsel %vm6390_vm1, 0, %v6389_v61  ;;  %12635 = vst [vmem:[#allocation30_spill] sm:$0xff] %v9567_v50  ;;  %v3209_v10 = vadd.s32 %v9453_v40, %v9474_v35  ;;  %v3104_v30 = vmul.u32 %v9519_v31, %v3088_v48  ;;  %v3107_v0 = vadd.s32 1, %v9557_v21 }
 0x3ca   : > { %v3225_v55 = vsub.s32 32, %v3224_v37  ;;  %v3229_v14 = vsub.s32 4294967266, %v3224_v37  ;;  %v12636_v43 = vand.u32 2147483647, %v9493_v18  ;;  %v3373_v62 = vsel %vm3372_vm13, %v3371_v5, 0 }
 0x3cb   : > { %vm12298_vm14 = vcmp.lt.s32.totalorder %v9251_v57, 0  ;;  %v3226_v53 = vshll.u32 %v9532_v3, %v3224_v37  ;;  %vm3106_vm12 = vc.u32 %v9563_v51, %v9556_v2  ;;  %v3375_v35 = vand.u32 31, %v3373_v62 }
 0x3cc   : > { %v3368_v27 = vand.u32 8388607, %v12636_v43  ;;  %v3227_v8 = vshrl.u32 %v3209_v10, %v3225_v55  ;;  %v3230_v15 = vadd.s32 127, %v3229_v14  ;;  %v3108_v40 = vsel %vm3106_vm12, %v3107_v0, %v9557_v21 }
 0x3cd   : > { %v3260_v60 = vand.u32 2139095040, %v9567_v50  ;;  %v2925_v42 = vxor.u32 2147483648, %v2924_v29  ;;  %v3109_v19 = vadd.s32 %v3108_v40, %v3104_v30  ;;  %v3374_v61 = vshrl.u32 %v3373_v62, 5 }
 0x3ce   : > { %v3228_v7 = vor.u32 %v3227_v8, %v3226_v53  ;;  %v3231_v34 = vshll.u32 %v3230_v15, 23  ;;  %v3376_v28 = vsub.s32 32, %v3375_v35  ;;  %v3378_v3 = vshll.u32 %v12607_v12, %v3375_v35 }
 0x3cf   : > { %v3381_v47 = vshll.u32 %v12608_v13, %v3375_v35  ;;  %v3110_v33 = vadd.s32 536870912, %v3109_v19  ;;  %v3384_v21 = vshll.u32 %v12609_v4, %v3375_v35  ;;  %v3387_v14 = vshll.u32 %v12610_v23, %v3375_v35 }
 0x3d0   : > { %v3232_v5 = vor.u32 4788187, %v3231_v34  ;;  %v3235_v48 = vcvt.s32.f32 %v3228_v7  ;;  %v3379_v37 = vshrl.u32 %v12608_v13, %v3376_v28  ;;  %v3382_v10 = vshrl.u32 %v12609_v4, %v3376_v28 }
 0x3d1   : > { %v3385_v55 = vshrl.u32 %v12610_v23, %v3376_v28  ;;  %v12637_v30 = vand.u32 2147483647, %v9251_v57  ;;  %v9595_v62 = vshrl.u32 %v3110_v33, 30  ;;  %v3388_v53 = vshrl.u32 %v12611_v49, %v3376_v28 }
 0x3d2   : > { %v3233_v43 = vand.u32 2147483647, %v3232_v5  ;;  %v3390_v8 = vshll.u32 %v12611_v49, %v3375_v35  ;;  %vm12280_vm10 = vcmp.lt.s32.totalorder %v9254_v16, 0  ;;  %v3380_v15 = vor.u32 %v3379_v37, %v3378_v3  ;;  %v9605_v35 = vpop.eup %7045 }
 0x3d3   : > { %vm9591_vm11 = vcmp.le.f32.partialorder %v12637_v30, 0.7853982  ;;  %12640 = vst [vmem:[#allocation9_spill] sm:$0xff] %v9595_v62  ;;  %v3383_v40 = vor.u32 %v3382_v10, %v3381_v47  ;;  %v3386_v7 = vor.u32 %v3385_v55, %v3384_v21  ;;  %v3391_v34 = vshrl.u32 %v12612_v59, %v3376_v28  ;;  %12641 = vst [vmem:[#allocation22_spill] sm:$0xff] %v9605_v35 }
 0x3d4   : > { %v3236_v31 = vmul.f32 %v3235_v48, %v3233_v43  ;;  %v3112_v30 = vshll.u32 %v9595_v62, 30  ;;  %v3369_v25 = vor.u32 8388608, %v3368_v27  ;;  %v3389_v56 = vor.u32 %v3388_v53, %v3387_v14 }
 0x3d5   : > { %v2926_v5 = vsel %vm12298_vm14, %v2925_v42, %v2924_v29  ;;  %v3377_v33 = vshrl.u32 %v12607_v12, %v3376_v28  ;;  %v3392_v6 = vor.u32 %v3391_v34, %v3390_v8  ;;  %v3261_v32 = vshrl.u32 %v3260_v60, 23 }
 0x3d6   : > { %v9607_v54 = vsub.s32 %v3109_v19, %v3112_v30  ;;  %vm3393_vm1 = vcmp.lt.s32.totalorder %v3374_v61, 1  ;;  %vm3394_vm13 = vcmp.lt.s32.totalorder %v3374_v61, 2  ;;  %vm3396_vm12 = vcmp.lt.s32.totalorder %v3374_v61, 4 }
 0x3d7   : > { %vm3395_vm0 = vcmp.lt.s32.totalorder %v3374_v61, 3  ;;  %v3398_v3 = vsel %vm3396_vm12, %v3386_v7, 2102212464  ;;  %v3401_v47 = vsel %vm3393_vm1, %v3380_v15, %v3383_v40  ;;  %v3402_v48 = vsel %vm3396_vm12, %v3389_v56, 920167782 }
 0x3d8   : > { %v3237_v27 = vxor.u32 2147483648, %v3236_v31  ;;  %v3115_v21 = vsub.s32 0, %v9607_v54  ;;  %v3403_v37 = vsel %vm3395_vm0, %v3386_v7, %v3402_v48  ;;  %v3405_v29 = vsel %vm3393_vm1, %v3383_v40, %v3386_v7 }
 0x3d9   : > { %v3397_v42 = vsel %vm3393_vm1, %v3377_v33, %v3380_v15  ;;  %v3404_v28 = vsel %vm3394_vm13, %v3401_v47, %v3403_v37  ;;  %v3406_v60 = vsel %vm3396_vm12, %v3392_v6, 1326507024  ;;  %v3409_v10 = vshll.u32 %v3369_v25, 8 }
 0x3da   : > { %v6384_v19 = vmin.u32 %v3115_v21, %v9607_v54  ;;  %v3399_v55 = vsel %vm3395_vm0, %v3383_v40, %v3398_v3  ;;  %v3407_v14 = vsel %vm3395_vm0, %v3389_v56, %v3406_v60  ;;  %v6391_v43 = vadd.s32 4294967169, %v3261_v32 }
 0x3db   : > { %v9615_v53 = vsel %vm9591_vm11, %v9251_v57, %v2926_v5  ;;  %v3408_v8 = vsel %vm3394_vm13, %v3405_v29, %v3407_v14  ;;  %v9618_v34 = vmul.u32.u64.low %v3409_v10, %v3404_v28  ;;  %v9619_v30 = vmul.u32.u64.high %v3409_v10, %v3404_v28, %v9618_v34 }
 0x3dc   : > { %v3238_v6 = vsel %vm12280_vm10, %v3237_v27, %v3236_v31  ;;  %v3117_v25 = vclz %v6384_v19  ;;  %v9624_v15 = vmul.u32.u64.low %v3409_v10, %v3408_v8  ;;  %v9625_v7 = vmul.u32.u64.high %v3409_v10, %v3408_v8, %v9624_v15 }
 0x3dd   : > { %7047 = vsinq.f32 %v9514_v41  ;;  %v3400_v32 = vsel %vm3394_vm13, %v3397_v42, %v3399_v55  ;;  %v12642_v56 = vand.u32 2147483647, %v9567_v50  ;;  %v3267_v5 = vadd.s32 1, %v6391_v43  ;;  %v6655_v15 = vpop.f32.mrf.mxu1 }
 0x3de   : > { %7049 = vcosq.f32 %v9615_v53  ;;  %v12643_v3 = vand.u32 2147483647, %v9254_v16  ;;  %v12644_v31 = vmov 0  ;;  %v6385_v47 = vadd.s32 4294967294, %v3117_v25 }
 0x3df   : > { %v9631_v40 = vand.u32 8388607, %v12642_v56  ;;  %v3105_v61 = vadd.s32 %v9556_v2, %v9563_v51  ;;  %v3419_v48 = vadd.s32 1, %v9619_v30  ;;  %vm3268_vm1 = vcmp.gt.s32.totalorder %v3267_v5, 0 }
 0x3e0   : > { %vm9637_vm0 = vcmp.le.f32.partialorder %v12643_v3, 0.7853982  ;;  %vm6386_vm13 = vcmp.lt.s32.totalorder %v6385_v47, 0  ;;  %v3416_v27 = vmul.u32 %v3409_v10, %v3400_v32  ;;  %vm3418_vm12 = vc.u32 %v9625_v7, %v9618_v34 }
 0x3e1   : > { %v12645_v31 = vsel %vm9637_vm0, 4294967295, %v12644_v31  ;;  %v9644_v41 = vsel %vm9637_vm0, %v9254_v16, %v3238_v6  ;;  %v3269_v21 = vsel %vm3268_vm1, %v3267_v5, 0  ;;  %v3120_v37 = vsel %vm6386_vm13, 0, %v6385_v47 }
 0x3e2   : > { %12646 = vst [vmem:[#allocation29_spill] sm:$0xff] %v12645_v31  ;;  %v3420_v29 = vsel %vm3418_vm12, %v3419_v48, %v9619_v30  ;;  %v3265_v42 = vor.u32 8388608, %v9631_v40  ;;  %v3271_v28 = vand.u32 31, %v3269_v21  ;;  %v3121_v60 = vsub.s32 32, %v3120_v37 }
 0x3e3   : > { %v3125_v19 = vsub.s32 4294967266, %v3120_v37  ;;  %v3421_v55 = vadd.s32 %v3420_v29, %v3416_v27  ;;  %v9653_v14 = vshrl.u32 %v3269_v21, 5  ;;  %v3122_v2 = vshll.u32 %v9607_v54, %v3120_v37 }
 0x3e4   : > { %v3272_v51 = vsub.s32 32, %v3271_v28  ;;  %v3274_v10 = vshll.u32 %v12607_v12, %v3271_v28  ;;  %v3277_v43 = vshll.u32 %v12608_v13, %v3271_v28  ;;  %v3123_v8 = vshrl.u32 %v3105_v61, %v3121_v60 }
 0x3e5   : > { %v3126_v6 = vadd.s32 127, %v3125_v19  ;;  %v3422_v25 = vadd.s32 536870912, %v3421_v55  ;;  %v3280_v30 = vshll.u32 %v12609_v4, %v3271_v28  ;;  %v3283_v5 = vshll.u32 %v12610_v23, %v3271_v28 }
 0x3e6   : > { %v3275_v32 = vshrl.u32 %v12608_v13, %v3272_v51  ;;  %v3278_v56 = vshrl.u32 %v12609_v4, %v3272_v51  ;;  %v3281_v40 = vshrl.u32 %v12610_v23, %v3272_v51  ;;  %v3124_v54 = vor.u32 %v3123_v8, %v3122_v2 }
 0x3e7   : > { %v3127_v3 = vshll.u32 %v3126_v6, 23  ;;  %v9663_v47 = vshrl.u32 %v3422_v25, 30  ;;  %v3284_v48 = vshrl.u32 %v12611_v49, %v3272_v51  ;;  %v9667_v37 = vadd.f32 %v9490_v17, %v6655_v15 }
 0x3e8   : > { %v3276_v61 = vor.u32 %v3275_v32, %v3274_v10  ;;  %v3279_v27 = vor.u32 %v3278_v56, %v3277_v43  ;;  %v3282_v21 = vor.u32 %v3281_v40, %v3280_v30  ;;  %v3273_v19 = vshrl.u32 %v12607_v12, %v3272_v51 }
 0x3e9   : > { %12647 = vst [vmem:[#allocation23_spill] sm:$0xff] %v9663_v47  ;;  %12648 = vst [vmem:[#allocation18_spill] sm:$0xff] %v9667_v37  ;;  %v3128_v29 = vor.u32 4788187, %v3127_v3  ;;  %v3424_v60 = vshll.u32 %v9663_v47, 30  ;;  %v3285_v33 = vor.u32 %v3284_v48, %v3283_v5  ;;  %v3131_v31 = vcvt.s32.f32 %v3124_v54  ;;  %v2396_v48 = vpop.f32.mrf.mxu1 }
 0x3ea   : > { %v3286_v2 = vshll.u32 %v12611_v49, %v3271_v28  ;;  %v3287_v8 = vshrl.u32 %v12612_v59, %v3272_v51  ;;  %vm3289_vm1 = vcmp.lt.s32.totalorder %v9653_v14, 1  ;;  %v9674_v6 = vpop.eup %7047  ;;  %vm3291_vm13 = vcmp.lt.s32.totalorder %v9653_v14, 3 }
 0x3eb   : > { %12649 = vst [vmem:[#allocation28_spill] sm:$0xff] %v9674_v6  ;;  %v3129_v10 = vand.u32 2147483647, %v3128_v29  ;;  %v9676_v43 = vsub.s32 %v3421_v55, %v3424_v60  ;;  %vm3292_vm12 = vcmp.lt.s32.totalorder %v9653_v14, 4  ;;  %v9680_v25 = vpop.eup %7049  ;;  %v3297_v28 = vsel %vm3289_vm1, %v3276_v61, %v3279_v27 }
 0x3ec   : > { %12650 = vst [vmem:[#allocation13_spill] sm:$0xff] %v9680_v25  ;;  %v3288_v30 = vor.u32 %v3287_v8, %v3286_v2  ;;  %v3294_v15 = vsel %vm3292_vm12, %v3282_v21, 2102212464  ;;  %v3298_v32 = vsel %vm3292_vm12, %v3285_v33, 920167782  ;;  %vm3290_vm10 = vcmp.lt.s32.totalorder %v9653_v14, 2 }
 0x3ed   : > { %v3132_v51 = vmul.f32 %v3131_v31, %v3129_v10  ;;  %v3427_v56 = vsub.s32 0, %v9676_v43  ;;  %v3299_v55 = vsel %vm3291_vm13, %v3282_v21, %v3298_v32  ;;  %v3301_v5 = vsel %vm3289_vm1, %v3279_v27, %v3282_v21 }
 0x3ee   : > { %v3300_v40 = vsel %vm3290_vm10, %v3297_v28, %v3299_v55  ;;  %v3302_v54 = vsel %vm3292_vm12, %v3288_v30, 1326507024  ;;  %v3305_v3 = vshll.u32 %v3265_v42, 8  ;;  %v3293_v31 = vsel %vm3289_vm1, %v3273_v19, %v3276_v61 }
 0x3ef   : > { %v6396_v29 = vmin.u32 %v3427_v56, %v9676_v43  ;;  %v3295_v60 = vsel %vm3291_vm13, %v3279_v27, %v3294_v15  ;;  %v3303_v2 = vsel %vm3291_vm13, %v3285_v33, %v3302_v54  ;;  %v3133_v8 = vxor.u32 2147483648, %v3132_v51 }
 0x3f0   : > { %v3304_v10 = vsel %vm3290_vm10, %v3301_v5, %v3303_v2  ;;  %v9701_v28 = vmul.u32.u64.low %v3305_v3, %v3300_v40  ;;  %v9702_v21 = vmul.u32.u64.high %v3305_v3, %v3300_v40, %v9701_v28  ;;  %v9708_v56 = vadd.f32 %v9490_v17, %v2396_v48 }
 0x3f1   : > { %v3429_v42 = vclz %v6396_v29  ;;  %v9704_v30 = vmul.u32.u64.low %v3305_v3, %v3304_v10  ;;  %v9705_v32 = vmul.u32.u64.high %v3305_v3, %v3304_v10, %v9704_v30  ;;  %v12652_v61 = vsub.s32 4, %v9098_v1 }
 0x3f2   : > { %12651 = vst [vmem:[#allocation39_spill] sm:$0xff] %v9708_v56  ;;  %7051 = vsinq.f32 %v9615_v53  ;;  %v3296_v27 = vsel %vm3290_vm10, %v3293_v31, %v3295_v60  ;;  %v3572_v19 = vand.u32 2139095040, %v9667_v37  ;;  %v12653_v15 = vand.u32 2147483647, %v9375_v20 }
 0x3f3   : > { %v9715_v33 = vsel %vm2531_vm4, %v12652_v61, %v9098_v1  ;;  %7053 = vcosq.f32 %v9644_v41  ;;  %v12654_v55 = vmov 0  ;;  %vm12297_vm13 = vcmp.lt.s32.totalorder %v9375_v20, 0  ;;  %v6658_v1 = vpop.f32.mrf.mxu1 }
 0x3f4   : > { %vm9724_vm1 = vcmp.le.f32.partialorder %v12653_v15, 0.7853982  ;;  %v6397_v40 = vadd.s32 4294967294, %v3429_v42  ;;  %v3134_v53 = vsel %vm12297_vm13, %v3133_v8, %v3132_v51  ;;  %v3315_v14 = vadd.s32 1, %v9702_v21 }
 0x3f5   : > { %v12655_v55 = vsel %vm9724_vm1, 4294967295, %v12654_v55  ;;  %v12282_v5 = vand.u32 2147483647, %v9667_v37  ;;  %v3573_v54 = vshrl.u32 %v3572_v19, 23  ;;  %v3312_v48 = vmul.u32 %v3305_v3, %v3296_v27  ;;  %v2406_v3 = vpop.f32.mrf.mxu1 }
 0x3f6   : > { %12656 = vst [vmem:[#allocation35_spill] sm:$0xff] %v12655_v55  ;;  %vm6398_vm4 = vcmp.lt.s32.totalorder %v6397_v40, 0  ;;  %vm3314_vm10 = vc.u32 %v9705_v32, %v9701_v28  ;;  %v3468_v29 = vand.u32 2139095040, %v9708_v56  ;;  %v3417_v31 = vadd.s32 %v9618_v34, %v9625_v7 }
 0x3f7   : > { %v3432_v60 = vsel %vm6398_vm4, 0, %v6397_v40  ;;  %v3316_v2 = vsel %vm3314_vm10, %v3315_v14, %v9702_v21  ;;  %v6403_v10 = vadd.s32 4294967169, %v3573_v54  ;;  %v9741_v51 = vsel %vm9724_vm1, %v9375_v20, %v3134_v53 }
 0x3f8   : > { %v3433_v8 = vsub.s32 32, %v3432_v60  ;;  %v3437_v42 = vsub.s32 4294967266, %v3432_v60  ;;  %v3317_v30 = vadd.s32 %v3316_v2, %v3312_v48  ;;  %v3434_v61 = vshll.u32 %v9676_v43, %v3432_v60 }
 0x3f9   : > { %v3576_v27 = vand.u32 8388607, %v12282_v5  ;;  %v3579_v19 = vadd.s32 1, %v6403_v10  ;;  %v12281_v34 = vand.u32 2147483647, %v9708_v56  ;;  %v3469_v40 = vshrl.u32 %v3468_v29, 23 }
 0x3fa   : > { %v3435_v7 = vshrl.u32 %v3417_v31, %v3433_v8  ;;  %v3438_v21 = vadd.s32 127, %v3437_v42  ;;  %v3318_v15 = vadd.s32 536870912, %v3317_v30  ;;  %7055 = vsinq.f32 %v9644_v41 }
 0x3fb   : > { %vm3580_vm12 = vcmp.gt.s32.totalorder %v3579_v19, 0  ;;  %v9749_v53 = vadd.f32 %v9490_v17, %v6658_v1  ;;  %v9752_v14 = vadd.f32 %v9490_v17, %v2406_v3  ;;  %7057 = vcosq.f32 %v9741_v51 }
 0x3fc   : > { %v3436_v43 = vor.u32 %v3435_v7, %v3434_v61  ;;  %v3439_v54 = vshll.u32 %v3438_v21, 23  ;;  %v9754_v48 = vshrl.u32 %v3318_v15, 30  ;;  %v3581_v60 = vsel %vm3580_vm12, %v3579_v19, 0 }
 0x3fd   : > { %v9758_v31 = vadd.s32 %v9701_v28, %v9705_v32  ;;  %v3577_v29 = vor.u32 8388608, %v3576_v27  ;;  %v3583_v2 = vand.u32 31, %v3581_v60  ;;  %v6399_v1 = vadd.s32 4294967169, %v3469_v40 }
 0x3fe   : > { %12657 = vst [vmem:[#allocation27_spill] sm:$0xff] %v9754_v48  ;;  %v3440_v41 = vor.u32 4788187, %v3439_v54  ;;  %v3320_v10 = vshll.u32 %v9754_v48, 30  ;;  %v9763_v8 = vand.u32 8388607, %v12281_v34  ;;  %v3443_v42 = vcvt.s32.f32 %v3436_v43 }
 0x3ff   : > { %v3582_v3 = vshrl.u32 %v3581_v60, 5  ;;  %v3584_v61 = vsub.s32 32, %v3583_v2  ;;  %v3586_v19 = vshll.u32 %v12607_v12, %v3583_v2  ;;  %v9766_v7 = vpop.eup %7051  ;;  %v3589_v32 = vshll.u32 %v12608_v13, %v3583_v2 }
 0x400   : > { %12658 = vst [vmem:[#allocation37_spill] sm:$0xff] %v9766_v7  ;;  %v3441_v21 = vand.u32 2147483647, %v3440_v41  ;;  %v9768_v28 = vsub.s32 %v3317_v30, %v3320_v10  ;;  %v3592_v27 = vshll.u32 %v12609_v4, %v3583_v2  ;;  %v9772_v15 = vpop.eup %7053  ;;  %v3595_v60 = vshll.u32 %v12610_v23, %v3583_v2 }
 0x401   : > { %12659 = vst [vmem:[#allocation36_spill] sm:$0xff] %v9772_v15  ;;  %v3587_v40 = vshrl.u32 %v12608_v13, %v3584_v61  ;;  %v3590_v54 = vshrl.u32 %v12609_v4, %v3584_v61  ;;  %v3593_v43 = vshrl.u32 %v12610_v23, %v3584_v61  ;;  %v3596_v41 = vshrl.u32 %v12611_v49, %v3584_v61 }
 0x402   : > { %v3323_v34 = vsub.s32 0, %v9768_v28  ;;  %v3598_v30 = vshll.u32 %v12611_v49, %v3583_v2  ;;  %v3599_v10 = vshrl.u32 %v12612_v59, %v3584_v61  ;;  %v3444_v5 = vmul.f32 %v3443_v42, %v3441_v21 }
 0x403   : > { %v3588_v47 = vor.u32 %v3587_v40, %v3586_v19  ;;  %v3591_v48 = vor.u32 %v3590_v54, %v3589_v32  ;;  %v3594_v15 = vor.u32 %v3593_v43, %v3592_v27  ;;  %v3597_v55 = vor.u32 %v3596_v41, %v3595_v60 }
 0x404   : > { %v6392_v16 = vmin.u32 %v3323_v34, %v9768_v28  ;;  %v9783_v20 = vshll.u32 %v3577_v29, 8  ;;  %vm12310_vm4 = vcmp.lt.s32.totalorder %v9493_v18, 0  ;;  %v3600_v35 = vor.u32 %v3599_v10, %v3598_v30 }
 0x405   : > { %vm3601_vm10 = vcmp.lt.s32.totalorder %v3582_v3, 1  ;;  %vm3604_vm12 = vcmp.lt.s32.totalorder %v3582_v3, 4  ;;  %v3473_v2 = vor.u32 8388608, %v9763_v8  ;;  %v3475_v21 = vadd.s32 1, %v6399_v1 }
 0x406   : > { %v3325_v6 = vclz %v6392_v16  ;;  %v3606_v42 = vsel %vm3604_vm12, %v3594_v15, 2102212464  ;;  %v3609_v19 = vsel %vm3601_vm10, %v3588_v47, %v3591_v48  ;;  %v3445_v32 = vxor.u32 2147483648, %v3444_v5 }
 0x407   : > { %v3585_v34 = vshrl.u32 %v12607_v12, %v3584_v61  ;;  %vm3603_vm13 = vcmp.lt.s32.totalorder %v3582_v3, 3  ;;  %v3610_v29 = vsel %vm3604_vm12, %v3597_v55, 920167782  ;;  %v9792_v27 = vpop.eup %7055  ;;  %vm3602_vm14 = vcmp.lt.s32.totalorder %v3582_v3, 2 }
 0x408   : > { %12660 = vst [vmem:[#allocation24_spill] sm:$0xff] %v9792_v27  ;;  %v6393_v40 = vadd.s32 4294967294, %v3325_v6  ;;  %v3611_v54 = vsel %vm3603_vm13, %v3594_v15, %v3610_v29  ;;  %v3613_v43 = vsel %vm3601_vm10, %v3591_v48, %v3594_v15  ;;  %v3607_v8 = vsel %vm3603_vm13, %v3591_v48, %v3606_v42  ;;  %v9798_v41 = vpop.eup %7057 }
 0x409   : > { %v3605_v16 = vsel %vm3601_vm10, %v3585_v34, %v3588_v47  ;;  %v3612_v60 = vsel %vm3602_vm14, %v3609_v19, %v3611_v54  ;;  %v3614_v1 = vsel %vm3604_vm12, %v3600_v35, 1326507024  ;;  %12661 = vst [vmem:[#allocation38_spill] sm:$0xff] %v9798_v41  ;;  %vm3476_vm5 = vcmp.gt.s32.totalorder %v3475_v21, 0 }
 0x40a   : > { %vm6394_vm3 = vcmp.lt.s32.totalorder %v6393_v40, 0  ;;  %v3615_v61 = vsel %vm3603_vm13, %v3597_v55, %v3614_v1  ;;  %v9801_v30 = vmul.u32.u64.low %v9783_v20, %v3612_v60  ;;  %v9802_v10 = vmul.u32.u64.high %v9783_v20, %v3612_v60, %v9801_v30 }
 0x40b   : > { %v3328_v6 = vsel %vm6394_vm3, 0, %v6393_v40  ;;  %v3616_v29 = vsel %vm3602_vm14, %v3613_v43, %v3615_v61  ;;  %v3780_v47 = vand.u32 2139095040, %v9749_v53  ;;  %v3608_v42 = vsel %vm3602_vm14, %v3605_v16, %v3607_v8 }
 0x40c   : > { %v3329_v48 = vsub.s32 32, %v3328_v6  ;;  %v3333_v15 = vsub.s32 4294967266, %v3328_v6  ;;  %v3477_v35 = vsel %vm3476_vm5, %v3475_v21, 0  ;;  %v9812_v54 = vshll.u32 %v3473_v2, 8 }
 0x40d   : > { %v9809_v19 = vmul.u32.u64.low %v9783_v20, %v3616_v29  ;;  %v9810_v34 = vmul.u32.u64.high %v9783_v20, %v3616_v29, %v9809_v19  ;;  %v3479_v55 = vand.u32 31, %v3477_v35  ;;  %v9816_v40 = vsel %vm12310_vm4, %v3445_v32, %v3444_v5  ;;  %v4092_v5 = vld [vmem:[%s12142_s5 + $0x18] sm:$0xff] }
 0x40e   : > { %v3331_v43 = vshrl.u32 %v9758_v31, %v3329_v48  ;;  %v3334_v60 = vadd.s32 127, %v3333_v15  ;;  %v3627_v1 = vadd.s32 1, %v9802_v10  ;;  %v3330_v3 = vshll.u32 %v9768_v28, %v3328_v6  ;;  %6662 = vmatprep.subr.mxu0 %v4092_v5 }
 0x40f   : > { %v3624_v21 = vmul.u32 %v9783_v20, %v3608_v42  ;;  %v3480_v16 = vsub.s32 32, %v3479_v55  ;;  %v3781_v8 = vshrl.u32 %v3780_v47, 23  ;;  %v9822_v29 = vshrl.u32 %v3477_v35, 5  ;;  %6663 = vmatpush3.msra.mxu0 %v4092_v5  ;;  %v4091_v35 = vld [vmem:[%s12142_s5 + $0x10] sm:$0xff]  ;;  %v4090_v5 = vld [vmem:[%s12142_s5 + $0x8] sm:$0xff] }
 0x410   : > { %v3335_v61 = vshll.u32 %v3334_v60, 23  ;;  %v3482_v2 = vshll.u32 %v12607_v12, %v3479_v55  ;;  %v3485_v19 = vshll.u32 %v12608_v13, %v3479_v55  ;;  %v3332_v31 = vor.u32 %v3331_v43, %v3330_v3  ;;  %6664 = vmatprep.subr.mxu0 %v4091_v35 }
 0x411   : > { %vm3626_vm3 = vc.u32 %v9810_v34, %v9801_v30  ;;  %v3483_v28 = vshrl.u32 %v12608_v13, %v3480_v16  ;;  %v3488_v20 = vshll.u32 %v12609_v4, %v3479_v55  ;;  %v12662_v32 = vand.u32 2147483647, %v9493_v18  ;;  %6665 = vmatpush3.msra.mxu0 %v4091_v35 }
 0x412   : > { %v12663_v6 = vmov 0  ;;  %v3336_v47 = vor.u32 4788187, %v3335_v61  ;;  %v3628_v48 = vsel %vm3626_vm3, %v3627_v1, %v9802_v10  ;;  %v3486_v15 = vshrl.u32 %v12609_v4, %v3480_v16  ;;  %6666 = vmatprep.subr.mxu0 %v4090_v5 }
 0x413   : > { %vm9835_vm5 = vcmp.le.f32.partialorder %v12662_v32, 0.7853982  ;;  %v3491_v42 = vshll.u32 %v12610_v23, %v3479_v55  ;;  %v3629_v43 = vadd.s32 %v3628_v48, %v3624_v21  ;;  %v3484_v60 = vor.u32 %v3483_v28, %v3482_v2  ;;  %6667 = vmatpush3.msra.mxu0 %v4090_v5 }
 0x414   : > { %v12664_v6 = vsel %vm9835_vm5, 4294967295, %v12663_v6  ;;  %v3489_v3 = vshrl.u32 %v12610_v23, %v3480_v16  ;;  %v3492_v32 = vshrl.u32 %v12611_v49, %v3480_v16  ;;  %v3337_v62 = vand.u32 2147483647, %v3336_v47 }
 0x415   : > { %12665 = vst [vmem:[#allocation42_spill] sm:$0xff] %v12664_v6  ;;  %v3487_v61 = vor.u32 %v3486_v15, %v3485_v19  ;;  %v3494_v10 = vshll.u32 %v12611_v49, %v3479_v55  ;;  %v3495_v1 = vshrl.u32 %v12612_v59, %v3480_v16  ;;  %v3630_v27 = vadd.s32 536870912, %v3629_v43  ;;  %v4089_v55 = vld [vmem:[%s12142_s5] sm:$0xff] }
 0x416   : > { %v3490_v41 = vor.u32 %v3489_v3, %v3488_v20  ;;  %v3493_v21 = vor.u32 %v3492_v32, %v3491_v42  ;;  %v6411_v2 = vadd.s32 4294967169, %v3781_v8  ;;  %v3339_v28 = vcvt.s32.f32 %v3332_v31  ;;  %6668 = vmatprep.subr.mxu0 %v4089_v55 }
 0x417   : > { %v3496_v48 = vor.u32 %v3495_v1, %v3494_v10  ;;  %vm3497_vm14 = vcmp.lt.s32.totalorder %v9822_v29, 1  ;;  %vm3500_vm13 = vcmp.lt.s32.totalorder %v9822_v29, 4  ;;  %vm12311_vm10 = vcmp.lt.s32.totalorder %v9567_v50, 0  ;;  %6669 = vmatpush3.msra.mxu0 %v4089_v55 }
 0x418   : > { %v9858_v19 = vshrl.u32 %v3630_v27, 30  ;;  %v3481_v20 = vshrl.u32 %v12607_v12, %v3480_v16  ;;  %v3502_v8 = vsel %vm3500_vm13, %v3490_v41, 2102212464  ;;  %v3505_v31 = vsel %vm3497_vm14, %v3484_v60, %v3487_v61 }
 0x419   : > { %v3340_v47 = vmul.f32 %v3339_v28, %v3337_v62  ;;  %vm3499_vm12 = vcmp.lt.s32.totalorder %v9822_v29, 3  ;;  %v3506_v15 = vsel %vm3500_vm13, %v3493_v21, 920167782  ;;  %v3509_v42 = vsel %vm3497_vm14, %v3487_v61, %v3490_v41 }
 0x41a   : > { %12666 = vst [vmem:[#allocation40_spill] sm:$0xff] %v9858_v19  ;;  %v3632_v27 = vshll.u32 %v9858_v19, 30  ;;  %vm3498_vm3 = vcmp.lt.s32.totalorder %v9822_v29, 2  ;;  %v3507_v16 = vsel %vm3499_vm12, %v3490_v41, %v3506_v15  ;;  %v3510_v35 = vsel %vm3500_vm13, %v3496_v48, 1326507024 }
 0x41b   : > { %v3501_v62 = vsel %vm3497_vm14, %v3481_v20, %v3484_v60  ;;  %v3503_v3 = vsel %vm3499_vm12, %v3487_v61, %v3502_v8  ;;  %v3508_v32 = vsel %vm3498_vm3, %v3505_v31, %v3507_v16  ;;  %v3511_v10 = vsel %vm3499_vm12, %v3493_v21, %v3510_v35  ;;  %v6661_v60 = vpop.f32.mrf.mxu1 }
 0x41c   : > { %v9882_v1 = vsel %vm9835_vm5, %v9493_v18, %v9816_v40  ;;  %v9884_v5 = vsub.s32 %v3629_v43, %v3632_v27  ;;  %v3512_v41 = vsel %vm3498_vm3, %v3509_v42, %v3511_v10  ;;  %v12667_v28 = vand.u32 2147483647, %v9749_v53 }
 0x41d   : > { %v3341_v61 = vxor.u32 2147483648, %v3340_v47  ;;  %v9891_v55 = vmul.u32.u64.low %v9812_v54, %v3512_v41  ;;  %v9892_v20 = vmul.u32.u64.high %v9812_v54, %v3512_v41, %v9891_v55  ;;  %v3787_v21 = vadd.s32 1, %v6411_v2 }
 0x41e   : > { %v3784_v48 = vand.u32 8388607, %v12667_v28  ;;  %v3635_v8 = vsub.s32 0, %v9884_v5  ;;  %v3504_v40 = vsel %vm3498_vm3, %v3501_v62, %v3503_v3  ;;  %7059 = vsinq.f32 %v9741_v51 }
 0x41f   : > { %v9898_v43 = vmul.u32.u64.low %v9812_v54, %v3508_v32  ;;  %v9899_v31 = vmul.u32.u64.high %v9812_v54, %v3508_v32, %v9898_v43  ;;  %vm3788_vm14 = vcmp.gt.s32.totalorder %v3787_v21, 0  ;;  %v9904_v42 = vadd.f32 %v9490_v17, %v6661_v60 }
 0x420   : > { %v3785_v15 = vor.u32 8388608, %v3784_v48  ;;  %7061 = vcosq.f32 %v9882_v1  ;;  %v3625_v2 = vadd.s32 %v9801_v30, %v9810_v34  ;;  %v6404_v29 = vmin.u32 %v3635_v8, %v9884_v5 }
 0x421   : > { %v3789_v27 = vsel %vm3788_vm14, %v3787_v21, 0  ;;  %v9912_v16 = vsel %vm12311_vm10, %v3341_v61, %v3340_v47  ;;  %v3520_v35 = vmul.u32 %v9812_v54, %v3504_v40  ;;  %vm3522_vm13 = vc.u32 %v9892_v20, %v9898_v43 }
 0x422   : > { %v3791_v51 = vand.u32 31, %v3789_v27  ;;  %v3637_v17 = vclz %v6404_v29  ;;  %v3523_v62 = vadd.s32 1, %v9899_v31  ;;  %v3676_v30 = vand.u32 2139095040, %v9752_v14 }
 0x423   : > { %v9920_v34 = vshrl.u32 %v3789_v27, 5  ;;  %v9923_v47 = vshll.u32 %v3785_v15, 8  ;;  %7063 = vsinq.f32 %v9882_v1 }
 0x424   : > { %v3792_v32 = vsub.s32 32, %v3791_v51  ;;  %v3794_v10 = vshll.u32 %v12607_v12, %v3791_v51  ;;  %v6405_v41 = vadd.s32 4294967294, %v3637_v17  ;;  %v3524_v54 = vsel %vm3522_vm13, %v3523_v62, %v9899_v31 }
 0x425   : > { %v3797_v28 = vshll.u32 %v12608_v13, %v3791_v51  ;;  %v3800_v48 = vshll.u32 %v12609_v4, %v3791_v51  ;;  %v3525_v60 = vadd.s32 %v3524_v54, %v3520_v35  ;;  %v3803_v21 = vshll.u32 %v12610_v23, %v3791_v51 }
 0x426   : > { %v3795_v61 = vshrl.u32 %v12608_v13, %v3792_v32  ;;  %v3798_v55 = vshrl.u32 %v12609_v4, %v3792_v32  ;;  %vm6406_vm12 = vcmp.lt.s32.totalorder %v6405_v41, 0  ;;  %v3801_v8 = vshrl.u32 %v12610_v23, %v3792_v32 }
 0x427   : > { %v3804_v40 = vshrl.u32 %v12611_v49, %v3792_v32  ;;  %v3807_v15 = vshrl.u32 %v12612_v59, %v3792_v32  ;;  %v3640_v29 = vsel %vm6406_vm12, 0, %v6405_v41  ;;  %v3526_v31 = vadd.s32 536870912, %v3525_v60 }
 0x428   : > { %v3796_v27 = vor.u32 %v3795_v61, %v3794_v10  ;;  %v3799_v17 = vor.u32 %v3798_v55, %v3797_v28  ;;  %v12668_v62 = vand.u32 2147483647, %v9567_v50  ;;  %v12669_v35 = vmov 0 }
 0x429   : > { %v3641_v54 = vsub.s32 32, %v3640_v29  ;;  %v3645_v3 = vsub.s32 4294967266, %v3640_v29  ;;  %v3802_v19 = vor.u32 %v3801_v8, %v3800_v48  ;;  %v3806_v6 = vshll.u32 %v12611_v49, %v3791_v51 }
 0x42a   : > { %vm9936_vm3 = vcmp.le.f32.partialorder %v12668_v62, 0.7853982  ;;  %v3642_v18 = vshll.u32 %v9884_v5, %v3640_v29  ;;  %v9942_v25 = vshrl.u32 %v3526_v31, 30  ;;  %v3793_v41 = vshrl.u32 %v12607_v12, %v3792_v32 }
 0x42b   : > { %v12670_v35 = vsel %vm9936_vm3, 4294967295, %v12669_v35  ;;  %v3805_v7 = vor.u32 %v3804_v40, %v3803_v21  ;;  %v3643_v10 = vshrl.u32 %v3625_v2, %v3641_v54  ;;  %v3646_v28 = vadd.s32 127, %v3645_v3  ;;  %v9951_v5 = vpop.eup %7059 }
 0x42c   : > { %12671 = vst [vmem:[#allocation17_spill] sm:$0xff] %v12670_v35  ;;  %12672 = vst [vmem:[#allocation43_spill] sm:$0xff] %v9942_v25  ;;  %v3808_v61 = vor.u32 %v3807_v15, %v3806_v6  ;;  %vm3809_vm14 = vcmp.lt.s32.totalorder %v9920_v34, 1  ;;  %v3528_v55 = vshll.u32 %v9942_v25, 30  ;;  %vm3811_vm13 = vcmp.lt.s32.totalorder %v9920_v34, 3 }
 0x42d   : > { %vm3812_vm12 = vcmp.lt.s32.totalorder %v9920_v34, 4  ;;  %v3817_v51 = vsel %vm3809_vm14, %v3796_v27, %v3799_v17  ;;  %v3644_v48 = vor.u32 %v3643_v10, %v3642_v18  ;;  %v3647_v8 = vshll.u32 %v3646_v28, 23  ;;  %v9957_v3 = vpop.eup %7061 }
 0x42e   : > { %v3814_v2 = vsel %vm3812_vm12, %v3802_v19, 2102212464  ;;  %v3818_v6 = vsel %vm3812_vm12, %v3805_v7, 920167782  ;;  %12673 = vst [vmem:[#allocation33_spill] sm:$0xff] %v9957_v3  ;;  %v9959_v32 = vsub.s32 %v3525_v60, %v3528_v55  ;;  %vm3810_vm4 = vcmp.lt.s32.totalorder %v9920_v34, 2 }
 0x42f   : > { %v3813_v21 = vsel %vm3809_vm14, %v3793_v41, %v3796_v27  ;;  %v3819_v40 = vsel %vm3811_vm13, %v3802_v19, %v3818_v6  ;;  %v3648_v18 = vor.u32 4788187, %v3647_v8  ;;  %v3815_v15 = vsel %vm3811_vm13, %v3799_v17, %v3814_v2 }
 0x430   : > { %v3820_v29 = vsel %vm3810_vm4, %v3817_v51, %v3819_v40  ;;  %v3821_v31 = vsel %vm3809_vm14, %v3799_v17, %v3802_v19  ;;  %v3531_v60 = vsub.s32 0, %v9959_v32  ;;  %v3822_v62 = vsel %vm3812_vm12, %v3808_v61, 1326507024 }
 0x431   : > { %v9976_v27 = vmul.u32.u64.low %v9923_v47, %v3820_v29  ;;  %v9977_v54 = vmul.u32.u64.high %v9923_v47, %v3820_v29, %v9976_v27  ;;  %v3649_v41 = vand.u32 2147483647, %v3648_v18  ;;  %v3651_v10 = vcvt.s32.f32 %v3644_v48 }
 0x432   : > { %v3823_v28 = vsel %vm3811_vm13, %v3805_v7, %v3822_v62  ;;  %v3677_v55 = vshrl.u32 %v3676_v30, 23  ;;  %v3345_v19 = vsel %vm9936_vm3, %v9567_v50, %v9912_v16  ;;  %v6400_v17 = vmin.u32 %v3531_v60, %v9959_v32 }
 0x433   : > { %v3824_v61 = vsel %vm3810_vm4, %v3821_v31, %v3823_v28  ;;  %v12674_v51 = vand.u32 2147483647, %v9752_v14  ;;  %v3652_v2 = vmul.f32 %v3651_v10, %v3649_v41  ;;  %v3816_v16 = vsel %vm3810_vm4, %v3813_v21, %v3815_v15 }
 0x434   : > { %v9992_v48 = vmul.u32.u64.low %v9923_v47, %v3824_v61  ;;  %v9993_v6 = vmul.u32.u64.high %v9923_v47, %v3824_v61, %v9992_v48  ;;  %v6407_v7 = vadd.s32 4294967169, %v3677_v55  ;;  %v3533_v30 = vclz %v6400_v17 }
 0x435   : > { %v3680_v8 = vand.u32 8388607, %v12674_v51  ;;  %v3835_v40 = vadd.s32 1, %v9977_v54  ;;  %7065 = vcosq.f32 %v3345_v19  ;;  %vm12312_vm14 = vcmp.lt.s32.totalorder %v9667_v37, 0 }
 0x436   : > { %v3683_v29 = vadd.s32 1, %v6407_v7  ;;  %7067 = vsinq.f32 %v3345_v19  ;;  %v6401_v31 = vadd.s32 4294967294, %v3533_v30  ;;  %v3653_v62 = vxor.u32 2147483648, %v3652_v2 }
 0x437   : > { %v3681_v60 = vor.u32 8388608, %v3680_v8  ;;  %v3832_v1 = vmul.u32 %v9923_v47, %v3816_v16  ;;  %vm3834_vm13 = vc.u32 %v9993_v6, %v9976_v27  ;;  %v3521_v41 = vadd.s32 %v9898_v43, %v9892_v20 }
 0x438   : > { %vm3684_vm4 = vcmp.gt.s32.totalorder %v3683_v29, 0  ;;  %vm6402_vm12 = vcmp.lt.s32.totalorder %v6401_v31, 0  ;;  %v3836_v34 = vsel %vm3834_vm13, %v3835_v40, %v9977_v54  ;;  %v3988_v61 = vand.u32 2139095040, %v9904_v42 }
 0x439   : > { %v3685_v21 = vsel %vm3684_vm4, %v3683_v29, 0  ;;  %v3536_v10 = vsel %vm6402_vm12, 0, %v6401_v31  ;;  %v3837_v28 = vadd.s32 %v3836_v34, %v3832_v1  ;;  %v10012_v47 = vshll.u32 %v3681_v60, 8 }
 0x43a   : > { %v10010_v55 = vshrl.u32 %v3685_v21, 5  ;;  %v3537_v19 = vsub.s32 32, %v3536_v10  ;;  %v3541_v17 = vsub.s32 4294967266, %v3536_v10  ;;  %v3654_v51 = vsel %vm12312_vm14, %v3653_v62, %v3652_v2 }
 0x43b   : > { %v3538_v54 = vshll.u32 %v9959_v32, %v3536_v10  ;;  %v3838_v8 = vadd.s32 536870912, %v3837_v28  ;;  %v3687_v48 = vand.u32 31, %v3685_v21  ;;  %v12676_v31 = vand.u32 2147483647, %v9667_v37 }
 0x43c   : > { %v3539_v7 = vshrl.u32 %v3521_v41, %v3537_v19  ;;  %v3542_v30 = vadd.s32 127, %v3541_v17  ;;  %vm3705_vm13 = vcmp.lt.s32.totalorder %v10010_v55, 1  ;;  %vm3707_vm4 = vcmp.lt.s32.totalorder %v10010_v55, 3 }
 0x43d   : > { %v10020_v20 = vshrl.u32 %v3838_v8, 30  ;;  %v3688_v43 = vsub.s32 32, %v3687_v48  ;;  %v3690_v16 = vshll.u32 %v12607_v12, %v3687_v48  ;;  %vm3706_vm12 = vcmp.lt.s32.totalorder %v10010_v55, 2 }
 0x43e   : > { %vm3708_vm10 = vcmp.lt.s32.totalorder %v10010_v55, 4  ;;  %v3540_v2 = vor.u32 %v3539_v7, %v3538_v54  ;;  %v3543_v40 = vshll.u32 %v3542_v30, 23  ;;  %v3693_v32 = vshll.u32 %v12608_v13, %v3687_v48  ;;  %v10039_v54 = vpop.eup %7063 }
 0x43f   : > { %12675 = vst [vmem:[#allocation44_spill] sm:$0xff] %v10020_v20  ;;  %v3696_v29 = vshll.u32 %v12609_v4, %v3687_v48  ;;  %vm10029_vm14 = vcmp.le.f32.partialorder %v12676_v31, 0.7853982  ;;  %v12677_v60 = vmov 0  ;;  %v3840_v62 = vshll.u32 %v10020_v20, 30  ;;  %12680 = vst [vmem:[#allocation5_spill] sm:$0xff] %v10039_v54 }
 0x440   : > { %v12678_v60 = vsel %vm10029_vm14, 4294967295, %v12677_v60  ;;  %v3691_v1 = vshrl.u32 %v12608_v13, %v3688_v43  ;;  %v3694_v34 = vshrl.u32 %v12609_v4, %v3688_v43  ;;  %v3699_v21 = vshll.u32 %v12610_v23, %v3687_v48 }
 0x441   : > { %12679 = vst [vmem:[#allocation41_spill] sm:$0xff] %v12678_v60  ;;  %v3544_v41 = vor.u32 4788187, %v3543_v40  ;;  %v3547_v10 = vcvt.s32.f32 %v3540_v2  ;;  %v3697_v19 = vshrl.u32 %v12610_v23, %v3688_v43  ;;  %v3700_v17 = vshrl.u32 %v12611_v49, %v3688_v43 }
 0x442   : > { %v10041_v8 = vsub.s32 %v3837_v28, %v3840_v62  ;;  %v3692_v7 = vor.u32 %v3691_v1, %v3690_v16  ;;  %v3695_v30 = vor.u32 %v3694_v34, %v3693_v32  ;;  %v3702_v31 = vshll.u32 %v12611_v49, %v3687_v48  ;;  %v10044_v18 = vpop.eup %7065 }
 0x443   : > { %12681 = vst [vmem:[#allocation12_spill] sm:$0xff] %v10044_v18  ;;  %v3545_v15 = vand.u32 2147483647, %v3544_v41  ;;  %v3698_v20 = vor.u32 %v3697_v19, %v3696_v29  ;;  %v3701_v40 = vor.u32 %v3700_v17, %v3699_v21  ;;  %v3703_v2 = vshrl.u32 %v12612_v59, %v3688_v43  ;;  %v10048_v3 = vpop.eup %7067 }
 0x444   : > { %12682 = vst [vmem:[#allocation26_spill] sm:$0xff] %v10048_v3  ;;  %v3843_v25 = vsub.s32 0, %v10041_v8  ;;  %v3689_v28 = vshrl.u32 %v12607_v12, %v3688_v43  ;;  %v3713_v16 = vsel %vm3705_vm13, %v3692_v7, %v3695_v30  ;;  %v3989_v32 = vshrl.u32 %v3988_v61, 23 }
 0x445   : > { %v3548_v48 = vmul.f32 %v3547_v10, %v3545_v15  ;;  %v3704_v62 = vor.u32 %v3703_v2, %v3702_v31  ;;  %v3710_v1 = vsel %vm3708_vm10, %v3698_v20, 2102212464  ;;  %v3714_v29 = vsel %vm3708_vm10, %v3701_v40, 920167782 }
 0x446   : > { %v12683_v34 = vand.u32 2147483647, %v9708_v56  ;;  %v12684_v21 = vmov 0  ;;  %v6412_v43 = vmin.u32 %v3843_v25, %v10041_v8  ;;  %v3709_v41 = vsel %vm3705_vm13, %v3689_v28, %v3692_v7  ;;  %v2416_v25 = vpop.f32.mrf.mxu1 }
 0x447   : > { %v3715_v15 = vsel %vm3707_vm4, %v3698_v20, %v3714_v29  ;;  %v3717_v61 = vsel %vm3705_vm13, %v3695_v30, %v3698_v20  ;;  %v3549_v10 = vxor.u32 2147483648, %v3548_v48  ;;  %v3711_v19 = vsel %vm3707_vm4, %v3695_v30, %v3710_v1 }
 0x448   : > { %vm10060_vm15 = vcmp.le.f32.partialorder %v12683_v34, 0.7853982  ;;  %v3716_v17 = vsel %vm3706_vm12, %v3713_v16, %v3715_v15  ;;  %v3718_v31 = vsel %vm3708_vm10, %v3704_v62, 1326507024  ;;  %v3845_v2 = vclz %v6412_v43  ;;  %v7160_v15 = vld [vmem:[%s12141_s4] ss:$0 sm:$0xff] }
 0x449   : > { %v12685_v21 = vsel %vm10060_vm15, 4294967295, %v12684_v21  ;;  %v3719_v7 = vsel %vm3707_vm4, %v3701_v40, %v3718_v31  ;;  %v10080_v28 = vmul.u32.u64.low %v10012_v47, %v3716_v17  ;;  %v10081_v29 = vmul.u32.u64.high %v10012_v47, %v3716_v17, %v10080_v28 }
 0x44a   : > { %12686 = vst [vmem:[#allocation8_spill] sm:$0xff] %v12685_v21  ;;  %v3657_v20 = vsel %vm10029_vm14, %v9667_v37, %v3654_v51  ;;  %v3720_v30 = vsel %vm3706_vm12, %v3717_v61, %v3719_v7  ;;  %v6419_v16 = vadd.s32 4294967169, %v3989_v32  ;;  %v12687_v62 = vand.u32 2147483647, %v9904_v42 }
 0x44b   : > { %v6413_v34 = vadd.s32 4294967294, %v3845_v2  ;;  %v10092_v43 = vmul.u32.u64.low %v10012_v47, %v3720_v30  ;;  %v10093_v40 = vmul.u32.u64.high %v10012_v47, %v3720_v30, %v10092_v43  ;;  %v10098_v17 = vadd.f32 %v7160_v15, %v2416_v25 }
 0x44c   : > { %v3992_v1 = vand.u32 8388607, %v12687_v62  ;;  %v3833_v51 = vadd.s32 %v9976_v27, %v9993_v6  ;;  %v3712_v32 = vsel %vm3706_vm12, %v3709_v41, %v3711_v19  ;;  %v3995_v61 = vadd.s32 1, %v6419_v16 }
 0x44d   : > { %7069 = vcosq.f32 %v3657_v20  ;;  %vm12688_vm10 = vcmp.lt.s32.totalorder %v9708_v56, 0  ;;  %vm6414_vm13 = vcmp.lt.s32.totalorder %v6413_v34, 0  ;;  %v3731_v7 = vadd.s32 1, %v10081_v29 }
 0x44e   : > { %v3550_v2 = vsel %vm12688_vm10, %v3549_v10, %v3548_v48  ;;  %7071 = vsinq.f32 %v3657_v20  ;;  %v3848_v30 = vsel %vm6414_vm13, 0, %v6413_v34  ;;  %v3993_v25 = vor.u32 8388608, %v3992_v1 }
 0x44f   : > { %vm3996_vm4 = vcmp.gt.s32.totalorder %v3995_v61, 0  ;;  %v3849_v62 = vsub.s32 32, %v3848_v30  ;;  %v3853_v43 = vsub.s32 4294967266, %v3848_v30  ;;  %v3728_v27 = vmul.u32 %v10012_v47, %v3712_v32 }
 0x450   : > { %v12319_v6 = vand.u32 2147483647, %v10098_v17  ;;  %v10113_v55 = vsel %vm10060_vm15, %v9708_v56, %v3550_v2  ;;  %v3850_v48 = vshll.u32 %v10041_v8, %v3848_v30  ;;  %vm3730_vm12 = vc.u32 %v10093_v40, %v10080_v28 }
 0x451   : > { %v3997_v41 = vsel %vm3996_vm4, %v3995_v61, 0  ;;  %v3851_v10 = vshrl.u32 %v3833_v51, %v3849_v62  ;;  %v3854_v19 = vadd.s32 127, %v3853_v43  ;;  %v3732_v20 = vsel %vm3730_vm12, %v3731_v7, %v10081_v29 }
 0x452   : > { %v3998_v16 = vshrl.u32 %v3997_v41, 5  ;;  %v3733_v1 = vadd.s32 %v3732_v20, %v3728_v27  ;;  %v3999_v47 = vand.u32 31, %v3997_v41  ;;  %v10119_v34 = vshll.u32 %v3993_v25, 8 }
 0x453   : > { %v3884_v15 = vand.u32 2139095040, %v10098_v17  ;;  %v3852_v32 = vor.u32 %v3851_v10, %v3850_v48  ;;  %v3855_v2 = vshll.u32 %v3854_v19, 23  ;;  %v10124_v8 = vand.u32 8388607, %v12319_v6 }
 0x454   : > { %vm4017_vm10 = vcmp.lt.s32.totalorder %v3998_v16, 1  ;;  %v3734_v51 = vadd.s32 536870912, %v3733_v1  ;;  %v4000_v61 = vsub.s32 32, %v3999_v47  ;;  %v4002_v29 = vshll.u32 %v12607_v12, %v3999_v47 }
 0x455   : > { %v4005_v7 = vshll.u32 %v12608_v13, %v3999_v47  ;;  %v3856_v30 = vor.u32 4788187, %v3855_v2  ;;  %v3859_v25 = vcvt.s32.f32 %v3852_v32  ;;  %v4008_v62 = vshll.u32 %v12609_v4, %v3999_v47 }
 0x456   : > { %v4011_v43 = vshll.u32 %v12610_v23, %v3999_v47  ;;  %v10131_v27 = vshrl.u32 %v3734_v51, 30  ;;  %v4001_v48 = vshrl.u32 %v12607_v12, %v4000_v61  ;;  %v4003_v41 = vshrl.u32 %v12608_v13, %v4000_v61 }
 0x457   : > { %v4006_v10 = vshrl.u32 %v12609_v4, %v4000_v61  ;;  %v12690_v19 = vand.u32 2147483647, %v9749_v53  ;;  %v3857_v2 = vand.u32 2147483647, %v3856_v30  ;;  %v4009_v32 = vshrl.u32 %v12610_v23, %v4000_v61 }
 0x458   : > { %12689 = vst [vmem:[#allocation32_spill] sm:$0xff] %v10131_v27  ;;  %v4012_v6 = vshrl.u32 %v12611_v49, %v4000_v61  ;;  %v4014_v51 = vshll.u32 %v12611_v49, %v3999_v47  ;;  %v3736_v31 = vshll.u32 %v10131_v27, 30  ;;  %v4004_v60 = vor.u32 %v4003_v41, %v4002_v29 }
 0x459   : > { %vm10138_vm12 = vcmp.le.f32.partialorder %v12690_v19, 0.7853982  ;;  %v4007_v37 = vor.u32 %v4006_v10, %v4005_v7  ;;  %v4015_v21 = vshrl.u32 %v12612_v59, %v4000_v61  ;;  %v3860_v56 = vmul.f32 %v3859_v25, %v3857_v2 }
 0x45a   : > { %v4010_v54 = vor.u32 %v4009_v32, %v4008_v62  ;;  %v4013_v18 = vor.u32 %v4012_v6, %v4011_v43  ;;  %vm4019_vm4 = vcmp.lt.s32.totalorder %v3998_v16, 3  ;;  %v10147_v19 = vpop.eup %7069  ;;  %v10149_v3 = vsub.s32 %v3733_v1, %v3736_v31 }
 0x45b   : > { %v4016_v30 = vor.u32 %v4015_v21, %v4014_v51  ;;  %vm4020_vm13 = vcmp.lt.s32.totalorder %v3998_v16, 4  ;;  %v4021_v35 = vsel %vm4017_vm10, %v4001_v48, %v4004_v60  ;;  %v10152_v50 = vpop.eup %7071  ;;  %v3861_v47 = vxor.u32 2147483648, %v3860_v56 }
 0x45c   : > { %v4022_v27 = vsel %vm4020_vm13, %v4010_v54, 2102212464  ;;  %v4025_v29 = vsel %vm4017_vm10, %v4004_v60, %v4007_v37  ;;  %v4026_v7 = vsel %vm4020_vm13, %v4013_v18, 920167782  ;;  %v3739_v61 = vsub.s32 0, %v10149_v3 }
 0x45d   : > { %v4023_v6 = vsel %vm4019_vm4, %v4007_v37, %v4022_v27  ;;  %v4027_v25 = vsel %vm4019_vm4, %v4010_v54, %v4026_v7  ;;  %v4029_v31 = vsel %vm4017_vm10, %v4007_v37, %v4010_v54  ;;  %vm12693_vm14 = vcmp.lt.s32.totalorder %v9749_v53, 0 }
 0x45e   : > { %v3862_v21 = vsel %vm12693_vm14, %v3861_v47, %v3860_v56  ;;  %vm12694_vm15 = vcmp.lt.s32.totalorder %v3998_v16, 2  ;;  %v4030_v62 = vsel %vm4020_vm13, %v4016_v30, 1326507024  ;;  %v3885_v43 = vshrl.u32 %v3884_v15, 23 }
 0x45f   : > { %v4028_v1 = vsel %vm12694_vm15, %v4025_v29, %v4027_v25  ;;  %7073 = vcosq.f32 %v10113_v55  ;;  %v6408_v60 = vmin.u32 %v3739_v61, %v10149_v3  ;;  %v4031_v48 = vsel %vm4019_vm4, %v4013_v18, %v4030_v62  ;;  %vm12695_vm5 = vmmov %vm12694_vm15 }
 0x460   : > { %v3889_v41 = vor.u32 8388608, %v10124_v8  ;;  %v4024_v27 = vsel %vm12695_vm5, %v4021_v35, %v4023_v6  ;;  %vm12696_vm3 = vmmov %vm12695_vm5  ;;  %v10169_v37 = vmul.u32.u64.low %v10119_v34, %v4028_v1  ;;  %v10170_v54 = vmul.u32.u64.high %v10119_v34, %v4028_v1, %v10169_v37 }
 0x461   : > { %v4032_v10 = vsel %vm12696_vm3, %v4029_v31, %v4031_v48  ;;  %v3865_v56 = vsel %vm10138_vm12, %v9749_v53, %v3862_v21  ;;  %v3741_v15 = vclz %v6408_v60  ;;  %v12697_v18 = vsel %vm9241_vm9, 0, %v9715_v33 }
 0x462   : > { %v10176_v2 = vmul.u32.u64.low %v10119_v34, %v4032_v10  ;;  %v10177_v32 = vmul.u32.u64.high %v10119_v34, %v4032_v10, %v10176_v2  ;;  %v2622_v35 = vadd.s32 3, %v12697_v18  ;;  %7075 = vsinq.f32 %v10113_v55 }
 0x463   : > { %v6415_v16 = vadd.s32 4294967169, %v3885_v43  ;;  %v12698_v8 = vsub.s32 4, %v9132_v39  ;;  %vm12699_vm15 = vcmp.lt.s32.totalorder %v9028_v24, 0  ;;  %v3729_v30 = vadd.s32 %v10080_v28, %v10093_v40 }
 0x464   : > { %v6409_v47 = vadd.s32 4294967294, %v3741_v15  ;;  %v4040_v29 = vmul.u32 %v10119_v34, %v4024_v27  ;;  %7077 = vcosq.f32 %v3865_v56  ;;  %v4043_v33 = vadd.s32 1, %v10170_v54 }
 0x465   : > { %v2512_v51 = vsel %vm12699_vm15, %v12698_v8, %v9132_v39  ;;  %v3891_v55 = vadd.s32 1, %v6415_v16  ;;  %7079 = vsinq.f32 %v3865_v56  ;;  %vm4042_vm5 = vc.u32 %v10177_v32, %v10169_v37 }
 0x466   : > { %v2514_v63 = vsel %vm9305_vm8, 0, %v2512_v51  ;;  %vm6410_vm9 = vcmp.lt.s32.totalorder %v6409_v47, 0  ;;  %v10196_v61 = vshll.u32 %v3889_v41, 8  ;;  %v4044_v28 = vsel %vm4042_vm5, %v4043_v33, %v10170_v54 }
 0x467   : > { %v2518_v7 = vadd.s32 3, %v2514_v63  ;;  %v3744_v39 = vsel %vm6410_vm9, 0, %v6409_v47  ;;  %vm3892_vm3 = vcmp.gt.s32.totalorder %v3891_v55, 0  ;;  %v4045_v6 = vadd.s32 %v4044_v28, %v4040_v29 }
 0x468   : > { %v3745_v34 = vsub.s32 32, %v3744_v39  ;;  %v3749_v26 = vsub.s32 4294967266, %v3744_v39  ;;  %v2522_v25 = vxor.u32 2147483648, %v9530_v11  ;;  %v10203_v31 = vadd.s32 %v10169_v37, %v10177_v32 }
 0x469   : > { %v10199_v40 = vand.u32 3, %v2518_v7  ;;  %v3893_v21 = vsel %vm3892_vm3, %v3891_v55, 0  ;;  %v2525_v1 = vxor.u32 2147483648, %v9522_v22  ;;  %v10206_v62 = vand.u32 3, %v2622_v35 }
 0x46a   : > { %v3746_v43 = vshll.u32 %v10149_v3, %v3744_v39  ;;  %v3747_v60 = vshrl.u32 %v3729_v30, %v3745_v34  ;;  %v3750_v48 = vadd.s32 127, %v3749_v26  ;;  %v4046_v41 = vadd.s32 536870912, %v4045_v6 }
 0x46b   : > { %v10209_v27 = vshrl.u32 %v3893_v21, 5  ;;  %v3895_v10 = vand.u32 31, %v3893_v21  ;;  %vm2521_vm8 = vcmp.eq.s32.totalorder %v10199_v40, 0  ;;  %vm2524_vm14 = vcmp.eq.s32.totalorder %v10199_v40, 2 }
 0x46c   : > { %v3748_v54 = vor.u32 %v3747_v60, %v3746_v43  ;;  %v3751_v37 = vshll.u32 %v3750_v48, 23  ;;  %v10213_v56 = vshrl.u32 %v4046_v41, 30  ;;  %v2523_v15 = vsel %vm2521_vm8, %v9522_v22, %v2522_v25  ;;  %v10216_v2 = vpop.eup %7073 }
 0x46d   : > { %v3896_v32 = vsub.s32 32, %v3895_v10  ;;  %v3898_v3 = vshll.u32 %v12607_v12, %v3895_v10  ;;  %v3901_v18 = vshll.u32 %v12608_v13, %v3895_v10  ;;  %v2526_v35 = vsel %vm2524_vm14, %v2525_v1, %v9530_v11 }
 0x46e   : > { %vm3675_vm10 = vcmp.lt.s32.totalorder %v9752_v14, 0  ;;  %v3752_v16 = vor.u32 4788187, %v3751_v37  ;;  %v3755_v8 = vcvt.s32.f32 %v3748_v54  ;;  %v4048_v51 = vshll.u32 %v10213_v56, 30 }
 0x46f   : > { %v3904_v30 = vshll.u32 %v12609_v4, %v3895_v10  ;;  %v3899_v47 = vshrl.u32 %v12608_v13, %v3896_v32  ;;  %v3902_v22 = vshrl.u32 %v12609_v4, %v3896_v32  ;;  %v3905_v29 = vshrl.u32 %v12610_v23, %v3896_v32  ;;  %v10228_v33 = vpop.eup %7075 }
 0x470   : > { %v3907_v63 = vshll.u32 %v12610_v23, %v3895_v10  ;;  %v3753_v55 = vand.u32 2147483647, %v3752_v16  ;;  %v10230_v11 = vsub.s32 %v4045_v6, %v4048_v51  ;;  %v3908_v7 = vshrl.u32 %v12611_v49, %v3896_v32 }
 0x471   : > { %v3910_v39 = vshll.u32 %v12611_v49, %v3895_v10  ;;  %vm2517_vm13 = vweird.f32 %v9028_v24  ;;  %v12700_v28 = vand.u32 2147483647, %v9752_v14  ;;  %v3900_v26 = vor.u32 %v3899_v47, %v3898_v3  ;;  %v10242_v43 = vpop.eup %7077 }
 0x472   : > { %v3903_v25 = vor.u32 %v3902_v22, %v3901_v18  ;;  %v3906_v21 = vor.u32 %v3905_v29, %v3904_v30  ;;  %v3911_v1 = vshrl.u32 %v12612_v59, %v3896_v32  ;;  %v3756_v6 = vmul.f32 %v3755_v8, %v3753_v55  ;;  %v10246_v41 = vpop.eup %7079 }
 0x473   : > { %vm10237_vm4 = vcmp.le.f32.partialorder %v12700_v28, 0.7853982  ;;  %v4051_v60 = vsub.s32 0, %v10230_v11  ;;  %v3909_v48 = vor.u32 %v3908_v7, %v3907_v63  ;;  %vm3913_vm15 = vcmp.lt.s32.totalorder %v10209_v27, 1 }
 0x474   : > { %v3897_v10 = vshrl.u32 %v12607_v12, %v3896_v32  ;;  %v3912_v54 = vor.u32 %v3911_v1, %v3910_v39  ;;  %vm3914_vm9 = vcmp.lt.s32.totalorder %v10209_v27, 2  ;;  %vm3916_vm5 = vcmp.lt.s32.totalorder %v10209_v27, 4 }
 0x475   : > { %v3757_v37 = vxor.u32 2147483648, %v3756_v6  ;;  %v6420_v3 = vmin.u32 %v4051_v60, %v10230_v11  ;;  %v3918_v18 = vsel %vm3916_vm5, %v3906_v21, 2102212464  ;;  %v3921_v16 = vsel %vm3913_vm15, %v3900_v26, %v3903_v25 }
 0x476   : > { %vm3915_vm3 = vcmp.lt.s32.totalorder %v10209_v27, 3  ;;  %v3922_v8 = vsel %vm3916_vm5, %v3909_v48, 920167782  ;;  %v3925_v51 = vsel %vm3913_vm15, %v3903_v25, %v3906_v21  ;;  %v3926_v30 = vsel %vm3916_vm5, %v3912_v54, 1326507024 }
 0x477   : > { %v4053_v47 = vclz %v6420_v3  ;;  %v3917_v22 = vsel %vm3913_vm15, %v3897_v10, %v3900_v26  ;;  %v3919_v29 = vsel %vm3915_vm3, %v3903_v25, %v3918_v18  ;;  %v3923_v63 = vsel %vm3915_vm3, %v3906_v21, %v3922_v8 }
 0x478   : > { %vm2621_vm8 = vweird.f32 %v9023_v45  ;;  %v3758_v32 = vsel %vm3675_vm10, %v3757_v37, %v3756_v6  ;;  %v3924_v55 = vsel %vm3914_vm9, %v3921_v16, %v3923_v63  ;;  %v3927_v7 = vsel %vm3915_vm3, %v3909_v48, %v3926_v30 }
 0x479   : > { %vm2520_vm14 = vcmp.lt.s32.totalorder %v10199_v40, 2  ;;  %v6421_v39 = vadd.s32 4294967294, %v4053_v47  ;;  %v3928_v28 = vsel %vm3914_vm9, %v3925_v51, %v3927_v7  ;;  %vm2624_vm15 = vcmp.lt.s32.totalorder %v10206_v62, 2 }
 0x47a   : > { %v2527_v1 = vsel %vm2520_vm14, %v2523_v15, %v2526_v35  ;;  %v3920_v26 = vsel %vm3914_vm9, %v3917_v22, %v3919_v29  ;;  %v10265_v25 = vmul.u32.u64.low %v10196_v61, %v3928_v28  ;;  %v10266_v21 = vmul.u32.u64.high %v10196_v61, %v3928_v28, %v10265_v25 }
 0x47b   : > { %v2528_v6 = vsel %vm2517_vm13, nan, %v2527_v1  ;;  %v3761_v40 = vsel %vm10237_vm4, %v9752_v14, %v3758_v32  ;;  %vm6422_vm5 = vcmp.lt.s32.totalorder %v6421_v39, 0  ;;  %vm12703_vm3 = vcmask 261120   ;;  %v12705_v32 = vld [vmem:[#allocation34_spill] sm:$0xff] }
 0x47c   : > { %v10274_v60 = vmul.u32.u64.low %v10196_v61, %v3924_v55  ;;  %v10275_v15 = vmul.u32.u64.high %v10196_v61, %v3924_v55, %v10274_v60  ;;  %6670 = vmatprep.mubr.msk.f32.mxu0 %vm12703_vm3, %v2528_v6  ;;  %v4056_v27 = vsel %vm6422_vm5, 0, %v6421_v39  ;;  %vm2625_vm9 = vcmp.eq.s32.totalorder %v10206_v62, 0 }
 0x47d   : > { %v2626_v35 = vxor.u32 2147483648, %v9369_v58  ;;  %v2629_v24 = vxor.u32 2147483648, %v9359_v36  ;;  %v4057_v48 = vsub.s32 32, %v4056_v27  ;;  %v4061_v10 = vsub.s32 4294967266, %v4056_v27 }
 0x47e   : > { %vm2628_vm13 = vcmp.eq.s32.totalorder %v10206_v62, 2  ;;  %v2719_v54 = vsub.s32 4, %v9277_v52  ;;  %v4058_v37 = vshll.u32 %v10230_v11, %v4056_v27  ;;  %vm3938_vm14 = vc.u32 %v10266_v21, %v10274_v60  ;;  %v12710_v27 = vld [vmem:[#allocation6_spill] sm:$0xff] }
 0x47f   : > { %v2627_v3 = vsel %vm2625_vm9, %v9359_v36, %v2626_v35  ;;  %v2630_v18 = vsel %vm2628_vm13, %v2629_v24, %v9369_v58  ;;  %v4059_v16 = vshrl.u32 %v10203_v31, %v4057_v48  ;;  %v4062_v8 = vadd.s32 127, %v4061_v10 }
 0x480   : > { %v3939_v51 = vadd.s32 1, %v10275_v15  ;;  %v2631_v30 = vsel %vm2624_vm15, %v2627_v3, %v2630_v18  ;;  %7081 = vcosq.f32 %v3761_v40  ;;  %v3936_v47 = vmul.u32 %v10196_v61, %v3920_v26 }
 0x481   : > { %v2632_v11 = vsel %vm2621_vm8, nan, %v2631_v30  ;;  %vm12704_vm5 = vcmp.lt.s32.totalorder %v9108_v38, 0  ;;  %v4060_v22 = vor.u32 %v4059_v16, %v4058_v37  ;;  %v4063_v58 = vshll.u32 %v4062_v8, 23  ;;  %v12714_v8 = vld [vmem:[#allocation31_spill] sm:$0xff] }
 0x482   : > { %v2720_v36 = vsel %vm12704_vm5, %v2719_v54, %v9277_v52  ;;  %v3940_v31 = vsel %vm3938_vm14, %v3939_v51, %v10275_v15  ;;  %6671 = vmatmul.mubr.msk.f32.vlgmr.msra.gmra.mxu0 %vm12703_vm3, %v2632_v11  ;;  %7083 = vsinq.f32 %v3761_v40  ;;  %vm12338_vm15 = vcmp.lt.s32.totalorder %v9904_v42, 0  ;;  %v12709_v40 = vld [vmem:[#allocation14_spill] sm:$0xff] }
 0x483   : > { %v2722_v62 = vsel %vm9460_vm7, 0, %v2720_v36  ;;  %v3941_v61 = vadd.s32 %v3940_v31, %v3936_v47  ;;  %v2823_v45 = vsub.s32 4, %v9207_v46  ;;  %v4064_v63 = vor.u32 4788187, %v4063_v58  ;;  %v12716_v31 = vld [vmem:[#allocation37_spill] sm:$0xff] }
 0x484   : > { %v2726_v29 = vadd.s32 3, %v2722_v62  ;;  %vm2725_vm8 = vweird.f32 %v9108_v38  ;;  %v2730_v52 = vxor.u32 2147483648, %v9548_v9  ;;  %v2733_v55 = vxor.u32 2147483648, %v12705_v32  ;;  %v12718_v38 = vld [vmem:[#allocation13_spill] sm:$0xff] }
 0x485   : > { %v4067_v7 = vcvt.s32.f32 %v4060_v22  ;;  %v3942_v39 = vadd.s32 536870912, %v3941_v61  ;;  %vm12707_vm7 = vcmp.lt.s32.totalorder %v12706_v44, 0  ;;  %v4065_v26 = vand.u32 2147483647, %v4064_v63 }
 0x486   : > { %v2727_v28 = vand.u32 3, %v2726_v29  ;;  %v2824_v1 = vsel %vm12707_vm7, %v2823_v45, %v9207_v46  ;;  %v2834_v15 = vxor.u32 2147483648, %v12709_v40  ;;  %v2927_v35 = vsub.s32 4, %v12710_v27  ;;  %v12717_v29 = vld [vmem:[#allocation10_spill] sm:$0xff] }
 0x487   : > { %v2826_v6 = vsel %vm9420_vm6, 0, %v2824_v1  ;;  %v12711_v24 = vand.u32 2147483647, %v9904_v42  ;;  %v10321_v10 = vshrl.u32 %v3942_v39, 30  ;;  %v4068_v46 = vmul.f32 %v4067_v7, %v4065_v26 }
 0x488   : > { %vm2728_vm13 = vcmp.lt.s32.totalorder %v2727_v28, 2  ;;  %vm2729_vm14 = vcmp.eq.s32.totalorder %v2727_v28, 0  ;;  %vm2732_vm5 = vcmp.eq.s32.totalorder %v2727_v28, 2  ;;  %v2830_v3 = vadd.s32 3, %v2826_v6  ;;  %v12719_v28 = vld [vmem:[#allocation7_spill] sm:$0xff] }
 0x489   : > { %vm10317_vm9 = vcmp.le.f32.partialorder %v12711_v24, 0.7853982  ;;  %v2731_v54 = vsel %vm2729_vm14, %v12705_v32, %v2730_v52  ;;  %v2734_v37 = vsel %vm2732_vm5, %v2733_v55, %v9548_v9  ;;  %v3944_v18 = vshll.u32 %v10321_v10, 30 }
 0x48a   : > { %v2735_v16 = vsel %vm2728_vm13, %v2731_v54, %v2734_v37  ;;  %v2837_v51 = vxor.u32 2147483648, %v12714_v8  ;;  %vm12715_vm6 = vcmp.lt.s32.totalorder %v9251_v57, 0  ;;  %v4069_v47 = vxor.u32 2147483648, %v4068_v46  ;;  %v12723_v37 = vld [vmem:[#allocation28_spill] sm:$0xff] }
 0x48b   : > { %v2928_v30 = vsel %vm12715_vm6, %v2927_v35, %v12710_v27  ;;  %v2736_v11 = vsel %vm2725_vm8, nan, %v2735_v16  ;;  %v2831_v36 = vand.u32 3, %v2830_v3  ;;  %v10334_v58 = vsub.s32 %v3941_v61, %v3944_v18  ;;  %vm12722_vm6 = vmmov %vm12703_vm3  ;;  %v12724_v18 = vld [vmem:[#allocation22_spill] sm:$0xff] }
 0x48c   : > { %v2930_v22 = vsel %vm9591_vm11, 0, %v2928_v30  ;;  %6673 = vmatprep.mubr.msk.f32.mxu0 %vm12703_vm3, %v2736_v11  ;;  %v2938_v62 = vxor.u32 2147483648, %v12716_v31  ;;  %v3031_v45 = vsub.s32 4, %v12717_v29  ;;  %v4070_v63 = vsel %vm12338_vm15, %v4069_v47, %v4068_v46 }
 0x48d   : > { %v2934_v9 = vadd.s32 3, %v2930_v22  ;;  %vm2833_vm7 = vcmp.eq.s32.totalorder %v2831_v36, 0  ;;  %vm2836_vm13 = vcmp.eq.s32.totalorder %v2831_v36, 2  ;;  %v2941_v52 = vxor.u32 2147483648, %v12718_v38  ;;  %v10345_v55 = vpop.eup %7081  ;;  %v12727_v22 = vld [vmem:[#allocation21_spill] sm:$0xff] }
 0x48e   : > { %v3947_v32 = vsub.s32 0, %v10334_v58  ;;  %vm2832_vm8 = vcmp.lt.s32.totalorder %v2831_v36, 2  ;;  %v2835_v0 = vsel %vm2833_vm7, %v12714_v8, %v2834_v15  ;;  %v2838_v61 = vsel %vm2836_vm13, %v2837_v51, %v12709_v40  ;;  %v12725_v8 = vld [vmem:[#allocation9_spill] sm:$0xff] }
 0x48f   : > { %vm2829_vm11 = vweird.f32 %v12706_v44  ;;  %v2839_v7 = vsel %vm2832_vm8, %v2835_v0, %v2838_v61  ;;  %v2935_v39 = vand.u32 3, %v2934_v9  ;;  %vm12720_vm14 = vcmp.lt.s32.totalorder %v12719_v28, 0  ;;  %v10355_v27 = vpop.eup %7083 }
 0x490   : > { %v3032_v1 = vsel %vm12720_vm14, %v3031_v45, %v12717_v29  ;;  %v6416_v26 = vmin.u32 %v3947_v32, %v10334_v58  ;;  %v2840_v25 = vsel %vm2829_vm11, nan, %v2839_v7  ;;  %vm2933_vm5 = vweird.f32 %v9251_v57  ;;  %v12731_v7 = vld [vmem:[#allocation38_spill] sm:$0xff] }
 0x491   : > { %v3034_v15 = vsel %vm9504_vm2, 0, %v3032_v1  ;;  %v10360_v44 = vsel %vm10317_vm9, %v9904_v42, %v4070_v63  ;;  %6674 = vmatmul.mubr.msk.f32.gmra.mxu0 %vm12722_vm6, %v2840_v25  ;;  %vm2936_vm3 = vcmp.lt.s32.totalorder %v2935_v39, 2  ;;  %vm2937_vm7 = vcmp.eq.s32.totalorder %v2935_v39, 0  ;;  %vm12726_vm2 = vmmov %vm12722_vm6 }
 0x492   : > { %vm2940_vm13 = vcmp.eq.s32.totalorder %v2935_v39, 2  ;;  %v3949_v40 = vclz %v6416_v26  ;;  %v2939_v35 = vsel %vm2937_vm7, %v12718_v38, %v2938_v62  ;;  %v3038_v46 = vadd.s32 3, %v3034_v15  ;;  %v12752_v15 = vld [vmem:[#allocation12_spill] sm:$0xff] }
 0x493   : > { %v2942_v24 = vsel %vm2940_vm13, %v2941_v52, %v12716_v31  ;;  %v3042_v3 = vxor.u32 2147483648, %v12723_v37  ;;  %v3045_v16 = vxor.u32 2147483648, %v12724_v18  ;;  %v3135_v51 = vsub.s32 4, %v12725_v8  ;;  %v12729_v31 = vld [vmem:[#allocation11_spill] sm:$0xff]  ;;  %vm12734_vm13 = vmmov %vm12726_vm2 }
 0x494   : > { %v2943_v54 = vsel %vm2936_vm3, %v2939_v35, %v2942_v24  ;;  %v3937_v30 = vadd.s32 %v10274_v60, %v10266_v21  ;;  %v6417_v47 = vadd.s32 4294967294, %v3949_v40  ;;  %v3039_v36 = vand.u32 3, %v3038_v46  ;;  %v12736_v46 = vld [vmem:[#allocation24_spill] sm:$0xff] }
 0x495   : > { %v2944_v11 = vsel %vm2933_vm5, nan, %v2943_v54  ;;  %7085 = vcosq.f32 %v10360_v44  ;;  %vm3037_vm8 = vweird.f32 %v12719_v28  ;;  %vm12728_vm11 = vcmp.lt.s32.totalorder %v12727_v22, 0  ;;  %v12732_v28 = vld [vmem:[#allocation25_spill] sm:$0xff] }
 0x496   : > { %6676 = vmatprep.mubr.msk.f32.mxu0 %vm12726_vm2, %v2944_v11  ;;  %v3136_v9 = vsel %vm12728_vm11, %v3135_v51, %v12725_v8  ;;  %v3239_v62 = vsub.s32 4, %v12729_v31  ;;  %vm6418_vm14 = vcmp.lt.s32.totalorder %v6417_v47, 0  ;;  %vm3040_vm6 = vcmp.lt.s32.totalorder %v3039_v36, 2  ;;  %v12738_v8 = vld [vmem:[#allocation27_spill] sm:$0xff] }
 0x497   : > { %vm3041_vm3 = vcmp.eq.s32.totalorder %v3039_v36, 0  ;;  %vm3044_vm7 = vcmp.eq.s32.totalorder %v3039_v36, 2  ;;  %v3952_v21 = vsel %vm6418_vm14, 0, %v6417_v47  ;;  %v3138_v45 = vsel %vm9724_vm1, 0, %v3136_v9 }
 0x498   : > { %v3043_v57 = vsel %vm3041_vm3, %v12724_v18, %v3042_v3  ;;  %v3046_v60 = vsel %vm3044_vm7, %v3045_v16, %v12723_v37  ;;  %v3953_v63 = vsub.s32 32, %v3952_v21  ;;  %v3957_v38 = vsub.s32 4294967266, %v3952_v21  ;;  %v12737_v18 = vld [vmem:[#allocation36_spill] sm:$0xff] }
 0x499   : > { %v3047_v52 = vsel %vm3040_vm6, %v3043_v57, %v3046_v60  ;;  %v3146_v32 = vxor.u32 2147483648, %v9951_v5  ;;  %v3142_v61 = vadd.s32 3, %v3138_v45  ;;  %v3149_v39 = vxor.u32 2147483648, %v12731_v7 }
 0x49a   : > { %v3048_v0 = vsel %vm3037_vm8, nan, %v3047_v52  ;;  %vm12733_vm5 = vcmp.lt.s32.totalorder %v12732_v28, 0  ;;  %v3954_v26 = vshll.u32 %v10334_v58, %v3952_v21  ;;  %v3955_v25 = vshrl.u32 %v3937_v30, %v3953_v63  ;;  %v12743_v63 = vld [vmem:[#allocation30_spill] sm:$0xff] }
 0x49b   : > { %v3240_v1 = vsel %vm12733_vm5, %v3239_v62, %v12729_v31  ;;  %v3958_v6 = vadd.s32 127, %v3957_v38  ;;  %6677 = vmatmul.mubr.msk.f32.gmra.mxu0 %vm12734_vm13, %v3048_v0  ;;  %vm3141_vm1 = vweird.f32 %v12727_v22  ;;  %v3143_v35 = vand.u32 3, %v3142_v61  ;;  %vm12742_vm5 = vmmov %vm12734_vm13  ;;  %v12745_v38 = vld [vmem:[#allocation23_spill] sm:$0xff]  ;;  %v12746_v61 = vld [vmem:[#allocation17_spill] sm:$0xff] }
 0x49c   : > { %v3242_v40 = vsel %vm9637_vm0, 0, %v3240_v1  ;;  %v3250_v54 = vxor.u32 2147483648, %v12736_v46  ;;  %v3956_v37 = vor.u32 %v3955_v25, %v3954_v26  ;;  %v3253_v16 = vxor.u32 2147483648, %v12737_v18  ;;  %v12750_v26 = vld [vmem:[#allocation16_spill] sm:$0xff] }
 0x49d   : > { %v3246_v24 = vadd.s32 3, %v3242_v40  ;;  %v3959_v3 = vshll.u32 %v3958_v6, 23  ;;  %v3343_v51 = vsub.s32 4, %v12738_v8  ;;  %vm12339_vm2 = vcmp.lt.s32.totalorder %v10098_v17, 0 }
 0x49e   : > { %vm3144_vm8 = vcmp.lt.s32.totalorder %v3143_v35, 2  ;;  %vm3145_vm11 = vcmp.eq.s32.totalorder %v3143_v35, 0  ;;  %vm3148_vm14 = vcmp.eq.s32.totalorder %v3143_v35, 2  ;;  %v12739_v30 = vand.u32 2147483647, %v10098_v17 }
 0x49f   : > { %v3247_v58 = vand.u32 3, %v3246_v24  ;;  %v3960_v11 = vor.u32 4788187, %v3959_v3  ;;  %v3963_v36 = vcvt.s32.f32 %v3956_v37  ;;  %v3147_v9 = vsel %vm3145_vm11, %v12731_v7, %v3146_v32  ;;  %v12755_v24 = vld [vmem:[#allocation43_spill] sm:$0xff]  ;;  %v12756_v3 = vld [vmem:[#allocation5_spill] sm:$0xff] }
 0x4a0   : > { %vm10399_vm0 = vcmp.le.f32.partialorder %v12739_v30, 0.7853982  ;;  %v3150_v31 = vsel %vm3148_vm14, %v3149_v39, %v9951_v5  ;;  %vm3245_vm13 = vweird.f32 %v12732_v28  ;;  %vm12744_vm11 = vcmp.lt.s32.totalorder %v12743_v63, 0  ;;  %v12749_v28 = vld [vmem:[#allocation26_spill] sm:$0xff] }
 0x4a1   : > { %v3151_v62 = vsel %vm3144_vm8, %v3147_v9, %v3150_v31  ;;  %vm3248_vm6 = vcmp.lt.s32.totalorder %v3247_v58, 2  ;;  %vm3249_vm3 = vcmp.eq.s32.totalorder %v3247_v58, 0  ;;  %vm3252_vm7 = vcmp.eq.s32.totalorder %v3247_v58, 2  ;;  %vm12748_vm8 = vmmov %vm12742_vm5  ;;  %v12758_v58 = vld [vmem:[#allocation39_spill] sm:$0xff] }
 0x4a2   : > { %v3961_v21 = vand.u32 2147483647, %v3960_v11  ;;  %v3152_v57 = vsel %vm3141_vm1, nan, %v3151_v62  ;;  %v3251_v60 = vsel %vm3249_vm3, %v12737_v18, %v3250_v54  ;;  %v3254_v29 = vsel %vm3252_vm7, %v3253_v16, %v12736_v46  ;;  %v10415_v32 = vpop.eup %7085  ;;  %v12760_v11 = vld [vmem:[#allocation40_spill] sm:$0xff] }
 0x4a3   : > { %6679 = vmatprep.mubr.msk.f32.mxu0 %vm12742_vm5, %v3152_v57  ;;  %v3255_v45 = vsel %vm3248_vm6, %v3251_v60, %v3254_v29  ;;  %v3344_v5 = vsel %vm12744_vm11, %v3343_v51, %v12738_v8  ;;  %v3447_v52 = vsub.s32 4, %v12745_v38  ;;  %7087 = vsinq.f32 %v10360_v44  ;;  %v12753_v44 = vld [vmem:[#allocation42_spill] sm:$0xff]  ;;  %v12757_v8 = vld [vmem:[#allocation33_spill] sm:$0xff]  ;;  %v12761_v60 = vld [vmem:[#allocation8_spill] sm:$0xff] }
 0x4a4   : > { %v3964_v22 = vmul.f32 %v3963_v36, %v3961_v21  ;;  %v3256_v0 = vsel %vm3245_vm13, nan, %v3255_v45  ;;  %vm12747_vm1 = vnez %v12746_v61  ;;  %vm3349_vm14 = vweird.f32 %v12743_v63  ;;  %v12763_v45 = vld [vmem:[#allocation18_spill] sm:$0xff]  ;;  %v12766_v61 = vld [vmem:[#allocation41_spill] sm:$0xff] }
 0x4a5   : > { %v3346_v7 = vsel %vm12747_vm1, 0, %v3344_v5  ;;  %6680 = vmatmul.mubr.msk.f32.gmra.mxu0 %vm12748_vm8, %v3256_v0  ;;  %v3354_v1 = vxor.u32 2147483648, %v12749_v28  ;;  %vm12751_vm6 = vcmp.lt.s32.totalorder %v12750_v26, 0  ;;  %v3357_v40 = vxor.u32 2147483648, %v12752_v15 }
 0x4a6   : > { %v3350_v39 = vadd.s32 3, %v3346_v7  ;;  %v3448_v25 = vsel %vm12751_vm6, %v3447_v52, %v12745_v38  ;;  %v3965_v6 = vxor.u32 2147483648, %v3964_v22  ;;  %vm12754_vm3 = vnez %v12753_v44 }
 0x4a7   : > { %v3450_v35 = vsel %vm12754_vm3, 0, %v3448_v25  ;;  %v3551_v46 = vsub.s32 4, %v12755_v24  ;;  %vm3453_vm7 = vweird.f32 %v12750_v26  ;;  %v3458_v18 = vxor.u32 2147483648, %v12756_v3 }
 0x4a8   : > { %v3351_v54 = vand.u32 3, %v3350_v39  ;;  %v3454_v37 = vadd.s32 3, %v3450_v35  ;;  %v3966_v16 = vsel %vm12339_vm2, %v3965_v6, %v3964_v22  ;;  %v3461_v51 = vxor.u32 2147483648, %v12757_v8 }
 0x4a9   : > { %vm12759_vm5 = vcmp.lt.s32.totalorder %v12758_v58, 0  ;;  %v3655_v36 = vsub.s32 4, %v12760_v11  ;;  %v3969_v9 = vsel %vm10399_vm0, %v10098_v17, %v3966_v16  ;;  %vm12762_vm8 = vnez %v12761_v60 }
 0x4aa   : > { %v3552_v30 = vsel %vm12759_vm5, %v3551_v46, %v12755_v24  ;;  %vm3352_vm13 = vcmp.lt.s32.totalorder %v3351_v54, 2  ;;  %vm3353_vm11 = vcmp.eq.s32.totalorder %v3351_v54, 0  ;;  %vm3356_vm1 = vcmp.eq.s32.totalorder %v3351_v54, 2  ;;  %v12770_v46 = vld [vmem:[#allocation44_spill] sm:$0xff] }
 0x4ab   : > { %7089 = vcosq.f32 %v3969_v9  ;;  %v3355_v31 = vsel %vm3353_vm11, %v12752_v15, %v3354_v1  ;;  %v3358_v62 = vsel %vm3356_vm1, %v3357_v40, %v12749_v28  ;;  %v3455_v21 = vand.u32 3, %v3454_v37  ;;  %v12768_v40 = vld [vmem:[#allocation32_spill] sm:$0xff] }
 0x4ac   : > { %7091 = vsinq.f32 %v3969_v9  ;;  %v3359_v57 = vsel %vm3352_vm13, %v3355_v31, %v3358_v62  ;;  %v3554_v29 = vsel %vm12762_vm8, 0, %v3552_v30  ;;  %vm3557_vm6 = vweird.f32 %v12758_v58 }
 0x4ad   : > { %vm12764_vm3 = vcmp.lt.s32.totalorder %v12763_v45, 0  ;;  %v3360_v38 = vsel %vm3349_vm14, nan, %v3359_v57  ;;  %vm3456_vm5 = vcmp.lt.s32.totalorder %v3455_v21, 2  ;;  %vm3457_vm15 = vcmp.eq.s32.totalorder %v3455_v21, 0 }
 0x4ae   : > { %v3656_v5 = vsel %vm12764_vm3, %v3655_v36, %v12760_v11  ;;  %vm3460_vm11 = vcmp.eq.s32.totalorder %v3455_v21, 2  ;;  %vm12765_vm2 = vcmask 261120   ;;  %v3459_v52 = vsel %vm3457_vm15, %v12757_v8, %v3458_v18 }
 0x4af   : > { %6682 = vmatprep.mubr.msk.f32.mxu0 %vm12765_vm2, %v3360_v38  ;;  %v3462_v22 = vsel %vm3460_vm11, %v3461_v51, %v12756_v3  ;;  %v3558_v0 = vadd.s32 3, %v3554_v29  ;;  %vm12767_vm13 = vnez %v12766_v61  ;;  %v3562_v28 = vxor.u32 2147483648, %v10228_v33  ;;  %vm12769_vm15 = vmmov %vm12765_vm2 }
 0x4b0   : > { %v3658_v7 = vsel %vm12767_vm13, 0, %v3656_v5  ;;  %v3463_v39 = vsel %vm3456_vm5, %v3459_v52, %v3462_v22  ;;  %v3565_v1 = vxor.u32 2147483648, %v10216_v2  ;;  %v3666_v15 = vxor.u32 2147483648, %v10152_v50  ;;  %v10467_v37 = vpop.eup %7087  ;;  %vm12772_vm11 = vmmov %vm12769_vm15 }
 0x4b1   : > { %v3662_v63 = vadd.s32 3, %v3658_v7  ;;  %v3464_v25 = vsel %vm3453_vm7, nan, %v3463_v39  ;;  %v3559_v6 = vand.u32 3, %v3558_v0  ;;  %v3759_v44 = vsub.s32 4, %v12768_v40 }
 0x4b2   : > { %6683 = vmatmul.mubr.msk.f32.gmra.mxu0 %vm12769_vm15, %v3464_v25  ;;  %vm3661_vm2 = vweird.f32 %v12763_v45  ;;  %v3669_v24 = vxor.u32 2147483648, %v10147_v19  ;;  %v3863_v54 = vsub.s32 4, %v12770_v46  ;;  %v3770_v9 = vxor.u32 2147483648, %v10355_v27 }
 0x4b3   : > { %v3663_v35 = vand.u32 3, %v3662_v63  ;;  %vm3560_vm14 = vcmp.lt.s32.totalorder %v3559_v6, 2  ;;  %vm3561_vm1 = vcmp.eq.s32.totalorder %v3559_v6, 0  ;;  %vm3564_vm8 = vcmp.eq.s32.totalorder %v3559_v6, 2 }
 0x4b4   : > { %v3760_v26 = vsel %vm3675_vm10, %v3759_v44, %v12768_v40  ;;  %v3563_v3 = vsel %vm3561_vm1, %v10216_v2, %v3562_v28  ;;  %v3566_v18 = vsel %vm3564_vm8, %v3565_v1, %v10228_v33  ;;  %vm12771_vm10 = vcmp.lt.s32.totalorder %v9749_v53, 0 }
 0x4b5   : > { %vm3664_vm7 = vcmp.lt.s32.totalorder %v3663_v35, 2  ;;  %vm3665_vm3 = vcmp.eq.s32.totalorder %v3663_v35, 0  ;;  %v3567_v16 = vsel %vm3560_vm14, %v3563_v3, %v3566_v18  ;;  %vm3668_vm5 = vcmp.eq.s32.totalorder %v3663_v35, 2 }
 0x4b6   : > { %v3667_v8 = vsel %vm3665_vm3, %v10147_v19, %v3666_v15  ;;  %v3762_v51 = vsel %vm10237_vm4, 0, %v3760_v26  ;;  %v3568_v30 = vsel %vm3557_vm6, nan, %v3567_v16  ;;  %v3670_v11 = vsel %vm3668_vm5, %v3669_v24, %v10152_v50  ;;  %vm12773_vm4 = vmmov %vm12772_vm11 }
 0x4b7   : > { %v3766_v36 = vadd.s32 3, %v3762_v51  ;;  %v3864_v2 = vsel %vm12771_vm10, %v3863_v54, %v12770_v46  ;;  %6685 = vmatprep.mubr.msk.f32.mxu0 %vm12772_vm11, %v3568_v30  ;;  %v3671_v33 = vsel %vm3664_vm7, %v3667_v8, %v3670_v11  ;;  %v3773_v19 = vxor.u32 2147483648, %v10345_v55  ;;  %vm12775_vm7 = vmmov %vm12773_vm4 }
 0x4b8   : > { %v3866_v34 = vsel %vm10138_vm12, 0, %v3864_v2  ;;  %v3672_v58 = vsel %vm3661_vm2, nan, %v3671_v33  ;;  %v7090_v62 = vpop.eup %7089  ;;  %vm3765_vm6 = vweird.f32 %v9752_v14  ;;  %v3874_v21 = vxor.u32 2147483648, %v10246_v41  ;;  %vm12777_vm10 = vmmov %vm12773_vm4 }
 0x4b9   : > { %v3767_v31 = vand.u32 3, %v3766_v36  ;;  %v3870_v50 = vadd.s32 3, %v3866_v34  ;;  %6686 = vmatmul.mubr.msk.f32.gmra.mxu0 %vm12773_vm4, %v3672_v58  ;;  %v3877_v57 = vxor.u32 2147483648, %v10242_v43  ;;  %v3967_v60 = vsub.s32 4, %v10321_v10  ;;  %v7092_v29 = vpop.eup %7091 }
 0x4ba   : > { %v4071_v45 = vsub.s32 4, %v10213_v56  ;;  %vm12774_vm2 = vcmp.lt.s32.totalorder %v10098_v17, 0  ;;  %vm3869_vm3 = vweird.f32 %v9749_v53  ;;  %vm12776_vm5 = vcmp.lt.s32.totalorder %v9904_v42, 0 }
 0x4bb   : > { %vm3769_vm13 = vcmp.eq.s32.totalorder %v3767_v31, 0  ;;  %vm3772_vm15 = vcmp.eq.s32.totalorder %v3767_v31, 2  ;;  %v3871_v20 = vand.u32 3, %v3870_v50  ;;  %vm3768_vm12 = vcmp.lt.s32.totalorder %v3767_v31, 2 }
 0x4bc   : > { %v3771_v5 = vsel %vm3769_vm13, %v10345_v55, %v3770_v9  ;;  %v3774_v38 = vsel %vm3772_vm15, %v3773_v19, %v10355_v27  ;;  %v3968_v52 = vsel %vm12774_vm2, %v3967_v60, %v10321_v10  ;;  %v4072_v39 = vsel %vm12776_vm5, %v4071_v45, %v10213_v56 }
 0x4bd   : > { %v3775_v22 = vsel %vm3768_vm12, %v3771_v5, %v3774_v38  ;;  %vm3872_vm14 = vcmp.lt.s32.totalorder %v3871_v20, 2  ;;  %vm3873_vm1 = vcmp.eq.s32.totalorder %v3871_v20, 0  ;;  %vm3876_vm8 = vcmp.eq.s32.totalorder %v3871_v20, 2  ;;  %vm12778_vm12 = vmmov %vm12775_vm7 }
 0x4be   : > { %v3776_v0 = vsel %vm3765_vm6, nan, %v3775_v22  ;;  %v3875_v61 = vsel %vm3873_vm1, %v10242_v43, %v3874_v21  ;;  %v3878_v7 = vsel %vm3876_vm8, %v3877_v57, %v10246_v41  ;;  %v3970_v55 = vsel %vm10399_vm0, 0, %v3968_v52 }
 0x4bf   : > { %6688 = vmatprep.mubr.msk.f32.mxu0 %vm12775_vm7, %v3776_v0  ;;  %v3879_v27 = vsel %vm3872_vm14, %v3875_v61, %v3878_v7  ;;  %v3974_v10 = vadd.s32 3, %v3970_v55  ;;  %v3978_v14 = vxor.u32 2147483648, %v7092_v29  ;;  %v3981_v1 = vxor.u32 2147483648, %v7090_v62  ;;  %vm12779_vm14 = vmmov %vm12775_vm7 }
 0x4c0   : > { %v3880_v28 = vsel %vm3869_vm3, nan, %v3879_v27  ;;  %v4074_v43 = vsel %vm10317_vm9, 0, %v4072_v39  ;;  %v4082_v63 = vxor.u32 2147483648, %v10467_v37  ;;  %v4085_v53 = vxor.u32 2147483648, %v10415_v32 }
 0x4c1   : > { %6689 = vmatmul.mubr.msk.f32.gmra.mxu0 %vm12777_vm10, %v3880_v28  ;;  %v3975_v41 = vand.u32 3, %v3974_v10  ;;  %v4078_v47 = vadd.s32 3, %v4074_v43  ;;  %vm3973_vm6 = vweird.f32 %v10098_v17  ;;  %vm4077_vm2 = vweird.f32 %v9904_v42  ;;  %v10526_v17 = vld [vmem:[%s12143_s6] ss:$0 sm:$0xff] }
 0x4c3   : > { %vm3977_vm0 = vcmp.eq.s32.totalorder %v3975_v41, 0  ;;  %vm3980_vm11 = vcmp.eq.s32.totalorder %v3975_v41, 2  ;;  %v4079_v25 = vand.u32 3, %v4078_v47  ;;  %vm3976_vm4 = vcmp.lt.s32.totalorder %v3975_v41, 2 }
 0x4c4   : > { %v3979_v6 = vsel %vm3977_vm0, %v7090_v62, %v3978_v14  ;;  %v3982_v56 = vsel %vm3980_vm11, %v3981_v1, %v7092_v29 }
 0x4c5   : > { %v3983_v15 = vsel %vm3976_vm4, %v3979_v6, %v3982_v56  ;;  %vm4081_vm13 = vcmp.eq.s32.totalorder %v4079_v25, 0  ;;  %vm4084_vm15 = vcmp.eq.s32.totalorder %v4079_v25, 2  ;;  %vm4080_vm9 = vcmp.lt.s32.totalorder %v4079_v25, 2 }
 0x4c6   : > { %v3984_v48 = vsel %vm3973_vm6, nan, %v3983_v15  ;;  %v4083_v40 = vsel %vm4081_vm13, %v10415_v32, %v4082_v63  ;;  %v4086_v44 = vsel %vm4084_vm15, %v4085_v53, %v10467_v37 }
 0x4c7   : > { %6691 = vmatprep.mubr.msk.f32.mxu0 %vm12778_vm12, %v3984_v48  ;;  %v4087_v35 = vsel %vm4080_vm9, %v4083_v40, %v4086_v44 }
 0x4c8   : > { %v4088_v24 = vsel %vm4077_vm2, nan, %v4087_v35 }
 0x4c9   : > { %6692 = vmatmul.mubr.msk.f32.gmra.mxu0 %vm12779_vm14, %v4088_v24 }
 0x542   : > { %v6672_v46 = vpop.f32.mrf.mxu0 }
 0x543   : > { %v10529_v54 = vadd.f32 %v6672_v46, %v10526_v17 }
 0x544   : > { %v4214_v32 = vpop.f32.mrf.mxu0 }
 0x545   : > { %v4397_v37 = vand.u32 2147483647, %v10529_v54  ;;  %v4400_v26 = vand.u32 2139095040, %v10529_v54  ;;  %v10534_v42 = vadd.f32 %v10526_v17, %v4214_v32 }
 0x547   : > { %v4401_v3 = vshrl.u32 %v4400_v26, 23  ;;  %v4404_v18 = vand.u32 8388607, %v4397_v37  ;;  %v4293_v16 = vand.u32 2147483647, %v10534_v42  ;;  %v4296_v8 = vand.u32 2139095040, %v10534_v42 }
 0x549   : > { %v6444_v51 = vadd.s32 4294967169, %v4401_v3  ;;  %v4297_v30 = vshrl.u32 %v4296_v8, 23  ;;  %v4405_v36 = vor.u32 8388608, %v4404_v18  ;;  %v4300_v33 = vand.u32 8388607, %v4293_v16 }
 0x54b   : > { %v4407_v11 = vadd.s32 1, %v6444_v51  ;;  %v6440_v2 = vadd.s32 4294967169, %v4297_v30  ;;  %v10542_v31 = vshll.u32 %v4405_v36, 8  ;;  %v4301_v50 = vor.u32 8388608, %v4300_v33 }
 0x54d   : > { %vm4408_vm1 = vcmp.gt.s32.totalorder %v4407_v11, 0  ;;  %v4303_v19 = vadd.s32 1, %v6440_v2  ;;  %v10563_v48 = vshll.u32 %v4301_v50, 8 }
 0x54e   : > { %v4409_v9 = vsel %vm4408_vm1, %v4407_v11, 0 }
 0x54f   : > { %v4410_v34 = vshrl.u32 %v4409_v9, 5  ;;  %v4411_v58 = vand.u32 31, %v4409_v9  ;;  %vm4304_vm8 = vcmp.gt.s32.totalorder %v4303_v19, 0 }
 0x550   : > { %v4305_v27 = vsel %vm4304_vm8, %v4303_v19, 0 }
 0x551   : > { %v4412_v62 = vsub.s32 32, %v4411_v58  ;;  %v4414_v21 = vshll.u32 %v12607_v12, %v4411_v58  ;;  %v4417_v57 = vshll.u32 %v12608_v13, %v4411_v58  ;;  %v4420_v60 = vshll.u32 %v12609_v4, %v4411_v58 }
 0x552   : > { %v4423_v29 = vshll.u32 %v12610_v23, %v4411_v58  ;;  %v4426_v20 = vshll.u32 %v12611_v49, %v4411_v58  ;;  %vm4429_vm7 = vcmp.lt.s32.totalorder %v4410_v34, 1  ;;  %vm4430_vm3 = vcmp.lt.s32.totalorder %v4410_v34, 2 }
 0x553   : > { %v4415_v45 = vshrl.u32 %v12608_v13, %v4412_v62  ;;  %v4418_v5 = vshrl.u32 %v12609_v4, %v4412_v62  ;;  %v4421_v38 = vshrl.u32 %v12610_v23, %v4412_v62  ;;  %v4413_v52 = vshrl.u32 %v12607_v12, %v4412_v62 }
 0x554   : > { %v4424_v22 = vshrl.u32 %v12611_v49, %v4412_v62  ;;  %v4427_v0 = vshrl.u32 %v12612_v59, %v4412_v62  ;;  %vm4431_vm5 = vcmp.lt.s32.totalorder %v4410_v34, 3  ;;  %vm4432_vm10 = vcmp.lt.s32.totalorder %v4410_v34, 4 }
 0x555   : > { %v4416_v61 = vor.u32 %v4415_v45, %v4414_v21  ;;  %v4419_v7 = vor.u32 %v4418_v5, %v4417_v57  ;;  %v4422_v55 = vor.u32 %v4421_v38, %v4420_v60  ;;  %v4307_v28 = vand.u32 31, %v4305_v27  ;;  %v6675_v60 = vpop.f32.mrf.mxu0 }
 0x556   : > { %v4425_v10 = vor.u32 %v4424_v22, %v4423_v29  ;;  %v4428_v39 = vor.u32 %v4427_v0, %v4426_v20  ;;  %v4306_v35 = vshrl.u32 %v4305_v27, 5 }
 0x557   : > { %v4433_v14 = vsel %vm4429_vm7, %v4413_v52, %v4416_v61  ;;  %v4434_v1 = vsel %vm4432_vm10, %v4422_v55, 2102212464  ;;  %v4437_v43 = vsel %vm4429_vm7, %v4416_v61, %v4419_v7  ;;  %v4441_v41 = vsel %vm4429_vm7, %v4419_v7, %v4422_v55 }
 0x558   : > { %v4435_v47 = vsel %vm4431_vm5, %v4419_v7, %v4434_v1  ;;  %v4438_v63 = vsel %vm4432_vm10, %v4425_v10, 920167782  ;;  %v4442_v53 = vsel %vm4432_vm10, %v4428_v39, 1326507024  ;;  %v4308_v25 = vsub.s32 32, %v4307_v28 }
 0x559   : > { %v4436_v6 = vsel %vm4430_vm3, %v4433_v14, %v4435_v47  ;;  %v4439_v56 = vsel %vm4431_vm5, %v4422_v55, %v4438_v63  ;;  %v4443_v15 = vsel %vm4431_vm5, %v4425_v10, %v4442_v53  ;;  %v4310_v24 = vshll.u32 %v12607_v12, %v4307_v28 }
 0x55a   : > { %v4440_v40 = vsel %vm4430_vm3, %v4437_v43, %v4439_v56  ;;  %v4444_v44 = vsel %vm4430_vm3, %v4441_v41, %v4443_v15  ;;  %v4452_v18 = vmul.u32 %v10542_v31, %v4436_v6  ;;  %v4311_v8 = vshrl.u32 %v12608_v13, %v4308_v25  ;;  %v4224_v56 = vpop.f32.mrf.mxu0 }
 0x55b   : > { %v10569_v46 = vmul.u32.u64.low %v10542_v31, %v4444_v44  ;;  %v10570_v32 = vmul.u32.u64.high %v10542_v31, %v4444_v44, %v10569_v46  ;;  %v10573_v26 = vmul.u32.u64.low %v10542_v31, %v4440_v40  ;;  %v10574_v3 = vmul.u32.u64.high %v10542_v31, %v4440_v40, %v10573_v26 }
 0x55c   : > { %v4313_v51 = vshll.u32 %v12608_v13, %v4307_v28  ;;  %v4314_v30 = vshrl.u32 %v12609_v4, %v4308_v25  ;;  %v4316_v11 = vshll.u32 %v12609_v4, %v4307_v28  ;;  %v4317_v36 = vshrl.u32 %v12610_v23, %v4308_v25 }
 0x55d   : > { %v4319_v2 = vshll.u32 %v12610_v23, %v4307_v28  ;;  %v4320_v33 = vshrl.u32 %v12611_v49, %v4308_v25  ;;  %v4312_v9 = vor.u32 %v4311_v8, %v4310_v24  ;;  %v4322_v34 = vshll.u32 %v12611_v49, %v4307_v28 }
 0x55e   : > { %v4315_v19 = vor.u32 %v4314_v30, %v4313_v51  ;;  %v4323_v58 = vshrl.u32 %v12612_v59, %v4308_v25  ;;  %vm4454_vm0 = vc.u32 %v10570_v32, %v10573_v26  ;;  %v4455_v31 = vadd.s32 1, %v10574_v3 }
 0x55f   : > { %v4309_v50 = vshrl.u32 %v12607_v12, %v4308_v25  ;;  %v4318_v62 = vor.u32 %v4317_v36, %v4316_v11  ;;  %v4321_v21 = vor.u32 %v4320_v33, %v4319_v2  ;;  %vm4325_vm11 = vcmp.lt.s32.totalorder %v4306_v35, 1  ;;  %v6678_v33 = vpop.f32.mrf.mxu0 }
 0x560   : > { %v4324_v57 = vor.u32 %v4323_v58, %v4322_v34  ;;  %vm4326_vm4 = vcmp.lt.s32.totalorder %v4306_v35, 2  ;;  %v4456_v29 = vsel %vm4454_vm0, %v4455_v31, %v10574_v3  ;;  %vm4327_vm6 = vcmp.lt.s32.totalorder %v4306_v35, 3 }
 0x561   : > { %vm4328_vm13 = vcmp.lt.s32.totalorder %v4306_v35, 4  ;;  %v4333_v20 = vsel %vm4325_vm11, %v4312_v9, %v4315_v19  ;;  %v4457_v45 = vadd.s32 %v4456_v29, %v4452_v18  ;;  %v4337_v52 = vsel %vm4325_vm11, %v4315_v19, %v4318_v62 }
 0x562   : > { %v4330_v5 = vsel %vm4328_vm13, %v4318_v62, 2102212464  ;;  %v4334_v38 = vsel %vm4328_vm13, %v4321_v21, 920167782  ;;  %v4329_v22 = vsel %vm4325_vm11, %v4309_v50, %v4312_v9  ;;  %v4338_v61 = vsel %vm4328_vm13, %v4324_v57, 1326507024 }
 0x563   : > { %v4335_v0 = vsel %vm4327_vm6, %v4318_v62, %v4334_v38  ;;  %v10593_v7 = vadd.f32 %v6675_v60, %v10526_v17  ;;  %v4458_v55 = vadd.s32 536870912, %v4457_v45  ;;  %v4331_v27 = vsel %vm4327_vm6, %v4315_v19, %v4330_v5 }
 0x564   : > { %v4336_v10 = vsel %vm4326_vm4, %v4333_v20, %v4335_v0  ;;  %v4339_v39 = vsel %vm4327_vm6, %v4321_v21, %v4338_v61  ;;  %v4332_v63 = vsel %vm4326_vm4, %v4329_v22, %v4331_v27  ;;  %v10622_v18 = vadd.f32 %v10526_v17, %v4224_v56 }
 0x565   : > { %v4340_v28 = vsel %vm4326_vm4, %v4337_v52, %v4339_v39  ;;  %v10598_v14 = vmul.u32.u64.low %v10563_v48, %v4336_v10  ;;  %v10599_v1 = vmul.u32.u64.high %v10563_v48, %v4336_v10, %v10598_v14  ;;  %v10602_v43 = vshrl.u32 %v4458_v55, 30 }
 0x566   : > { %v10605_v41 = vmul.u32.u64.low %v10563_v48, %v4340_v28  ;;  %v10606_v47 = vmul.u32.u64.high %v10563_v48, %v4340_v28, %v10605_v41  ;;  %v4605_v53 = vand.u32 2147483647, %v10593_v7  ;;  %v4608_v25 = vand.u32 2139095040, %v10593_v7 }
 0x567   : > { %v4460_v6 = vshll.u32 %v10602_v43, 30  ;;  %v4351_v15 = vadd.s32 1, %v10599_v1  ;;  %v4348_v24 = vmul.u32 %v10563_v48, %v4332_v63  ;;  %v4504_v2 = vand.u32 2139095040, %v10622_v18 }
 0x568   : > { %v4609_v40 = vshrl.u32 %v4608_v25, 23  ;;  %vm4350_vm15 = vc.u32 %v10606_v47, %v10598_v14  ;;  %v4612_v3 = vand.u32 8388607, %v4605_v53  ;;  %v4453_v58 = vadd.s32 %v10573_v26, %v10570_v32 }
 0x569   : > { %v10613_v44 = vsub.s32 %v4457_v45, %v4460_v6  ;;  %v4352_v35 = vsel %vm4350_vm15, %v4351_v15, %v10599_v1  ;;  %v4501_v21 = vand.u32 2147483647, %v10622_v18  ;;  %v10634_v57 = vadd.f32 %v6678_v33, %v10526_v17 }
 0x56a   : > { %v6452_v46 = vadd.s32 4294967169, %v4609_v40  ;;  %v4353_v51 = vadd.s32 %v4352_v35, %v4348_v24  ;;  %v4613_v48 = vor.u32 8388608, %v4612_v3  ;;  %v4505_v45 = vshrl.u32 %v4504_v2, 23 }
 0x56b   : > { %v4463_v8 = vsub.s32 0, %v10613_v44  ;;  %12780 = vst [vmem:[#allocation34_spill] sm:$0xff] %v10634_v57  ;;  %v4508_v24 = vand.u32 8388607, %v4501_v21  ;;  %v4816_v35 = vand.u32 2139095040, %v10634_v57  ;;  %vm4399_vm10 = vcmp.lt.s32.totalorder %v10529_v54, 0 }
 0x56c   : > { %v4615_v30 = vadd.s32 1, %v6452_v46  ;;  %v4354_v36 = vadd.s32 536870912, %v4353_v51  ;;  %v10638_v20 = vshll.u32 %v4613_v48, 8 }
 0x56d   : > { %v6445_v11 = vmin.u32 %v4463_v8, %v10613_v44 }
 0x56e   : > { %vm4616_vm9 = vcmp.gt.s32.totalorder %v4615_v30, 0  ;;  %v10627_v19 = vshrl.u32 %v4354_v36, 30 }
 0x56f   : > { %v4465_v9 = vclz %v6445_v11  ;;  %v4617_v34 = vsel %vm4616_vm9, %v4615_v30, 0 }
 0x570   : > { %v4619_v31 = vand.u32 31, %v4617_v34  ;;  %v4356_v62 = vshll.u32 %v10627_v19, 30  ;;  %v10636_v60 = vshrl.u32 %v4617_v34, 5 }
 0x571   : > { %v6446_v50 = vadd.s32 4294967294, %v4465_v9 }
 0x572   : > { %v4620_v29 = vsub.s32 32, %v4619_v31  ;;  %v10640_v5 = vsub.s32 %v4353_v51, %v4356_v62  ;;  %v4622_v32 = vshll.u32 %v12607_v12, %v4619_v31  ;;  %v4625_v26 = vshll.u32 %v12608_v13, %v4619_v31 }
 0x573   : > { %vm6447_vm12 = vcmp.lt.s32.totalorder %v6446_v50, 0  ;;  %v4628_v0 = vshll.u32 %v12609_v4, %v4619_v31  ;;  %v4631_v10 = vshll.u32 %v12610_v23, %v4619_v31  ;;  %v4634_v41 = vshll.u32 %v12611_v49, %v4619_v31 }
 0x574   : > { %v4468_v38 = vsel %vm6447_vm12, 0, %v6446_v50  ;;  %v4623_v52 = vshrl.u32 %v12608_v13, %v4620_v29  ;;  %v4626_v22 = vshrl.u32 %v12609_v4, %v4620_v29  ;;  %v4359_v27 = vsub.s32 0, %v10640_v5 }
 0x575   : > { %v4469_v61 = vsub.s32 32, %v4468_v38  ;;  %v4473_v55 = vsub.s32 4294967266, %v4468_v38  ;;  %v4629_v28 = vshrl.u32 %v12610_v23, %v4620_v29  ;;  %v4632_v1 = vshrl.u32 %v12611_v49, %v4620_v29 }
 0x576   : > { %v4624_v39 = vor.u32 %v4623_v52, %v4622_v32  ;;  %v6441_v25 = vmin.u32 %v4359_v27, %v10640_v5  ;;  %v4627_v6 = vor.u32 %v4626_v22, %v4625_v26  ;;  %v4635_v56 = vshrl.u32 %v12612_v59, %v4620_v29 }
 0x577   : > { %v4474_v63 = vadd.s32 127, %v4473_v55  ;;  %v4630_v15 = vor.u32 %v4629_v28, %v4628_v0  ;;  %v4633_v40 = vor.u32 %v4632_v1, %v4631_v10  ;;  %v4471_v46 = vshrl.u32 %v4453_v58, %v4469_v61 }
 0x578   : > { %v4361_v3 = vclz %v6441_v25  ;;  %v4636_v8 = vor.u32 %v4635_v56, %v4634_v41  ;;  %v6448_v51 = vadd.s32 4294967169, %v4505_v45  ;;  %v4470_v30 = vshll.u32 %v10613_v44, %v4468_v38 }
 0x579   : > { %v4475_v11 = vshll.u32 %v4474_v63, 23  ;;  %vm4637_vm2 = vcmp.lt.s32.totalorder %v10636_v60, 1  ;;  %vm4638_vm14 = vcmp.lt.s32.totalorder %v10636_v60, 2  ;;  %vm4639_vm1 = vcmp.lt.s32.totalorder %v10636_v60, 3 }
 0x57a   : > { %v6442_v36 = vadd.s32 4294967294, %v4361_v3  ;;  %vm4640_vm8 = vcmp.lt.s32.totalorder %v10636_v60, 4  ;;  %v4645_v48 = vsel %vm4637_vm2, %v4624_v39, %v4627_v6  ;;  %v4621_v2 = vshrl.u32 %v12607_v12, %v4620_v29 }
 0x57b   : > { %v4642_v33 = vsel %vm4640_vm8, %v4630_v15, 2102212464  ;;  %v4646_v9 = vsel %vm4640_vm8, %v4633_v40, 920167782  ;;  %v4650_v34 = vsel %vm4640_vm8, %v4636_v8, 1326507024  ;;  %v4472_v58 = vor.u32 %v4471_v46, %v4470_v30 }
 0x57c   : > { %vm6443_vm7 = vcmp.lt.s32.totalorder %v6442_v36, 0  ;;  %v4647_v44 = vsel %vm4639_vm1, %v4630_v15, %v4646_v9  ;;  %v4649_v31 = vsel %vm4637_vm2, %v4627_v6, %v4630_v15  ;;  %v4476_v50 = vor.u32 4788187, %v4475_v11 }
 0x57d   : > { %v4364_v62 = vsel %vm6443_vm7, 0, %v6442_v36  ;;  %v4648_v45 = vsel %vm4638_vm14, %v4645_v48, %v4647_v44  ;;  %v4651_v32 = vsel %vm4639_vm1, %v4633_v40, %v4650_v34  ;;  %v4641_v38 = vsel %vm4637_vm2, %v4621_v2, %v4624_v39 }
 0x57e   : > { %v4365_v29 = vsub.s32 32, %v4364_v62  ;;  %v4369_v26 = vsub.s32 4294967266, %v4364_v62  ;;  %v4643_v52 = vsel %vm4639_vm1, %v4627_v6, %v4642_v33  ;;  %v4652_v22 = vsel %vm4638_vm14, %v4649_v31, %v4651_v32 }
 0x57f   : > { %v10680_v0 = vmul.u32.u64.low %v10638_v20, %v4648_v45  ;;  %v10681_v61 = vmul.u32.u64.high %v10638_v20, %v4648_v45, %v10680_v0  ;;  %v4511_v55 = vadd.s32 1, %v6448_v51  ;;  %v4349_v27 = vadd.s32 %v10598_v14, %v10606_v47 }
 0x580   : > { %v4370_v10 = vadd.s32 127, %v4369_v26  ;;  %v4509_v28 = vor.u32 8388608, %v4508_v24  ;;  %v4813_v1 = vand.u32 2147483647, %v10634_v57  ;;  %v4477_v39 = vand.u32 2147483647, %v4476_v50 }
 0x581   : > { %v10688_v41 = vmul.u32.u64.low %v10638_v20, %v4652_v22  ;;  %v10689_v63 = vmul.u32.u64.high %v10638_v20, %v4652_v22, %v10688_v41  ;;  %vm4512_vm3 = vcmp.gt.s32.totalorder %v4511_v55, 0  ;;  %v4367_v25 = vshrl.u32 %v4349_v27, %v4365_v29 }
 0x582   : > { %v4644_v6 = vsel %vm4638_vm14, %v4641_v38, %v4643_v52  ;;  %v4513_v56 = vsel %vm4512_vm3, %v4511_v55, 0  ;;  %v4817_v15 = vshrl.u32 %v4816_v35, 23  ;;  %v4479_v40 = vcvt.s32.f32 %v4472_v58 }
 0x583   : > { %v4663_v46 = vadd.s32 1, %v10681_v61  ;;  %v4515_v14 = vand.u32 31, %v4513_v56  ;;  %v4366_v47 = vshll.u32 %v10640_v5, %v4364_v62  ;;  %v4371_v24 = vshll.u32 %v4370_v10, 23 }
 0x584   : > { %v10695_v3 = vshll.u32 %v4509_v28, 8  ;;  %v10699_v8 = vand.u32 8388607, %v4813_v1  ;;  %v4480_v51 = vmul.f32 %v4479_v40, %v4477_v39  ;;  %v4660_v30 = vmul.u32 %v10638_v20, %v4644_v6 }
 0x585   : > { %vm4662_vm5 = vc.u32 %v10689_v63, %v10680_v0  ;;  %v4516_v60 = vsub.s32 32, %v4515_v14  ;;  %v4368_v35 = vor.u32 %v4367_v25, %v4366_v47  ;;  %v4514_v36 = vshrl.u32 %v4513_v56, 5 }
 0x586   : > { %v4664_v11 = vsel %vm4662_vm5, %v4663_v46, %v10681_v61  ;;  %v6460_v48 = vadd.s32 4294967169, %v4817_v15  ;;  %v4518_v2 = vshll.u32 %v12607_v12, %v4515_v14  ;;  %v4372_v34 = vor.u32 4788187, %v4371_v24 }
 0x587   : > { %v4665_v5 = vadd.s32 %v4664_v11, %v4660_v30  ;;  %v4519_v33 = vshrl.u32 %v12608_v13, %v4516_v60  ;;  %v4522_v9 = vshrl.u32 %v12609_v4, %v4516_v60  ;;  %v4521_v58 = vshll.u32 %v12608_v13, %v4515_v14 }
 0x588   : > { %v4524_v20 = vshll.u32 %v12609_v4, %v4515_v14  ;;  %v4525_v44 = vshrl.u32 %v12610_v23, %v4516_v60  ;;  %v4527_v62 = vshll.u32 %v12610_v23, %v4515_v14  ;;  %v4528_v45 = vshrl.u32 %v12611_v49, %v4516_v60 }
 0x589   : > { %v4666_v31 = vadd.s32 536870912, %v4665_v5  ;;  %v4520_v50 = vor.u32 %v4519_v33, %v4518_v2  ;;  %v4523_v32 = vor.u32 %v4522_v9, %v4521_v58  ;;  %v4530_v26 = vshll.u32 %v12611_v49, %v4515_v14 }
 0x58a   : > { %v4526_v29 = vor.u32 %v4525_v44, %v4524_v20  ;;  %v4531_v38 = vshrl.u32 %v12612_v59, %v4516_v60  ;;  %v4481_v52 = vxor.u32 2147483648, %v4480_v51  ;;  %v4375_v22 = vcvt.s32.f32 %v4368_v35 }
 0x58b   : > { %v10716_v61 = vshrl.u32 %v4666_v31, 30  ;;  %v4529_v55 = vor.u32 %v4528_v45, %v4527_v62  ;;  %v4373_v27 = vand.u32 2147483647, %v4372_v34  ;;  %vm4536_vm0 = vcmp.lt.s32.totalorder %v4514_v36, 4  ;;  %v4234_v31 = vpop.f32.mrf.mxu0 }
 0x58c   : > { %v4532_v10 = vor.u32 %v4531_v38, %v4530_v26  ;;  %v4823_v28 = vadd.s32 1, %v6460_v48  ;;  %v4517_v41 = vshrl.u32 %v12607_v12, %v4516_v60  ;;  %vm4533_vm11 = vcmp.lt.s32.totalorder %v4514_v36, 1 }
 0x58d   : > { %v4668_v39 = vshll.u32 %v10716_v61, 30  ;;  %v4538_v25 = vsel %vm4536_vm0, %v4526_v29, 2102212464  ;;  %vm4534_vm4 = vcmp.lt.s32.totalorder %v4514_v36, 2  ;;  %vm4535_vm6 = vcmp.lt.s32.totalorder %v4514_v36, 3 }
 0x58e   : > { %v4541_v6 = vsel %vm4533_vm11, %v4520_v50, %v4523_v32  ;;  %v4542_v56 = vsel %vm4536_vm0, %v4529_v55, 920167782  ;;  %v4537_v40 = vsel %vm4533_vm11, %v4517_v41, %v4520_v50  ;;  %v4539_v46 = vsel %vm4535_vm6, %v4523_v32, %v4538_v25 }
 0x58f   : > { %v10722_v15 = vsub.s32 %v4665_v5, %v4668_v39  ;;  %v4543_v14 = vsel %vm4535_vm6, %v4526_v29, %v4542_v56  ;;  %v10724_v47 = vmul.f32 %v4375_v22, %v4373_v27  ;;  %v4545_v30 = vsel %vm4533_vm11, %v4523_v32, %v4526_v29 }
 0x590   : > { %v4544_v24 = vsel %vm4534_vm4, %v4541_v6, %v4543_v14  ;;  %v4546_v60 = vsel %vm4536_vm0, %v4532_v10, 1326507024  ;;  %v4540_v5 = vsel %vm4534_vm4, %v4537_v40, %v4539_v46  ;;  %v4821_v9 = vor.u32 8388608, %v10699_v8 }
 0x591   : > { %v4671_v35 = vsub.s32 0, %v10722_v15  ;;  %v4547_v11 = vsel %vm4535_vm6, %v4529_v55, %v4546_v60  ;;  %v10730_v48 = vmul.u32.u64.low %v10695_v3, %v4544_v24  ;;  %v10731_v2 = vmul.u32.u64.high %v10695_v3, %v4544_v24, %v10730_v48 }
 0x592   : > { %v4548_v33 = vsel %vm4534_vm4, %v4545_v30, %v4547_v11  ;;  %vm4824_vm13 = vcmp.gt.s32.totalorder %v4823_v28, 0  ;;  %v10744_v50 = vsel %vm4399_vm10, %v4481_v52, %v4480_v51  ;;  %v4377_v45 = vxor.u32 2147483648, %v10724_v47 }
 0x593   : > { %v6453_v34 = vmin.u32 %v4671_v35, %v10722_v15  ;;  %v10739_v58 = vmul.u32.u64.low %v10695_v3, %v4548_v33  ;;  %v10740_v20 = vmul.u32.u64.high %v10695_v3, %v4548_v33, %v10739_v58  ;;  %v4825_v44 = vsel %vm4824_vm13, %v4823_v28, 0 }
 0x594   : > { %v4827_v62 = vand.u32 31, %v4825_v44  ;;  %v4661_v36 = vadd.s32 %v10680_v0, %v10689_v63  ;;  %v4559_v32 = vadd.s32 1, %v10731_v2  ;;  %v4556_v29 = vmul.u32 %v10695_v3, %v4540_v5 }
 0x595   : > { %v4673_v8 = vclz %v6453_v34  ;;  %v10751_v38 = vshll.u32 %v4821_v9, 8  ;;  %v10754_v22 = vadd.f32 %v10526_v17, %v4234_v31  ;;  %vm4558_vm15 = vc.u32 %v10740_v20, %v10730_v48 }
 0x596   : > { %v4828_v26 = vsub.s32 32, %v4827_v62  ;;  %v4826_v51 = vshrl.u32 %v4825_v44, 5  ;;  %v4830_v52 = vshll.u32 %v12607_v12, %v4827_v62  ;;  %v4560_v0 = vsel %vm4558_vm15, %v4559_v32, %v10731_v2 }
 0x597   : > { %12781 = vst [vmem:[#allocation15_spill] sm:$0xff] %v10754_v22  ;;  %v6454_v55 = vadd.s32 4294967294, %v4673_v8  ;;  %v4833_v27 = vshll.u32 %v12608_v13, %v4827_v62  ;;  %v4561_v10 = vadd.s32 %v4560_v0, %v4556_v29  ;;  %v4836_v6 = vshll.u32 %v12609_v4, %v4827_v62 }
 0x598   : > { %v4831_v63 = vshrl.u32 %v12608_v13, %v4828_v26  ;;  %v4834_v3 = vshrl.u32 %v12609_v4, %v4828_v26  ;;  %v4837_v28 = vshrl.u32 %v12610_v23, %v4828_v26  ;;  %v4840_v39 = vshrl.u32 %v12611_v49, %v4828_v26 }
 0x599   : > { %vm6455_vm9 = vcmp.lt.s32.totalorder %v6454_v55, 0  ;;  %v4839_v56 = vshll.u32 %v12610_v23, %v4827_v62  ;;  %v4562_v14 = vadd.s32 536870912, %v4561_v10  ;;  %vm10769_vm12 = vcmp.le.f32.partialorder %v4397_v37, 0.7853982 }
 0x59a   : > { %v4676_v41 = vsel %vm6455_vm9, 0, %v6454_v55  ;;  %v4832_v25 = vor.u32 %v4831_v63, %v4830_v52  ;;  %v4835_v24 = vor.u32 %v4834_v3, %v4833_v27  ;;  %v4838_v60 = vor.u32 %v4837_v28, %v4836_v6 }
 0x59b   : > { %v4677_v40 = vsub.s32 32, %v4676_v41  ;;  %v4681_v46 = vsub.s32 4294967266, %v4676_v41  ;;  %v4841_v35 = vor.u32 %v4840_v39, %v4839_v56  ;;  %v4842_v11 = vshll.u32 %v12611_v49, %v4827_v62 }
 0x59c   : > { %v4843_v2 = vshrl.u32 %v12612_v59, %v4828_v26  ;;  %v10775_v33 = vshrl.u32 %v4562_v14, 30  ;;  %v4829_v9 = vshrl.u32 %v12607_v12, %v4828_v26  ;;  %v4712_v34 = vand.u32 2139095040, %v10754_v22 }
 0x59d   : > { %v4682_v5 = vadd.s32 127, %v4681_v46  ;;  %vm12400_vm2 = vcmp.lt.s32.totalorder %v10534_v42, 0  ;;  %v4678_v37 = vshll.u32 %v10722_v15, %v4676_v41  ;;  %v4679_v58 = vshrl.u32 %v4661_v36, %v4677_v40 }
 0x59e   : > { %v4844_v44 = vor.u32 %v4843_v2, %v4842_v11  ;;  %vm4848_vm14 = vcmp.lt.s32.totalorder %v4826_v51, 4  ;;  %v4564_v8 = vshll.u32 %v10775_v33, 30  ;;  %vm4845_vm1 = vcmp.lt.s32.totalorder %v4826_v51, 1 }
 0x59f   : > { %v4683_v31 = vshll.u32 %v4682_v5, 23  ;;  %v4850_v62 = vsel %vm4848_vm14, %v4838_v60, 2102212464  ;;  %vm4846_vm8 = vcmp.lt.s32.totalorder %v4826_v51, 2  ;;  %vm4847_vm7 = vcmp.lt.s32.totalorder %v4826_v51, 3 }
 0x5a0   : > { %v4853_v32 = vsel %vm4845_vm1, %v4832_v25, %v4835_v24  ;;  %v4854_v29 = vsel %vm4848_vm14, %v4841_v35, 920167782  ;;  %v10784_v55 = vsub.s32 %v4561_v10, %v4564_v8  ;;  %v4849_v52 = vsel %vm4845_vm1, %v4829_v9, %v4832_v25 }
 0x5a1   : > { %v4684_v26 = vor.u32 4788187, %v4683_v31  ;;  %v4857_v0 = vsel %vm4845_vm1, %v4835_v24, %v4838_v60  ;;  %v4680_v15 = vor.u32 %v4679_v58, %v4678_v37  ;;  %v4851_v36 = vsel %vm4847_vm7, %v4835_v24, %v4850_v62 }
 0x5a2   : > { %v4855_v63 = vsel %vm4847_vm7, %v4838_v60, %v4854_v29  ;;  %v4858_v27 = vsel %vm4848_vm14, %v4844_v44, 1326507024  ;;  %v4567_v28 = vsub.s32 0, %v10784_v55  ;;  %v4713_v10 = vshrl.u32 %v4712_v34, 23  ;;  %v6681_v60 = vpop.f32.mrf.mxu0 }
 0x5a3   : > { %v4685_v3 = vand.u32 2147483647, %v4684_v26  ;;  %v4856_v39 = vsel %vm4846_vm8, %v4853_v32, %v4855_v63  ;;  %v4859_v41 = vsel %vm4847_vm7, %v4841_v35, %v4858_v27  ;;  %v10799_v25 = vsel %vm10769_vm12, %v10529_v54, %v10744_v50 }
 0x5a4   : > { %v4860_v6 = vsel %vm4846_vm8, %v4857_v0, %v4859_v41  ;;  %v10791_v56 = vmul.u32.u64.low %v10751_v38, %v4856_v39  ;;  %v10792_v40 = vmul.u32.u64.high %v10751_v38, %v4856_v39, %v10791_v56  ;;  %v6449_v46 = vmin.u32 %v4567_v28, %v10784_v55  ;;  %v4244_v32 = vpop.f32.mrf.mxu0 }
 0x5a5   : > { %v10803_v14 = vmul.u32.u64.low %v10751_v38, %v4860_v6  ;;  %v10804_v24 = vmul.u32.u64.high %v10751_v38, %v4860_v6, %v10803_v14  ;;  %v4687_v35 = vcvt.s32.f32 %v4680_v15  ;;  %v4852_v11 = vsel %vm4846_vm8, %v4849_v52, %v4851_v36 }
 0x5a6   : > { %v12340_v2 = vand.u32 2147483647, %v10754_v22  ;;  %v6456_v5 = vadd.s32 4294967169, %v4713_v10  ;;  %v4483_v9 = vsub.s32 4, %v10602_v43  ;;  %vm10811_vm3 = vcmp.le.f32.partialorder %v4293_v16, 0.7853982 }
 0x5a7   : > { %v4378_v34 = vsel %vm12400_vm2, %v4377_v45, %v10724_v47  ;;  %v4569_v37 = vclz %v6449_v46  ;;  %v10820_v51 = vmul.f32 %v4687_v35, %v4685_v3  ;;  %v4871_v58 = vadd.s32 1, %v10792_v40 }
 0x5a8   : > { %v4719_v44 = vadd.s32 1, %v6456_v5  ;;  %v10824_v31 = vadd.f32 %v6681_v60, %v10526_v17  ;;  %7093 = vcosq.f32 %v10799_v25  ;;  %v4868_v8 = vmul.u32 %v10751_v38, %v4852_v11 }
 0x5a9   : > { %v6450_v16 = vadd.s32 4294967294, %v4569_v37  ;;  %vm4870_vm5 = vc.u32 %v10804_v24, %v10791_v56  ;;  %v10833_v47 = vsel %vm10811_vm3, %v10534_v42, %v4378_v34  ;;  %v4716_v62 = vand.u32 8388607, %v12340_v2 }
 0x5aa   : > { %12786 = vst [vmem:[#allocation20_spill] sm:$0xff] %v10824_v31  ;;  %v4872_v45 = vsel %vm4870_vm5, %v4871_v58, %v10792_v40  ;;  %vm4720_vm0 = vcmp.gt.s32.totalorder %v4719_v44, 0  ;;  %v4557_v29 = vadd.s32 %v10730_v48, %v10740_v20  ;;  %v4689_v52 = vxor.u32 2147483648, %v10820_v51 }
 0x5ab   : > { %vm6451_vm11 = vcmp.lt.s32.totalorder %v6450_v16, 0  ;;  %v4873_v38 = vadd.s32 %v4872_v45, %v4868_v8  ;;  %v4721_v26 = vsel %vm4720_vm0, %v4719_v44, 0  ;;  %v12342_v36 = vand.u32 2147483647, %v10824_v31 }
 0x5ac   : > { %v4572_v0 = vsel %vm6451_vm11, 0, %v6450_v16  ;;  %v4723_v15 = vand.u32 31, %v4721_v26  ;;  %v5024_v3 = vand.u32 2139095040, %v10824_v31  ;;  %v10844_v28 = vadd.f32 %v10526_v17, %v4244_v32 }
 0x5ad   : > { %v4577_v63 = vsub.s32 4294967266, %v4572_v0  ;;  %v4874_v27 = vadd.s32 536870912, %v4873_v38  ;;  %v4573_v39 = vsub.s32 32, %v4572_v0  ;;  %v4717_v41 = vor.u32 8388608, %v4716_v62 }
 0x5ae   : > { %12787 = vst [vmem:[#allocation14_spill] sm:$0xff] %v10844_v28  ;;  %v10846_v6 = vshrl.u32 %v4721_v26, 5  ;;  %v4724_v48 = vsub.s32 32, %v4723_v15  ;;  %v4726_v10 = vshll.u32 %v12607_v12, %v4723_v15  ;;  %v4729_v46 = vshll.u32 %v12608_v13, %v4723_v15 }
 0x5af   : > { %v4578_v20 = vadd.s32 127, %v4577_v63  ;;  %v10848_v40 = vshrl.u32 %v4874_v27, 30  ;;  %v4732_v35 = vshll.u32 %v12609_v4, %v4723_v15  ;;  %v4735_v34 = vshll.u32 %v12610_v23, %v4723_v15 }
 0x5b0   : > { %v4727_v14 = vshrl.u32 %v12608_v13, %v4724_v48  ;;  %v4730_v60 = vshrl.u32 %v12609_v4, %v4724_v48  ;;  %v4733_v17 = vshrl.u32 %v12610_v23, %v4724_v48  ;;  %v4736_v37 = vshrl.u32 %v12611_v49, %v4724_v48 }
 0x5b1   : > { %12788 = vst [vmem:[#allocation6_spill] sm:$0xff] %v10848_v40  ;;  %v4579_v11 = vshll.u32 %v4578_v20, 23  ;;  %v4876_v5 = vshll.u32 %v10848_v40, 30  ;;  %v10859_v8 = vshll.u32 %v4717_v41, 8  ;;  %vm12384_vm4 = vcmp.lt.s32.totalorder %v10593_v7, 0 }
 0x5b2   : > { %v4728_v58 = vor.u32 %v4727_v14, %v4726_v10  ;;  %v4731_v44 = vor.u32 %v4730_v60, %v4729_v46  ;;  %v4734_v16 = vor.u32 %v4733_v17, %v4732_v35  ;;  %v4574_v45 = vshll.u32 %v10784_v55, %v4572_v0 }
 0x5b3   : > { %v4575_v62 = vshrl.u32 %v4557_v29, %v4573_v39  ;;  %v10863_v32 = vsub.s32 %v4873_v38, %v4876_v5  ;;  %v4737_v26 = vor.u32 %v4736_v37, %v4735_v34  ;;  %v4580_v63 = vor.u32 4788187, %v4579_v11 }
 0x5b4   : > { %v4725_v27 = vshrl.u32 %v12607_v12, %v4724_v48  ;;  %v4738_v20 = vshll.u32 %v12611_v49, %v4723_v15  ;;  %v4739_v2 = vshrl.u32 %v12612_v59, %v4724_v48  ;;  %vm4741_vm6 = vcmp.lt.s32.totalorder %v10846_v6, 1 }
 0x5b5   : > { %v4879_v10 = vsub.s32 0, %v10863_v32  ;;  %vm4743_vm13 = vcmp.lt.s32.totalorder %v10846_v6, 3  ;;  %vm4744_vm15 = vcmp.lt.s32.totalorder %v10846_v6, 4  ;;  %v10872_v55 = vpop.eup %7093  ;;  %v4749_v0 = vsel %vm4741_vm6, %v4728_v58, %v4731_v44 }
 0x5b6   : > { %v4740_v29 = vor.u32 %v4739_v2, %v4738_v20  ;;  %v4746_v38 = vsel %vm4744_vm15, %v4734_v16, 2102212464  ;;  %v4750_v39 = vsel %vm4744_vm15, %v4737_v26, 920167782  ;;  %vm10878_vm9 = vcmp.le.f32.partialorder %v4605_v53, 0.7853982 }
 0x5b7   : > { %v4576_v41 = vor.u32 %v4575_v62, %v4574_v45  ;;  %v6461_v48 = vmin.u32 %v4879_v10, %v10863_v32  ;;  %vm4742_vm14 = vcmp.lt.s32.totalorder %v10846_v6, 2  ;;  %v4751_v46 = vsel %vm4743_vm13, %v4734_v16, %v4750_v39 }
 0x5b8   : > { %v4581_v2 = vand.u32 2147483647, %v4580_v63  ;;  %v4752_v14 = vsel %vm4742_vm14, %v4749_v0, %v4751_v46  ;;  %v4753_v60 = vsel %vm4741_vm6, %v4731_v44, %v4734_v16  ;;  %v4754_v35 = vsel %vm4744_vm15, %v4740_v29, 1326507024 }
 0x5b9   : > { %v4881_v53 = vclz %v6461_v48  ;;  %v4745_v17 = vsel %vm4741_vm6, %v4725_v27, %v4728_v58  ;;  %v4747_v11 = vsel %vm4743_vm13, %v4731_v44, %v4746_v38  ;;  %v4755_v5 = vsel %vm4743_vm13, %v4737_v26, %v4754_v35 }
 0x5ba   : > { %v4756_v34 = vsel %vm4742_vm14, %v4753_v60, %v4755_v5  ;;  %v10899_v37 = vmul.u32.u64.low %v10859_v8, %v4752_v14  ;;  %v10900_v45 = vmul.u32.u64.high %v10859_v8, %v4752_v14, %v10899_v37  ;;  %v5025_v16 = vshrl.u32 %v5024_v3, 23 }
 0x5bb   : > { %v4583_v62 = vcvt.s32.f32 %v4576_v41  ;;  %v6462_v63 = vadd.s32 4294967294, %v4881_v53  ;;  %v10904_v20 = vmul.u32.u64.low %v10859_v8, %v4756_v34  ;;  %v10905_v58 = vmul.u32.u64.high %v10859_v8, %v4756_v34, %v10904_v20 }
 0x5bc   : > { %7095 = vsinq.f32 %v10799_v25  ;;  %v4690_v44 = vsel %vm12384_vm4, %v4689_v52, %v10820_v51  ;;  %vm12398_vm1 = vcmp.lt.s32.totalorder %v10622_v18, 0  ;;  %v6468_v26 = vadd.s32 4294967169, %v5025_v16 }
 0x5bd   : > { %v4584_v27 = vmul.f32 %v4583_v62, %v4581_v2  ;;  %vm6463_vm8 = vcmp.lt.s32.totalorder %v6462_v63, 0  ;;  %v4748_v3 = vsel %vm4742_vm14, %v4745_v17, %v4747_v11  ;;  %v5028_v10 = vand.u32 8388607, %v12342_v36 }
 0x5be   : > { %7097 = vcosq.f32 %v10833_v47  ;;  %v4884_v25 = vsel %vm6463_vm8, 0, %v6462_v63  ;;  %v4767_v29 = vadd.s32 1, %v10900_v45  ;;  %v4920_v38 = vand.u32 2139095040, %v10844_v28 }
 0x5bf   : > { %7099 = vsinq.f32 %v10833_v47  ;;  %v4869_v51 = vadd.s32 %v10791_v56, %v10804_v24  ;;  %v4885_v52 = vsub.s32 32, %v4884_v25  ;;  %v4889_v0 = vsub.s32 4294967266, %v4884_v25 }
 0x5c0   : > { %v4693_v6 = vsel %vm10878_vm9, %v10593_v7, %v4690_v44  ;;  %v4764_v39 = vmul.u32 %v10859_v8, %v4748_v3  ;;  %vm4766_vm7 = vc.u32 %v10905_v58, %v10899_v37  ;;  %v5031_v41 = vadd.s32 1, %v6468_v26 }
 0x5c1   : > { %v4585_v48 = vxor.u32 2147483648, %v4584_v27  ;;  %v4890_v46 = vadd.s32 127, %v4889_v0  ;;  %v4768_v2 = vsel %vm4766_vm7, %v4767_v29, %v10900_v45  ;;  %v5029_v47 = vor.u32 8388608, %v5028_v10 }
 0x5c2   : > { %v4887_v14 = vshrl.u32 %v4869_v51, %v4885_v52  ;;  %v4769_v60 = vadd.s32 %v4768_v2, %v4764_v39  ;;  %vm5032_vm5 = vcmp.gt.s32.totalorder %v5031_v41, 0  ;;  %v4921_v56 = vshrl.u32 %v4920_v38, 23 }
 0x5c3   : > { %v10936_v24 = vsel %vm4399_vm10, %v4483_v9, %v10602_v43  ;;  %7101 = vcosq.f32 %v4693_v6  ;;  %v4891_v8 = vshll.u32 %v4890_v46, 23  ;;  %v5033_v35 = vsel %vm5032_vm5, %v5031_v41, 0 }
 0x5c4   : > { %7103 = vsinq.f32 %v4693_v6  ;;  %v4886_v53 = vshll.u32 %v10863_v32, %v4884_v25  ;;  %v4770_v17 = vadd.s32 536870912, %v4769_v60  ;;  %v5035_v11 = vand.u32 31, %v5033_v35 }
 0x5c5   : > { %v10941_v5 = vsel %vm12398_vm1, %v4585_v48, %v4584_v27  ;;  %v4892_v34 = vor.u32 4788187, %v4891_v8  ;;  %v10943_v45 = vshll.u32 %v5029_v47, 8  ;;  %v12341_v16 = vand.u32 2147483647, %v10844_v28 }
 0x5c6   : > { %v4888_v62 = vor.u32 %v4887_v14, %v4886_v53  ;;  %v10946_v43 = vshrl.u32 %v4770_v17, 30  ;;  %v5036_v9 = vsub.s32 32, %v5035_v11  ;;  %v6464_v63 = vadd.s32 4294967169, %v4921_v56 }
 0x5c7   : > { %v4893_v20 = vand.u32 2147483647, %v4892_v34  ;;  %v10948_v44 = vshrl.u32 %v5033_v35, 5  ;;  %v5038_v32 = vshll.u32 %v12607_v12, %v5035_v11  ;;  %v5041_v26 = vshll.u32 %v12608_v13, %v5035_v11 }
 0x5c8   : > { %12791 = vst [vmem:[#allocation31_spill] sm:$0xff] %v10946_v43  ;;  %v4772_v27 = vshll.u32 %v10946_v43, 30  ;;  %v5039_v3 = vshrl.u32 %v12608_v13, %v5036_v9  ;;  %v5042_v10 = vshrl.u32 %v12609_v4, %v5036_v9  ;;  %v5044_v25 = vshll.u32 %v12609_v4, %v5035_v11 }
 0x5c9   : > { %v10956_v29 = vpop.eup %7095  ;;  %v5045_v38 = vshrl.u32 %v12610_v23, %v5036_v9  ;;  %v5047_v51 = vshll.u32 %v12610_v23, %v5035_v11  ;;  %v5048_v52 = vshrl.u32 %v12611_v49, %v5036_v9  ;;  %v5051_v0 = vshrl.u32 %v12612_v59, %v5036_v9 }
 0x5ca   : > { %v10962_v6 = vsub.s32 %v4769_v60, %v4772_v27  ;;  %v5040_v39 = vor.u32 %v5039_v3, %v5038_v32  ;;  %v5043_v41 = vor.u32 %v5042_v10, %v5041_v26  ;;  %v5050_v48 = vshll.u32 %v12611_v49, %v5035_v11  ;;  %v6684_v11 = vpop.f32.mrf.mxu0 }
 0x5cb   : > { %v10965_v46 = vpop.eup %7097  ;;  %vm10969_vm10 = vcmp.le.f32.partialorder %v4501_v21, 0.7853982  ;;  %v4895_v47 = vcvt.s32.f32 %v4888_v62  ;;  %v5046_v14 = vor.u32 %v5045_v38, %v5044_v25  ;;  %v5049_v56 = vor.u32 %v5048_v52, %v5047_v51 }
 0x5cc   : > { %v4924_v8 = vand.u32 8388607, %v12341_v16  ;;  %v10975_v60 = vpop.eup %7099  ;;  %v4775_v35 = vsub.s32 0, %v10962_v6  ;;  %v5052_v53 = vor.u32 %v5051_v0, %v5050_v48  ;;  %vm5053_vm0 = vcmp.lt.s32.totalorder %v10948_v44, 1 }
 0x5cd   : > { %v4927_v17 = vadd.s32 1, %v6464_v63  ;;  %vm12364_vm11 = vcmp.lt.s32.totalorder %v10634_v57, 0  ;;  %v4896_v21 = vmul.f32 %v4895_v47, %v4893_v20  ;;  %v5037_v34 = vshrl.u32 %v12607_v12, %v5036_v9  ;;  %v10992_v9 = vld [vmem:[%s12143_s6] ss:$0 sm:$0xff] }
 0x5ce   : > { %vm5056_vm6 = vcmp.lt.s32.totalorder %v10948_v44, 4  ;;  %v5061_v62 = vsel %vm5053_vm0, %v5040_v39, %v5043_v41  ;;  %v6457_v32 = vmin.u32 %v4775_v35, %v10962_v6  ;;  %vm5055_vm13 = vcmp.lt.s32.totalorder %v10948_v44, 3 }
 0x5cf   : > { %v5058_v26 = vsel %vm5056_vm6, %v5046_v14, 2102212464  ;;  %v5062_v27 = vsel %vm5056_vm6, %v5049_v56, 920167782  ;;  %vm5054_vm15 = vcmp.lt.s32.totalorder %v10948_v44, 2  ;;  %v5065_v3 = vsel %vm5053_vm0, %v5043_v41, %v5046_v14 }
 0x5d0   : > { %v5063_v63 = vsel %vm5055_vm13, %v5046_v14, %v5062_v27  ;;  %v10995_v20 = vadd.f32 %v10992_v9, %v6684_v11  ;;  %v10997_v10 = vpop.eup %7101  ;;  %v4777_v25 = vclz %v6457_v32  ;;  %v5057_v38 = vsel %vm5053_vm0, %v5037_v34, %v5040_v39 }
 0x5d1   : > { %12795 = vst [vmem:[#allocation10_spill] sm:$0xff] %v10997_v10  ;;  %v5064_v51 = vsel %vm5054_vm15, %v5061_v62, %v5063_v63  ;;  %v5066_v52 = vsel %vm5056_vm6, %v5052_v53, 1326507024  ;;  %v11003_v0 = vpop.eup %7103  ;;  %v5059_v48 = vsel %vm5055_vm13, %v5043_v41, %v5058_v26  ;;  %v4897_v11 = vxor.u32 2147483648, %v4896_v21 }
 0x5d2   : > { %12794 = vst [vmem:[#allocation37_spill] sm:$0xff] %v10995_v20  ;;  %12796 = vst [vmem:[#allocation13_spill] sm:$0xff] %v11003_v0  ;;  %v5067_v47 = vsel %vm5055_vm13, %v5049_v56, %v5066_v52  ;;  %v11006_v14 = vmul.u32.u64.low %v10943_v45, %v5064_v51  ;;  %v11007_v35 = vmul.u32.u64.high %v10943_v45, %v5064_v51, %v11006_v14  ;;  %v6458_v27 = vadd.s32 4294967294, %v4777_v25 }
 0x5d3   : > { %v5068_v32 = vsel %vm5054_vm15, %v5065_v3, %v5067_v47  ;;  %vm4928_vm14 = vcmp.gt.s32.totalorder %v4927_v17, 0  ;;  %v4925_v53 = vor.u32 8388608, %v4924_v8  ;;  %v11020_v41 = vsel %vm10969_vm10, %v10622_v18, %v10941_v5 }
 0x5d4   : > { %v11013_v39 = vmul.u32.u64.low %v10943_v45, %v5068_v32  ;;  %v11014_v34 = vmul.u32.u64.high %v10943_v45, %v5068_v32, %v11013_v39  ;;  %v4929_v62 = vsel %vm4928_vm14, %v4927_v17, 0  ;;  %vm6459_vm8 = vcmp.lt.s32.totalorder %v6458_v27, 0 }
 0x5d5   : > { %v5060_v56 = vsel %vm5054_vm15, %v5057_v38, %v5059_v48  ;;  %v4931_v26 = vand.u32 31, %v4929_v62  ;;  %v4765_v63 = vadd.s32 %v10899_v37, %v10905_v58  ;;  %v4780_v3 = vsel %vm6459_vm8, 0, %v6458_v27 }
 0x5d6   : > { %v5079_v25 = vadd.s32 1, %v11007_v35  ;;  %v4898_v17 = vsel %vm12364_vm11, %v4897_v11, %v4896_v21  ;;  %v4781_v51 = vsub.s32 32, %v4780_v3  ;;  %v4785_v52 = vsub.s32 4294967266, %v4780_v3 }
 0x5d7   : > { %v4932_v5 = vsub.s32 32, %v4931_v26  ;;  %v5076_v47 = vmul.u32 %v10943_v45, %v5060_v56  ;;  %vm5078_vm7 = vc.u32 %v11014_v34, %v11006_v14  ;;  %v4930_v44 = vshrl.u32 %v4929_v62, 5 }
 0x5d8   : > { %v11033_v38 = vshll.u32 %v4925_v53, 8  ;;  %v4786_v37 = vadd.s32 127, %v4785_v52  ;;  %v5080_v58 = vsel %vm5078_vm7, %v5079_v25, %v11007_v35  ;;  %v4934_v48 = vshll.u32 %v12607_v12, %v4931_v26 }
 0x5d9   : > { %v5232_v27 = vand.u32 2139095040, %v10995_v20  ;;  %v5081_v32 = vadd.s32 %v5080_v58, %v5076_v47  ;;  %v4935_v21 = vshrl.u32 %v12608_v13, %v4932_v5  ;;  %v4937_v11 = vshll.u32 %v12608_v13, %v4931_v26 }
 0x5da   : > { %v4938_v45 = vshrl.u32 %v12609_v4, %v4932_v5  ;;  %v4783_v39 = vshrl.u32 %v4765_v63, %v4781_v51  ;;  %v4787_v56 = vshll.u32 %v4786_v37, 23  ;;  %v4940_v62 = vshll.u32 %v12609_v4, %v4931_v26 }
 0x5db   : > { %v4941_v53 = vshrl.u32 %v12610_v23, %v4932_v5  ;;  %v4782_v52 = vshll.u32 %v10962_v6, %v4780_v3  ;;  %v5082_v35 = vadd.s32 536870912, %v5081_v32  ;;  %v4943_v25 = vshll.u32 %v12610_v23, %v4931_v26 }
 0x5dc   : > { %v4944_v16 = vshrl.u32 %v12611_v49, %v4932_v5  ;;  %vm11048_vm5 = vcmp.le.f32.partialorder %v4813_v1, 0.7853982  ;;  %v12797_v47 = vmov 0  ;;  %v4788_v58 = vor.u32 4788187, %v4787_v56 }
 0x5dd   : > { %v12798_v47 = vsel %vm11048_vm5, 4294967295, %v12797_v47  ;;  %v4936_v63 = vor.u32 %v4935_v21, %v4934_v48  ;;  %v4939_v51 = vor.u32 %v4938_v45, %v4937_v11  ;;  %v4942_v37 = vor.u32 %v4941_v53, %v4940_v62 }
 0x5de   : > { %12799 = vst [vmem:[#allocation7_spill] sm:$0xff] %v12798_v47  ;;  %v11052_v36 = vshrl.u32 %v5082_v35, 30  ;;  %v4945_v8 = vor.u32 %v4944_v16, %v4943_v25  ;;  %v4946_v6 = vshll.u32 %v12611_v49, %v4931_v26  ;;  %v4947_v3 = vshrl.u32 %v12612_v59, %v4932_v5 }
 0x5df   : > { %v4784_v40 = vor.u32 %v4783_v39, %v4782_v52  ;;  %v4933_v43 = vshrl.u32 %v12607_v12, %v4932_v5  ;;  %vm4952_vm0 = vcmp.lt.s32.totalorder %v4930_v44, 4  ;;  %v12801_v1 = vand.u32 2147483647, %v10995_v20 }
 0x5e0   : > { %12800 = vst [vmem:[#allocation19_spill] sm:$0xff] %v11052_v36  ;;  %v5084_v0 = vshll.u32 %v11052_v36, 30  ;;  %v4948_v56 = vor.u32 %v4947_v3, %v4946_v6  ;;  %vm4949_vm6 = vcmp.lt.s32.totalorder %v4930_v44, 1  ;;  %v4954_v48 = vsel %vm4952_vm0, %v4942_v37, 2102212464 }
 0x5e1   : > { %v5236_v10 = vand.u32 8388607, %v12801_v1  ;;  %v4789_v21 = vand.u32 2147483647, %v4788_v58  ;;  %vm4951_vm13 = vcmp.lt.s32.totalorder %v4930_v44, 3  ;;  %v4957_v16 = vsel %vm4949_vm6, %v4936_v63, %v4939_v51 }
 0x5e2   : > { %v4958_v26 = vsel %vm4952_vm0, %v4945_v8, 920167782  ;;  %v11062_v11 = vsub.s32 %v5081_v32, %v5084_v0  ;;  %vm4950_vm15 = vcmp.lt.s32.totalorder %v4930_v44, 2  ;;  %v4961_v5 = vsel %vm4949_vm6, %v4939_v51, %v4942_v37 }
 0x5e3   : > { %v4959_v45 = vsel %vm4951_vm13, %v4942_v37, %v4958_v26  ;;  %v4953_v39 = vsel %vm4949_vm6, %v4933_v43, %v4936_v63  ;;  %v4955_v62 = vsel %vm4951_vm13, %v4939_v51, %v4954_v48  ;;  %v4962_v52 = vsel %vm4952_vm0, %v4948_v56, 1326507024  ;;  %v4254_v43 = vpop.f32.mrf.mxu0 }
 0x5e4   : > { %v4960_v53 = vsel %vm4950_vm15, %v4957_v16, %v4959_v45  ;;  %v5087_v35 = vsub.s32 0, %v11062_v11  ;;  %v4963_v25 = vsel %vm4951_vm13, %v4945_v8, %v4962_v52  ;;  %7105 = vcosq.f32 %v11020_v41 }
 0x5e5   : > { %v11068_v58 = vmul.u32.u64.low %v11033_v38, %v4960_v53  ;;  %v11069_v6 = vmul.u32.u64.high %v11033_v38, %v4960_v53, %v11068_v58  ;;  %v4791_v0 = vcvt.s32.f32 %v4784_v40  ;;  %v4964_v32 = vsel %vm4950_vm15, %v4961_v5, %v4963_v25 }
 0x5e6   : > { %v5233_v37 = vshrl.u32 %v5232_v27, 23  ;;  %v11077_v63 = vsel %vm11048_vm5, %v10634_v57, %v4898_v17  ;;  %v6469_v51 = vmin.u32 %v5087_v35, %v11062_v11  ;;  %v4956_v56 = vsel %vm4950_vm15, %v4953_v39, %v4955_v62 }
 0x5e7   : > { %v11081_v8 = vmul.u32.u64.low %v11033_v38, %v4964_v32  ;;  %v11082_v3 = vmul.u32.u64.high %v11033_v38, %v4964_v32, %v11081_v8  ;;  %v11084_v1 = vmul.f32 %v4791_v0, %v4789_v21  ;;  %v5237_v48 = vor.u32 8388608, %v5236_v10  ;;  %v6687_v21 = vpop.f32.mrf.mxu0 }
 0x5e8   : > { %v6476_v40 = vadd.s32 4294967169, %v5233_v37  ;;  %7107 = vsinq.f32 %v11020_v41  ;;  %v5089_v27 = vclz %v6469_v51  ;;  %v4975_v16 = vadd.s32 1, %v11069_v6 }
 0x5e9   : > { %7109 = vcosq.f32 %v11077_v63  ;;  %v11094_v45 = vadd.f32 %v10992_v9, %v4254_v43  ;;  %v5077_v44 = vadd.s32 %v11006_v14, %v11014_v34  ;;  %v4972_v41 = vmul.u32 %v11033_v38, %v4956_v56 }
 0x5ea   : > { %v5239_v26 = vadd.s32 1, %v6476_v40  ;;  %v6470_v10 = vadd.s32 4294967294, %v5089_v27  ;;  %vm4974_vm14 = vc.u32 %v11082_v3, %v11068_v58  ;;  %v11103_v62 = vshll.u32 %v5237_v48, 8 }
 0x5eb   : > { %12802 = vst [vmem:[#allocation28_spill] sm:$0xff] %v11094_v45  ;;  %v4976_v39 = vsel %vm4974_vm14, %v4975_v16, %v11069_v6  ;;  %v11106_v35 = vadd.f32 %v10992_v9, %v6687_v21  ;;  %v5128_v25 = vand.u32 2139095040, %v11094_v45  ;;  %vm12383_vm0 = vcmp.lt.s32.totalorder %v10754_v22, 0 }
 0x5ec   : > { %vm5240_vm8 = vcmp.gt.s32.totalorder %v5239_v26, 0  ;;  %vm6471_vm7 = vcmp.lt.s32.totalorder %v6470_v10, 0  ;;  %v4977_v53 = vadd.s32 %v4976_v39, %v4972_v41  ;;  %7111 = vsinq.f32 %v11077_v63 }
 0x5ed   : > { %v5241_v52 = vsel %vm5240_vm8, %v5239_v26, 0  ;;  %12803 = vst [vmem:[#allocation22_spill] sm:$0xff] %v11106_v35  ;;  %v5092_v14 = vsel %vm6471_vm7, 0, %v6470_v10  ;;  %v5129_v17 = vshrl.u32 %v5128_v25, 23 }
 0x5ee   : > { %v5243_v34 = vand.u32 31, %v5241_v52  ;;  %v5093_v0 = vsub.s32 32, %v5092_v14  ;;  %v5097_v32 = vsub.s32 4294967266, %v5092_v14  ;;  %v4978_v37 = vadd.s32 536870912, %v4977_v53 }
 0x5ef   : > { %v11110_v43 = vshrl.u32 %v5241_v52, 5  ;;  %v5094_v6 = vshll.u32 %v11062_v11, %v5092_v14 }
 0x5f0   : > { %v5244_v51 = vsub.s32 32, %v5243_v34  ;;  %v5246_v8 = vshll.u32 %v12607_v12, %v5243_v34  ;;  %v5249_v56 = vshll.u32 %v12608_v13, %v5243_v34  ;;  %v5095_v40 = vshrl.u32 %v5077_v44, %v5093_v0 }
 0x5f1   : > { %v5098_v48 = vadd.s32 127, %v5097_v32  ;;  %v11115_v27 = vshrl.u32 %v4978_v37, 30  ;;  %v5252_v16 = vshll.u32 %v12609_v4, %v5243_v34  ;;  %v5255_v41 = vshll.u32 %v12610_v23, %v5243_v34  ;;  %v11122_v11 = vpop.eup %7105 }
 0x5f2   : > { %v5247_v26 = vshrl.u32 %v12608_v13, %v5244_v51  ;;  %v5250_v21 = vshrl.u32 %v12609_v4, %v5244_v51  ;;  %v5253_v10 = vshrl.u32 %v12610_v23, %v5244_v51  ;;  %v5096_v39 = vor.u32 %v5095_v40, %v5094_v6 }
 0x5f3   : > { %12804 = vst [vmem:[#allocation9_spill] sm:$0xff] %v11115_v27  ;;  %v5099_v52 = vshll.u32 %v5098_v48, 23  ;;  %v4980_v14 = vshll.u32 %v11115_v27, 30  ;;  %v5256_v44 = vshrl.u32 %v12611_v49, %v5244_v51  ;;  %v5245_v0 = vshrl.u32 %v12607_v12, %v5244_v51 }
 0x5f4   : > { %v5248_v32 = vor.u32 %v5247_v26, %v5246_v8  ;;  %v5251_v37 = vor.u32 %v5250_v21, %v5249_v56  ;;  %v5254_v36 = vor.u32 %v5253_v10, %v5252_v16  ;;  %v5103_v6 = vcvt.s32.f32 %v5096_v39 }
 0x5f5   : > { %v5100_v5 = vor.u32 4788187, %v5099_v52  ;;  %v11127_v38 = vsub.s32 %v4977_v53, %v4980_v14  ;;  %v5257_v47 = vor.u32 %v5256_v44, %v5255_v41  ;;  %v11129_v57 = vpop.eup %7107  ;;  %v5258_v40 = vshll.u32 %v12611_v49, %v5243_v34 }
 0x5f6   : > { %v5259_v48 = vshrl.u32 %v12612_v59, %v5244_v51  ;;  %vm5261_vm6 = vcmp.lt.s32.totalorder %v11110_v43, 1  ;;  %v11135_v27 = vpop.eup %7109  ;;  %vm5262_vm13 = vcmp.lt.s32.totalorder %v11110_v43, 2  ;;  %vm5264_vm15 = vcmp.lt.s32.totalorder %v11110_v43, 4 }
 0x5f7   : > { %12805 = vst [vmem:[#allocation21_spill] sm:$0xff] %v11135_v27  ;;  %v5101_v8 = vand.u32 2147483647, %v5100_v5  ;;  %v4983_v25 = vsub.s32 0, %v11127_v38  ;;  %vm5263_vm14 = vcmp.lt.s32.totalorder %v11110_v43, 3  ;;  %v5269_v56 = vsel %vm5261_vm6, %v5248_v32, %v5251_v37 }
 0x5f8   : > { %v5260_v53 = vor.u32 %v5259_v48, %v5258_v40  ;;  %v5270_v34 = vsel %vm5264_vm15, %v5257_v47, 920167782  ;;  %v12806_v51 = vand.u32 2147483647, %v10754_v22  ;;  %v12807_v16 = vmov 0 }
 0x5f9   : > { %v5104_v5 = vmul.f32 %v5103_v6, %v5101_v8  ;;  %v6465_v26 = vmin.u32 %v4983_v25, %v11127_v38  ;;  %v5266_v21 = vsel %vm5264_vm15, %v5254_v36, 2102212464  ;;  %v5271_v10 = vsel %vm5263_vm14, %v5254_v36, %v5270_v34 }
 0x5fa   : > { %vm11145_vm8 = vcmp.le.f32.partialorder %v12806_v51, 0.7853982  ;;  %v5272_v41 = vsel %vm5262_vm13, %v5269_v56, %v5271_v10  ;;  %v5273_v39 = vsel %vm5261_vm6, %v5251_v37, %v5254_v36  ;;  %v5274_v52 = vsel %vm5264_vm15, %v5260_v53, 1326507024 }
 0x5fb   : > { %v12808_v16 = vsel %vm11145_vm8, 4294967295, %v12807_v16  ;;  %v6472_v14 = vadd.s32 4294967169, %v5129_v17  ;;  %v4985_v44 = vclz %v6465_v26  ;;  %v5265_v40 = vsel %vm5261_vm6, %v5245_v0, %v5248_v32 }
 0x5fc   : > { %12809 = vst [vmem:[#allocation11_spill] sm:$0xff] %v12808_v16  ;;  %v5275_v6 = vsel %vm5263_vm14, %v5257_v47, %v5274_v52  ;;  %v12810_v48 = vand.u32 2147483647, %v11094_v45  ;;  %v5267_v25 = vsel %vm5263_vm14, %v5251_v37, %v5266_v21  ;;  %v5105_v17 = vxor.u32 2147483648, %v5104_v5 }
 0x5fd   : > { %v5276_v56 = vsel %vm5262_vm13, %v5273_v39, %v5275_v6  ;;  %v11167_v36 = vmul.u32.u64.low %v11103_v62, %v5272_v41  ;;  %v11168_v53 = vmul.u32.u64.high %v11103_v62, %v5272_v41, %v11167_v36  ;;  %v6466_v34 = vadd.s32 4294967294, %v4985_v44 }
 0x5fe   : > { %v5132_v8 = vand.u32 8388607, %v12810_v48  ;;  %v11172_v0 = vmul.u32.u64.low %v11103_v62, %v5276_v56  ;;  %v11173_v32 = vmul.u32.u64.high %v11103_v62, %v5276_v56, %v11172_v0  ;;  %v12811_v47 = vand.u32 2147483647, %v10824_v31 }
 0x5ff   : > { %v12812_v37 = vmov 0  ;;  %vm12363_vm6 = vcmp.lt.s32.totalorder %v10824_v31, 0  ;;  %v5135_v51 = vadd.s32 1, %v6472_v14  ;;  %v12815_v26 = vxor.u32 2147483648, %v11084_v1 }
 0x600   : > { %vm11178_vm7 = vcmp.le.f32.partialorder %v12811_v47, 0.7853982  ;;  %v4973_v10 = vadd.s32 %v11068_v58, %v11082_v3  ;;  %vm6467_vm15 = vcmp.lt.s32.totalorder %v6466_v34, 0  ;;  %v5268_v63 = vsel %vm5262_vm13, %v5265_v40, %v5267_v25 }
 0x601   : > { %v12813_v37 = vsel %vm11178_vm7, 4294967295, %v12812_v37  ;;  %v4794_v21 = vsel %vm12383_vm0, %v12815_v26, %v11084_v1  ;;  %v4988_v41 = vsel %vm6467_vm15, 0, %v6466_v34  ;;  %v5287_v39 = vadd.s32 1, %v11168_v53 }
 0x602   : > { %12814 = vst [vmem:[#allocation35_spill] sm:$0xff] %v12813_v37  ;;  %v5133_v52 = vor.u32 8388608, %v5132_v8  ;;  %vm5136_vm14 = vcmp.gt.s32.totalorder %v5135_v51, 0  ;;  %v5106_v14 = vsel %vm12363_vm6, %v5105_v17, %v5104_v5  ;;  %v4989_v44 = vsub.s32 32, %v4988_v41 }
 0x603   : > { %v4993_v6 = vsub.s32 4294967266, %v4988_v41  ;;  %v5440_v48 = vand.u32 2139095040, %v11106_v35  ;;  %v11199_v58 = vsel %vm11145_vm8, %v10754_v22, %v4794_v21  ;;  %v5284_v3 = vmul.u32 %v11103_v62, %v5268_v63 }
 0x604   : > { %vm5286_vm13 = vc.u32 %v11173_v32, %v11167_v36  ;;  %v5137_v1 = vsel %vm5136_vm14, %v5135_v51, 0  ;;  %v4990_v43 = vshll.u32 %v11127_v38, %v4988_v41  ;;  %v4991_v40 = vshrl.u32 %v4973_v10, %v4989_v44 }
 0x605   : > { %v4994_v8 = vadd.s32 127, %v4993_v6  ;;  %v5288_v5 = vsel %vm5286_vm13, %v5287_v39, %v11168_v53  ;;  %v11209_v25 = vsel %vm11178_vm7, %v10824_v31, %v5106_v14  ;;  %v5139_v17 = vand.u32 31, %v5137_v1 }
 0x606   : > { %v5289_v56 = vadd.s32 %v5288_v5, %v5284_v3  ;;  %v4992_v62 = vor.u32 %v4991_v40, %v4990_v43  ;;  %v11212_v47 = vshll.u32 %v5133_v52, 8  ;;  %v5441_v51 = vshrl.u32 %v5440_v48, 23 }
 0x607   : > { %v4995_v0 = vshll.u32 %v4994_v8, 23  ;;  %v5138_v38 = vshrl.u32 %v5137_v1, 5  ;;  %v5140_v21 = vsub.s32 32, %v5139_v17  ;;  %v5142_v10 = vshll.u32 %v12607_v12, %v5139_v17 }
 0x608   : > { %v5290_v26 = vadd.s32 536870912, %v5289_v56  ;;  %v4999_v63 = vcvt.s32.f32 %v4992_v62  ;;  %v5145_v41 = vshll.u32 %v12608_v13, %v5139_v17  ;;  %v5148_v39 = vshll.u32 %v12609_v4, %v5139_v17 }
 0x609   : > { %v4996_v53 = vor.u32 4788187, %v4995_v0  ;;  %v5143_v44 = vshrl.u32 %v12608_v13, %v5140_v21  ;;  %v5146_v6 = vshrl.u32 %v12609_v4, %v5140_v21  ;;  %v5151_v52 = vshll.u32 %v12610_v23, %v5139_v17  ;;  %v11227_v0 = vpop.eup %7111 }
 0x60a   : > { %v11217_v14 = vshrl.u32 %v5290_v26, 30  ;;  %v5149_v3 = vshrl.u32 %v12610_v23, %v5140_v21  ;;  %v5152_v1 = vshrl.u32 %v12611_v49, %v5140_v21  ;;  %v5154_v43 = vshll.u32 %v12611_v49, %v5139_v17  ;;  %12817 = vst [vmem:[#allocation25_spill] sm:$0xff] %v11227_v0 }
 0x60b   : > { %v4997_v48 = vand.u32 2147483647, %v4996_v53  ;;  %v5144_v8 = vor.u32 %v5143_v44, %v5142_v10  ;;  %v5147_v5 = vor.u32 %v5146_v6, %v5145_v41  ;;  %v5155_v62 = vshrl.u32 %v12612_v59, %v5140_v21 }
 0x60c   : > { %12816 = vst [vmem:[#allocation38_spill] sm:$0xff] %v11217_v14  ;;  %v5292_v40 = vshll.u32 %v11217_v14, 30  ;;  %v5141_v26 = vshrl.u32 %v12607_v12, %v5140_v21  ;;  %v5150_v34 = vor.u32 %v5149_v3, %v5148_v39  ;;  %v5153_v37 = vor.u32 %v5152_v1, %v5151_v52 }
 0x60d   : > { %vm5157_vm15 = vcmp.lt.s32.totalorder %v5138_v38, 1  ;;  %v5000_v53 = vmul.f32 %v4999_v63, %v4997_v48  ;;  %v5156_v27 = vor.u32 %v5155_v62, %v5154_v43  ;;  %vm5160_vm14 = vcmp.lt.s32.totalorder %v5138_v38, 4 }
 0x60e   : > { %v11230_v31 = vsub.s32 %v5289_v56, %v5292_v40  ;;  %vm5159_vm13 = vcmp.lt.s32.totalorder %v5138_v38, 3  ;;  %v5162_v17 = vsel %vm5160_vm14, %v5150_v34, 2102212464  ;;  %v5165_v16 = vsel %vm5157_vm15, %v5144_v8, %v5147_v5 }
 0x60f   : > { %v5166_v14 = vsel %vm5160_vm14, %v5153_v37, 920167782  ;;  %vm5158_vm6 = vcmp.lt.s32.totalorder %v5138_v38, 2  ;;  %v5169_v44 = vsel %vm5157_vm15, %v5147_v5, %v5150_v34  ;;  %v5161_v6 = vsel %vm5157_vm15, %v5141_v26, %v5144_v8 }
 0x610   : > { %v5295_v10 = vsub.s32 0, %v11230_v31  ;;  %v5167_v41 = vsel %vm5159_vm13, %v5150_v34, %v5166_v14  ;;  %v5170_v39 = vsel %vm5160_vm14, %v5156_v27, 1326507024  ;;  %v6484_v52 = vadd.s32 4294967169, %v5441_v51 }
 0x611   : > { %v5168_v21 = vsel %vm5158_vm6, %v5165_v16, %v5167_v41  ;;  %v5001_v3 = vxor.u32 2147483648, %v5000_v53  ;;  %v5163_v63 = vsel %vm5159_vm13, %v5147_v5, %v5162_v17  ;;  %v5171_v48 = vsel %vm5159_vm13, %v5153_v37, %v5170_v39 }
 0x612   : > { %v6477_v56 = vmin.u32 %v5295_v10, %v11230_v31  ;;  %v5172_v1 = vsel %vm5158_vm6, %v5169_v44, %v5171_v48  ;;  %v11237_v43 = vmul.u32.u64.low %v11212_v47, %v5168_v21  ;;  %v11238_v40 = vmul.u32.u64.high %v11212_v47, %v5168_v21, %v11237_v43 }
 0x613   : > { %v12818_v14 = vand.u32 2147483647, %v11106_v35  ;;  %7113 = vcosq.f32 %v11199_v58  ;;  %v11245_v27 = vmul.u32.u64.low %v11212_v47, %v5172_v1  ;;  %v11246_v51 = vmul.u32.u64.high %v11212_v47, %v5172_v1, %v11245_v27 }
 0x614   : > { %v5297_v16 = vclz %v6477_v56  ;;  %7115 = vsinq.f32 %v11199_v58  ;;  %vm12368_vm15 = vcmp.lt.s32.totalorder %v10844_v28, 0  ;;  %v5164_v37 = vsel %vm5158_vm6, %v5161_v6, %v5163_v63 }
 0x615   : > { %v5444_v34 = vand.u32 8388607, %v12818_v14  ;;  %v5447_v8 = vadd.s32 1, %v6484_v52  ;;  %7117 = vcosq.f32 %v11209_v25  ;;  %v12819_v5 = vand.u32 2147483647, %v10844_v28 }
 0x616   : > { %v12820_v62 = vmov 0  ;;  %v5002_v26 = vsel %vm12368_vm15, %v5001_v3, %v5000_v53  ;;  %v6478_v17 = vadd.s32 4294967294, %v5297_v16  ;;  %v5285_v58 = vadd.s32 %v11167_v36, %v11173_v32 }
 0x617   : > { %vm11254_vm14 = vcmp.le.f32.partialorder %v12819_v5, 0.7853982  ;;  %v5183_v10 = vadd.s32 1, %v11238_v40  ;;  %v5445_v38 = vor.u32 8388608, %v5444_v34  ;;  %vm5448_vm6 = vcmp.gt.s32.totalorder %v5447_v8, 0 }
 0x618   : > { %v12821_v62 = vsel %vm11254_vm14, 4294967295, %v12820_v62  ;;  %vm6479_vm13 = vcmp.lt.s32.totalorder %v6478_v17, 0  ;;  %v5180_v41 = vmul.u32 %v11212_v47, %v5164_v37  ;;  %vm5182_vm11 = vc.u32 %v11246_v51, %v11237_v43 }
 0x619   : > { %12822 = vst [vmem:[#allocation29_spill] sm:$0xff] %v12821_v62  ;;  %v5449_v44 = vsel %vm5448_vm6, %v5447_v8, 0  ;;  %v11269_v6 = vsel %vm11254_vm14, %v10844_v28, %v5002_v26  ;;  %v5300_v53 = vsel %vm6479_vm13, 0, %v6478_v17  ;;  %v5184_v21 = vsel %vm5182_vm11, %v5183_v10, %v11238_v40 }
 0x61a   : > { %v5451_v36 = vand.u32 31, %v5449_v44  ;;  %v5301_v32 = vsub.s32 32, %v5300_v53  ;;  %v5305_v39 = vsub.s32 4294967266, %v5300_v53  ;;  %v5185_v52 = vadd.s32 %v5184_v21, %v5180_v41 }
 0x61b   : > { %v11272_v3 = vshrl.u32 %v5449_v44, 5  ;;  %v5302_v47 = vshll.u32 %v11230_v31, %v5300_v53  ;;  %v11285_v44 = vshll.u32 %v5445_v38, 8  ;;  %7119 = vsinq.f32 %v11209_v25 }
 0x61c   : > { %v5452_v56 = vsub.s32 32, %v5451_v36  ;;  %v5454_v63 = vshll.u32 %v12607_v12, %v5451_v36  ;;  %v5457_v48 = vshll.u32 %v12608_v13, %v5451_v36  ;;  %v5303_v1 = vshrl.u32 %v5285_v58, %v5301_v32 }
 0x61d   : > { %v5306_v14 = vadd.s32 127, %v5305_v39  ;;  %v5186_v34 = vadd.s32 536870912, %v5185_v52  ;;  %v5460_v16 = vshll.u32 %v12609_v4, %v5451_v36  ;;  %v5463_v8 = vshll.u32 %v12610_v23, %v5451_v36 }
 0x61e   : > { %v5455_v40 = vshrl.u32 %v12608_v13, %v5452_v56  ;;  %v5458_v27 = vshrl.u32 %v12609_v4, %v5452_v56  ;;  %v5461_v37 = vshrl.u32 %v12610_v23, %v5452_v56  ;;  %v5304_v5 = vor.u32 %v5303_v1, %v5302_v47 }
 0x61f   : > { %v5307_v31 = vshll.u32 %v5306_v14, 23  ;;  %v11282_v26 = vshrl.u32 %v5186_v34, 30  ;;  %v5464_v17 = vshrl.u32 %v12611_v49, %v5452_v56  ;;  %v5453_v32 = vshrl.u32 %v12607_v12, %v5452_v56 }
 0x620   : > { %v5456_v10 = vor.u32 %v5455_v40, %v5454_v63  ;;  %v5459_v58 = vor.u32 %v5458_v27, %v5457_v48  ;;  %v5462_v41 = vor.u32 %v5461_v37, %v5460_v16  ;;  %v11289_v62 = vpop.eup %7113  ;;  %v5311_v28 = vcvt.s32.f32 %v5304_v5  ;;  %v4264_v63 = vpop.f32.mrf.mxu0 }
 0x621   : > { %12823 = vst [vmem:[#allocation24_spill] sm:$0xff] %v11282_v26  ;;  %v5308_v53 = vor.u32 4788187, %v5307_v31  ;;  %v5188_v21 = vshll.u32 %v11282_v26, 30  ;;  %v5465_v39 = vor.u32 %v5464_v17, %v5463_v8  ;;  %12824 = vst [vmem:[#allocation36_spill] sm:$0xff] %v11289_v62  ;;  %v5466_v47 = vshll.u32 %v12611_v49, %v5451_v36  ;;  %v11294_v48 = vpop.eup %7115 }
 0x622   : > { %v5467_v1 = vshrl.u32 %v12612_v59, %v5452_v56  ;;  %vm5469_vm11 = vcmp.lt.s32.totalorder %v11272_v3, 1  ;;  %12825 = vst [vmem:[#allocation27_spill] sm:$0xff] %v11294_v48  ;;  %vm5471_vm6 = vcmp.lt.s32.totalorder %v11272_v3, 3  ;;  %vm5472_vm13 = vcmp.lt.s32.totalorder %v11272_v3, 4  ;;  %v11300_v34 = vpop.eup %7117 }
 0x623   : > { %v5309_v38 = vand.u32 2147483647, %v5308_v53  ;;  %v11296_v14 = vsub.s32 %v5185_v52, %v5188_v21  ;;  %12826 = vst [vmem:[#allocation30_spill] sm:$0xff] %v11300_v34  ;;  %v5474_v40 = vsel %vm5472_vm13, %v5462_v41, 2102212464  ;;  %v5477_v36 = vsel %vm5469_vm11, %v5456_v10, %v5459_v58  ;;  %v6690_v53 = vpop.f32.mrf.mxu0 }
 0x624   : > { %v5468_v16 = vor.u32 %v5467_v1, %v5466_v47  ;;  %v5478_v56 = vsel %vm5472_vm13, %v5465_v39, 920167782  ;;  %vm5470_vm15 = vcmp.lt.s32.totalorder %v11272_v3, 2  ;;  %v5481_v5 = vsel %vm5469_vm11, %v5459_v58, %v5462_v41 }
 0x625   : > { %v5312_v27 = vmul.f32 %v5311_v28, %v5309_v38  ;;  %v5191_v37 = vsub.s32 0, %v11296_v14  ;;  %v5479_v52 = vsel %vm5471_vm6, %v5462_v41, %v5478_v56  ;;  %v11313_v17 = vadd.f32 %v10992_v9, %v4264_v63 }
 0x626   : > { %v5480_v8 = vsel %vm5470_vm15, %v5477_v36, %v5479_v52  ;;  %v5482_v31 = vsel %vm5472_vm13, %v5468_v16, 1326507024  ;;  %v5473_v21 = vsel %vm5469_vm11, %v5453_v32, %v5456_v10  ;;  %v5475_v47 = vsel %vm5471_vm6, %v5459_v58, %v5474_v40 }
 0x627   : > { %v6473_v28 = vmin.u32 %v5191_v37, %v11296_v14  ;;  %v5483_v1 = vsel %vm5471_vm6, %v5465_v39, %v5482_v31  ;;  %v5313_v38 = vxor.u32 2147483648, %v5312_v27  ;;  %v11333_v10 = vadd.f32 %v10992_v9, %v6690_v53 }
 0x628   : > { %v5484_v41 = vsel %vm5470_vm15, %v5481_v5, %v5483_v1  ;;  %v11325_v16 = vmul.u32.u64.low %v11285_v44, %v5480_v8  ;;  %v11326_v63 = vmul.u32.u64.high %v11285_v44, %v5480_v8, %v11325_v16  ;;  %v12827_v58 = vsel %vm10769_vm12, 0, %v10936_v24  ;;  %v4274_v24 = vpop.f32.mrf.mxu0 }
 0x629   : > { %v5193_v36 = vclz %v6473_v28  ;;  %v11329_v56 = vmul.u32.u64.low %v11285_v44, %v5484_v41  ;;  %v11330_v37 = vmul.u32.u64.high %v11285_v44, %v5484_v41, %v11329_v56  ;;  %v11339_v32 = vadd.s32 3, %v12827_v58 }
 0x62a   : > { %v5476_v39 = vsel %vm5470_vm15, %v5473_v21, %v5475_v47  ;;  %v5336_v40 = vand.u32 2139095040, %v11313_v17  ;;  %7121 = vcosq.f32 %v11269_v6  ;;  %v12828_v52 = vand.u32 2147483647, %v10995_v20 }
 0x62b   : > { %v12829_v8 = vmov 0  ;;  %vm12382_vm6 = vcmp.lt.s32.totalorder %v10995_v20, 0  ;;  %v6474_v30 = vadd.s32 4294967294, %v5193_v36  ;;  %v5495_v3 = vadd.s32 1, %v11326_v63 }
 0x62c   : > { %vm11348_vm11 = vcmp.le.f32.partialorder %v12828_v52, 0.7853982  ;;  %v5314_v25 = vsel %vm12382_vm6, %v5313_v38, %v5312_v27  ;;  %v12370_v5 = vand.u32 2147483647, %v11313_v17  ;;  %v5337_v31 = vshrl.u32 %v5336_v40, 23 }
 0x62d   : > { %v12830_v8 = vsel %vm11348_vm11, 4294967295, %v12829_v8  ;;  %vm6475_vm12 = vcmp.lt.s32.totalorder %v6474_v30, 0  ;;  %v5492_v53 = vmul.u32 %v11285_v44, %v5476_v39  ;;  %vm5494_vm15 = vc.u32 %v11330_v37, %v11325_v16  ;;  %v6693_v44 = vpop.f32.mrf.mxu0 }
 0x62e   : > { %12831 = vst [vmem:[#allocation23_spill] sm:$0xff] %v12830_v8  ;;  %v5648_v28 = vand.u32 2139095040, %v11333_v10  ;;  %v5181_v21 = vadd.s32 %v11237_v43, %v11246_v51  ;;  %v5196_v47 = vsel %vm6475_vm12, 0, %v6474_v30  ;;  %v5496_v1 = vsel %vm5494_vm15, %v5495_v3, %v11326_v63 }
 0x62f   : > { %v6480_v41 = vadd.s32 4294967169, %v5337_v31  ;;  %v11366_v27 = vsel %vm11348_vm11, %v10995_v20, %v5314_v25  ;;  %v5197_v38 = vsub.s32 32, %v5196_v47  ;;  %v5201_v36 = vsub.s32 4294967266, %v5196_v47  ;;  %v5960_v25 = vld [vmem:[%s12144_s7 + $0x18] sm:$0xff]  ;;  %v5959_v31 = vld [vmem:[%s12144_s7 + $0x10] sm:$0xff] }
 0x630   : > { %v5497_v56 = vadd.s32 %v5496_v1, %v5492_v53  ;;  %v5198_v58 = vshll.u32 %v11296_v14, %v5196_v47  ;;  %v5340_v39 = vand.u32 8388607, %v12370_v5  ;;  %v12369_v43 = vand.u32 2147483647, %v11333_v10  ;;  %6694 = vmatprep.subr.mxu1 %v5960_v25 }
 0x631   : > { %v5343_v40 = vadd.s32 1, %v6480_v41  ;;  %v5199_v51 = vshrl.u32 %v5181_v21, %v5197_v38  ;;  %v5202_v63 = vadd.s32 127, %v5201_v36  ;;  %v5649_v30 = vshrl.u32 %v5648_v28, 23  ;;  %6695 = vmatpush3.msra.mxu1 %v5960_v25 }
 0x632   : > { %v5498_v52 = vadd.s32 536870912, %v5497_v56  ;;  %7123 = vsinq.f32 %v11269_v6  ;;  %v11377_v3 = vadd.f32 %v10992_v9, %v4274_v24  ;;  %v11380_v14 = vadd.f32 %v10992_v9, %v6693_v44  ;;  %6696 = vmatprep.subr.mxu1 %v5959_v31  ;;  %v5958_v9 = vld [vmem:[%s12144_s7 + $0x8] sm:$0xff] }
 0x633   : > { %vm5344_vm13 = vcmp.gt.s32.totalorder %v5343_v40, 0  ;;  %v5200_v53 = vor.u32 %v5199_v51, %v5198_v58  ;;  %v5203_v28 = vshll.u32 %v5202_v63, 23  ;;  %7125 = vcosq.f32 %v11366_v27  ;;  %6697 = vmatpush3.msra.mxu1 %v5959_v31  ;;  %v11405_v51 = vpop.eup %7119 }
 0x634   : > { %v11385_v21 = vshrl.u32 %v5498_v52, 30  ;;  %v5345_v47 = vsel %vm5344_vm13, %v5343_v40, 0  ;;  %v11389_v6 = vadd.s32 %v11325_v16, %v11330_v37  ;;  %v5341_v24 = vor.u32 8388608, %v5340_v39  ;;  %6698 = vmatprep.subr.mxu1 %v5958_v9  ;;  %v5957_v39 = vld [vmem:[%s12144_s7] sm:$0xff]  ;;  %12833 = vst [vmem:[#allocation26_spill] sm:$0xff] %v11405_v51 }
 0x635   : > { %v5347_v1 = vand.u32 31, %v5345_v47  ;;  %v5204_v41 = vor.u32 4788187, %v5203_v28  ;;  %v6492_v36 = vadd.s32 4294967169, %v5649_v30  ;;  %v11397_v44 = vand.u32 8388607, %v12369_v43  ;;  %6699 = vmatpush3.msra.mxu1 %v5958_v9 }
 0x636   : > { %12832 = vst [vmem:[#allocation17_spill] sm:$0xff] %v11385_v21  ;;  %v5500_v38 = vshll.u32 %v11385_v21, 30  ;;  %v5207_v58 = vcvt.s32.f32 %v5200_v53  ;;  %v11399_v40 = vshrl.u32 %v5345_v47, 5  ;;  %6700 = vmatprep.subr.mxu1 %v5957_v39  ;;  %v11422_v26 = vshll.u32 %v5341_v24, 8 }
 0x637   : > { %v5348_v16 = vsub.s32 32, %v5347_v1  ;;  %v5350_v37 = vshll.u32 %v12607_v12, %v5347_v1  ;;  %v5205_v63 = vand.u32 2147483647, %v5204_v41  ;;  %v5353_v30 = vshll.u32 %v12608_v13, %v5347_v1  ;;  %v11411_v31 = vpop.eup %7121  ;;  %6701 = vmatpush3.msra.mxu1 %v5957_v39 }
 0x638   : > { %v11407_v52 = vsub.s32 %v5497_v56, %v5500_v38  ;;  %v5356_v25 = vshll.u32 %v12609_v4, %v5347_v1  ;;  %12834 = vst [vmem:[#allocation16_spill] sm:$0xff] %v11411_v31  ;;  %v5359_v43 = vshll.u32 %v12610_v23, %v5347_v1  ;;  %v5362_v38 = vshll.u32 %v12611_v49, %v5347_v1 }
 0x639   : > { %v5351_v53 = vshrl.u32 %v12608_v13, %v5348_v16  ;;  %v5354_v28 = vshrl.u32 %v12609_v4, %v5348_v16  ;;  %v5357_v47 = vshrl.u32 %v12610_v23, %v5348_v16  ;;  %v5360_v56 = vshrl.u32 %v12611_v49, %v5348_v16 }
 0x63a   : > { %v5503_v41 = vsub.s32 0, %v11407_v52  ;;  %v5363_v5 = vshrl.u32 %v12612_v59, %v5348_v16  ;;  %v5208_v9 = vmul.f32 %v5207_v58, %v5205_v63  ;;  %vm12389_vm12 = vcmp.lt.s32.totalorder %v11094_v45, 0 }
 0x63b   : > { %v5352_v21 = vor.u32 %v5351_v53, %v5350_v37  ;;  %v5355_v8 = vor.u32 %v5354_v28, %v5353_v30  ;;  %v5358_v20 = vor.u32 %v5357_v47, %v5356_v25  ;;  %v5361_v51 = vor.u32 %v5360_v56, %v5359_v43 }
 0x63c   : > { %v6485_v34 = vmin.u32 %v5503_v41, %v11407_v52  ;;  %v5364_v0 = vor.u32 %v5363_v5, %v5362_v38  ;;  %vm5365_vm15 = vcmp.lt.s32.totalorder %v11399_v40, 1  ;;  %vm5368_vm13 = vcmp.lt.s32.totalorder %v11399_v40, 4 }
 0x63d   : > { %v5653_v1 = vor.u32 8388608, %v11397_v44  ;;  %v5370_v37 = vsel %vm5368_vm13, %v5358_v20, 2102212464  ;;  %v5373_v43 = vsel %vm5365_vm15, %v5352_v21, %v5355_v8  ;;  %v5655_v24 = vadd.s32 1, %v6492_v36 }
 0x63e   : > { %v5505_v58 = vclz %v6485_v34  ;;  %v5209_v39 = vxor.u32 2147483648, %v5208_v9  ;;  %v5349_v63 = vshrl.u32 %v12607_v12, %v5348_v16  ;;  %vm5367_vm6 = vcmp.lt.s32.totalorder %v11399_v40, 3 }
 0x63f   : > { %v5374_v5 = vsel %vm5368_vm13, %v5361_v51, 920167782  ;;  %v11437_v30 = vpop.eup %7123  ;;  %vm5366_vm0 = vcmp.lt.s32.totalorder %v11399_v40, 2  ;;  %v5377_v44 = vsel %vm5365_vm15, %v5355_v8, %v5358_v20  ;;  %v5371_v53 = vsel %vm5367_vm6, %v5355_v8, %v5370_v37 }
 0x640   : > { %12835 = vst [vmem:[#allocation12_spill] sm:$0xff] %v11437_v30  ;;  %v6486_v25 = vadd.s32 4294967294, %v5505_v58  ;;  %v5375_v34 = vsel %vm5367_vm6, %v5358_v20, %v5374_v5  ;;  %v5369_v36 = vsel %vm5365_vm15, %v5349_v63, %v5352_v21  ;;  %v5378_v28 = vsel %vm5368_vm13, %v5364_v0, 1326507024  ;;  %v11448_v47 = vpop.eup %7125 }
 0x641   : > { %v5376_v16 = vsel %vm5366_vm0, %v5373_v43, %v5375_v34  ;;  %12836 = vst [vmem:[#allocation42_spill] sm:$0xff] %v11448_v47  ;;  %v5379_v41 = vsel %vm5367_vm6, %v5361_v51, %v5378_v28  ;;  %vm5656_vm15 = vcmp.gt.s32.totalorder %v5655_v24, 0  ;;  %v5544_v8 = vand.u32 2139095040, %v11377_v3 }
 0x642   : > { %vm6487_vm4 = vcmp.lt.s32.totalorder %v6486_v25, 0  ;;  %v11451_v56 = vmul.u32.u64.low %v11422_v26, %v5376_v16  ;;  %v11452_v38 = vmul.u32.u64.high %v11422_v26, %v5376_v16, %v11451_v56  ;;  %v5380_v21 = vsel %vm5366_vm0, %v5377_v44, %v5379_v41 }
 0x643   : > { %v5508_v20 = vsel %vm6487_vm4, 0, %v6486_v25  ;;  %v5372_v0 = vsel %vm5366_vm0, %v5369_v36, %v5371_v53  ;;  %v5657_v43 = vsel %vm5656_vm15, %v5655_v24, 0  ;;  %v11464_v34 = vshll.u32 %v5653_v1, 8 }
 0x644   : > { %v5509_v58 = vsub.s32 32, %v5508_v20  ;;  %v5513_v37 = vsub.s32 4294967266, %v5508_v20  ;;  %v11461_v51 = vmul.u32.u64.low %v11422_v26, %v5380_v21  ;;  %v11462_v63 = vmul.u32.u64.high %v11422_v26, %v5380_v21, %v11461_v51 }
 0x645   : > { %v5659_v5 = vand.u32 31, %v5657_v43  ;;  %v5210_v25 = vsel %vm12389_vm12, %v5209_v39, %v5208_v9  ;;  %v5391_v28 = vadd.s32 1, %v11452_v38  ;;  %v5510_v41 = vshll.u32 %v11407_v52, %v5508_v20 }
 0x646   : > { %v5511_v44 = vshrl.u32 %v11389_v6, %v5509_v58  ;;  %v5514_v16 = vadd.s32 127, %v5513_v37  ;;  %v5388_v40 = vmul.u32 %v11422_v26, %v5372_v0  ;;  %v5545_v36 = vshrl.u32 %v5544_v8, 23 }
 0x647   : > { %v5660_v24 = vsub.s32 32, %v5659_v5  ;;  %v5658_v21 = vshrl.u32 %v5657_v43, 5  ;;  %v5662_v51 = vshll.u32 %v12607_v12, %v5659_v5  ;;  %v5665_v1 = vshll.u32 %v12608_v13, %v5659_v5 }
 0x648   : > { %v5515_v53 = vshll.u32 %v5514_v16, 23  ;;  %v5512_v31 = vor.u32 %v5511_v44, %v5510_v41  ;;  %vm5390_vm4 = vc.u32 %v11462_v63, %v11451_v56  ;;  %v5668_v9 = vshll.u32 %v12609_v4, %v5659_v5 }
 0x649   : > { %v5663_v6 = vshrl.u32 %v12608_v13, %v5660_v24  ;;  %v12837_v52 = vand.u32 2147483647, %v11094_v45  ;;  %v12838_v26 = vmov 0  ;;  %v5392_v20 = vsel %vm5390_vm4, %v5391_v28, %v11452_v38 }
 0x64a   : > { %v5516_v39 = vor.u32 4788187, %v5515_v53  ;;  %v5666_v8 = vshrl.u32 %v12609_v4, %v5660_v24  ;;  %v5671_v58 = vshll.u32 %v12610_v23, %v5659_v5  ;;  %v5393_v37 = vadd.s32 %v5392_v20, %v5388_v40 }
 0x64b   : > { %vm11480_vm0 = vcmp.le.f32.partialorder %v12837_v52, 0.7853982  ;;  %v5664_v0 = vor.u32 %v5663_v6, %v5662_v51  ;;  %v5669_v43 = vshrl.u32 %v12610_v23, %v5660_v24  ;;  %v5672_v44 = vshrl.u32 %v12611_v49, %v5660_v24 }
 0x64c   : > { %v12839_v26 = vsel %vm11480_vm0, 4294967295, %v12838_v26  ;;  %v5517_v16 = vand.u32 2147483647, %v5516_v39  ;;  %v5667_v41 = vor.u32 %v5666_v8, %v5665_v1  ;;  %v5674_v52 = vshll.u32 %v12611_v49, %v5659_v5 }
 0x64d   : > { %12840 = vst [vmem:[#allocation43_spill] sm:$0xff] %v12839_v26  ;;  %v5675_v47 = vshrl.u32 %v12612_v59, %v5660_v24  ;;  %v5394_v30 = vadd.s32 536870912, %v5393_v37  ;;  %v5670_v53 = vor.u32 %v5669_v43, %v5668_v9  ;;  %v5673_v62 = vor.u32 %v5672_v44, %v5671_v58 }
 0x64e   : > { %v6488_v38 = vadd.s32 4294967169, %v5545_v36  ;;  %v5519_v28 = vcvt.s32.f32 %v5512_v31  ;;  %vm5677_vm6 = vcmp.lt.s32.totalorder %v5658_v21, 1  ;;  %vm5680_vm13 = vcmp.lt.s32.totalorder %v5658_v21, 4 }
 0x64f   : > { %v5676_v48 = vor.u32 %v5675_v47, %v5674_v52  ;;  %vm12397_vm15 = vcmp.lt.s32.totalorder %v11106_v35, 0  ;;  %v11492_v40 = vshrl.u32 %v5394_v30, 30  ;;  %v5661_v51 = vshrl.u32 %v12607_v12, %v5660_v24 }
 0x650   : > { %v5682_v6 = vsel %vm5680_vm13, %v5670_v53, 2102212464  ;;  %v5685_v1 = vsel %vm5677_vm6, %v5664_v0, %v5667_v41  ;;  %v5520_v39 = vmul.f32 %v5519_v28, %v5517_v16  ;;  %vm5679_vm4 = vcmp.lt.s32.totalorder %v5658_v21, 3  ;;  %v4284_v28 = vpop.f32.mrf.mxu0 }
 0x651   : > { %12841 = vst [vmem:[#allocation5_spill] sm:$0xff] %v11492_v40  ;;  %v5686_v5 = vsel %vm5680_vm13, %v5673_v62, 920167782  ;;  %v5689_v20 = vsel %vm5677_vm6, %v5667_v41, %v5670_v53  ;;  %v5396_v9 = vshll.u32 %v11492_v40, 30  ;;  %vm5678_vm12 = vcmp.lt.s32.totalorder %v5658_v21, 2 }
 0x652   : > { %v5687_v36 = vsel %vm5679_vm4, %v5670_v53, %v5686_v5  ;;  %v5690_v31 = vsel %vm5680_vm13, %v5676_v48, 1326507024  ;;  %v5681_v47 = vsel %vm5677_vm6, %v5661_v51, %v5664_v0  ;;  %v5683_v8 = vsel %vm5679_vm4, %v5667_v41, %v5682_v6 }
 0x653   : > { %v5688_v58 = vsel %vm5678_vm12, %v5685_v1, %v5687_v36  ;;  %v5691_v43 = vsel %vm5679_vm4, %v5673_v62, %v5690_v31  ;;  %v11500_v30 = vsel %vm11480_vm0, %v11094_v45, %v5210_v25  ;;  %v11502_v24 = vsub.s32 %v5393_v37, %v5396_v9  ;;  %v7162_v1 = vld [vmem:[%s12143_s6] ss:$0 sm:$0xff] }
 0x654   : > { %v5692_v44 = vsel %vm5678_vm12, %v5689_v20, %v5691_v43  ;;  %v12842_v16 = vand.u32 2147483647, %v11377_v3  ;;  %v5521_v53 = vxor.u32 2147483648, %v5520_v39  ;;  %v5551_v41 = vadd.s32 1, %v6488_v38 }
 0x655   : > { %v11508_v48 = vmul.u32.u64.low %v11464_v34, %v5692_v44  ;;  %v11509_v0 = vmul.u32.u64.high %v11464_v34, %v5692_v44, %v11508_v48  ;;  %v5399_v62 = vsub.s32 0, %v11502_v24  ;;  %v5684_v51 = vsel %vm5678_vm12, %v5681_v47, %v5683_v8 }
 0x656   : > { %v5548_v52 = vand.u32 8388607, %v12842_v16  ;;  %v11514_v25 = vmul.u32.u64.low %v11464_v34, %v5688_v58  ;;  %v11515_v37 = vmul.u32.u64.high %v11464_v34, %v5688_v58, %v11514_v25  ;;  %7127 = vsinq.f32 %v11366_v27 }
 0x657   : > { %vm5552_vm6 = vcmp.gt.s32.totalorder %v5551_v41, 0  ;;  %v11522_v5 = vadd.f32 %v7162_v1, %v4284_v28  ;;  %7129 = vcosq.f32 %v11500_v30  ;;  %v5389_v21 = vadd.s32 %v11451_v56, %v11462_v63 }
 0x658   : > { %v5549_v6 = vor.u32 8388608, %v5548_v52  ;;  %v6481_v38 = vmin.u32 %v5399_v62, %v11502_v24  ;;  %v5553_v20 = vsel %vm5552_vm6, %v5551_v41, 0  ;;  %v11530_v9 = vsel %vm12397_vm15, %v5521_v53, %v5520_v39 }
 0x659   : > { %v5700_v27 = vmul.u32 %v11464_v34, %v5684_v51  ;;  %vm5702_vm12 = vc.u32 %v11509_v0, %v11514_v25  ;;  %v5555_v36 = vand.u32 31, %v5553_v20  ;;  %v5703_v47 = vadd.s32 1, %v11515_v37 }
 0x65a   : > { %v5401_v31 = vclz %v6481_v38  ;;  %v5856_v56 = vand.u32 2139095040, %v11380_v14  ;;  %v11538_v63 = vshrl.u32 %v5553_v20, 5  ;;  %v11541_v39 = vshll.u32 %v5549_v6, 8 }
 0x65b   : > { %v5556_v58 = vsub.s32 32, %v5555_v36  ;;  %v5558_v43 = vshll.u32 %v12607_v12, %v5555_v36  ;;  %v5704_v34 = vsel %vm5702_vm12, %v5703_v47, %v11515_v37  ;;  %v5561_v16 = vshll.u32 %v12608_v13, %v5555_v36 }
 0x65c   : > { %v6482_v44 = vadd.s32 4294967294, %v5401_v31  ;;  %v5564_v52 = vshll.u32 %v12609_v4, %v5555_v36  ;;  %v5705_v28 = vadd.s32 %v5704_v34, %v5700_v27  ;;  %v5567_v41 = vshll.u32 %v12610_v23, %v5555_v36 }
 0x65d   : > { %v5559_v53 = vshrl.u32 %v12608_v13, %v5556_v58  ;;  %v5562_v48 = vshrl.u32 %v12609_v4, %v5556_v58  ;;  %v5565_v62 = vshrl.u32 %v12610_v23, %v5556_v58  ;;  %v5568_v51 = vshrl.u32 %v12611_v49, %v5556_v58 }
 0x65e   : > { %vm6483_vm13 = vcmp.lt.s32.totalorder %v6482_v44, 0  ;;  %v5571_v6 = vshrl.u32 %v12612_v59, %v5556_v58  ;;  %v5706_v37 = vadd.s32 536870912, %v5705_v28  ;;  %v12843_v31 = vand.u32 2147483647, %v11106_v35 }
 0x65f   : > { %v5404_v1 = vsel %vm6483_vm13, 0, %v6482_v44  ;;  %v5560_v38 = vor.u32 %v5559_v53, %v5558_v43  ;;  %v5563_v20 = vor.u32 %v5562_v48, %v5561_v16  ;;  %v12844_v27 = vmov 0 }
 0x660   : > { %vm11554_vm4 = vcmp.le.f32.partialorder %v12843_v31, 0.7853982  ;;  %v5405_v47 = vsub.s32 32, %v5404_v1  ;;  %v5409_v34 = vsub.s32 4294967266, %v5404_v1  ;;  %v5566_v8 = vor.u32 %v5565_v62, %v5564_v52 }
 0x661   : > { %v12845_v27 = vsel %vm11554_vm4, 4294967295, %v12844_v27  ;;  %v5570_v40 = vshll.u32 %v12611_v49, %v5555_v36  ;;  %v5406_v26 = vshll.u32 %v11502_v24, %v5404_v1  ;;  %v11560_v45 = vshrl.u32 %v5706_v37, 30 }
 0x662   : > { %12846 = vst [vmem:[#allocation33_spill] sm:$0xff] %v12845_v27  ;;  %v5557_v44 = vshrl.u32 %v12607_v12, %v5556_v58  ;;  %v5569_v22 = vor.u32 %v5568_v51, %v5567_v41  ;;  %v5407_v43 = vshrl.u32 %v5389_v21, %v5405_v47  ;;  %v5410_v16 = vadd.s32 127, %v5409_v34 }
 0x663   : > { %12847 = vst [vmem:[#allocation39_spill] sm:$0xff] %v11560_v45  ;;  %v5572_v53 = vor.u32 %v5571_v6, %v5570_v40  ;;  %vm5573_vm6 = vcmp.lt.s32.totalorder %v11538_v63, 1  ;;  %v5708_v48 = vshll.u32 %v11560_v45, 30  ;;  %vm5575_vm12 = vcmp.lt.s32.totalorder %v11538_v63, 3  ;;  %v11569_v24 = vpop.eup %7127 }
 0x664   : > { %vm5576_vm13 = vcmp.lt.s32.totalorder %v11538_v63, 4  ;;  %v5581_v36 = vsel %vm5573_vm6, %v5560_v38, %v5563_v20  ;;  %v5408_v52 = vor.u32 %v5407_v43, %v5406_v26  ;;  %v5411_v62 = vshll.u32 %v5410_v16, 23  ;;  %v11575_v58 = vpop.eup %7129 }
 0x665   : > { %v5578_v21 = vsel %vm5576_vm13, %v5566_v8, 2102212464  ;;  %v5582_v40 = vsel %vm5576_vm13, %v5569_v22, 920167782  ;;  %v11577_v41 = vsub.s32 %v5705_v28, %v5708_v48  ;;  %vm5574_vm15 = vcmp.lt.s32.totalorder %v11538_v63, 2 }
 0x666   : > { %v5577_v51 = vsel %vm5573_vm6, %v5557_v44, %v5560_v38  ;;  %v5583_v6 = vsel %vm5575_vm12, %v5566_v8, %v5582_v40  ;;  %vm12399_vm1 = vcmp.lt.s32.totalorder %v11313_v17, 0  ;;  %v5412_v26 = vor.u32 4788187, %v5411_v62 }
 0x667   : > { %v5579_v1 = vsel %vm5575_vm12, %v5563_v20, %v5578_v21  ;;  %v5584_v37 = vsel %vm5574_vm15, %v5581_v36, %v5583_v6  ;;  %v5585_v28 = vsel %vm5573_vm6, %v5563_v20, %v5566_v8  ;;  %v5711_v31 = vsub.s32 0, %v11577_v41 }
 0x668   : > { %v5586_v38 = vsel %vm5576_vm13, %v5572_v53, 1326507024  ;;  %v11595_v47 = vmul.u32.u64.low %v11541_v39, %v5584_v37  ;;  %v11596_v34 = vmul.u32.u64.high %v11541_v39, %v5584_v37, %v11595_v47  ;;  %v5413_v44 = vand.u32 2147483647, %v5412_v26 }
 0x669   : > { %v5415_v43 = vcvt.s32.f32 %v5408_v52  ;;  %v5587_v16 = vsel %vm5575_vm12, %v5569_v22, %v5586_v38  ;;  %v5857_v48 = vshrl.u32 %v5856_v56, 23  ;;  %v5525_v8 = vsel %vm11554_vm4, %v11106_v35, %v11530_v9 }
 0x66a   : > { %v6493_v20 = vmin.u32 %v5711_v31, %v11577_v41  ;;  %v5588_v53 = vsel %vm5574_vm15, %v5585_v28, %v5587_v16  ;;  %v12848_v36 = vand.u32 2147483647, %v11380_v14  ;;  %7131 = vsinq.f32 %v11500_v30 }
 0x66b   : > { %v5416_v21 = vmul.f32 %v5415_v43, %v5413_v44  ;;  %v11611_v52 = vmul.u32.u64.low %v11541_v39, %v5588_v53  ;;  %v11612_v40 = vmul.u32.u64.high %v11541_v39, %v5588_v53, %v11611_v52  ;;  %v6500_v22 = vadd.s32 4294967169, %v5857_v48 }
 0x66c   : > { %v5860_v62 = vand.u32 8388607, %v12848_v36  ;;  %v5713_v56 = vclz %v6493_v20  ;;  %v5580_v9 = vsel %vm5574_vm15, %v5577_v51, %v5579_v1  ;;  %v5599_v6 = vadd.s32 1, %v11596_v34 }
 0x66d   : > { %7133 = vcosq.f32 %v5525_v8  ;;  %v12849_v26 = vand.u32 2147483647, %v11313_v17  ;;  %v12850_v37 = vmov 0  ;;  %v5417_v28 = vxor.u32 2147483648, %v5416_v21 }
 0x66e   : > { %v5863_v31 = vadd.s32 1, %v6500_v22  ;;  %7135 = vsinq.f32 %v5525_v8  ;;  %v6494_v38 = vadd.s32 4294967294, %v5713_v56  ;;  %v5861_v44 = vor.u32 8388608, %v5860_v62 }
 0x66f   : > { %vm11620_vm6 = vcmp.le.f32.partialorder %v12849_v26, 0.7853982  ;;  %v5701_v63 = vadd.s32 %v11514_v25, %v11509_v0  ;;  %v5596_v51 = vmul.u32 %v11541_v39, %v5580_v9  ;;  %vm5598_vm15 = vc.u32 %v11612_v40, %v11595_v47 }
 0x670   : > { %v12851_v37 = vsel %vm11620_vm6, 4294967295, %v12850_v37  ;;  %vm5864_vm12 = vcmp.gt.s32.totalorder %v5863_v31, 0  ;;  %v5418_v1 = vsel %vm12399_vm1, %v5417_v28, %v5416_v21  ;;  %vm6495_vm13 = vcmp.lt.s32.totalorder %v6494_v38, 0 }
 0x671   : > { %v5600_v43 = vsel %vm5598_vm15, %v5599_v6, %v11596_v34  ;;  %v5865_v16 = vsel %vm5864_vm12, %v5863_v31, 0  ;;  %v5716_v48 = vsel %vm6495_vm13, 0, %v6494_v38  ;;  %v5752_v53 = vand.u32 2139095040, %v11522_v5 }
 0x672   : > { %v5601_v8 = vadd.s32 %v5600_v43, %v5596_v51  ;;  %v11633_v20 = vshrl.u32 %v5865_v16, 5  ;;  %v5717_v0 = vsub.s32 32, %v5716_v48  ;;  %v5721_v25 = vsub.s32 4294967266, %v5716_v48 }
 0x673   : > { %v11636_v39 = vshll.u32 %v5861_v44, 8  ;;  %v11642_v62 = vsel %vm11620_vm6, %v11313_v17, %v5418_v1  ;;  %v5718_v34 = vshll.u32 %v11577_v41, %v5716_v48  ;;  %v5867_v52 = vand.u32 31, %v5865_v16 }
 0x674   : > { %v5602_v21 = vadd.s32 536870912, %v5601_v8  ;;  %v5719_v22 = vshrl.u32 %v5701_v63, %v5717_v0  ;;  %v5722_v56 = vadd.s32 127, %v5721_v25  ;;  %vm5885_vm15 = vcmp.lt.s32.totalorder %v11633_v20, 1 }
 0x675   : > { %vm5887_vm12 = vcmp.lt.s32.totalorder %v11633_v20, 3  ;;  %v5868_v6 = vsub.s32 32, %v5867_v52  ;;  %v5870_v26 = vshll.u32 %v12607_v12, %v5867_v52  ;;  %vm5886_vm13 = vcmp.lt.s32.totalorder %v11633_v20, 2 }
 0x676   : > { %v11647_v9 = vshrl.u32 %v5602_v21, 30  ;;  %vm5888_vm1 = vcmp.lt.s32.totalorder %v11633_v20, 4  ;;  %v5720_v28 = vor.u32 %v5719_v22, %v5718_v34  ;;  %v5723_v31 = vshll.u32 %v5722_v56, 23 }
 0x677   : > { %v5873_v41 = vshll.u32 %v12608_v13, %v5867_v52  ;;  %v5876_v38 = vshll.u32 %v12609_v4, %v5867_v52  ;;  %v5871_v63 = vshrl.u32 %v12608_v13, %v5868_v6  ;;  %v5874_v51 = vshrl.u32 %v12609_v4, %v5868_v6  ;;  %v11661_v25 = vpop.eup %7131 }
 0x678   : > { %12852 = vst [vmem:[#allocation40_spill] sm:$0xff] %v11647_v9  ;;  %v5604_v44 = vshll.u32 %v11647_v9, 30  ;;  %v5879_v1 = vshll.u32 %v12610_v23, %v5867_v52  ;;  %v5724_v43 = vor.u32 4788187, %v5723_v31  ;;  %v5727_v16 = vcvt.s32.f32 %v5720_v28 }
 0x679   : > { %v5877_v48 = vshrl.u32 %v12610_v23, %v5868_v6  ;;  %v5880_v0 = vshrl.u32 %v12611_v49, %v5868_v6  ;;  %v5872_v21 = vor.u32 %v5871_v63, %v5870_v26  ;;  %v5875_v22 = vor.u32 %v5874_v51, %v5873_v41 }
 0x67a   : > { %v11663_v34 = vsub.s32 %v5601_v8, %v5604_v44  ;;  %v5882_v56 = vshll.u32 %v12611_v49, %v5867_v52  ;;  %v11666_v36 = vpop.eup %7133  ;;  %v12853_v30 = vand.u32 2147483647, %v11333_v10  ;;  %v12854_v45 = vmov 0 }
 0x67b   : > { %v5725_v28 = vand.u32 2147483647, %v5724_v43  ;;  %v5878_v31 = vor.u32 %v5877_v48, %v5876_v38  ;;  %v5881_v9 = vor.u32 %v5880_v0, %v5879_v1  ;;  %v5883_v27 = vshrl.u32 %v12612_v59, %v5868_v6  ;;  %v11675_v35 = vpop.eup %7135 }
 0x67c   : > { %vm11670_vm2 = vcmp.le.f32.partialorder %v12853_v30, 0.7853982  ;;  %v5607_v8 = vsub.s32 0, %v11663_v34  ;;  %v5869_v26 = vshrl.u32 %v12607_v12, %v5868_v6  ;;  %v5893_v52 = vsel %vm5885_vm15, %v5872_v21, %v5875_v22 }
 0x67d   : > { %v12855_v45 = vsel %vm11670_vm2, 4294967295, %v12854_v45  ;;  %v5753_v41 = vshrl.u32 %v5752_v53, 23  ;;  %v5728_v44 = vmul.f32 %v5727_v16, %v5725_v28  ;;  %v5884_v30 = vor.u32 %v5883_v27, %v5882_v56 }
 0x67e   : > { %v5890_v63 = vsel %vm5888_vm1, %v5878_v31, 2102212464  ;;  %v5894_v38 = vsel %vm5888_vm1, %v5881_v9, 920167782  ;;  %v6489_v51 = vmin.u32 %v5607_v8, %v11663_v34  ;;  %v5889_v1 = vsel %vm5885_vm15, %v5869_v26, %v5872_v21 }
 0x67f   : > { %v5895_v6 = vsel %vm5887_vm12, %v5878_v31, %v5894_v38  ;;  %v5897_v43 = vsel %vm5885_vm15, %v5875_v22, %v5878_v31  ;;  %v5729_v53 = vxor.u32 2147483648, %v5728_v44  ;;  %v5891_v27 = vsel %vm5887_vm12, %v5875_v22, %v5890_v63 }
 0x680   : > { %v5896_v16 = vsel %vm5886_vm13, %v5893_v52, %v5895_v6  ;;  %v5898_v48 = vsel %vm5888_vm1, %v5884_v30, 1326507024  ;;  %v5609_v0 = vclz %v6489_v51  ;;  %vm12856_vm15 = vcmp.lt.s32.totalorder %v11333_v10, 0 }
 0x681   : > { %v5899_v21 = vsel %vm5887_vm12, %v5881_v9, %v5898_v48  ;;  %v11701_v56 = vmul.u32.u64.low %v11636_v39, %v5896_v16  ;;  %v11702_v28 = vmul.u32.u64.high %v11636_v39, %v5896_v16, %v11701_v56  ;;  %v5730_v31 = vsel %vm12856_vm15, %v5729_v53, %v5728_v44 }
 0x682   : > { %v5900_v22 = vsel %vm5886_vm13, %v5897_v43, %v5899_v21  ;;  %v6496_v8 = vadd.s32 4294967169, %v5753_v41  ;;  %v12857_v26 = vand.u32 2147483647, %v11522_v5  ;;  %v5597_v30 = vadd.s32 %v11595_v47, %v11612_v40 }
 0x683   : > { %v6490_v63 = vadd.s32 4294967294, %v5609_v0  ;;  %v11714_v9 = vmul.u32.u64.low %v11636_v39, %v5900_v22  ;;  %v11715_v38 = vmul.u32.u64.high %v11636_v39, %v5900_v22, %v11714_v9  ;;  %7137 = vcosq.f32 %v11642_v62 }
 0x684   : > { %v5756_v52 = vand.u32 8388607, %v12857_v26  ;;  %v5892_v44 = vsel %vm5886_vm13, %v5889_v1, %v5891_v27  ;;  %v5759_v51 = vadd.s32 1, %v6496_v8  ;;  %v12858_v41 = vsub.s32 4, %v10627_v19 }
 0x685   : > { %vm12859_vm1 = vcmp.lt.s32.totalorder %v10534_v42, 0  ;;  %v5733_v47 = vsel %vm11670_vm2, %v11333_v10, %v5730_v31  ;;  %vm6491_vm12 = vcmp.lt.s32.totalorder %v6490_v63, 0  ;;  %v5911_v40 = vadd.s32 1, %v11702_v28 }
 0x686   : > { %v4380_v6 = vsel %vm12859_vm1, %v12858_v41, %v10627_v19  ;;  %7139 = vsinq.f32 %v11642_v62  ;;  %v5612_v20 = vsel %vm6491_vm12, 0, %v6490_v63  ;;  %v5757_v1 = vor.u32 8388608, %v5756_v52 }
 0x687   : > { %v4382_v43 = vsel %vm10811_vm3, 0, %v4380_v6  ;;  %vm5760_vm13 = vcmp.gt.s32.totalorder %v5759_v51, 0  ;;  %v5613_v53 = vsub.s32 32, %v5612_v20  ;;  %v5617_v27 = vsub.s32 4294967266, %v5612_v20 }
 0x688   : > { %v5908_v16 = vmul.u32 %v11636_v39, %v5892_v44  ;;  %v4386_v19 = vadd.s32 3, %v4382_v43  ;;  %7141 = vcosq.f32 %v5733_v47  ;;  %v5614_v48 = vshll.u32 %v11663_v34, %v5612_v20 }
 0x689   : > { %vm5910_vm15 = vc.u32 %v11715_v38, %v11701_v56  ;;  %v5761_v0 = vsel %vm5760_vm13, %v5759_v51, 0  ;;  %v5615_v21 = vshrl.u32 %v5597_v30, %v5613_v53  ;;  %v5618_v50 = vadd.s32 127, %v5617_v27 }
 0x68a   : > { %v5912_v31 = vsel %vm5910_vm15, %v5911_v40, %v11702_v28  ;;  %v11737_v62 = vshrl.u32 %v5761_v0, 5  ;;  %7143 = vsinq.f32 %v5733_v47  ;;  %v5763_v8 = vand.u32 31, %v5761_v0 }
 0x68b   : > { %v5913_v22 = vadd.s32 %v5912_v31, %v5908_v16  ;;  %v11739_v26 = vshll.u32 %v5757_v1, 8  ;;  %v5616_v39 = vor.u32 %v5615_v21, %v5614_v48  ;;  %v5619_v52 = vshll.u32 %v5618_v50, 23 }
 0x68c   : > { %vm5781_vm3 = vcmp.lt.s32.totalorder %v11737_v62, 1  ;;  %v11742_v34 = vand.u32 3, %v4386_v19  ;;  %v5764_v30 = vsub.s32 32, %v5763_v8  ;;  %v5766_v9 = vshll.u32 %v12607_v12, %v5763_v8 }
 0x68d   : > { %v5914_v63 = vadd.s32 536870912, %v5913_v22  ;;  %v5769_v28 = vshll.u32 %v12608_v13, %v5763_v8  ;;  %v12860_v44 = vand.u32 2147483647, %v11377_v3  ;;  %v12861_v51 = vmov 0 }
 0x68e   : > { %v5620_v41 = vor.u32 4788187, %v5619_v52  ;;  %v5623_v6 = vcvt.s32.f32 %v5616_v39  ;;  %v5772_v47 = vshll.u32 %v12609_v4, %v5763_v8  ;;  %v5775_v40 = vshll.u32 %v12610_v23, %v5763_v8 }
 0x68f   : > { %vm11750_vm13 = vcmp.le.f32.partialorder %v12860_v44, 0.7853982  ;;  %v11756_v43 = vshrl.u32 %v5914_v63, 30  ;;  %v5765_v20 = vshrl.u32 %v12607_v12, %v5764_v30  ;;  %v5767_v1 = vshrl.u32 %v12608_v13, %v5764_v30 }
 0x690   : > { %v12862_v51 = vsel %vm11750_vm13, 4294967295, %v12861_v51  ;;  %v5770_v53 = vshrl.u32 %v12609_v4, %v5764_v30  ;;  %v5621_v27 = vand.u32 2147483647, %v5620_v41  ;;  %v5773_v16 = vshrl.u32 %v12610_v23, %v5764_v30  ;;  %v11766_v39 = vpop.eup %7137 }
 0x691   : > { %v5776_v19 = vshrl.u32 %v12611_v49, %v5764_v30  ;;  %v5778_v48 = vshll.u32 %v12611_v49, %v5763_v8  ;;  %v5916_v0 = vshll.u32 %v11756_v43, 30  ;;  %v5768_v21 = vor.u32 %v5767_v1, %v5766_v9 }
 0x692   : > { %v5771_v50 = vor.u32 %v5770_v53, %v5769_v28  ;;  %v5779_v31 = vshrl.u32 %v12612_v59, %v5764_v30  ;;  %v5624_v12 = vmul.f32 %v5623_v6, %v5621_v27  ;;  %v5774_v52 = vor.u32 %v5773_v16, %v5772_v47 }
 0x693   : > { %v5777_v13 = vor.u32 %v5776_v19, %v5775_v40  ;;  %vm5783_vm15 = vcmp.lt.s32.totalorder %v11737_v62, 3  ;;  %v11769_v4 = vsub.s32 %v5913_v22, %v5916_v0  ;;  %vm5784_vm12 = vcmp.lt.s32.totalorder %v11737_v62, 4  ;;  %v11774_v8 = vpop.eup %7139 }
 0x694   : > { %v5780_v23 = vor.u32 %v5779_v31, %v5778_v48  ;;  %v5785_v49 = vsel %vm5781_vm3, %v5765_v20, %v5768_v21  ;;  %v5625_v63 = vxor.u32 2147483648, %v5624_v12  ;;  %v5786_v9 = vsel %vm5784_vm12, %v5774_v52, 2102212464 }
 0x695   : > { %v5789_v59 = vsel %vm5781_vm3, %v5768_v21, %v5771_v50  ;;  %v5790_v30 = vsel %vm5784_vm12, %v5777_v13, 920167782  ;;  %v5919_v28 = vsub.s32 0, %v11769_v4  ;;  %v5787_v22 = vsel %vm5783_vm15, %v5771_v50, %v5786_v9  ;;  %v11786_v6 = vpop.eup %7141 }
 0x696   : > { %v5791_v44 = vsel %vm5783_vm15, %v5774_v52, %v5790_v30  ;;  %v5793_v41 = vsel %vm5781_vm3, %v5771_v50, %v5774_v52  ;;  %vm4385_vm1 = vweird.f32 %v10534_v42  ;;  %vm12863_vm2 = vcmp.lt.s32.totalorder %v11377_v3, 0 }
 0x697   : > { %v5626_v47 = vsel %vm12863_vm2, %v5625_v63, %v5624_v12  ;;  %vm12864_vm4 = vcmp.lt.s32.totalorder %v11737_v62, 2  ;;  %v5794_v20 = vsel %vm5784_vm12, %v5780_v23, 1326507024  ;;  %v4390_v1 = vxor.u32 2147483648, %v10975_v60  ;;  %v11801_v48 = vpop.eup %7143 }
 0x698   : > { %v5792_v40 = vsel %vm12864_vm4, %v5789_v59, %v5791_v44  ;;  %v5629_v53 = vsel %vm11750_vm13, %v11377_v3, %v5626_v47  ;;  %v5909_v27 = vadd.s32 %v11701_v56, %v11715_v38  ;;  %v6501_v16 = vmin.u32 %v5919_v28, %v11769_v4  ;;  %vm12865_vm2 = vmmov %vm12864_vm4 }
 0x699   : > { %v5795_v19 = vsel %vm5783_vm15, %v5777_v13, %v5794_v20  ;;  %v5788_v0 = vsel %vm12865_vm2, %v5785_v49, %v5787_v22  ;;  %vm12866_vm4 = vmmov %vm12865_vm2  ;;  %v11808_v50 = vmul.u32.u64.low %v11739_v26, %v5792_v40  ;;  %v11809_v31 = vmul.u32.u64.high %v11739_v26, %v5792_v40, %v11808_v50 }
 0x69a   : > { %v5796_v21 = vsel %vm12866_vm4, %v5793_v41, %v5795_v19  ;;  %v5921_v12 = vclz %v6501_v16  ;;  %vm4389_vm3 = vcmp.eq.s32.totalorder %v11742_v34, 0  ;;  %7145 = vcosq.f32 %v5629_v53 }
 0x69b   : > { %v11813_v56 = vmul.u32.u64.low %v11739_v26, %v5796_v21  ;;  %v11814_v38 = vmul.u32.u64.high %v11739_v26, %v5796_v21, %v11813_v56  ;;  %vm4388_vm12 = vcmp.lt.s32.totalorder %v11742_v34, 2  ;;  %v4391_v52 = vsel %vm4389_vm3, %v10965_v46, %v4390_v1 }
 0x69c   : > { %v4393_v62 = vxor.u32 2147483648, %v10965_v46  ;;  %7147 = vsinq.f32 %v5629_v53  ;;  %v6502_v13 = vadd.s32 4294967294, %v5921_v12  ;;  %v5804_v23 = vmul.u32 %v11739_v26, %v5788_v0 }
 0x69d   : > { %vm4392_vm15 = vcmp.eq.s32.totalorder %v11742_v34, 2  ;;  %v5807_v49 = vadd.s32 1, %v11809_v31  ;;  %v4491_v9 = vand.u32 3, %v11339_v32  ;;  %v4587_v59 = vsub.s32 4, %v10775_v33 }
 0x69e   : > { %v4394_v63 = vsel %vm4392_vm15, %v4393_v62, %v10975_v60  ;;  %vm6503_vm2 = vcmp.lt.s32.totalorder %v6502_v13, 0  ;;  %vm5806_vm4 = vc.u32 %v11814_v38, %v11808_v50  ;;  %v4494_v46 = vxor.u32 2147483648, %v10956_v29 }
 0x69f   : > { %v4395_v30 = vsel %vm4388_vm12, %v4391_v52, %v4394_v63  ;;  %v5924_v28 = vsel %vm6503_vm2, 0, %v6502_v13  ;;  %v5808_v26 = vsel %vm5806_vm4, %v5807_v49, %v11809_v31  ;;  %v4497_v22 = vxor.u32 2147483648, %v10872_v55 }
 0x6a0   : > { %v4396_v34 = vsel %vm4385_vm1, nan, %v4395_v30  ;;  %v5925_v60 = vsub.s32 32, %v5924_v28  ;;  %v5929_v44 = vsub.s32 4294967266, %v5924_v28  ;;  %v5809_v32 = vadd.s32 %v5808_v26, %v5804_v23  ;;  %v12875_v26 = vld [vmem:[#allocation31_spill] sm:$0xff] }
 0x6a1   : > { %vm12867_vm3 = vcmask 261120   ;;  %vm4489_vm15 = vweird.f32 %v10529_v54  ;;  %v5926_v41 = vshll.u32 %v11769_v4, %v5924_v28  ;;  %vm4493_vm12 = vcmp.eq.s32.totalorder %v4491_v9, 0 }
 0x6a2   : > { %6702 = vmatprep.mubr.msk.f32.mxu1 %vm12867_vm3, %v4396_v34  ;;  %vm4496_vm13 = vcmp.eq.s32.totalorder %v4491_v9, 2  ;;  %vm12868_vm2 = vcmp.lt.s32.totalorder %v10622_v18, 0  ;;  %v5927_v40 = vshrl.u32 %v5909_v27, %v5925_v60  ;;  %v5930_v42 = vadd.s32 127, %v5929_v44 }
 0x6a3   : > { %v4588_v47 = vsel %vm12868_vm2, %v4587_v59, %v10775_v33  ;;  %v5810_v20 = vadd.s32 536870912, %v5809_v32  ;;  %v4495_v1 = vsel %vm4493_vm12, %v10872_v55, %v4494_v46  ;;  %vm4492_vm1 = vcmp.lt.s32.totalorder %v4491_v9, 2  ;;  %v12874_v46 = vld [vmem:[#allocation10_spill] sm:$0xff] }
 0x6a4   : > { %v4498_v53 = vsel %vm4496_vm13, %v4497_v22, %v10956_v29  ;;  %v4590_v16 = vsel %vm10969_vm10, 0, %v4588_v47  ;;  %v4691_v19 = vsub.s32 4, %v10716_v61  ;;  %v5928_v4 = vor.u32 %v5927_v40, %v5926_v41 }
 0x6a5   : > { %v5931_v0 = vshll.u32 %v5930_v42, 23  ;;  %v11844_v21 = vshrl.u32 %v5810_v20, 30  ;;  %v4499_v31 = vsel %vm4492_vm1, %v4495_v1, %v4498_v53  ;;  %v4594_v27 = vadd.s32 3, %v4590_v16 }
 0x6a6   : > { %v4500_v33 = vsel %vm4489_vm15, nan, %v4499_v31  ;;  %v4598_v55 = vxor.u32 2147483648, %v11129_v57  ;;  %vm12869_vm13 = vcmp.lt.s32.totalorder %v10593_v7, 0  ;;  %v12870_v2 = vand.u32 2147483647, %v11380_v14 }
 0x6a7   : > { %v4692_v29 = vsel %vm12869_vm13, %v4691_v19, %v10716_v61  ;;  %v5932_v56 = vor.u32 4788187, %v5931_v0  ;;  %v5812_v52 = vshll.u32 %v11844_v21, 30  ;;  %6703 = vmatmul.mubr.msk.f32.vlgmr.msra.gmra.mxu1 %vm12867_vm3, %v4500_v33  ;;  %v4601_v54 = vxor.u32 2147483648, %v11122_v11  ;;  %v12873_v61 = vld [vmem:[#allocation13_spill] sm:$0xff]  ;;  %v11865_v9 = vpop.eup %7145 }
 0x6a8   : > { %vm11855_vm10 = vcmp.le.f32.partialorder %v12870_v2, 0.7853982  ;;  %v4694_v62 = vsel %vm10878_vm9, 0, %v4692_v29  ;;  %v5935_v13 = vcvt.s32.f32 %v5928_v4  ;;  %v4595_v23 = vand.u32 3, %v4594_v27  ;;  %v12880_v27 = vld [vmem:[#allocation6_spill] sm:$0xff] }
 0x6a9   : > { %v4698_v49 = vadd.s32 3, %v4694_v62  ;;  %v4702_v63 = vxor.u32 2147483648, %v12873_v61  ;;  %v5933_v59 = vand.u32 2147483647, %v5932_v56  ;;  %v11867_v30 = vsub.s32 %v5809_v32, %v5812_v52  ;;  %v11871_v22 = vpop.eup %7147  ;;  %v12882_v56 = vld [vmem:[#allocation27_spill] sm:$0xff]  ;;  %v12883_v62 = vld [vmem:[#allocation36_spill] sm:$0xff] }
 0x6aa   : > { %v4705_v28 = vxor.u32 2147483648, %v12874_v46  ;;  %v4795_v34 = vsub.s32 4, %v12875_v26  ;;  %vm4596_vm15 = vcmp.lt.s32.totalorder %v4595_v23, 2  ;;  %vm4597_vm12 = vcmp.eq.s32.totalorder %v4595_v23, 0 }
 0x6ab   : > { %vm4600_vm2 = vcmp.eq.s32.totalorder %v4595_v23, 2  ;;  %v4699_v15 = vand.u32 3, %v4698_v49  ;;  %v5936_v60 = vmul.f32 %v5935_v13, %v5933_v59  ;;  %v5815_v44 = vsub.s32 0, %v11867_v30  ;;  %v12884_v23 = vld [vmem:[#allocation34_spill] sm:$0xff]  ;;  %v12888_v59 = vld [vmem:[#allocation9_spill] sm:$0xff] }
 0x6ac   : > { %v4599_v41 = vsel %vm4597_vm12, %v11122_v11, %v4598_v55  ;;  %v4602_v47 = vsel %vm4600_vm2, %v4601_v54, %v11129_v57  ;;  %vm4593_vm9 = vweird.f32 %v10622_v18  ;;  %vm4697_vm4 = vweird.f32 %v10593_v7  ;;  %v12876_v57 = vld [vmem:[#allocation15_spill] sm:$0xff]  ;;  %vm12881_vm2 = vmmov %vm12867_vm3 }
 0x6ad   : > { %v4603_v32 = vsel %vm4596_vm15, %v4599_v41, %v4602_v47  ;;  %vm4701_vm1 = vcmp.eq.s32.totalorder %v4699_v15, 0  ;;  %vm4704_vm13 = vcmp.eq.s32.totalorder %v4699_v15, 2  ;;  %v5937_v40 = vxor.u32 2147483648, %v5936_v60 }
 0x6ae   : > { %v6497_v42 = vmin.u32 %v5815_v44, %v11867_v30  ;;  %v4604_v20 = vsel %vm4593_vm9, nan, %v4603_v32  ;;  %v4703_v1 = vsel %vm4701_vm1, %v12874_v46, %v4702_v63  ;;  %vm4700_vm6 = vcmp.lt.s32.totalorder %v4699_v15, 2 }
 0x6af   : > { %6705 = vmatprep.mubr.msk.f32.mxu1 %vm12867_vm3, %v4604_v20  ;;  %v4706_v11 = vsel %vm4704_vm13, %v4705_v28, %v12873_v61  ;;  %vm12877_vm12 = vcmp.lt.s32.totalorder %v12876_v57, 0  ;;  %vm12878_vm15 = vcmp.lt.s32.totalorder %v11380_v14, 0  ;;  %v4899_v55 = vsub.s32 4, %v12880_v27 }
 0x6b0   : > { %v4796_v18 = vsel %vm12877_vm12, %v4795_v34, %v12875_v26  ;;  %v5938_v53 = vsel %vm12878_vm15, %v5937_v40, %v5936_v60  ;;  %v5817_v16 = vclz %v6497_v42  ;;  %v4707_v19 = vsel %vm4700_vm6, %v4703_v1, %v4706_v11  ;;  %v12889_v26 = vld [vmem:[#allocation21_spill] sm:$0xff]  ;;  %v12890_v40 = vld [vmem:[#allocation14_spill] sm:$0xff]  ;;  %vm12894_vm12 = vmmov %vm12881_vm2 }
 0x6b1   : > { %v4798_v0 = vsel %vm11145_vm8, 0, %v4796_v18  ;;  %v5941_v31 = vsel %vm11855_vm10, %v11380_v14, %v5938_v53  ;;  %v4708_v7 = vsel %vm4697_vm4, nan, %v4707_v19  ;;  %v5805_v29 = vadd.s32 %v11808_v50, %v11814_v38  ;;  %v12887_v50 = vld [vmem:[#allocation25_spill] sm:$0xff] }
 0x6b2   : > { %v4802_v33 = vadd.s32 3, %v4798_v0  ;;  %v6498_v2 = vadd.s32 4294967294, %v5817_v16  ;;  %6706 = vmatmul.mubr.msk.f32.gmra.mxu1 %vm12881_vm2, %v4708_v7  ;;  %vm4801_vm9 = vweird.f32 %v12876_v57  ;;  %v4806_v52 = vxor.u32 2147483648, %v12882_v56  ;;  %v12893_v0 = vld [vmem:[#allocation12_spill] sm:$0xff] }
 0x6b3   : > { %7149 = vcosq.f32 %v5941_v31  ;;  %v4809_v13 = vxor.u32 2147483648, %v12883_v62  ;;  %vm12885_vm8 = vcmp.lt.s32.totalorder %v12884_v23, 0  ;;  %v4910_v38 = vxor.u32 2147483648, %v12887_v50 }
 0x6b4   : > { %v4803_v54 = vand.u32 3, %v4802_v33  ;;  %v4900_v49 = vsel %vm12885_vm8, %v4899_v55, %v12880_v27  ;;  %vm6499_vm6 = vcmp.lt.s32.totalorder %v6498_v2, 0  ;;  %v5003_v46 = vsub.s32 4, %v12888_v59  ;;  %v12895_v27 = vld [vmem:[#allocation16_spill] sm:$0xff] }
 0x6b5   : > { %v4902_v63 = vsel %vm11048_vm5, 0, %v4900_v49  ;;  %v5820_v28 = vsel %vm6499_vm6, 0, %v6498_v2  ;;  %vm4905_vm13 = vweird.f32 %v12884_v23  ;;  %v4913_v34 = vxor.u32 2147483648, %v12889_v26  ;;  %v12896_v2 = vld [vmem:[#allocation19_spill] sm:$0xff] }
 0x6b6   : > { %vm4804_vm4 = vcmp.lt.s32.totalorder %v4803_v54, 2  ;;  %vm4805_vm1 = vcmp.eq.s32.totalorder %v4803_v54, 0  ;;  %v5821_v15 = vsub.s32 32, %v5820_v28  ;;  %v5825_v60 = vsub.s32 4294967266, %v5820_v28 }
 0x6b7   : > { %v4807_v44 = vsel %vm4805_vm1, %v12883_v62, %v4806_v52  ;;  %vm4808_vm3 = vcmp.eq.s32.totalorder %v4803_v54, 2  ;;  %v5822_v41 = vshll.u32 %v11867_v30, %v5820_v28  ;;  %v4906_v32 = vadd.s32 3, %v4902_v63 }
 0x6b8   : > { %v4810_v47 = vsel %vm4808_vm3, %v4809_v13, %v12882_v56  ;;  %vm12891_vm5 = vcmp.lt.s32.totalorder %v12890_v40, 0  ;;  %v5823_v20 = vshrl.u32 %v5805_v29, %v5821_v15  ;;  %v5826_v1 = vadd.s32 127, %v5825_v60  ;;  %vm12900_vm3 = vmmov %vm12894_vm12 }
 0x6b9   : > { %v5004_v42 = vsel %vm12891_vm5, %v5003_v46, %v12888_v59  ;;  %v4811_v11 = vsel %vm4804_vm4, %v4807_v44, %v4810_v47  ;;  %v4907_v19 = vand.u32 3, %v4906_v32  ;;  %v5014_v30 = vxor.u32 2147483648, %v12893_v0  ;;  %v12906_v32 = vld [vmem:[#allocation26_spill] sm:$0xff] }
 0x6ba   : > { %v5006_v53 = vsel %vm11254_vm14, 0, %v5004_v42  ;;  %v4812_v16 = vsel %vm4801_vm9, nan, %v4811_v11  ;;  %v5824_v7 = vor.u32 %v5823_v20, %v5822_v41  ;;  %v5827_v33 = vshll.u32 %v5826_v1, 23  ;;  %v12904_v41 = vld [vmem:[#allocation24_spill] sm:$0xff]  ;;  %v12907_v42 = vld [vmem:[#allocation30_spill] sm:$0xff] }
 0x6bb   : > { %v5010_v4 = vadd.s32 3, %v5006_v53  ;;  %6708 = vmatprep.mubr.msk.f32.mxu1 %vm12894_vm12, %v4812_v16  ;;  %v5017_v55 = vxor.u32 2147483648, %v12895_v27  ;;  %v5107_v29 = vsub.s32 4, %v12896_v2  ;;  %vm5751_vm15 = vcmp.lt.s32.totalorder %v11522_v5, 0  ;;  %v12908_v11 = vld [vmem:[#allocation28_spill] sm:$0xff]  ;;  %v12910_v53 = vld [vmem:[#allocation38_spill] sm:$0xff] }
 0x6bc   : > { %vm4908_vm2 = vcmp.lt.s32.totalorder %v4907_v19, 2  ;;  %vm4909_vm8 = vcmp.eq.s32.totalorder %v4907_v19, 0  ;;  %vm4912_vm14 = vcmp.eq.s32.totalorder %v4907_v19, 2  ;;  %v12897_v57 = vand.u32 2147483647, %v11522_v5 }
 0x6bd   : > { %v5011_v56 = vand.u32 3, %v5010_v4  ;;  %v5828_v54 = vor.u32 4788187, %v5827_v33  ;;  %v5831_v62 = vcvt.s32.f32 %v5824_v7  ;;  %v4911_v13 = vsel %vm4909_vm8, %v12889_v26, %v4910_v38 }
 0x6be   : > { %vm11925_vm9 = vcmp.le.f32.partialorder %v12897_v57, 0.7853982  ;;  %v4914_v49 = vsel %vm4912_vm14, %v4913_v34, %v12887_v50  ;;  %7151 = vsinq.f32 %v5941_v31  ;;  %vm5009_vm5 = vweird.f32 %v12890_v40  ;;  %v12901_v50 = vld [vmem:[#allocation20_spill] sm:$0xff] }
 0x6bf   : > { %v4915_v61 = vsel %vm4908_vm2, %v4911_v13, %v4914_v49  ;;  %vm5012_vm6 = vcmp.lt.s32.totalorder %v5011_v56, 2  ;;  %vm5013_vm4 = vcmp.eq.s32.totalorder %v5011_v56, 0  ;;  %vm5016_vm1 = vcmp.eq.s32.totalorder %v5011_v56, 2 }
 0x6c0   : > { %v5829_v63 = vand.u32 2147483647, %v5828_v54  ;;  %v4916_v59 = vsel %vm4905_vm13, nan, %v4915_v61  ;;  %v5015_v46 = vsel %vm5013_vm4, %v12895_v27, %v5014_v30  ;;  %v5018_v28 = vsel %vm5016_vm1, %v5017_v55, %v12893_v0  ;;  %v11940_v34 = vpop.eup %7149  ;;  %vm12905_vm13 = vmmov %vm12900_vm3  ;;  %v12912_v55 = vld [vmem:[#allocation37_spill] sm:$0xff] }
 0x6c1   : > { %6709 = vmatmul.mubr.msk.f32.gmra.mxu1 %vm12900_vm3, %v4916_v59  ;;  %v5019_v38 = vsel %vm5012_vm6, %v5015_v46, %v5018_v28  ;;  %vm12902_vm12 = vcmp.lt.s32.totalorder %v12901_v50, 0  ;;  %v5211_v47 = vsub.s32 4, %v12904_v41  ;;  %vm5113_vm2 = vweird.f32 %v12901_v50 }
 0x6c2   : > { %v5108_v26 = vsel %vm12902_vm12, %v5107_v29, %v12896_v2  ;;  %v5832_v15 = vmul.f32 %v5831_v62, %v5829_v63  ;;  %v5020_v60 = vsel %vm5009_vm5, nan, %v5019_v38  ;;  %v5118_v40 = vxor.u32 2147483648, %v12906_v32  ;;  %v12914_v29 = vld [vmem:[#allocation5_spill] sm:$0xff] }
 0x6c3   : > { %v5110_v44 = vsel %vm11178_vm7, 0, %v5108_v26  ;;  %6711 = vmatprep.mubr.msk.f32.mxu1 %vm12905_vm13, %v5020_v60  ;;  %v5121_v20 = vxor.u32 2147483648, %v12907_v42  ;;  %vm12909_vm8 = vcmp.lt.s32.totalorder %v12908_v11, 0  ;;  %vm5217_vm14 = vweird.f32 %v12908_v11 }
 0x6c4   : > { %v5114_v31 = vadd.s32 3, %v5110_v44  ;;  %v5833_v1 = vxor.u32 2147483648, %v5832_v15  ;;  %v5212_v18 = vsel %vm12909_vm8, %v5211_v47, %v12904_v41  ;;  %v5315_v16 = vsub.s32 4, %v12910_v53  ;;  %v12918_v44 = vld [vmem:[#allocation42_spill] sm:$0xff] }
 0x6c5   : > { %v5214_v0 = vsel %vm11480_vm0, 0, %v5212_v18  ;;  %v5222_v30 = vxor.u32 2147483648, %v11661_v25  ;;  %v5225_v7 = vxor.u32 2147483648, %v11575_v58  ;;  %vm12913_vm7 = vcmp.lt.s32.totalorder %v12912_v55, 0 }
 0x6c6   : > { %v5115_v19 = vand.u32 3, %v5114_v31  ;;  %v5834_v33 = vsel %vm5751_vm15, %v5833_v1, %v5832_v15  ;;  %v5218_v27 = vadd.s32 3, %v5214_v0  ;;  %v5316_v2 = vsel %vm12913_vm7, %v5315_v16, %v12910_v53 }
 0x6c7   : > { %v5419_v56 = vsub.s32 4, %v12914_v29  ;;  %v5837_v57 = vsel %vm11925_vm9, %v11522_v5, %v5834_v33  ;;  %v5326_v54 = vxor.u32 2147483648, %v11569_v24  ;;  %v5318_v59 = vsel %vm11348_vm11, 0, %v5316_v2  ;;  %vm12920_vm11 = vmmov %vm12905_vm13  ;;  %v12925_v33 = vld [vmem:[#allocation40_spill] sm:$0xff] }
 0x6c8   : > { %vm5117_vm6 = vcmp.eq.s32.totalorder %v5115_v19, 0  ;;  %vm5120_vm0 = vcmp.eq.s32.totalorder %v5115_v19, 2  ;;  %vm5116_vm4 = vcmp.lt.s32.totalorder %v5115_v19, 2  ;;  %v5219_v49 = vand.u32 3, %v5218_v27  ;;  %v12923_v19 = vld [vmem:[#allocation33_spill] sm:$0xff] }
 0x6c9   : > { %v5119_v62 = vsel %vm5117_vm6, %v12907_v42, %v5118_v40  ;;  %v5122_v13 = vsel %vm5120_vm0, %v5121_v20, %v12906_v32  ;;  %7153 = vcosq.f32 %v5837_v57  ;;  %vm12916_vm1 = vcmp.lt.s32.totalorder %v11313_v17, 0  ;;  %v12919_v40 = vld [vmem:[#allocation17_spill] sm:$0xff]  ;;  %v12921_v20 = vld [vmem:[#allocation22_spill] sm:$0xff] }
 0x6ca   : > { %v5123_v61 = vsel %vm5116_vm4, %v5119_v62, %v5122_v13  ;;  %v5420_v46 = vsel %vm12916_vm1, %v5419_v56, %v12914_v29  ;;  %vm5220_vm3 = vcmp.lt.s32.totalorder %v5219_v49, 2  ;;  %vm5221_vm5 = vcmp.eq.s32.totalorder %v5219_v49, 0 }
 0x6cb   : > { %v5124_v28 = vsel %vm5113_vm2, nan, %v5123_v61  ;;  %vm5224_vm12 = vcmp.eq.s32.totalorder %v5219_v49, 2  ;;  %v5223_v38 = vsel %vm5221_vm5, %v11575_v58, %v5222_v30  ;;  %v5322_v15 = vadd.s32 3, %v5318_v59  ;;  %v11987_v58 = vpop.eup %7151 }
 0x6cc   : > { %6712 = vmatmul.mubr.msk.f32.gmra.mxu1 %vm12905_vm13, %v5124_v28  ;;  %v5226_v26 = vsel %vm5224_vm12, %v5225_v7, %v11661_v25  ;;  %vm12917_vm8 = vnez %v12851_v37  ;;  %7155 = vsinq.f32 %v5837_v57  ;;  %v5329_v41 = vxor.u32 2147483648, %v12918_v44  ;;  %vm12926_vm13 = vmmov %vm12920_vm11 }
 0x6cd   : > { %v5422_v60 = vsel %vm12917_vm8, 0, %v5420_v46  ;;  %v5227_v23 = vsel %vm5220_vm3, %v5223_v38, %v5226_v26  ;;  %v5323_v31 = vand.u32 3, %v5322_v15  ;;  %v5430_v32 = vxor.u32 2147483648, %v11774_v8 }
 0x6ce   : > { %v5426_v47 = vadd.s32 3, %v5422_v60  ;;  %v5228_v50 = vsel %vm5217_vm14, nan, %v5227_v23  ;;  %v5523_v42 = vsub.s32 4, %v12919_v40  ;;  %vm5321_vm2 = vweird.f32 %v12912_v55  ;;  %v12928_v55 = vld [vmem:[#allocation39_spill] sm:$0xff] }
 0x6cf   : > { %6714 = vmatprep.mubr.msk.f32.mxu1 %vm12920_vm11, %v5228_v50  ;;  %vm5425_vm7 = vweird.f32 %v11313_v17  ;;  %v5433_v25 = vxor.u32 2147483648, %v11766_v39  ;;  %vm5324_vm6 = vcmp.lt.s32.totalorder %v5323_v31, 2  ;;  %vm5325_vm0 = vcmp.eq.s32.totalorder %v5323_v31, 0 }
 0x6d0   : > { %v5427_v37 = vand.u32 3, %v5426_v47  ;;  %vm5328_vm4 = vcmp.eq.s32.totalorder %v5323_v31, 2  ;;  %vm12922_vm14 = vcmp.lt.s32.totalorder %v12921_v20, 0  ;;  %v5327_v11 = vsel %vm5325_vm0, %v12918_v44, %v5326_v54 }
 0x6d1   : > { %v5524_v1 = vsel %vm12922_vm14, %v5523_v42, %v12919_v40  ;;  %v5330_v18 = vsel %vm5328_vm4, %v5329_v41, %v11569_v24  ;;  %vm12924_vm12 = vnez %v12923_v19  ;;  %v5627_v27 = vsub.s32 4, %v12925_v33 }
 0x6d2   : > { %vm5428_vm1 = vcmp.lt.s32.totalorder %v5427_v37, 2  ;;  %vm5429_vm3 = vcmp.eq.s32.totalorder %v5427_v37, 0  ;;  %v5331_v53 = vsel %vm5324_vm6, %v5327_v11, %v5330_v18  ;;  %vm5432_vm5 = vcmp.eq.s32.totalorder %v5427_v37, 2 }
 0x6d3   : > { %v5431_v16 = vsel %vm5429_vm3, %v11766_v39, %v5430_v32  ;;  %v5526_v4 = vsel %vm12924_vm12, 0, %v5524_v1  ;;  %v5332_v0 = vsel %vm5321_vm2, nan, %v5331_v53  ;;  %v5434_v30 = vsel %vm5432_vm5, %v5433_v25, %v11774_v8  ;;  %vm12929_vm2 = vmmov %vm12926_vm13 }
 0x6d4   : > { %v5530_v7 = vadd.s32 3, %v5526_v4  ;;  %6715 = vmatmul.mubr.msk.f32.gmra.mxu1 %vm12926_vm13, %v5332_v0  ;;  %v5435_v24 = vsel %vm5428_vm1, %v5431_v16, %v5434_v30  ;;  %vm5529_vm8 = vweird.f32 %v12921_v20  ;;  %v5534_v2 = vxor.u32 2147483648, %v11675_v35  ;;  %vm12933_vm5 = vmmov %vm12929_vm2  ;;  %v6504_v4 = vld [vmem:[%s12145_s8] ss:$0 sm:$0xff] }
 0x6d5   : > { %v5537_v39 = vxor.u32 2147483648, %v11666_v36  ;;  %v5436_v29 = vsel %vm5425_vm7, nan, %v5435_v24  ;;  %vm12927_vm11 = vcmp.lt.s32.totalorder %v11377_v3, 0  ;;  %v5731_v57 = vsub.s32 4, %v12928_v55 }
 0x6d6   : > { %v5531_v56 = vand.u32 3, %v5530_v7  ;;  %v5628_v8 = vsel %vm12927_vm11, %v5627_v27, %v12925_v33  ;;  %6717 = vmatprep.mubr.msk.f32.mxu1 %vm12929_vm2, %v5436_v29  ;;  %vm12930_vm6 = vnez %v12862_v51  ;;  %vm5633_vm0 = vweird.f32 %v11377_v3  ;;  %v7154_v17 = vpop.eup %7153 }
 0x6d7   : > { %v5630_v54 = vsel %vm12930_vm6, 0, %v5628_v8  ;;  %v5638_v62 = vxor.u32 2147483648, %v11871_v22  ;;  %v5641_v13 = vxor.u32 2147483648, %v11865_v9  ;;  %vm12931_vm1 = vcmp.lt.s32.totalorder %v11333_v10, 0  ;;  %vm12934_vm6 = vmmov %vm12933_vm5 }
 0x6d8   : > { %vm5532_vm7 = vcmp.lt.s32.totalorder %v5531_v56, 2  ;;  %vm5533_vm4 = vcmp.eq.s32.totalorder %v5531_v56, 0  ;;  %vm5536_vm14 = vcmp.eq.s32.totalorder %v5531_v56, 2  ;;  %v5634_v49 = vadd.s32 3, %v5630_v54 }
 0x6d9   : > { %v5535_v61 = vsel %vm5533_vm4, %v11666_v36, %v5534_v2  ;;  %v5538_v63 = vsel %vm5536_vm14, %v5537_v39, %v11675_v35  ;;  %v5732_v51 = vsel %vm12931_vm1, %v5731_v57, %v12928_v55  ;;  %v5835_v59 = vsub.s32 4, %v11844_v21  ;;  %v7156_v15 = vpop.eup %7155  ;;  %vm12936_vm14 = vmmov %vm12933_vm5 }
 0x6da   : > { %v5539_v46 = vsel %vm5532_vm7, %v5535_v61, %v5538_v63  ;;  %v5635_v28 = vand.u32 3, %v5634_v49  ;;  %vm12932_vm3 = vnez %v12855_v45  ;;  %v5742_v26 = vxor.u32 2147483648, %v11801_v48 }
 0x6db   : > { %v5734_v38 = vsel %vm12932_vm3, 0, %v5732_v51  ;;  %v5540_v60 = vsel %vm5529_vm8, nan, %v5539_v46  ;;  %v5745_v35 = vxor.u32 2147483648, %v11786_v6  ;;  %v5836_v23 = vsel %vm5751_vm15, %v5835_v59, %v11844_v21 }
 0x6dc   : > { %v5738_v36 = vadd.s32 3, %v5734_v38  ;;  %6718 = vmatmul.mubr.msk.f32.gmra.mxu1 %vm12933_vm5, %v5540_v60  ;;  %vm5636_vm12 = vcmp.lt.s32.totalorder %v5635_v28, 2  ;;  %vm5637_vm13 = vcmp.eq.s32.totalorder %v5635_v28, 0  ;;  %vm5640_vm11 = vcmp.eq.s32.totalorder %v5635_v28, 2 }
 0x6dd   : > { %v5838_v45 = vsel %vm11925_vm9, 0, %v5836_v23  ;;  %v5639_v44 = vsel %vm5637_vm13, %v11865_v9, %v5638_v62  ;;  %v5642_v41 = vsel %vm5640_vm11, %v5641_v13, %v11871_v22  ;;  %v5846_v32 = vxor.u32 2147483648, %v7156_v15 }
 0x6de   : > { %v5739_v47 = vand.u32 3, %v5738_v36  ;;  %v5842_v50 = vadd.s32 3, %v5838_v45  ;;  %v5643_v31 = vsel %vm5636_vm12, %v5639_v44, %v5642_v41  ;;  %v5849_v40 = vxor.u32 2147483648, %v7154_v17 }
 0x6df   : > { %v5939_v42 = vsub.s32 4, %v11756_v43  ;;  %v5644_v21 = vsel %vm5633_vm0, nan, %v5643_v31  ;;  %vm12935_vm9 = vcmp.lt.s32.totalorder %v11380_v14, 0  ;;  %vm5737_vm7 = vweird.f32 %v11333_v10 }
 0x6e0   : > { %vm5740_vm15 = vcmp.lt.s32.totalorder %v5739_v47, 2  ;;  %vm5741_vm8 = vcmp.eq.s32.totalorder %v5739_v47, 0  ;;  %vm5744_vm2 = vcmp.eq.s32.totalorder %v5739_v47, 2  ;;  %6720 = vmatprep.mubr.msk.f32.mxu1 %vm12934_vm6, %v5644_v21  ;;  %v5843_v22 = vand.u32 3, %v5842_v50 }
 0x6e1   : > { %v5743_v52 = vsel %vm5741_vm8, %v11786_v6, %v5742_v26  ;;  %v5746_v9 = vsel %vm5744_vm2, %v5745_v35, %v11801_v48  ;;  %v5940_v37 = vsel %vm12935_vm9, %v5939_v42, %v11756_v43  ;;  %vm5841_vm3 = vweird.f32 %v11522_v5 }
 0x6e2   : > { %v5747_v25 = vsel %vm5740_vm15, %v5743_v52, %v5746_v9  ;;  %v5942_v3 = vsel %vm11855_vm10, 0, %v5940_v37  ;;  %vm5845_vm0 = vcmp.eq.s32.totalorder %v5843_v22, 0  ;;  %vm5848_vm4 = vcmp.eq.s32.totalorder %v5843_v22, 2  ;;  %vm12937_vm10 = vmmov %vm12933_vm5 }
 0x6e3   : > { %v5748_v20 = vsel %vm5737_vm7, nan, %v5747_v25  ;;  %vm5844_vm1 = vcmp.lt.s32.totalorder %v5843_v22, 2  ;;  %v5847_v6 = vsel %vm5845_vm0, %v7154_v17, %v5846_v32  ;;  %v5850_v1 = vsel %vm5848_vm4, %v5849_v40, %v7156_v15  ;;  %vm12938_vm15 = vmmov %vm12934_vm6 }
 0x6e4   : > { %6721 = vmatmul.mubr.msk.f32.gmra.mxu1 %vm12936_vm14, %v5748_v20  ;;  %v5946_v48 = vadd.s32 3, %v5942_v3  ;;  %v5851_v11 = vsel %vm5844_vm1, %v5847_v6, %v5850_v1  ;;  %v5950_v10 = vxor.u32 2147483648, %v11987_v58  ;;  %v5953_v43 = vxor.u32 2147483648, %v11940_v34 }
 0x6e5   : > { %v5852_v12 = vsel %vm5841_vm3, nan, %v5851_v11  ;;  %vm5945_vm11 = vweird.f32 %v11380_v14 }
 0x6e6   : > { %v5947_v18 = vand.u32 3, %v5946_v48  ;;  %6723 = vmatprep.mubr.msk.f32.mxu1 %vm12937_vm10, %v5852_v12 }
 0x6e8   : > { %vm5949_vm5 = vcmp.eq.s32.totalorder %v5947_v18, 0  ;;  %vm5952_vm12 = vcmp.eq.s32.totalorder %v5947_v18, 2  ;;  %vm5948_vm13 = vcmp.lt.s32.totalorder %v5947_v18, 2 }
 0x6e9   : > { %v5951_v53 = vsel %vm5949_vm5, %v11940_v34, %v5950_v10  ;;  %v5954_v16 = vsel %vm5952_vm12, %v5953_v43, %v11987_v58 }
 0x6ea   : > { %v5955_v5 = vsel %vm5948_vm13, %v5951_v53, %v5954_v16 }
 0x6eb   : > { %v5956_v19 = vsel %vm5945_vm11, nan, %v5955_v5 }
 0x6ec   : > { %6724 = vmatmul.mubr.msk.f32.gmra.mxu1 %vm12938_vm15, %v5956_v19 }
 0x767   : > { %v6704_v0 = vpop.f32.mrf.mxu1 }
 0x768   : > { %v6088_v30 = vadd.f32 %v6704_v0, %v6504_v4 }
 0x769   : > { %v6082_v7 = vpop.f32.mrf.mxu1 }
 0x76a   : > { %6162 = vst [vmem:[%s12068_s26 + $0x8] sm:$0xff] %v6088_v30  ;;  %v6083_v14 = vadd.f32 %v6504_v4, %v6082_v7 }
 0x76c   : > { %6161 = vst [vmem:[%s12068_s26] sm:$0xff] %v6083_v14 }
 0x772   : > { %v6707_v34 = vpop.f32.mrf.mxu1 }
 0x773   : > { %v6098_v58 = vadd.f32 %v6707_v34, %v6504_v4 }
 0x774   : > { %v6092_v33 = vpop.f32.mrf.mxu1 }
 0x775   : > { %6164 = vst [vmem:[%s12068_s26 + $0x18] sm:$0xff] %v6098_v58  ;;  %v6093_v27 = vadd.f32 %v6504_v4, %v6092_v33 }
 0x777   : > { %6163 = vst [vmem:[%s12068_s26 + $0x10] sm:$0xff] %v6093_v27 }
 0x781   : > { %v6710_v24 = vpop.f32.mrf.mxu1 }
 0x782   : > { %v6108_v2 = vadd.f32 %v6710_v24, %v6504_v4 }
 0x783   : > { %v6102_v39 = vpop.f32.mrf.mxu1 }
 0x784   : > { %6166 = vst [vmem:[%s12068_s26 + $0x28] sm:$0xff] %v6108_v2  ;;  %v6103_v29 = vadd.f32 %v6504_v4, %v6102_v39 }
 0x786   : > { %6165 = vst [vmem:[%s12068_s26 + $0x20] sm:$0xff] %v6103_v29 }
 0x78c   : > { %v6713_v56 = vpop.f32.mrf.mxu1 }
 0x78d   : > { %v6118_v8 = vadd.f32 %v6713_v56, %v6504_v4 }
 0x78e   : > { %v6112_v55 = vpop.f32.mrf.mxu1 }
 0x78f   : > { %6168 = vst [vmem:[%s12068_s26 + $0x38] sm:$0xff] %v6118_v8  ;;  %v6113_v57 = vadd.f32 %v6504_v4, %v6112_v55 }
 0x791   : > { %6167 = vst [vmem:[%s12068_s26 + $0x30] sm:$0xff] %v6113_v57 }
 0x794   : > { %v6716_v54 = vpop.f32.mrf.mxu1 }
 0x795   : > { %v6128_v62 = vadd.f32 %v6716_v54, %v6504_v4 }
 0x796   : > { %v6122_v13 = vpop.f32.mrf.mxu1 }
 0x797   : > { %6170 = vst [vmem:[%s12068_s26 + $0x48] sm:$0xff] %v6128_v62  ;;  %v6123_v17 = vadd.f32 %v6504_v4, %v6122_v13 }
 0x799   : > { %6169 = vst [vmem:[%s12068_s26 + $0x40] sm:$0xff] %v6123_v17 }
 0x79c   : > { %v6719_v49 = vpop.f32.mrf.mxu1 }
 0x79d   : > { %v6138_v61 = vadd.f32 %v6719_v49, %v6504_v4 }
 0x79e   : > { %v6132_v63 = vpop.f32.mrf.mxu1 }
 0x79f   : > { %6172 = vst [vmem:[%s12068_s26 + $0x58] sm:$0xff] %v6138_v61  ;;  %v6133_v51 = vadd.f32 %v6504_v4, %v6132_v63 }
 0x7a1   : > { %6171 = vst [vmem:[%s12068_s26 + $0x50] sm:$0xff] %v6133_v51 }
 0x7a4   : > { %v6722_v59 = vpop.f32.mrf.mxu1 }
 0x7a5   : > { %v6148_v46 = vadd.f32 %v6722_v59, %v6504_v4 }
 0x7a6   : > { %v6142_v28 = vpop.f32.mrf.mxu1 }
 0x7a7   : > { %6174 = vst [vmem:[%s12068_s26 + $0x68] sm:$0xff] %v6148_v46  ;;  %v6143_v38 = vadd.f32 %v6504_v4, %v6142_v28 }
 0x7a9   : > { %6173 = vst [vmem:[%s12068_s26 + $0x60] sm:$0xff] %v6143_v38 }
 0x7ac   : > { %v6725_v26 = vpop.f32.mrf.mxu1 }
 0x7ad   : > { %v6158_v15 = vadd.f32 %v6725_v26, %v6504_v4 }
 0x7ae   : > { %v6152_v60 = vpop.f32.mrf.mxu1 }
 0x7af   : > { %6176 = vst [vmem:[%s12068_s26 + $0x78] sm:$0xff] %v6158_v15  ;;  %v6153_v36 = vadd.f32 %v6504_v4, %v6152_v60 }
 0x7b1   : > { %6175 = vst [vmem:[%s12068_s26 + $0x70] sm:$0xff] %v6153_v36 }
 0x7b2   : > { %7176 = shalt.err (!%p7173_p3)
}
 0x7b3   : > { %s7177_s22 = scalar_lea.hbm %s12089_s16, 2048  ;;  %s7181_s27 = scalar_lea.hbm %s12146_s9, 4096 }
 0x7b4   : > { %p7178_p4 = scmp.ne.s32.totalorder %s12089_s16, %s7177_s22  ;;  %p7182_p9 = scmp.lt.s32.totalorder %s12089_s16, %s12146_s9 }
 0x7b5   : > { %p7183_p10 = scmp.lt.s32.totalorder %s7181_s27, %s7177_s22 }
 0x7b6   : > { %p7179_p7 = pnand %p7178_p4, %p7322_p5 }
 0x7b7   : > { %p7184_p11 = por %p7183_p10, %p7182_p9 }
 0x7b8   : > { %p7180_p8 = pneg %p7179_p7 }
 0x7ba   : > { %p7185_p12 = pnand %p7184_p11, %p7180_p8 }
 0x7bc   : > { %7188 = shalt.err (!%p7185_p12)
}
 0x7bd   : > { %s7232_s13 = smov 128   ;;  %s7233_s21 = smov 8  }
 0x7be   : > { %6918 = dma.vmem_to_hbm [thread:$0]  (%p7322_p5), %s12091_s28, 2048, %s12089_s16, %s12097_s17, %s7232_s13, %s7232_s13, %s7233_s21  }
 0x7bf PF: > { %p6924_p13 = scmp.ge.s32.totalorder %s7223_s12, 2  ;;  %s6206_s23 = sand.u32 1, %s7211_s30  }
 0x7c0   : > { %s6207_s24 = scalar_lea.sflag [#allocation3], %s6206_s23 }
 0x7c1   : > { %p6921_p0 = pnand %p6924_p13, %p7326_p6 }
 0x7c3   : > { %p6922_p1 = pneg %p6921_p0 }
 0x7c5   : > { %7206 = dma.done.wait (%p6922_p1), %s6207_s24, 2048  }
 0x7c6   : > { %7208 = vsyncadd (%p6922_p1), %s6207_s24, 4294965248  ;;  %p19_p2 = scmp.ge.s32.totalorder %s7309_s15, 4   ;;  %s12939_s30 = smov %s7215_s10 }
 0x7c7   : > { %s12940_s10 = smov %s7219_s11  ;;  %s12941_s11 = smov %s7320_s18 }
 0x7c8   : > { %s12942_s12 = smov %s7309_s15  ;;  %21 = sbr.rel (!%p19_p2) target bundleno = 3 (0x3), region = 91 }
 0x7cd   :  { %6212 = vsyncpa [#allocation3], 1 }
 0x7ce   :  { %6214 = vsyncpa [#allocation3 + $0x1], 1 }

</bundles_post_ra>
